<compile_context>
chip_gen: v7x
topology: tpu7x:2x2x1
jax: 0.10.0
libtpu: 0.0.40
codegen_flags: <defaults>
</compile_context>

<pallas_src>
import math
from functools import partial

import jax
import jax.numpy as jnp
from jax.experimental import pallas as pl
from jax.experimental.pallas import tpu as pltpu

N_SUB = 4  # fixed RK4 substeps per t_eval interval (stand-in for the external solver)


def _elu(v):
    # torch.nn.functional.elu (alpha=1): v if v > 0 else exp(v) - 1.
    # Positive-branch exp may overflow to inf but is discarded by the where
    # (forward-only; no VJP is built through this).
    return jnp.where(v > 0.0, v, jnp.exp(v) - 1.0)


# ------------------------------- Pallas kernel ---------------------------------

def neural_ode_kernel(t_ref, x_ref, pack_ref, wenc_ref, wci_ref, w2_ref, w3_ref,
                      out_ref, *, hidden_size, n_sub):
    # t_ref    : SMEM (T,) f32     t_eval grid
    # x_ref    : VMEM (1, 32) f32  x[0,1:27] zero-padded into lanes 0..25
    # pack_ref : VMEM (8, 16H) f32 packed biases / fc1 / fc4 rows (constant slab)
    # wenc_ref : VMEM (32, 4H) bf16  block-diag fc + conv_temp + conv_caA + conv_caB
    # wci_ref  : VMEM (4H, 2H) bf16  [coef.weight.T | initial.weight.T]
    # w2_ref   : VMEM (4H, 16H) bf16 MfgFunc.fc2.weight.T
    # w3_ref   : VMEM (16H, 4H) bf16 MfgFunc.fc3.weight.T
    # out_ref  : VMEM (1, 128) f32   z trajectory at t_eval in lanes 0..T-1
    H = hidden_size
    H4, H16 = 4 * H, 16 * H
    f32, bf16 = jnp.float32, jnp.bfloat16

    # ---- encoder: fc + the three "convs" fused into one (1,32)@(32,4H) matvec --------
    x_row = x_ref[...].astype(bf16)                                      # (1, 32)
    b_enc = pack_ref[0:1, 0:H4]                                          # (1, 4H)
    enc = _elu(jnp.dot(x_row, wenc_ref[...], preferred_element_type=f32) + b_enc)

    # ---- coef / initial heads fused into one matmul, then scalar z0 ------------------
    b_ci = pack_ref[1:2, 0:2 * H]                                        # (1, 2H)
    ci = _elu(jnp.dot(enc.astype(bf16), wci_ref[...], preferred_element_type=f32) + b_ci)
    z0 = _elu(jnp.sum(ci[:, 0:H] * ci[:, H:2 * H], axis=-1, keepdims=True))  # (1, 1)

    # ---- MfgFunc (dz/dt) row-vector parameters (loaded once, reused every step) ------
    w1 = pack_ref[2:3, 0:H4]            # fc1.weight (4H,1) as a row
    b1 = pack_ref[3:4, 0:H4]
    b2 = pack_ref[4:5, 0:H16]
    b3 = pack_ref[5:6, 0:H4]
    w4 = pack_ref[6:7, 0:H4]            # fc4.weight (1,4H)
    b4 = pack_ref[6:7, H4:H4 + 1]       # (1, 1)

    def mfg(z):                                                          # (1,1) -> (1,1)
        h1 = _elu(z * w1 + b1)                                           # Linear(1, 4H), f32 VPU
        h2 = _elu(jnp.dot(h1.astype(bf16), w2_ref[...], preferred_element_type=f32) + b2)
        h3 = _elu(jnp.dot(h2.astype(bf16), w3_ref[...], preferred_element_type=f32) + b3)
        return jnp.sum(h3 * w4, axis=-1, keepdims=True) + b4             # Linear(4H, 1), f32

    # ---- fixed-step RK4 over the t_eval grid -----------------------------------------
    n_eval = t_ref.shape[0]
    lane = jax.lax.broadcasted_iota(jnp.int32, (1, 128), 1)              # hoisted once
    traj0 = jnp.where(lane == 0, z0, jnp.zeros((1, 128), f32))
    inv_sub = 1.0 / float(n_sub)

    def seg_body(i, carry):
        z, traj = carry
        dt = (t_ref[i + 1] - t_ref[i]) * inv_sub
        half = 0.5 * dt

        def rk4_step(_, zz):
            k1 = mfg(zz)
            k2 = mfg(zz + half * k1)
            k3 = mfg(zz + half * k2)
            k4 = mfg(zz + dt * k3)
            return zz + (dt * (1.0 / 6.0)) * (k1 + 2.0 * k2 + 2.0 * k3 + k4)

        # Fully unroll the short fixed-trip substep loop (scheduler visibility across
        # the serial mfg chain — perf-review item).
        z = jax.lax.fori_loop(0, n_sub, rk4_step, z, unroll=True)
        traj = jnp.where(lane == i + 1, z, traj)
        return z, traj

    # Outer segment loop (trip count T-1=7) kept rolled for code-size / compile-time
    # balance; bump to unroll=2 if a bundle dump shows the ODE phase still dominates.
    _, traj = jax.lax.fori_loop(0, n_eval - 1, seg_body, (z0, traj0))
    out_ref[...] = traj


# ------------------------------- wrapper ----------------------------------------

def neural_ode_forward(t, x, packed, *, n_sub=N_SUB):
    """t: (T,) time grid (options['t_eval']); x: (B, >=27) f32, only row 0 is used.
    Returns the ODE trajectory at the t_eval points, shape (T, 1)."""
    H = packed["hidden_size"]
    T = t.shape[0]
    assert T <= 128, "trajectory output row holds at most 128 eval points"

    # Only this tiny (1,32) feature row is built per call; the packed parameter slabs
    # stay constant operands XLA can keep resident / cached across calls.
    x_row = jnp.zeros((1, 32), jnp.float32).at[0, 0:26].set(x[0, 1:27].astype(jnp.float32))

    vmem = pl.BlockSpec(memory_space=pltpu.MemorySpace.VMEM)
    smem = pl.BlockSpec(memory_space=pltpu.MemorySpace.SMEM)

    out = pl.pallas_call(
        partial(neural_ode_kernel, hidden_size=H, n_sub=n_sub),
        out_shape=jax.ShapeDtypeStruct((1, 128), jnp.float32),
        in_specs=[smem, vmem, vmem, vmem, vmem, vmem, vmem],
        out_specs=vmem,
    )(t.astype(jnp.float32), x_row, packed["pack"], packed["w_enc"], packed["w_ci"],
      packed["w2"], packed["w3"])
    return out[0, :T].reshape(T, 1)


# ------------------------------- parameter setup --------------------------------

def init_raw_params(key, hidden_size):
    """Deterministic torch-default-like init (uniform +/- 1/sqrt(fan_in)).
    Conv weights are stored pre-flattened row-major: (H, k*k)."""
    H = hidden_size
    ks = jax.random.split(key, 10)

    def lin(k, fan_in, fan_out):
        kw, kb = jax.random.split(k)
        bound = 1.0 / math.sqrt(fan_in)
        w = jax.random.uniform(kw, (fan_out, fan_in), jnp.float32, -bound, bound)
        b = jax.random.uniform(kb, (fan_out,), jnp.float32, -bound, bound)
        return w, b

    raw = {}
    raw["fc_w"], raw["fc_b"] = lin(ks[0], 4, H)                # nn.Linear(4, H)
    raw["conv_temp_w"], raw["conv_temp_b"] = lin(ks[1], 4, H)  # Conv2d(1,H,2) on 2x2 -> 4-tap
    raw["conv_caA_w"], raw["conv_caA_b"] = lin(ks[2], 9, H)    # Conv2d(1,H,3) on 3x3 -> 9-tap
    raw["conv_caB_w"], raw["conv_caB_b"] = lin(ks[3], 9, H)
    raw["coef_w"], raw["coef_b"] = lin(ks[4], 4 * H, H)
    raw["init_w"], raw["init_b"] = lin(ks[5], 4 * H, H)
    raw["fc1_w"], raw["fc1_b"] = lin(ks[6], 1, 4 * H)          # MfgFunc
    raw["fc2_w"], raw["fc2_b"] = lin(ks[7], 4 * H, 16 * H)
    raw["fc3_w"], raw["fc3_b"] = lin(ks[8], 16 * H, 4 * H)
    raw["fc4_w"], raw["fc4_b"] = lin(ks[9], 4 * H, 1)
    return raw


def pack_params(raw, hidden_size):
    """Hoisted out of the hot path: block-diagonal encoder weight, fused coef/initial
    weight (both bf16), bf16 MfgFunc matmul weights, one constant (8,16H) f32 slab."""
    H = hidden_size
    H4, H16 = 4 * H, 16 * H
    f32, bf16 = jnp.float32, jnp.bfloat16

    # block-diagonal encoder weight, zero-padded to K=32 sublanes
    # (row j corresponds to padded-x lane j, i.e. original feature x[0, 1+j])
    w_enc = jnp.zeros((32, H4), f32)
    w_enc = w_enc.at[0:4, 0:H].set(raw["fc_w"].T)
    w_enc = w_enc.at[4:8, H:2 * H].set(raw["conv_temp_w"].T)
    w_enc = w_enc.at[8:17, 2 * H:3 * H].set(raw["conv_caA_w"].T)
    w_enc = w_enc.at[17:26, 3 * H:4 * H].set(raw["conv_caB_w"].T)

    w_ci = jnp.concatenate([raw["coef_w"].T, raw["init_w"].T], axis=1)   # (4H, 2H)

    b_enc = jnp.concatenate([raw["fc_b"], raw["conv_temp_b"],
                             raw["conv_caA_b"], raw["conv_caB_b"]])      # (4H,)
    b_ci = jnp.concatenate([raw["coef_b"], raw["init_b"]])               # (2H,)

    pack = jnp.zeros((8, H16), f32)
    pack = pack.at[0, 0:H4].set(b_enc)
    pack = pack.at[1, 0:2 * H].set(b_ci)
    pack = pack.at[2, 0:H4].set(raw["fc1_w"].reshape(H4))
    pack = pack.at[3, 0:H4].set(raw["fc1_b"])
    pack = pack.at[4, 0:H16].set(raw["fc2_b"])
    pack = pack.at[5, 0:H4].set(raw["fc3_b"])
    pack = pack.at[6, 0:H4].set(raw["fc4_w"].reshape(H4))
    pack = pack.at[6, H4].set(raw["fc4_b"][0])

    return {"hidden_size": H, "pack": pack,
            "w_enc": w_enc.astype(bf16), "w_ci": w_ci.astype(bf16),
            "w2": raw["fc2_w"].T.astype(bf16), "w3": raw["fc3_w"].T.astype(bf16)}


# ------------------------------- pure-JAX reference -----------------------------

def _bf16_round(v):
    return v.astype(jnp.bfloat16).astype(jnp.float32)


def _mxu_dot(a, b):
    # Emulates the kernel's MXU path: bf16 operands, exact f32 accumulation.
    return jnp.dot(_bf16_round(a), _bf16_round(b), precision=jax.lax.Precision.HIGHEST)


def neural_ode_ref(t, x, raw, *, n_sub=N_SUB):
    x0 = x[0].astype(jnp.float32)
    fc_out = _elu(_mxu_dot(x0[1:5], raw["fc_w"].T) + raw["fc_b"])
    temp_out = _elu(_mxu_dot(x0[5:9], raw["conv_temp_w"].T) + raw["conv_temp_b"])
    caA_out = _elu(_mxu_dot(x0[9:18], raw["conv_caA_w"].T) + raw["conv_caA_b"])
    caB_out = _elu(_mxu_dot(x0[18:27], raw["conv_caB_w"].T) + raw["conv_caB_b"])
    out = jnp.concatenate([fc_out, temp_out, caA_out, caB_out])
    coef = _elu(_mxu_dot(out, raw["coef_w"].T) + raw["coef_b"])
    xinit = _elu(_mxu_dot(out, raw["init_w"].T) + raw["init_b"])
    z = _elu(jnp.dot(coef, xinit, precision=jax.lax.Precision.HIGHEST)).reshape(1)

    def mfg(zz):
        h1 = _elu(zz * raw["fc1_w"][:, 0] + raw["fc1_b"])                # f32, matches kernel
        h2 = _elu(_mxu_dot(h1, raw["fc2_w"].T) + raw["fc2_b"])
        h3 = _elu(_mxu_dot(h2, raw["fc3_w"].T) + raw["fc3_b"])
        return jnp.dot(h3, raw["fc4_w"][0],
                       precision=jax.lax.Precision.HIGHEST) + raw["fc4_b"]

    tt = jnp.asarray(t, jnp.float32)
    traj = [z]
    for i in range(t.shape[0] - 1):
        dt = (tt[i + 1] - tt[i]) / n_sub
        for _ in range(n_sub):
            k1 = mfg(z)
            k2 = mfg(z + 0.5 * dt * k1)
            k3 = mfg(z + 0.5 * dt * k2)
            k4 = mfg(z + dt * k3)
            z = z + (dt / 6.0) * (k1 + 2.0 * k2 + 2.0 * k3 + k4)
        traj.append(z)
    return jnp.stack(traj)  # (T, 1)


# ------------------------------- main --------------------------------------------

if __name__ == "__main__":
    H = 32  # hidden_size -> 4H = 128, 16H = 512 (lane-aligned)
    key = jax.random.PRNGKey(0)
    k_params, k_x = jax.random.split(key)

    raw = init_raw_params(k_params, H)
    packed = pack_params(raw, H)

    # x: (batch=2, 27 features); only row 0 is consumed (matches torch `x[0, ...]`).
    x = jax.random.normal(k_x, (2, 27), jnp.float32) * 0.5
    # t_eval grid (seq = 8 time points)
    t = jnp.linspace(0.0, 0.7, 8).astype(jnp.float32)

    out = neural_ode_forward(t, x, packed)
    jax.block_until_ready(out)

    ref = neural_ode_ref(t, x, raw)
    assert out.shape == ref.shape == (t.shape[0], 1)
    assert bool(jnp.all(jnp.isfinite(out)))
    assert bool(jnp.allclose(out, ref, rtol=1e-2, atol=5e-3)), (out, ref)
    print("KERNEL_OK")
</pallas_src>

<mosaic_0001>
module attributes {stable_mosaic.version = 11 : i64} {
  func.func @neural_ode_kernel(%arg0: memref<8xf32, #tpu.memory_space<smem>>, %arg1: memref<1x32xf32, #tpu.memory_space<vmem>>, %arg2: memref<8x512xf32, #tpu.memory_space<vmem>>, %arg3: memref<32x128xbf16, #tpu.memory_space<vmem>>, %arg4: memref<128x64xbf16, #tpu.memory_space<vmem>>, %arg5: memref<128x512xbf16, #tpu.memory_space<vmem>>, %arg6: memref<512x128xbf16, #tpu.memory_space<vmem>>, %arg7: memref<1x128xf32, #tpu.memory_space<vmem>>) attributes {dimension_semantics = [], scalar_prefetch = 0 : i64, scratch_operands = 0 : i64, tpu.core_type = #tpu.core_type<tc>} {
    %c0 = arith.constant 0 : index
    %c0_0 = arith.constant 0 : index
    %0 = vector.load %arg1[%c0, %c0_0] : memref<1x32xf32, #tpu.memory_space<vmem>>, vector<1x32xf32>
    %1 = arith.truncf %0 : vector<1x32xf32> to vector<1x32xbf16>
    %c0_1 = arith.constant 0 : index
    %c0_2 = arith.constant 0 : index
    %2 = vector.load %arg2[%c0_1, %c0_2] : memref<8x512xf32, #tpu.memory_space<vmem>>, vector<1x128xf32>
    %c0_3 = arith.constant 0 : index
    %c0_4 = arith.constant 0 : index
    %3 = vector.load %arg3[%c0_3, %c0_4] : memref<32x128xbf16, #tpu.memory_space<vmem>>, vector<32x128xbf16>
    %cst = arith.constant dense<0.000000e+00> : vector<1x128xf32>
    %4 = tpu.matmul %1, %3, %cst {dimension_numbers = #tpu.dot_dimension_numbers<[1], [0], [0], [1], [0, 0, 1, 1], [], []>} : vector<1x32xbf16>, vector<32x128xbf16>, vector<1x128xf32> -> vector<1x128xf32>
    %5 = arith.addf %4, %2 : vector<1x128xf32>
    %cst_5 = arith.constant 0.000000e+00 : f32
    %6 = vector.broadcast %cst_5 : f32 to vector<1x128xf32>
    %7 = arith.cmpf ogt, %5, %6 : vector<1x128xf32>
    %8 = math.exp %5 : vector<1x128xf32>
    %cst_6 = arith.constant 1.000000e+00 : f32
    %9 = vector.broadcast %cst_6 : f32 to vector<1x128xf32>
    %10 = arith.subf %8, %9 : vector<1x128xf32>
    %11 = arith.select %7, %5, %10 : vector<1x128xi1>, vector<1x128xf32>
    %c1 = arith.constant 1 : index
    %c0_7 = arith.constant 0 : index
    %12 = vector.load %arg2[%c1, %c0_7] : memref<8x512xf32, #tpu.memory_space<vmem>>, vector<1x64xf32>
    %13 = arith.truncf %11 : vector<1x128xf32> to vector<1x128xbf16>
    %c0_8 = arith.constant 0 : index
    %c0_9 = arith.constant 0 : index
    %14 = vector.load %arg4[%c0_8, %c0_9] : memref<128x64xbf16, #tpu.memory_space<vmem>>, vector<128x64xbf16>
    %cst_10 = arith.constant dense<0.000000e+00> : vector<1x64xf32>
    %15 = tpu.matmul %13, %14, %cst_10 {dimension_numbers = #tpu.dot_dimension_numbers<[1], [0], [0], [1], [0, 0, 1, 1], [], []>} : vector<1x128xbf16>, vector<128x64xbf16>, vector<1x64xf32> -> vector<1x64xf32>
    %16 = arith.addf %15, %12 : vector<1x64xf32>
    %cst_11 = arith.constant 0.000000e+00 : f32
    %17 = vector.broadcast %cst_11 : f32 to vector<1x64xf32>
    %18 = arith.cmpf ogt, %16, %17 : vector<1x64xf32>
    %19 = math.exp %16 : vector<1x64xf32>
    %cst_12 = arith.constant 1.000000e+00 : f32
    %20 = vector.broadcast %cst_12 : f32 to vector<1x64xf32>
    %21 = arith.subf %19, %20 : vector<1x64xf32>
    %22 = arith.select %18, %16, %21 : vector<1x64xi1>, vector<1x64xf32>
    %23 = vector.extract_strided_slice %22 {offsets = [0, 0], sizes = [1, 32], strides = [1, 1]} : vector<1x64xf32> to vector<1x32xf32>
    %24 = vector.extract_strided_slice %22 {offsets = [0, 32], sizes = [1, 32], strides = [1, 1]} : vector<1x64xf32> to vector<1x32xf32>
    %25 = arith.mulf %23, %24 : vector<1x32xf32>
    %cst_13 = arith.constant dense<0.000000e+00> : vector<1xf32>
    %26 = vector.multi_reduction <add>, %25, %cst_13 [1] : vector<1x32xf32> to vector<1xf32>
    %27 = vector.shape_cast %26 : vector<1xf32> to vector<1x1xf32>
    %cst_14 = arith.constant 0.000000e+00 : f32
    %28 = vector.broadcast %cst_14 : f32 to vector<1x1xf32>
    %29 = arith.cmpf ogt, %27, %28 : vector<1x1xf32>
    %30 = math.exp %27 : vector<1x1xf32>
    %cst_15 = arith.constant 1.000000e+00 : f32
    %31 = vector.broadcast %cst_15 : f32 to vector<1x1xf32>
    %32 = arith.subf %30, %31 : vector<1x1xf32>
    %33 = arith.select %29, %27, %32 : vector<1x1xi1>, vector<1x1xf32>
    %c2 = arith.constant 2 : index
    %c0_16 = arith.constant 0 : index
    %34 = vector.load %arg2[%c2, %c0_16] : memref<8x512xf32, #tpu.memory_space<vmem>>, vector<1x128xf32>
    %c3 = arith.constant 3 : index
    %c0_17 = arith.constant 0 : index
    %35 = vector.load %arg2[%c3, %c0_17] : memref<8x512xf32, #tpu.memory_space<vmem>>, vector<1x128xf32>
    %c4 = arith.constant 4 : index
    %c0_18 = arith.constant 0 : index
    %36 = vector.load %arg2[%c4, %c0_18] : memref<8x512xf32, #tpu.memory_space<vmem>>, vector<1x512xf32>
    %c5 = arith.constant 5 : index
    %c0_19 = arith.constant 0 : index
    %37 = vector.load %arg2[%c5, %c0_19] : memref<8x512xf32, #tpu.memory_space<vmem>>, vector<1x128xf32>
    %c6 = arith.constant 6 : index
    %c0_20 = arith.constant 0 : index
    %38 = vector.load %arg2[%c6, %c0_20] : memref<8x512xf32, #tpu.memory_space<vmem>>, vector<1x128xf32>
    %c6_21 = arith.constant 6 : index
    %c128 = arith.constant 128 : index
    %39 = vector.load %arg2[%c6_21, %c128] : memref<8x512xf32, #tpu.memory_space<vmem>>, vector<1x1xf32>
    %40 = tpu.iota {dimensions = array<i32: 1>} : vector<1x128xi32>
    %c0_i32 = arith.constant 0 : i32
    %41 = vector.broadcast %c0_i32 : i32 to vector<1x128xi32>
    %42 = arith.cmpi eq, %40, %41 : vector<1x128xi32>
    %cst_22 = arith.constant 0.000000e+00 : f32
    %43 = vector.broadcast %cst_22 : f32 to vector<1x128xf32>
    %44 = vector.shape_cast %33 : vector<1x1xf32> to vector<1x1xf32>
    %45 = vector.broadcast %44 : vector<1x1xf32> to vector<1x128xf32>
    %46 = arith.select %42, %45, %43 : vector<1x128xi1>, vector<1x128xf32>
    %c0_i32_23 = arith.constant 0 : i32
    %c7_i32 = arith.constant 7 : i32
    %47 = arith.addi %c0_i32_23, %c7_i32 : i32
    %c1_i32 = arith.constant 1 : i32
    %48:2 = scf.for %arg8 = %c0_i32_23 to %47 step %c1_i32 iter_args(%arg9 = %33, %arg10 = %46) -> (vector<1x1xf32>, vector<1x128xf32>)  : i32 {
      %c1_i32_27 = arith.constant 1 : i32
      %50 = arith.addi %arg8, %c1_i32_27 : i32
      %51 = arith.index_cast %50 : i32 to index
      %52 = memref.load %arg0[%51] : memref<8xf32, #tpu.memory_space<smem>>
      %53 = arith.index_cast %arg8 : i32 to index
      %54 = memref.load %arg0[%53] : memref<8xf32, #tpu.memory_space<smem>>
      %55 = arith.subf %52, %54 : f32
      %cst_28 = arith.constant 2.500000e-01 : f32
      %56 = arith.mulf %55, %cst_28 : f32
      %cst_29 = arith.constant 5.000000e-01 : f32
      %57 = arith.mulf %cst_29, %56 : f32
      %c0_i32_30 = arith.constant 0 : i32
      %58 = vector.broadcast %arg9 : vector<1x1xf32> to vector<1x128xf32>
      %59 = arith.mulf %58, %34 : vector<1x128xf32>
      %60 = arith.addf %59, %35 : vector<1x128xf32>
      %cst_31 = arith.constant 0.000000e+00 : f32
      %61 = vector.broadcast %cst_31 : f32 to vector<1x128xf32>
      %62 = arith.cmpf ogt, %60, %61 : vector<1x128xf32>
      %63 = math.exp %60 : vector<1x128xf32>
      %cst_32 = arith.constant 1.000000e+00 : f32
      %64 = vector.broadcast %cst_32 : f32 to vector<1x128xf32>
      %65 = arith.subf %63, %64 : vector<1x128xf32>
      %66 = arith.select %62, %60, %65 : vector<1x128xi1>, vector<1x128xf32>
      %67 = arith.truncf %66 : vector<1x128xf32> to vector<1x128xbf16>
      %c0_33 = arith.constant 0 : index
      %c0_34 = arith.constant 0 : index
      %68 = vector.load %arg5[%c0_33, %c0_34] : memref<128x512xbf16, #tpu.memory_space<vmem>>, vector<128x512xbf16>
      %cst_35 = arith.constant dense<0.000000e+00> : vector<1x512xf32>
      %69 = tpu.matmul %67, %68, %cst_35 {dimension_numbers = #tpu.dot_dimension_numbers<[1], [0], [0], [1], [0, 0, 1, 1], [], []>} : vector<1x128xbf16>, vector<128x512xbf16>, vector<1x512xf32> -> vector<1x512xf32>
      %70 = arith.addf %69, %36 : vector<1x512xf32>
      %cst_36 = arith.constant 0.000000e+00 : f32
      %71 = vector.broadcast %cst_36 : f32 to vector<1x512xf32>
      %72 = arith.cmpf ogt, %70, %71 : vector<1x512xf32>
      %73 = math.exp %70 : vector<1x512xf32>
      %cst_37 = arith.constant 1.000000e+00 : f32
      %74 = vector.broadcast %cst_37 : f32 to vector<1x512xf32>
      %75 = arith.subf %73, %74 : vector<1x512xf32>
      %76 = arith.select %72, %70, %75 : vector<1x512xi1>, vector<1x512xf32>
      %77 = arith.truncf %76 : vector<1x512xf32> to vector<1x512xbf16>
      %c0_38 = arith.constant 0 : index
      %c0_39 = arith.constant 0 : index
      %78 = vector.load %arg6[%c0_38, %c0_39] : memref<512x128xbf16, #tpu.memory_space<vmem>>, vector<512x128xbf16>
      %cst_40 = arith.constant dense<0.000000e+00> : vector<1x128xf32>
      %79 = tpu.matmul %77, %78, %cst_40 {dimension_numbers = #tpu.dot_dimension_numbers<[1], [0], [0], [1], [0, 0, 1, 1], [], []>} : vector<1x512xbf16>, vector<512x128xbf16>, vector<1x128xf32> -> vector<1x128xf32>
      %80 = arith.addf %79, %37 : vector<1x128xf32>
      %cst_41 = arith.constant 0.000000e+00 : f32
      %81 = vector.broadcast %cst_41 : f32 to vector<1x128xf32>
      %82 = arith.cmpf ogt, %80, %81 : vector<1x128xf32>
      %83 = math.exp %80 : vector<1x128xf32>
      %cst_42 = arith.constant 1.000000e+00 : f32
      %84 = vector.broadcast %cst_42 : f32 to vector<1x128xf32>
      %85 = arith.subf %83, %84 : vector<1x128xf32>
      %86 = arith.select %82, %80, %85 : vector<1x128xi1>, vector<1x128xf32>
      %87 = arith.mulf %86, %38 : vector<1x128xf32>
      %cst_43 = arith.constant dense<0.000000e+00> : vector<1xf32>
      %88 = vector.multi_reduction <add>, %87, %cst_43 [1] : vector<1x128xf32> to vector<1xf32>
      %89 = vector.shape_cast %88 : vector<1xf32> to vector<1x1xf32>
      %90 = arith.addf %89, %39 : vector<1x1xf32>
      %91 = vector.broadcast %57 : f32 to vector<1x1xf32>
      %92 = arith.mulf %91, %90 : vector<1x1xf32>
      %93 = arith.addf %arg9, %92 : vector<1x1xf32>
      %94 = vector.broadcast %93 : vector<1x1xf32> to vector<1x128xf32>
      %95 = arith.mulf %94, %34 : vector<1x128xf32>
      %96 = arith.addf %95, %35 : vector<1x128xf32>
      %cst_44 = arith.constant 0.000000e+00 : f32
      %97 = vector.broadcast %cst_44 : f32 to vector<1x128xf32>
      %98 = arith.cmpf ogt, %96, %97 : vector<1x128xf32>
      %99 = math.exp %96 : vector<1x128xf32>
      %cst_45 = arith.constant 1.000000e+00 : f32
      %100 = vector.broadcast %cst_45 : f32 to vector<1x128xf32>
      %101 = arith.subf %99, %100 : vector<1x128xf32>
      %102 = arith.select %98, %96, %101 : vector<1x128xi1>, vector<1x128xf32>
      %103 = arith.truncf %102 : vector<1x128xf32> to vector<1x128xbf16>
      %c0_46 = arith.constant 0 : index
      %c0_47 = arith.constant 0 : index
      %104 = vector.load %arg5[%c0_46, %c0_47] : memref<128x512xbf16, #tpu.memory_space<vmem>>, vector<128x512xbf16>
      %cst_48 = arith.constant dense<0.000000e+00> : vector<1x512xf32>
      %105 = tpu.matmul %103, %104, %cst_48 {dimension_numbers = #tpu.dot_dimension_numbers<[1], [0], [0], [1], [0, 0, 1, 1], [], []>} : vector<1x128xbf16>, vector<128x512xbf16>, vector<1x512xf32> -> vector<1x512xf32>
      %106 = arith.addf %105, %36 : vector<1x512xf32>
      %cst_49 = arith.constant 0.000000e+00 : f32
      %107 = vector.broadcast %cst_49 : f32 to vector<1x512xf32>
      %108 = arith.cmpf ogt, %106, %107 : vector<1x512xf32>
      %109 = math.exp %106 : vector<1x512xf32>
      %cst_50 = arith.constant 1.000000e+00 : f32
      %110 = vector.broadcast %cst_50 : f32 to vector<1x512xf32>
      %111 = arith.subf %109, %110 : vector<1x512xf32>
      %112 = arith.select %108, %106, %111 : vector<1x512xi1>, vector<1x512xf32>
      %113 = arith.truncf %112 : vector<1x512xf32> to vector<1x512xbf16>
      %c0_51 = arith.constant 0 : index
      %c0_52 = arith.constant 0 : index
      %114 = vector.load %arg6[%c0_51, %c0_52] : memref<512x128xbf16, #tpu.memory_space<vmem>>, vector<512x128xbf16>
      %cst_53 = arith.constant dense<0.000000e+00> : vector<1x128xf32>
      %115 = tpu.matmul %113, %114, %cst_53 {dimension_numbers = #tpu.dot_dimension_numbers<[1], [0], [0], [1], [0, 0, 1, 1], [], []>} : vector<1x512xbf16>, vector<512x128xbf16>, vector<1x128xf32> -> vector<1x128xf32>
      %116 = arith.addf %115, %37 : vector<1x128xf32>
      %cst_54 = arith.constant 0.000000e+00 : f32
      %117 = vector.broadcast %cst_54 : f32 to vector<1x128xf32>
      %118 = arith.cmpf ogt, %116, %117 : vector<1x128xf32>
      %119 = math.exp %116 : vector<1x128xf32>
      %cst_55 = arith.constant 1.000000e+00 : f32
      %120 = vector.broadcast %cst_55 : f32 to vector<1x128xf32>
      %121 = arith.subf %119, %120 : vector<1x128xf32>
      %122 = arith.select %118, %116, %121 : vector<1x128xi1>, vector<1x128xf32>
      %123 = arith.mulf %122, %38 : vector<1x128xf32>
      %cst_56 = arith.constant dense<0.000000e+00> : vector<1xf32>
      %124 = vector.multi_reduction <add>, %123, %cst_56 [1] : vector<1x128xf32> to vector<1xf32>
      %125 = vector.shape_cast %124 : vector<1xf32> to vector<1x1xf32>
      %126 = arith.addf %125, %39 : vector<1x1xf32>
      %127 = vector.broadcast %57 : f32 to vector<1x1xf32>
      %128 = arith.mulf %127, %126 : vector<1x1xf32>
      %129 = arith.addf %arg9, %128 : vector<1x1xf32>
      %130 = vector.broadcast %129 : vector<1x1xf32> to vector<1x128xf32>
      %131 = arith.mulf %130, %34 : vector<1x128xf32>
      %132 = arith.addf %131, %35 : vector<1x128xf32>
      %cst_57 = arith.constant 0.000000e+00 : f32
      %133 = vector.broadcast %cst_57 : f32 to vector<1x128xf32>
      %134 = arith.cmpf ogt, %132, %133 : vector<1x128xf32>
      %135 = math.exp %132 : vector<1x128xf32>
      %cst_58 = arith.constant 1.000000e+00 : f32
      %136 = vector.broadcast %cst_58 : f32 to vector<1x128xf32>
      %137 = arith.subf %135, %136 : vector<1x128xf32>
      %138 = arith.select %134, %132, %137 : vector<1x128xi1>, vector<1x128xf32>
      %139 = arith.truncf %138 : vector<1x128xf32> to vector<1x128xbf16>
      %c0_59 = arith.constant 0 : index
      %c0_60 = arith.constant 0 : index
      %140 = vector.load %arg5[%c0_59, %c0_60] : memref<128x512xbf16, #tpu.memory_space<vmem>>, vector<128x512xbf16>
      %cst_61 = arith.constant dense<0.000000e+00> : vector<1x512xf32>
      %141 = tpu.matmul %139, %140, %cst_61 {dimension_numbers = #tpu.dot_dimension_numbers<[1], [0], [0], [1], [0, 0, 1, 1], [], []>} : vector<1x128xbf16>, vector<128x512xbf16>, vector<1x512xf32> -> vector<1x512xf32>
      %142 = arith.addf %141, %36 : vector<1x512xf32>
      %cst_62 = arith.constant 0.000000e+00 : f32
      %143 = vector.broadcast %cst_62 : f32 to vector<1x512xf32>
      %144 = arith.cmpf ogt, %142, %143 : vector<1x512xf32>
      %145 = math.exp %142 : vector<1x512xf32>
      %cst_63 = arith.constant 1.000000e+00 : f32
      %146 = vector.broadcast %cst_63 : f32 to vector<1x512xf32>
      %147 = arith.subf %145, %146 : vector<1x512xf32>
      %148 = arith.select %144, %142, %147 : vector<1x512xi1>, vector<1x512xf32>
      %149 = arith.truncf %148 : vector<1x512xf32> to vector<1x512xbf16>
      %c0_64 = arith.constant 0 : index
      %c0_65 = arith.constant 0 : index
      %150 = vector.load %arg6[%c0_64, %c0_65] : memref<512x128xbf16, #tpu.memory_space<vmem>>, vector<512x128xbf16>
      %cst_66 = arith.constant dense<0.000000e+00> : vector<1x128xf32>
      %151 = tpu.matmul %149, %150, %cst_66 {dimension_numbers = #tpu.dot_dimension_numbers<[1], [0], [0], [1], [0, 0, 1, 1], [], []>} : vector<1x512xbf16>, vector<512x128xbf16>, vector<1x128xf32> -> vector<1x128xf32>
      %152 = arith.addf %151, %37 : vector<1x128xf32>
      %cst_67 = arith.constant 0.000000e+00 : f32
      %153 = vector.broadcast %cst_67 : f32 to vector<1x128xf32>
      %154 = arith.cmpf ogt, %152, %153 : vector<1x128xf32>
      %155 = math.exp %152 : vector<1x128xf32>
      %cst_68 = arith.constant 1.000000e+00 : f32
      %156 = vector.broadcast %cst_68 : f32 to vector<1x128xf32>
      %157 = arith.subf %155, %156 : vector<1x128xf32>
      %158 = arith.select %154, %152, %157 : vector<1x128xi1>, vector<1x128xf32>
      %159 = arith.mulf %158, %38 : vector<1x128xf32>
      %cst_69 = arith.constant dense<0.000000e+00> : vector<1xf32>
      %160 = vector.multi_reduction <add>, %159, %cst_69 [1] : vector<1x128xf32> to vector<1xf32>
      %161 = vector.shape_cast %160 : vector<1xf32> to vector<1x1xf32>
      %162 = arith.addf %161, %39 : vector<1x1xf32>
      %163 = vector.broadcast %56 : f32 to vector<1x1xf32>
      %164 = arith.mulf %163, %162 : vector<1x1xf32>
      %165 = arith.addf %arg9, %164 : vector<1x1xf32>
      %166 = vector.broadcast %165 : vector<1x1xf32> to vector<1x128xf32>
      %167 = arith.mulf %166, %34 : vector<1x128xf32>
      %168 = arith.addf %167, %35 : vector<1x128xf32>
      %cst_70 = arith.constant 0.000000e+00 : f32
      %169 = vector.broadcast %cst_70 : f32 to vector<1x128xf32>
      %170 = arith.cmpf ogt, %168, %169 : vector<1x128xf32>
      %171 = math.exp %168 : vector<1x128xf32>
      %cst_71 = arith.constant 1.000000e+00 : f32
      %172 = vector.broadcast %cst_71 : f32 to vector<1x128xf32>
      %173 = arith.subf %171, %172 : vector<1x128xf32>
      %174 = arith.select %170, %168, %173 : vector<1x128xi1>, vector<1x128xf32>
      %175 = arith.truncf %174 : vector<1x128xf32> to vector<1x128xbf16>
      %c0_72 = arith.constant 0 : index
      %c0_73 = arith.constant 0 : index
      %176 = vector.load %arg5[%c0_72, %c0_73] : memref<128x512xbf16, #tpu.memory_space<vmem>>, vector<128x512xbf16>
      %cst_74 = arith.constant dense<0.000000e+00> : vector<1x512xf32>
      %177 = tpu.matmul %175, %176, %cst_74 {dimension_numbers = #tpu.dot_dimension_numbers<[1], [0], [0], [1], [0, 0, 1, 1], [], []>} : vector<1x128xbf16>, vector<128x512xbf16>, vector<1x512xf32> -> vector<1x512xf32>
      %178 = arith.addf %177, %36 : vector<1x512xf32>
      %cst_75 = arith.constant 0.000000e+00 : f32
      %179 = vector.broadcast %cst_75 : f32 to vector<1x512xf32>
      %180 = arith.cmpf ogt, %178, %179 : vector<1x512xf32>
      %181 = math.exp %178 : vector<1x512xf32>
      %cst_76 = arith.constant 1.000000e+00 : f32
      %182 = vector.broadcast %cst_76 : f32 to vector<1x512xf32>
      %183 = arith.subf %181, %182 : vector<1x512xf32>
      %184 = arith.select %180, %178, %183 : vector<1x512xi1>, vector<1x512xf32>
      %185 = arith.truncf %184 : vector<1x512xf32> to vector<1x512xbf16>
      %c0_77 = arith.constant 0 : index
      %c0_78 = arith.constant 0 : index
      %186 = vector.load %arg6[%c0_77, %c0_78] : memref<512x128xbf16, #tpu.memory_space<vmem>>, vector<512x128xbf16>
      %cst_79 = arith.constant dense<0.000000e+00> : vector<1x128xf32>
      %187 = tpu.matmul %185, %186, %cst_79 {dimension_numbers = #tpu.dot_dimension_numbers<[1], [0], [0], [1], [0, 0, 1, 1], [], []>} : vector<1x512xbf16>, vector<512x128xbf16>, vector<1x128xf32> -> vector<1x128xf32>
      %188 = arith.addf %187, %37 : vector<1x128xf32>
      %cst_80 = arith.constant 0.000000e+00 : f32
      %189 = vector.broadcast %cst_80 : f32 to vector<1x128xf32>
      %190 = arith.cmpf ogt, %188, %189 : vector<1x128xf32>
      %191 = math.exp %188 : vector<1x128xf32>
      %cst_81 = arith.constant 1.000000e+00 : f32
      %192 = vector.broadcast %cst_81 : f32 to vector<1x128xf32>
      %193 = arith.subf %191, %192 : vector<1x128xf32>
      %194 = arith.select %190, %188, %193 : vector<1x128xi1>, vector<1x128xf32>
      %195 = arith.mulf %194, %38 : vector<1x128xf32>
      %cst_82 = arith.constant dense<0.000000e+00> : vector<1xf32>
      %196 = vector.multi_reduction <add>, %195, %cst_82 [1] : vector<1x128xf32> to vector<1xf32>
      %197 = vector.shape_cast %196 : vector<1xf32> to vector<1x1xf32>
      %198 = arith.addf %197, %39 : vector<1x1xf32>
      %cst_83 = arith.constant 0.166666672 : f32
      %199 = arith.mulf %56, %cst_83 : f32
      %cst_84 = arith.constant 2.000000e+00 : f32
      %200 = vector.broadcast %cst_84 : f32 to vector<1x1xf32>
      %201 = arith.mulf %200, %126 : vector<1x1xf32>
      %202 = arith.addf %90, %201 : vector<1x1xf32>
      %cst_85 = arith.constant 2.000000e+00 : f32
      %203 = vector.broadcast %cst_85 : f32 to vector<1x1xf32>
      %204 = arith.mulf %203, %162 : vector<1x1xf32>
      %205 = arith.addf %202, %204 : vector<1x1xf32>
      %206 = arith.addf %205, %198 : vector<1x1xf32>
      %207 = vector.broadcast %199 : f32 to vector<1x1xf32>
      %208 = arith.mulf %207, %206 : vector<1x1xf32>
      %209 = arith.addf %arg9, %208 : vector<1x1xf32>
      %c1_i32_86 = arith.constant 1 : i32
      %210 = vector.broadcast %209 : vector<1x1xf32> to vector<1x128xf32>
      %211 = arith.mulf %210, %34 : vector<1x128xf32>
      %212 = arith.addf %211, %35 : vector<1x128xf32>
      %cst_87 = arith.constant 0.000000e+00 : f32
      %213 = vector.broadcast %cst_87 : f32 to vector<1x128xf32>
      %214 = arith.cmpf ogt, %212, %213 : vector<1x128xf32>
      %215 = math.exp %212 : vector<1x128xf32>
      %cst_88 = arith.constant 1.000000e+00 : f32
      %216 = vector.broadcast %cst_88 : f32 to vector<1x128xf32>
      %217 = arith.subf %215, %216 : vector<1x128xf32>
      %218 = arith.select %214, %212, %217 : vector<1x128xi1>, vector<1x128xf32>
      %219 = arith.truncf %218 : vector<1x128xf32> to vector<1x128xbf16>
      %c0_89 = arith.constant 0 : index
      %c0_90 = arith.constant 0 : index
      %220 = vector.load %arg5[%c0_89, %c0_90] : memref<128x512xbf16, #tpu.memory_space<vmem>>, vector<128x512xbf16>
      %cst_91 = arith.constant dense<0.000000e+00> : vector<1x512xf32>
      %221 = tpu.matmul %219, %220, %cst_91 {dimension_numbers = #tpu.dot_dimension_numbers<[1], [0], [0], [1], [0, 0, 1, 1], [], []>} : vector<1x128xbf16>, vector<128x512xbf16>, vector<1x512xf32> -> vector<1x512xf32>
      %222 = arith.addf %221, %36 : vector<1x512xf32>
      %cst_92 = arith.constant 0.000000e+00 : f32
      %223 = vector.broadcast %cst_92 : f32 to vector<1x512xf32>
      %224 = arith.cmpf ogt, %222, %223 : vector<1x512xf32>
      %225 = math.exp %222 : vector<1x512xf32>
      %cst_93 = arith.constant 1.000000e+00 : f32
      %226 = vector.broadcast %cst_93 : f32 to vector<1x512xf32>
      %227 = arith.subf %225, %226 : vector<1x512xf32>
      %228 = arith.select %224, %222, %227 : vector<1x512xi1>, vector<1x512xf32>
      %229 = arith.truncf %228 : vector<1x512xf32> to vector<1x512xbf16>
      %c0_94 = arith.constant 0 : index
      %c0_95 = arith.constant 0 : index
      %230 = vector.load %arg6[%c0_94, %c0_95] : memref<512x128xbf16, #tpu.memory_space<vmem>>, vector<512x128xbf16>
      %cst_96 = arith.constant dense<0.000000e+00> : vector<1x128xf32>
      %231 = tpu.matmul %229, %230, %cst_96 {dimension_numbers = #tpu.dot_dimension_numbers<[1], [0], [0], [1], [0, 0, 1, 1], [], []>} : vector<1x512xbf16>, vector<512x128xbf16>, vector<1x128xf32> -> vector<1x128xf32>
      %232 = arith.addf %231, %37 : vector<1x128xf32>
      %cst_97 = arith.constant 0.000000e+00 : f32
      %233 = vector.broadcast %cst_97 : f32 to vector<1x128xf32>
      %234 = arith.cmpf ogt, %232, %233 : vector<1x128xf32>
      %235 = math.exp %232 : vector<1x128xf32>
      %cst_98 = arith.constant 1.000000e+00 : f32
      %236 = vector.broadcast %cst_98 : f32 to vector<1x128xf32>
      %237 = arith.subf %235, %236 : vector<1x128xf32>
      %238 = arith.select %234, %232, %237 : vector<1x128xi1>, vector<1x128xf32>
      %239 = arith.mulf %238, %38 : vector<1x128xf32>
      %cst_99 = arith.constant dense<0.000000e+00> : vector<1xf32>
      %240 = vector.multi_reduction <add>, %239, %cst_99 [1] : vector<1x128xf32> to vector<1xf32>
      %241 = vector.shape_cast %240 : vector<1xf32> to vector<1x1xf32>
      %242 = arith.addf %241, %39 : vector<1x1xf32>
      %243 = vector.broadcast %57 : f32 to vector<1x1xf32>
      %244 = arith.mulf %243, %242 : vector<1x1xf32>
      %245 = arith.addf %209, %244 : vector<1x1xf32>
      %246 = vector.broadcast %245 : vector<1x1xf32> to vector<1x128xf32>
      %247 = arith.mulf %246, %34 : vector<1x128xf32>
      %248 = arith.addf %247, %35 : vector<1x128xf32>
      %cst_100 = arith.constant 0.000000e+00 : f32
      %249 = vector.broadcast %cst_100 : f32 to vector<1x128xf32>
      %250 = arith.cmpf ogt, %248, %249 : vector<1x128xf32>
      %251 = math.exp %248 : vector<1x128xf32>
      %cst_101 = arith.constant 1.000000e+00 : f32
      %252 = vector.broadcast %cst_101 : f32 to vector<1x128xf32>
      %253 = arith.subf %251, %252 : vector<1x128xf32>
      %254 = arith.select %250, %248, %253 : vector<1x128xi1>, vector<1x128xf32>
      %255 = arith.truncf %254 : vector<1x128xf32> to vector<1x128xbf16>
      %c0_102 = arith.constant 0 : index
      %c0_103 = arith.constant 0 : index
      %256 = vector.load %arg5[%c0_102, %c0_103] : memref<128x512xbf16, #tpu.memory_space<vmem>>, vector<128x512xbf16>
      %cst_104 = arith.constant dense<0.000000e+00> : vector<1x512xf32>
      %257 = tpu.matmul %255, %256, %cst_104 {dimension_numbers = #tpu.dot_dimension_numbers<[1], [0], [0], [1], [0, 0, 1, 1], [], []>} : vector<1x128xbf16>, vector<128x512xbf16>, vector<1x512xf32> -> vector<1x512xf32>
      %258 = arith.addf %257, %36 : vector<1x512xf32>
      %cst_105 = arith.constant 0.000000e+00 : f32
      %259 = vector.broadcast %cst_105 : f32 to vector<1x512xf32>
      %260 = arith.cmpf ogt, %258, %259 : vector<1x512xf32>
      %261 = math.exp %258 : vector<1x512xf32>
      %cst_106 = arith.constant 1.000000e+00 : f32
      %262 = vector.broadcast %cst_106 : f32 to vector<1x512xf32>
      %263 = arith.subf %261, %262 : vector<1x512xf32>
      %264 = arith.select %260, %258, %263 : vector<1x512xi1>, vector<1x512xf32>
      %265 = arith.truncf %264 : vector<1x512xf32> to vector<1x512xbf16>
      %c0_107 = arith.constant 0 : index
      %c0_108 = arith.constant 0 : index
      %266 = vector.load %arg6[%c0_107, %c0_108] : memref<512x128xbf16, #tpu.memory_space<vmem>>, vector<512x128xbf16>
      %cst_109 = arith.constant dense<0.000000e+00> : vector<1x128xf32>
      %267 = tpu.matmul %265, %266, %cst_109 {dimension_numbers = #tpu.dot_dimension_numbers<[1], [0], [0], [1], [0, 0, 1, 1], [], []>} : vector<1x512xbf16>, vector<512x128xbf16>, vector<1x128xf32> -> vector<1x128xf32>
      %268 = arith.addf %267, %37 : vector<1x128xf32>
      %cst_110 = arith.constant 0.000000e+00 : f32
      %269 = vector.broadcast %cst_110 : f32 to vector<1x128xf32>
      %270 = arith.cmpf ogt, %268, %269 : vector<1x128xf32>
      %271 = math.exp %268 : vector<1x128xf32>
      %cst_111 = arith.constant 1.000000e+00 : f32
      %272 = vector.broadcast %cst_111 : f32 to vector<1x128xf32>
      %273 = arith.subf %271, %272 : vector<1x128xf32>
      %274 = arith.select %270, %268, %273 : vector<1x128xi1>, vector<1x128xf32>
      %275 = arith.mulf %274, %38 : vector<1x128xf32>
      %cst_112 = arith.constant dense<0.000000e+00> : vector<1xf32>
      %276 = vector.multi_reduction <add>, %275, %cst_112 [1] : vector<1x128xf32> to vector<1xf32>
      %277 = vector.shape_cast %276 : vector<1xf32> to vector<1x1xf32>
      %278 = arith.addf %277, %39 : vector<1x1xf32>
      %279 = vector.broadcast %57 : f32 to vector<1x1xf32>
      %280 = arith.mulf %279, %278 : vector<1x1xf32>
      %281 = arith.addf %209, %280 : vector<1x1xf32>
      %282 = vector.broadcast %281 : vector<1x1xf32> to vector<1x128xf32>
      %283 = arith.mulf %282, %34 : vector<1x128xf32>
      %284 = arith.addf %283, %35 : vector<1x128xf32>
      %cst_113 = arith.constant 0.000000e+00 : f32
      %285 = vector.broadcast %cst_113 : f32 to vector<1x128xf32>
      %286 = arith.cmpf ogt, %284, %285 : vector<1x128xf32>
      %287 = math.exp %284 : vector<1x128xf32>
      %cst_114 = arith.constant 1.000000e+00 : f32
      %288 = vector.broadcast %cst_114 : f32 to vector<1x128xf32>
      %289 = arith.subf %287, %288 : vector<1x128xf32>
      %290 = arith.select %286, %284, %289 : vector<1x128xi1>, vector<1x128xf32>
      %291 = arith.truncf %290 : vector<1x128xf32> to vector<1x128xbf16>
      %c0_115 = arith.constant 0 : index
      %c0_116 = arith.constant 0 : index
      %292 = vector.load %arg5[%c0_115, %c0_116] : memref<128x512xbf16, #tpu.memory_space<vmem>>, vector<128x512xbf16>
      %cst_117 = arith.constant dense<0.000000e+00> : vector<1x512xf32>
      %293 = tpu.matmul %291, %292, %cst_117 {dimension_numbers = #tpu.dot_dimension_numbers<[1], [0], [0], [1], [0, 0, 1, 1], [], []>} : vector<1x128xbf16>, vector<128x512xbf16>, vector<1x512xf32> -> vector<1x512xf32>
      %294 = arith.addf %293, %36 : vector<1x512xf32>
      %cst_118 = arith.constant 0.000000e+00 : f32
      %295 = vector.broadcast %cst_118 : f32 to vector<1x512xf32>
      %296 = arith.cmpf ogt, %294, %295 : vector<1x512xf32>
      %297 = math.exp %294 : vector<1x512xf32>
      %cst_119 = arith.constant 1.000000e+00 : f32
      %298 = vector.broadcast %cst_119 : f32 to vector<1x512xf32>
      %299 = arith.subf %297, %298 : vector<1x512xf32>
      %300 = arith.select %296, %294, %299 : vector<1x512xi1>, vector<1x512xf32>
      %301 = arith.truncf %300 : vector<1x512xf32> to vector<1x512xbf16>
      %c0_120 = arith.constant 0 : index
      %c0_121 = arith.constant 0 : index
      %302 = vector.load %arg6[%c0_120, %c0_121] : memref<512x128xbf16, #tpu.memory_space<vmem>>, vector<512x128xbf16>
      %cst_122 = arith.constant dense<0.000000e+00> : vector<1x128xf32>
      %303 = tpu.matmul %301, %302, %cst_122 {dimension_numbers = #tpu.dot_dimension_numbers<[1], [0], [0], [1], [0, 0, 1, 1], [], []>} : vector<1x512xbf16>, vector<512x128xbf16>, vector<1x128xf32> -> vector<1x128xf32>
      %304 = arith.addf %303, %37 : vector<1x128xf32>
      %cst_123 = arith.constant 0.000000e+00 : f32
      %305 = vector.broadcast %cst_123 : f32 to vector<1x128xf32>
      %306 = arith.cmpf ogt, %304, %305 : vector<1x128xf32>
      %307 = math.exp %304 : vector<1x128xf32>
      %cst_124 = arith.constant 1.000000e+00 : f32
      %308 = vector.broadcast %cst_124 : f32 to vector<1x128xf32>
      %309 = arith.subf %307, %308 : vector<1x128xf32>
      %310 = arith.select %306, %304, %309 : vector<1x128xi1>, vector<1x128xf32>
      %311 = arith.mulf %310, %38 : vector<1x128xf32>
      %cst_125 = arith.constant dense<0.000000e+00> : vector<1xf32>
      %312 = vector.multi_reduction <add>, %311, %cst_125 [1] : vector<1x128xf32> to vector<1xf32>
      %313 = vector.shape_cast %312 : vector<1xf32> to vector<1x1xf32>
      %314 = arith.addf %313, %39 : vector<1x1xf32>
      %315 = vector.broadcast %56 : f32 to vector<1x1xf32>
      %316 = arith.mulf %315, %314 : vector<1x1xf32>
      %317 = arith.addf %209, %316 : vector<1x1xf32>
      %318 = vector.broadcast %317 : vector<1x1xf32> to vector<1x128xf32>
      %319 = arith.mulf %318, %34 : vector<1x128xf32>
      %320 = arith.addf %319, %35 : vector<1x128xf32>
      %cst_126 = arith.constant 0.000000e+00 : f32
      %321 = vector.broadcast %cst_126 : f32 to vector<1x128xf32>
      %322 = arith.cmpf ogt, %320, %321 : vector<1x128xf32>
      %323 = math.exp %320 : vector<1x128xf32>
      %cst_127 = arith.constant 1.000000e+00 : f32
      %324 = vector.broadcast %cst_127 : f32 to vector<1x128xf32>
      %325 = arith.subf %323, %324 : vector<1x128xf32>
      %326 = arith.select %322, %320, %325 : vector<1x128xi1>, vector<1x128xf32>
      %327 = arith.truncf %326 : vector<1x128xf32> to vector<1x128xbf16>
      %c0_128 = arith.constant 0 : index
      %c0_129 = arith.constant 0 : index
      %328 = vector.load %arg5[%c0_128, %c0_129] : memref<128x512xbf16, #tpu.memory_space<vmem>>, vector<128x512xbf16>
      %cst_130 = arith.constant dense<0.000000e+00> : vector<1x512xf32>
      %329 = tpu.matmul %327, %328, %cst_130 {dimension_numbers = #tpu.dot_dimension_numbers<[1], [0], [0], [1], [0, 0, 1, 1], [], []>} : vector<1x128xbf16>, vector<128x512xbf16>, vector<1x512xf32> -> vector<1x512xf32>
      %330 = arith.addf %329, %36 : vector<1x512xf32>
      %cst_131 = arith.constant 0.000000e+00 : f32
      %331 = vector.broadcast %cst_131 : f32 to vector<1x512xf32>
      %332 = arith.cmpf ogt, %330, %331 : vector<1x512xf32>
      %333 = math.exp %330 : vector<1x512xf32>
      %cst_132 = arith.constant 1.000000e+00 : f32
      %334 = vector.broadcast %cst_132 : f32 to vector<1x512xf32>
      %335 = arith.subf %333, %334 : vector<1x512xf32>
      %336 = arith.select %332, %330, %335 : vector<1x512xi1>, vector<1x512xf32>
      %337 = arith.truncf %336 : vector<1x512xf32> to vector<1x512xbf16>
      %c0_133 = arith.constant 0 : index
      %c0_134 = arith.constant 0 : index
      %338 = vector.load %arg6[%c0_133, %c0_134] : memref<512x128xbf16, #tpu.memory_space<vmem>>, vector<512x128xbf16>
      %cst_135 = arith.constant dense<0.000000e+00> : vector<1x128xf32>
      %339 = tpu.matmul %337, %338, %cst_135 {dimension_numbers = #tpu.dot_dimension_numbers<[1], [0], [0], [1], [0, 0, 1, 1], [], []>} : vector<1x512xbf16>, vector<512x128xbf16>, vector<1x128xf32> -> vector<1x128xf32>
      %340 = arith.addf %339, %37 : vector<1x128xf32>
      %cst_136 = arith.constant 0.000000e+00 : f32
      %341 = vector.broadcast %cst_136 : f32 to vector<1x128xf32>
      %342 = arith.cmpf ogt, %340, %341 : vector<1x128xf32>
      %343 = math.exp %340 : vector<1x128xf32>
      %cst_137 = arith.constant 1.000000e+00 : f32
      %344 = vector.broadcast %cst_137 : f32 to vector<1x128xf32>
      %345 = arith.subf %343, %344 : vector<1x128xf32>
      %346 = arith.select %342, %340, %345 : vector<1x128xi1>, vector<1x128xf32>
      %347 = arith.mulf %346, %38 : vector<1x128xf32>
      %cst_138 = arith.constant dense<0.000000e+00> : vector<1xf32>
      %348 = vector.multi_reduction <add>, %347, %cst_138 [1] : vector<1x128xf32> to vector<1xf32>
      %349 = vector.shape_cast %348 : vector<1xf32> to vector<1x1xf32>
      %350 = arith.addf %349, %39 : vector<1x1xf32>
      %cst_139 = arith.constant 0.166666672 : f32
      %351 = arith.mulf %56, %cst_139 : f32
      %cst_140 = arith.constant 2.000000e+00 : f32
      %352 = vector.broadcast %cst_140 : f32 to vector<1x1xf32>
      %353 = arith.mulf %352, %278 : vector<1x1xf32>
      %354 = arith.addf %242, %353 : vector<1x1xf32>
      %cst_141 = arith.constant 2.000000e+00 : f32
      %355 = vector.broadcast %cst_141 : f32 to vector<1x1xf32>
      %356 = arith.mulf %355, %314 : vector<1x1xf32>
      %357 = arith.addf %354, %356 : vector<1x1xf32>
      %358 = arith.addf %357, %350 : vector<1x1xf32>
      %359 = vector.broadcast %351 : f32 to vector<1x1xf32>
      %360 = arith.mulf %359, %358 : vector<1x1xf32>
      %361 = arith.addf %209, %360 : vector<1x1xf32>
      %c2_i32 = arith.constant 2 : i32
      %362 = vector.broadcast %361 : vector<1x1xf32> to vector<1x128xf32>
      %363 = arith.mulf %362, %34 : vector<1x128xf32>
      %364 = arith.addf %363, %35 : vector<1x128xf32>
      %cst_142 = arith.constant 0.000000e+00 : f32
      %365 = vector.broadcast %cst_142 : f32 to vector<1x128xf32>
      %366 = arith.cmpf ogt, %364, %365 : vector<1x128xf32>
      %367 = math.exp %364 : vector<1x128xf32>
      %cst_143 = arith.constant 1.000000e+00 : f32
      %368 = vector.broadcast %cst_143 : f32 to vector<1x128xf32>
      %369 = arith.subf %367, %368 : vector<1x128xf32>
      %370 = arith.select %366, %364, %369 : vector<1x128xi1>, vector<1x128xf32>
      %371 = arith.truncf %370 : vector<1x128xf32> to vector<1x128xbf16>
      %c0_144 = arith.constant 0 : index
      %c0_145 = arith.constant 0 : index
      %372 = vector.load %arg5[%c0_144, %c0_145] : memref<128x512xbf16, #tpu.memory_space<vmem>>, vector<128x512xbf16>
      %cst_146 = arith.constant dense<0.000000e+00> : vector<1x512xf32>
      %373 = tpu.matmul %371, %372, %cst_146 {dimension_numbers = #tpu.dot_dimension_numbers<[1], [0], [0], [1], [0, 0, 1, 1], [], []>} : vector<1x128xbf16>, vector<128x512xbf16>, vector<1x512xf32> -> vector<1x512xf32>
      %374 = arith.addf %373, %36 : vector<1x512xf32>
      %cst_147 = arith.constant 0.000000e+00 : f32
      %375 = vector.broadcast %cst_147 : f32 to vector<1x512xf32>
      %376 = arith.cmpf ogt, %374, %375 : vector<1x512xf32>
      %377 = math.exp %374 : vector<1x512xf32>
      %cst_148 = arith.constant 1.000000e+00 : f32
      %378 = vector.broadcast %cst_148 : f32 to vector<1x512xf32>
      %379 = arith.subf %377, %378 : vector<1x512xf32>
      %380 = arith.select %376, %374, %379 : vector<1x512xi1>, vector<1x512xf32>
      %381 = arith.truncf %380 : vector<1x512xf32> to vector<1x512xbf16>
      %c0_149 = arith.constant 0 : index
      %c0_150 = arith.constant 0 : index
      %382 = vector.load %arg6[%c0_149, %c0_150] : memref<512x128xbf16, #tpu.memory_space<vmem>>, vector<512x128xbf16>
      %cst_151 = arith.constant dense<0.000000e+00> : vector<1x128xf32>
      %383 = tpu.matmul %381, %382, %cst_151 {dimension_numbers = #tpu.dot_dimension_numbers<[1], [0], [0], [1], [0, 0, 1, 1], [], []>} : vector<1x512xbf16>, vector<512x128xbf16>, vector<1x128xf32> -> vector<1x128xf32>
      %384 = arith.addf %383, %37 : vector<1x128xf32>
      %cst_152 = arith.constant 0.000000e+00 : f32
      %385 = vector.broadcast %cst_152 : f32 to vector<1x128xf32>
      %386 = arith.cmpf ogt, %384, %385 : vector<1x128xf32>
      %387 = math.exp %384 : vector<1x128xf32>
      %cst_153 = arith.constant 1.000000e+00 : f32
      %388 = vector.broadcast %cst_153 : f32 to vector<1x128xf32>
      %389 = arith.subf %387, %388 : vector<1x128xf32>
      %390 = arith.select %386, %384, %389 : vector<1x128xi1>, vector<1x128xf32>
      %391 = arith.mulf %390, %38 : vector<1x128xf32>
      %cst_154 = arith.constant dense<0.000000e+00> : vector<1xf32>
      %392 = vector.multi_reduction <add>, %391, %cst_154 [1] : vector<1x128xf32> to vector<1xf32>
      %393 = vector.shape_cast %392 : vector<1xf32> to vector<1x1xf32>
      %394 = arith.addf %393, %39 : vector<1x1xf32>
      %395 = vector.broadcast %57 : f32 to vector<1x1xf32>
      %396 = arith.mulf %395, %394 : vector<1x1xf32>
      %397 = arith.addf %361, %396 : vector<1x1xf32>
      %398 = vector.broadcast %397 : vector<1x1xf32> to vector<1x128xf32>
      %399 = arith.mulf %398, %34 : vector<1x128xf32>
      %400 = arith.addf %399, %35 : vector<1x128xf32>
      %cst_155 = arith.constant 0.000000e+00 : f32
      %401 = vector.broadcast %cst_155 : f32 to vector<1x128xf32>
      %402 = arith.cmpf ogt, %400, %401 : vector<1x128xf32>
      %403 = math.exp %400 : vector<1x128xf32>
      %cst_156 = arith.constant 1.000000e+00 : f32
      %404 = vector.broadcast %cst_156 : f32 to vector<1x128xf32>
      %405 = arith.subf %403, %404 : vector<1x128xf32>
      %406 = arith.select %402, %400, %405 : vector<1x128xi1>, vector<1x128xf32>
      %407 = arith.truncf %406 : vector<1x128xf32> to vector<1x128xbf16>
      %c0_157 = arith.constant 0 : index
      %c0_158 = arith.constant 0 : index
      %408 = vector.load %arg5[%c0_157, %c0_158] : memref<128x512xbf16, #tpu.memory_space<vmem>>, vector<128x512xbf16>
      %cst_159 = arith.constant dense<0.000000e+00> : vector<1x512xf32>
      %409 = tpu.matmul %407, %408, %cst_159 {dimension_numbers = #tpu.dot_dimension_numbers<[1], [0], [0], [1], [0, 0, 1, 1], [], []>} : vector<1x128xbf16>, vector<128x512xbf16>, vector<1x512xf32> -> vector<1x512xf32>
      %410 = arith.addf %409, %36 : vector<1x512xf32>
      %cst_160 = arith.constant 0.000000e+00 : f32
      %411 = vector.broadcast %cst_160 : f32 to vector<1x512xf32>
      %412 = arith.cmpf ogt, %410, %411 : vector<1x512xf32>
      %413 = math.exp %410 : vector<1x512xf32>
      %cst_161 = arith.constant 1.000000e+00 : f32
      %414 = vector.broadcast %cst_161 : f32 to vector<1x512xf32>
      %415 = arith.subf %413, %414 : vector<1x512xf32>
      %416 = arith.select %412, %410, %415 : vector<1x512xi1>, vector<1x512xf32>
      %417 = arith.truncf %416 : vector<1x512xf32> to vector<1x512xbf16>
      %c0_162 = arith.constant 0 : index
      %c0_163 = arith.constant 0 : index
      %418 = vector.load %arg6[%c0_162, %c0_163] : memref<512x128xbf16, #tpu.memory_space<vmem>>, vector<512x128xbf16>
      %cst_164 = arith.constant dense<0.000000e+00> : vector<1x128xf32>
      %419 = tpu.matmul %417, %418, %cst_164 {dimension_numbers = #tpu.dot_dimension_numbers<[1], [0], [0], [1], [0, 0, 1, 1], [], []>} : vector<1x512xbf16>, vector<512x128xbf16>, vector<1x128xf32> -> vector<1x128xf32>
      %420 = arith.addf %419, %37 : vector<1x128xf32>
      %cst_165 = arith.constant 0.000000e+00 : f32
      %421 = vector.broadcast %cst_165 : f32 to vector<1x128xf32>
      %422 = arith.cmpf ogt, %420, %421 : vector<1x128xf32>
      %423 = math.exp %420 : vector<1x128xf32>
      %cst_166 = arith.constant 1.000000e+00 : f32
      %424 = vector.broadcast %cst_166 : f32 to vector<1x128xf32>
      %425 = arith.subf %423, %424 : vector<1x128xf32>
      %426 = arith.select %422, %420, %425 : vector<1x128xi1>, vector<1x128xf32>
      %427 = arith.mulf %426, %38 : vector<1x128xf32>
      %cst_167 = arith.constant dense<0.000000e+00> : vector<1xf32>
      %428 = vector.multi_reduction <add>, %427, %cst_167 [1] : vector<1x128xf32> to vector<1xf32>
      %429 = vector.shape_cast %428 : vector<1xf32> to vector<1x1xf32>
      %430 = arith.addf %429, %39 : vector<1x1xf32>
      %431 = vector.broadcast %57 : f32 to vector<1x1xf32>
      %432 = arith.mulf %431, %430 : vector<1x1xf32>
      %433 = arith.addf %361, %432 : vector<1x1xf32>
      %434 = vector.broadcast %433 : vector<1x1xf32> to vector<1x128xf32>
      %435 = arith.mulf %434, %34 : vector<1x128xf32>
      %436 = arith.addf %435, %35 : vector<1x128xf32>
      %cst_168 = arith.constant 0.000000e+00 : f32
      %437 = vector.broadcast %cst_168 : f32 to vector<1x128xf32>
      %438 = arith.cmpf ogt, %436, %437 : vector<1x128xf32>
      %439 = math.exp %436 : vector<1x128xf32>
      %cst_169 = arith.constant 1.000000e+00 : f32
      %440 = vector.broadcast %cst_169 : f32 to vector<1x128xf32>
      %441 = arith.subf %439, %440 : vector<1x128xf32>
      %442 = arith.select %438, %436, %441 : vector<1x128xi1>, vector<1x128xf32>
      %443 = arith.truncf %442 : vector<1x128xf32> to vector<1x128xbf16>
      %c0_170 = arith.constant 0 : index
      %c0_171 = arith.constant 0 : index
      %444 = vector.load %arg5[%c0_170, %c0_171] : memref<128x512xbf16, #tpu.memory_space<vmem>>, vector<128x512xbf16>
      %cst_172 = arith.constant dense<0.000000e+00> : vector<1x512xf32>
      %445 = tpu.matmul %443, %444, %cst_172 {dimension_numbers = #tpu.dot_dimension_numbers<[1], [0], [0], [1], [0, 0, 1, 1], [], []>} : vector<1x128xbf16>, vector<128x512xbf16>, vector<1x512xf32> -> vector<1x512xf32>
      %446 = arith.addf %445, %36 : vector<1x512xf32>
      %cst_173 = arith.constant 0.000000e+00 : f32
      %447 = vector.broadcast %cst_173 : f32 to vector<1x512xf32>
      %448 = arith.cmpf ogt, %446, %447 : vector<1x512xf32>
      %449 = math.exp %446 : vector<1x512xf32>
      %cst_174 = arith.constant 1.000000e+00 : f32
      %450 = vector.broadcast %cst_174 : f32 to vector<1x512xf32>
      %451 = arith.subf %449, %450 : vector<1x512xf32>
      %452 = arith.select %448, %446, %451 : vector<1x512xi1>, vector<1x512xf32>
      %453 = arith.truncf %452 : vector<1x512xf32> to vector<1x512xbf16>
      %c0_175 = arith.constant 0 : index
      %c0_176 = arith.constant 0 : index
      %454 = vector.load %arg6[%c0_175, %c0_176] : memref<512x128xbf16, #tpu.memory_space<vmem>>, vector<512x128xbf16>
      %cst_177 = arith.constant dense<0.000000e+00> : vector<1x128xf32>
      %455 = tpu.matmul %453, %454, %cst_177 {dimension_numbers = #tpu.dot_dimension_numbers<[1], [0], [0], [1], [0, 0, 1, 1], [], []>} : vector<1x512xbf16>, vector<512x128xbf16>, vector<1x128xf32> -> vector<1x128xf32>
      %456 = arith.addf %455, %37 : vector<1x128xf32>
      %cst_178 = arith.constant 0.000000e+00 : f32
      %457 = vector.broadcast %cst_178 : f32 to vector<1x128xf32>
      %458 = arith.cmpf ogt, %456, %457 : vector<1x128xf32>
      %459 = math.exp %456 : vector<1x128xf32>
      %cst_179 = arith.constant 1.000000e+00 : f32
      %460 = vector.broadcast %cst_179 : f32 to vector<1x128xf32>
      %461 = arith.subf %459, %460 : vector<1x128xf32>
      %462 = arith.select %458, %456, %461 : vector<1x128xi1>, vector<1x128xf32>
      %463 = arith.mulf %462, %38 : vector<1x128xf32>
      %cst_180 = arith.constant dense<0.000000e+00> : vector<1xf32>
      %464 = vector.multi_reduction <add>, %463, %cst_180 [1] : vector<1x128xf32> to vector<1xf32>
      %465 = vector.shape_cast %464 : vector<1xf32> to vector<1x1xf32>
      %466 = arith.addf %465, %39 : vector<1x1xf32>
      %467 = vector.broadcast %56 : f32 to vector<1x1xf32>
      %468 = arith.mulf %467, %466 : vector<1x1xf32>
      %469 = arith.addf %361, %468 : vector<1x1xf32>
      %470 = vector.broadcast %469 : vector<1x1xf32> to vector<1x128xf32>
      %471 = arith.mulf %470, %34 : vector<1x128xf32>
      %472 = arith.addf %471, %35 : vector<1x128xf32>
      %cst_181 = arith.constant 0.000000e+00 : f32
      %473 = vector.broadcast %cst_181 : f32 to vector<1x128xf32>
      %474 = arith.cmpf ogt, %472, %473 : vector<1x128xf32>
      %475 = math.exp %472 : vector<1x128xf32>
      %cst_182 = arith.constant 1.000000e+00 : f32
      %476 = vector.broadcast %cst_182 : f32 to vector<1x128xf32>
      %477 = arith.subf %475, %476 : vector<1x128xf32>
      %478 = arith.select %474, %472, %477 : vector<1x128xi1>, vector<1x128xf32>
      %479 = arith.truncf %478 : vector<1x128xf32> to vector<1x128xbf16>
      %c0_183 = arith.constant 0 : index
      %c0_184 = arith.constant 0 : index
      %480 = vector.load %arg5[%c0_183, %c0_184] : memref<128x512xbf16, #tpu.memory_space<vmem>>, vector<128x512xbf16>
      %cst_185 = arith.constant dense<0.000000e+00> : vector<1x512xf32>
      %481 = tpu.matmul %479, %480, %cst_185 {dimension_numbers = #tpu.dot_dimension_numbers<[1], [0], [0], [1], [0, 0, 1, 1], [], []>} : vector<1x128xbf16>, vector<128x512xbf16>, vector<1x512xf32> -> vector<1x512xf32>
      %482 = arith.addf %481, %36 : vector<1x512xf32>
      %cst_186 = arith.constant 0.000000e+00 : f32
      %483 = vector.broadcast %cst_186 : f32 to vector<1x512xf32>
      %484 = arith.cmpf ogt, %482, %483 : vector<1x512xf32>
      %485 = math.exp %482 : vector<1x512xf32>
      %cst_187 = arith.constant 1.000000e+00 : f32
      %486 = vector.broadcast %cst_187 : f32 to vector<1x512xf32>
      %487 = arith.subf %485, %486 : vector<1x512xf32>
      %488 = arith.select %484, %482, %487 : vector<1x512xi1>, vector<1x512xf32>
      %489 = arith.truncf %488 : vector<1x512xf32> to vector<1x512xbf16>
      %c0_188 = arith.constant 0 : index
      %c0_189 = arith.constant 0 : index
      %490 = vector.load %arg6[%c0_188, %c0_189] : memref<512x128xbf16, #tpu.memory_space<vmem>>, vector<512x128xbf16>
      %cst_190 = arith.constant dense<0.000000e+00> : vector<1x128xf32>
      %491 = tpu.matmul %489, %490, %cst_190 {dimension_numbers = #tpu.dot_dimension_numbers<[1], [0], [0], [1], [0, 0, 1, 1], [], []>} : vector<1x512xbf16>, vector<512x128xbf16>, vector<1x128xf32> -> vector<1x128xf32>
      %492 = arith.addf %491, %37 : vector<1x128xf32>
      %cst_191 = arith.constant 0.000000e+00 : f32
      %493 = vector.broadcast %cst_191 : f32 to vector<1x128xf32>
      %494 = arith.cmpf ogt, %492, %493 : vector<1x128xf32>
      %495 = math.exp %492 : vector<1x128xf32>
      %cst_192 = arith.constant 1.000000e+00 : f32
      %496 = vector.broadcast %cst_192 : f32 to vector<1x128xf32>
      %497 = arith.subf %495, %496 : vector<1x128xf32>
      %498 = arith.select %494, %492, %497 : vector<1x128xi1>, vector<1x128xf32>
      %499 = arith.mulf %498, %38 : vector<1x128xf32>
      %cst_193 = arith.constant dense<0.000000e+00> : vector<1xf32>
      %500 = vector.multi_reduction <add>, %499, %cst_193 [1] : vector<1x128xf32> to vector<1xf32>
      %501 = vector.shape_cast %500 : vector<1xf32> to vector<1x1xf32>
      %502 = arith.addf %501, %39 : vector<1x1xf32>
      %cst_194 = arith.constant 0.166666672 : f32
      %503 = arith.mulf %56, %cst_194 : f32
      %cst_195 = arith.constant 2.000000e+00 : f32
      %504 = vector.broadcast %cst_195 : f32 to vector<1x1xf32>
      %505 = arith.mulf %504, %430 : vector<1x1xf32>
      %506 = arith.addf %394, %505 : vector<1x1xf32>
      %cst_196 = arith.constant 2.000000e+00 : f32
      %507 = vector.broadcast %cst_196 : f32 to vector<1x1xf32>
      %508 = arith.mulf %507, %466 : vector<1x1xf32>
      %509 = arith.addf %506, %508 : vector<1x1xf32>
      %510 = arith.addf %509, %502 : vector<1x1xf32>
      %511 = vector.broadcast %503 : f32 to vector<1x1xf32>
      %512 = arith.mulf %511, %510 : vector<1x1xf32>
      %513 = arith.addf %361, %512 : vector<1x1xf32>
      %c3_i32 = arith.constant 3 : i32
      %514 = vector.broadcast %513 : vector<1x1xf32> to vector<1x128xf32>
      %515 = arith.mulf %514, %34 : vector<1x128xf32>
      %516 = arith.addf %515, %35 : vector<1x128xf32>
      %cst_197 = arith.constant 0.000000e+00 : f32
      %517 = vector.broadcast %cst_197 : f32 to vector<1x128xf32>
      %518 = arith.cmpf ogt, %516, %517 : vector<1x128xf32>
      %519 = math.exp %516 : vector<1x128xf32>
      %cst_198 = arith.constant 1.000000e+00 : f32
      %520 = vector.broadcast %cst_198 : f32 to vector<1x128xf32>
      %521 = arith.subf %519, %520 : vector<1x128xf32>
      %522 = arith.select %518, %516, %521 : vector<1x128xi1>, vector<1x128xf32>
      %523 = arith.truncf %522 : vector<1x128xf32> to vector<1x128xbf16>
      %c0_199 = arith.constant 0 : index
      %c0_200 = arith.constant 0 : index
      %524 = vector.load %arg5[%c0_199, %c0_200] : memref<128x512xbf16, #tpu.memory_space<vmem>>, vector<128x512xbf16>
      %cst_201 = arith.constant dense<0.000000e+00> : vector<1x512xf32>
      %525 = tpu.matmul %523, %524, %cst_201 {dimension_numbers = #tpu.dot_dimension_numbers<[1], [0], [0], [1], [0, 0, 1, 1], [], []>} : vector<1x128xbf16>, vector<128x512xbf16>, vector<1x512xf32> -> vector<1x512xf32>
      %526 = arith.addf %525, %36 : vector<1x512xf32>
      %cst_202 = arith.constant 0.000000e+00 : f32
      %527 = vector.broadcast %cst_202 : f32 to vector<1x512xf32>
      %528 = arith.cmpf ogt, %526, %527 : vector<1x512xf32>
      %529 = math.exp %526 : vector<1x512xf32>
      %cst_203 = arith.constant 1.000000e+00 : f32
      %530 = vector.broadcast %cst_203 : f32 to vector<1x512xf32>
      %531 = arith.subf %529, %530 : vector<1x512xf32>
      %532 = arith.select %528, %526, %531 : vector<1x512xi1>, vector<1x512xf32>
      %533 = arith.truncf %532 : vector<1x512xf32> to vector<1x512xbf16>
      %c0_204 = arith.constant 0 : index
      %c0_205 = arith.constant 0 : index
      %534 = vector.load %arg6[%c0_204, %c0_205] : memref<512x128xbf16, #tpu.memory_space<vmem>>, vector<512x128xbf16>
      %cst_206 = arith.constant dense<0.000000e+00> : vector<1x128xf32>
      %535 = tpu.matmul %533, %534, %cst_206 {dimension_numbers = #tpu.dot_dimension_numbers<[1], [0], [0], [1], [0, 0, 1, 1], [], []>} : vector<1x512xbf16>, vector<512x128xbf16>, vector<1x128xf32> -> vector<1x128xf32>
      %536 = arith.addf %535, %37 : vector<1x128xf32>
      %cst_207 = arith.constant 0.000000e+00 : f32
      %537 = vector.broadcast %cst_207 : f32 to vector<1x128xf32>
      %538 = arith.cmpf ogt, %536, %537 : vector<1x128xf32>
      %539 = math.exp %536 : vector<1x128xf32>
      %cst_208 = arith.constant 1.000000e+00 : f32
      %540 = vector.broadcast %cst_208 : f32 to vector<1x128xf32>
      %541 = arith.subf %539, %540 : vector<1x128xf32>
      %542 = arith.select %538, %536, %541 : vector<1x128xi1>, vector<1x128xf32>
      %543 = arith.mulf %542, %38 : vector<1x128xf32>
      %cst_209 = arith.constant dense<0.000000e+00> : vector<1xf32>
      %544 = vector.multi_reduction <add>, %543, %cst_209 [1] : vector<1x128xf32> to vector<1xf32>
      %545 = vector.shape_cast %544 : vector<1xf32> to vector<1x1xf32>
      %546 = arith.addf %545, %39 : vector<1x1xf32>
      %547 = vector.broadcast %57 : f32 to vector<1x1xf32>
      %548 = arith.mulf %547, %546 : vector<1x1xf32>
      %549 = arith.addf %513, %548 : vector<1x1xf32>
      %550 = vector.broadcast %549 : vector<1x1xf32> to vector<1x128xf32>
      %551 = arith.mulf %550, %34 : vector<1x128xf32>
      %552 = arith.addf %551, %35 : vector<1x128xf32>
      %cst_210 = arith.constant 0.000000e+00 : f32
      %553 = vector.broadcast %cst_210 : f32 to vector<1x128xf32>
      %554 = arith.cmpf ogt, %552, %553 : vector<1x128xf32>
      %555 = math.exp %552 : vector<1x128xf32>
      %cst_211 = arith.constant 1.000000e+00 : f32
      %556 = vector.broadcast %cst_211 : f32 to vector<1x128xf32>
      %557 = arith.subf %555, %556 : vector<1x128xf32>
      %558 = arith.select %554, %552, %557 : vector<1x128xi1>, vector<1x128xf32>
      %559 = arith.truncf %558 : vector<1x128xf32> to vector<1x128xbf16>
      %c0_212 = arith.constant 0 : index
      %c0_213 = arith.constant 0 : index
      %560 = vector.load %arg5[%c0_212, %c0_213] : memref<128x512xbf16, #tpu.memory_space<vmem>>, vector<128x512xbf16>
      %cst_214 = arith.constant dense<0.000000e+00> : vector<1x512xf32>
      %561 = tpu.matmul %559, %560, %cst_214 {dimension_numbers = #tpu.dot_dimension_numbers<[1], [0], [0], [1], [0, 0, 1, 1], [], []>} : vector<1x128xbf16>, vector<128x512xbf16>, vector<1x512xf32> -> vector<1x512xf32>
      %562 = arith.addf %561, %36 : vector<1x512xf32>
      %cst_215 = arith.constant 0.000000e+00 : f32
      %563 = vector.broadcast %cst_215 : f32 to vector<1x512xf32>
      %564 = arith.cmpf ogt, %562, %563 : vector<1x512xf32>
      %565 = math.exp %562 : vector<1x512xf32>
      %cst_216 = arith.constant 1.000000e+00 : f32
      %566 = vector.broadcast %cst_216 : f32 to vector<1x512xf32>
      %567 = arith.subf %565, %566 : vector<1x512xf32>
      %568 = arith.select %564, %562, %567 : vector<1x512xi1>, vector<1x512xf32>
      %569 = arith.truncf %568 : vector<1x512xf32> to vector<1x512xbf16>
      %c0_217 = arith.constant 0 : index
      %c0_218 = arith.constant 0 : index
      %570 = vector.load %arg6[%c0_217, %c0_218] : memref<512x128xbf16, #tpu.memory_space<vmem>>, vector<512x128xbf16>
      %cst_219 = arith.constant dense<0.000000e+00> : vector<1x128xf32>
      %571 = tpu.matmul %569, %570, %cst_219 {dimension_numbers = #tpu.dot_dimension_numbers<[1], [0], [0], [1], [0, 0, 1, 1], [], []>} : vector<1x512xbf16>, vector<512x128xbf16>, vector<1x128xf32> -> vector<1x128xf32>
      %572 = arith.addf %571, %37 : vector<1x128xf32>
      %cst_220 = arith.constant 0.000000e+00 : f32
      %573 = vector.broadcast %cst_220 : f32 to vector<1x128xf32>
      %574 = arith.cmpf ogt, %572, %573 : vector<1x128xf32>
      %575 = math.exp %572 : vector<1x128xf32>
      %cst_221 = arith.constant 1.000000e+00 : f32
      %576 = vector.broadcast %cst_221 : f32 to vector<1x128xf32>
      %577 = arith.subf %575, %576 : vector<1x128xf32>
      %578 = arith.select %574, %572, %577 : vector<1x128xi1>, vector<1x128xf32>
      %579 = arith.mulf %578, %38 : vector<1x128xf32>
      %cst_222 = arith.constant dense<0.000000e+00> : vector<1xf32>
      %580 = vector.multi_reduction <add>, %579, %cst_222 [1] : vector<1x128xf32> to vector<1xf32>
      %581 = vector.shape_cast %580 : vector<1xf32> to vector<1x1xf32>
      %582 = arith.addf %581, %39 : vector<1x1xf32>
      %583 = vector.broadcast %57 : f32 to vector<1x1xf32>
      %584 = arith.mulf %583, %582 : vector<1x1xf32>
      %585 = arith.addf %513, %584 : vector<1x1xf32>
      %586 = vector.broadcast %585 : vector<1x1xf32> to vector<1x128xf32>
      %587 = arith.mulf %586, %34 : vector<1x128xf32>
      %588 = arith.addf %587, %35 : vector<1x128xf32>
      %cst_223 = arith.constant 0.000000e+00 : f32
      %589 = vector.broadcast %cst_223 : f32 to vector<1x128xf32>
      %590 = arith.cmpf ogt, %588, %589 : vector<1x128xf32>
      %591 = math.exp %588 : vector<1x128xf32>
      %cst_224 = arith.constant 1.000000e+00 : f32
      %592 = vector.broadcast %cst_224 : f32 to vector<1x128xf32>
      %593 = arith.subf %591, %592 : vector<1x128xf32>
      %594 = arith.select %590, %588, %593 : vector<1x128xi1>, vector<1x128xf32>
      %595 = arith.truncf %594 : vector<1x128xf32> to vector<1x128xbf16>
      %c0_225 = arith.constant 0 : index
      %c0_226 = arith.constant 0 : index
      %596 = vector.load %arg5[%c0_225, %c0_226] : memref<128x512xbf16, #tpu.memory_space<vmem>>, vector<128x512xbf16>
      %cst_227 = arith.constant dense<0.000000e+00> : vector<1x512xf32>
      %597 = tpu.matmul %595, %596, %cst_227 {dimension_numbers = #tpu.dot_dimension_numbers<[1], [0], [0], [1], [0, 0, 1, 1], [], []>} : vector<1x128xbf16>, vector<128x512xbf16>, vector<1x512xf32> -> vector<1x512xf32>
      %598 = arith.addf %597, %36 : vector<1x512xf32>
      %cst_228 = arith.constant 0.000000e+00 : f32
      %599 = vector.broadcast %cst_228 : f32 to vector<1x512xf32>
      %600 = arith.cmpf ogt, %598, %599 : vector<1x512xf32>
      %601 = math.exp %598 : vector<1x512xf32>
      %cst_229 = arith.constant 1.000000e+00 : f32
      %602 = vector.broadcast %cst_229 : f32 to vector<1x512xf32>
      %603 = arith.subf %601, %602 : vector<1x512xf32>
      %604 = arith.select %600, %598, %603 : vector<1x512xi1>, vector<1x512xf32>
      %605 = arith.truncf %604 : vector<1x512xf32> to vector<1x512xbf16>
      %c0_230 = arith.constant 0 : index
      %c0_231 = arith.constant 0 : index
      %606 = vector.load %arg6[%c0_230, %c0_231] : memref<512x128xbf16, #tpu.memory_space<vmem>>, vector<512x128xbf16>
      %cst_232 = arith.constant dense<0.000000e+00> : vector<1x128xf32>
      %607 = tpu.matmul %605, %606, %cst_232 {dimension_numbers = #tpu.dot_dimension_numbers<[1], [0], [0], [1], [0, 0, 1, 1], [], []>} : vector<1x512xbf16>, vector<512x128xbf16>, vector<1x128xf32> -> vector<1x128xf32>
      %608 = arith.addf %607, %37 : vector<1x128xf32>
      %cst_233 = arith.constant 0.000000e+00 : f32
      %609 = vector.broadcast %cst_233 : f32 to vector<1x128xf32>
      %610 = arith.cmpf ogt, %608, %609 : vector<1x128xf32>
      %611 = math.exp %608 : vector<1x128xf32>
      %cst_234 = arith.constant 1.000000e+00 : f32
      %612 = vector.broadcast %cst_234 : f32 to vector<1x128xf32>
      %613 = arith.subf %611, %612 : vector<1x128xf32>
      %614 = arith.select %610, %608, %613 : vector<1x128xi1>, vector<1x128xf32>
      %615 = arith.mulf %614, %38 : vector<1x128xf32>
      %cst_235 = arith.constant dense<0.000000e+00> : vector<1xf32>
      %616 = vector.multi_reduction <add>, %615, %cst_235 [1] : vector<1x128xf32> to vector<1xf32>
      %617 = vector.shape_cast %616 : vector<1xf32> to vector<1x1xf32>
      %618 = arith.addf %617, %39 : vector<1x1xf32>
      %619 = vector.broadcast %56 : f32 to vector<1x1xf32>
      %620 = arith.mulf %619, %618 : vector<1x1xf32>
      %621 = arith.addf %513, %620 : vector<1x1xf32>
      %622 = vector.broadcast %621 : vector<1x1xf32> to vector<1x128xf32>
      %623 = arith.mulf %622, %34 : vector<1x128xf32>
      %624 = arith.addf %623, %35 : vector<1x128xf32>
      %cst_236 = arith.constant 0.000000e+00 : f32
      %625 = vector.broadcast %cst_236 : f32 to vector<1x128xf32>
      %626 = arith.cmpf ogt, %624, %625 : vector<1x128xf32>
      %627 = math.exp %624 : vector<1x128xf32>
      %cst_237 = arith.constant 1.000000e+00 : f32
      %628 = vector.broadcast %cst_237 : f32 to vector<1x128xf32>
      %629 = arith.subf %627, %628 : vector<1x128xf32>
      %630 = arith.select %626, %624, %629 : vector<1x128xi1>, vector<1x128xf32>
      %631 = arith.truncf %630 : vector<1x128xf32> to vector<1x128xbf16>
      %c0_238 = arith.constant 0 : index
      %c0_239 = arith.constant 0 : index
      %632 = vector.load %arg5[%c0_238, %c0_239] : memref<128x512xbf16, #tpu.memory_space<vmem>>, vector<128x512xbf16>
      %cst_240 = arith.constant dense<0.000000e+00> : vector<1x512xf32>
      %633 = tpu.matmul %631, %632, %cst_240 {dimension_numbers = #tpu.dot_dimension_numbers<[1], [0], [0], [1], [0, 0, 1, 1], [], []>} : vector<1x128xbf16>, vector<128x512xbf16>, vector<1x512xf32> -> vector<1x512xf32>
      %634 = arith.addf %633, %36 : vector<1x512xf32>
      %cst_241 = arith.constant 0.000000e+00 : f32
      %635 = vector.broadcast %cst_241 : f32 to vector<1x512xf32>
      %636 = arith.cmpf ogt, %634, %635 : vector<1x512xf32>
      %637 = math.exp %634 : vector<1x512xf32>
      %cst_242 = arith.constant 1.000000e+00 : f32
      %638 = vector.broadcast %cst_242 : f32 to vector<1x512xf32>
      %639 = arith.subf %637, %638 : vector<1x512xf32>
      %640 = arith.select %636, %634, %639 : vector<1x512xi1>, vector<1x512xf32>
      %641 = arith.truncf %640 : vector<1x512xf32> to vector<1x512xbf16>
      %c0_243 = arith.constant 0 : index
      %c0_244 = arith.constant 0 : index
      %642 = vector.load %arg6[%c0_243, %c0_244] : memref<512x128xbf16, #tpu.memory_space<vmem>>, vector<512x128xbf16>
      %cst_245 = arith.constant dense<0.000000e+00> : vector<1x128xf32>
      %643 = tpu.matmul %641, %642, %cst_245 {dimension_numbers = #tpu.dot_dimension_numbers<[1], [0], [0], [1], [0, 0, 1, 1], [], []>} : vector<1x512xbf16>, vector<512x128xbf16>, vector<1x128xf32> -> vector<1x128xf32>
      %644 = arith.addf %643, %37 : vector<1x128xf32>
      %cst_246 = arith.constant 0.000000e+00 : f32
      %645 = vector.broadcast %cst_246 : f32 to vector<1x128xf32>
      %646 = arith.cmpf ogt, %644, %645 : vector<1x128xf32>
      %647 = math.exp %644 : vector<1x128xf32>
      %cst_247 = arith.constant 1.000000e+00 : f32
      %648 = vector.broadcast %cst_247 : f32 to vector<1x128xf32>
      %649 = arith.subf %647, %648 : vector<1x128xf32>
      %650 = arith.select %646, %644, %649 : vector<1x128xi1>, vector<1x128xf32>
      %651 = arith.mulf %650, %38 : vector<1x128xf32>
      %cst_248 = arith.constant dense<0.000000e+00> : vector<1xf32>
      %652 = vector.multi_reduction <add>, %651, %cst_248 [1] : vector<1x128xf32> to vector<1xf32>
      %653 = vector.shape_cast %652 : vector<1xf32> to vector<1x1xf32>
      %654 = arith.addf %653, %39 : vector<1x1xf32>
      %cst_249 = arith.constant 0.166666672 : f32
      %655 = arith.mulf %56, %cst_249 : f32
      %cst_250 = arith.constant 2.000000e+00 : f32
      %656 = vector.broadcast %cst_250 : f32 to vector<1x1xf32>
      %657 = arith.mulf %656, %582 : vector<1x1xf32>
      %658 = arith.addf %546, %657 : vector<1x1xf32>
      %cst_251 = arith.constant 2.000000e+00 : f32
      %659 = vector.broadcast %cst_251 : f32 to vector<1x1xf32>
      %660 = arith.mulf %659, %618 : vector<1x1xf32>
      %661 = arith.addf %658, %660 : vector<1x1xf32>
      %662 = arith.addf %661, %654 : vector<1x1xf32>
      %663 = vector.broadcast %655 : f32 to vector<1x1xf32>
      %664 = arith.mulf %663, %662 : vector<1x1xf32>
      %665 = arith.addf %513, %664 : vector<1x1xf32>
      %c1_i32_252 = arith.constant 1 : i32
      %666 = arith.addi %arg8, %c1_i32_252 : i32
      %667 = vector.broadcast %666 : i32 to vector<1x128xi32>
      %668 = arith.cmpi eq, %40, %667 : vector<1x128xi32>
      %669 = vector.shape_cast %665 : vector<1x1xf32> to vector<1x1xf32>
      %670 = vector.broadcast %669 : vector<1x1xf32> to vector<1x128xf32>
      %671 = arith.select %668, %670, %arg10 : vector<1x128xi1>, vector<1x128xf32>
      scf.yield %665, %671 : vector<1x1xf32>, vector<1x128xf32>
    }
    %c7_i32_24 = arith.constant 7 : i32
    %c0_25 = arith.constant 0 : index
    %c0_26 = arith.constant 0 : index
    %49 = vector.load %arg7[%c0_25, %c0_26] : memref<1x128xf32, #tpu.memory_space<vmem>>, vector<1x128xf32>
    tpu.vector_store %arg7[%c0_25, %c0_26], %48#1 {strides = array<i32>} : memref<1x128xf32, #tpu.memory_space<vmem>>, vector<1x128xf32>,
    return
  }
}

</mosaic_0001>

<bundles_post_ra>
// kernel: tpu_custom_call.1
= control target key start
LH: loop header
LB: loop body
LE: loop exit
PB: predicated region body
PF: predicated region fallthrough
CT: control target
= control target key end

     0   :  { %12 = vsyncpa [#allocation5], 0  ;;  %s7776_s0 = inlined_call_operand.vmem [shape: f32[8], index: 0, kind: input, shape index: {}]   ;;  %s7777_s1 = inlined_call_operand.vmem [shape: f32[1,32], index: 1, kind: input, shape index: {}]   ;;  %s7778_s2 = inlined_call_operand.vmem [shape: f32[8,512], index: 2, kind: input, shape index: {}]   ;;  %s7779_s3 = inlined_call_operand.vmem [shape: bf16[32,128], index: 3, kind: input, shape index: {}]   ;;  %s7780_s4 = inlined_call_operand.vmem [shape: bf16[128,64], index: 4, kind: input, shape index: {}]   ;;  %s7781_s5 = inlined_call_operand.hbm [shape: bf16[128,512], index: 5, kind: input, shape index: {}]   ;;  %s7782_s6 = inlined_call_operand.hbm [shape: bf16[512,128], index: 6, kind: input, shape index: {}]   ;;  %s7783_s7 = inlined_call_operand.hbm [shape: f32[1,128], index: 7, kind: output, shape index: {}]  }
   0x1   :  { %13 = vsyncpa [#allocation3], 0 }
   0x2   :  { %14 = vsyncpa [#allocation8], 0 }
   0x3   :  { %15 = vsyncpa [#allocation4], 0  ;;  %s22_s26 = sshll.u32 %s7776_s0, 4  ;;  %s23_s26 = int_to_ptr.vmem [resolvable:$true] %s22_s26 }
   0x4   :  { %s5665_s27 = scalar_lea.vmem %s23_s26, 16  ;;  %p5670_p1 = scmp.lt.s32.totalorder %s23_s26, %s23_s26 }
   0x5   :  { %p5666_p0 = scmp.ne.s32.totalorder %s23_s26, %s5665_s27  ;;  %p5671_p2 = scmp.lt.s32.totalorder %s5665_s27, %s5665_s27 }
   0x7   :  { %p5672_p3 = por %p5671_p2, %p5670_p1 }
   0x9   :  { %p5673_p4 = pnand %p5672_p3, %p5666_p0 }
   0xb   :  { %5676 = shalt.err (!%p5673_p4)
}
   0xc   :  { %s5775_s28 = smov [#allocation2]   ;;  %s5776_s29 = smov [#allocation6]  }
   0xd   :  { %25 = dma.vmem_to_smem %s23_s26, 16, %s5775_s28, [#allocation5]  }
   0xe   :  { %s39_s30 = sshll.u32 %s5776_s29, 4  ;;  %s5677_s10 = scalar_lea.hbm %s7781_s5, 4096  ;;  %s40_s30 = int_to_ptr.vmem [resolvable:$true] %s39_s30 }
   0xf   :  { %p5678_p5 = scmp.ne.s32.totalorder %s7781_s5, %s5677_s10  ;;  %p5681_p6 = scmp.lt.u32.totalorder %s5677_s10, %s7781_s5 }
  0x11   :  { %p5683_p7 = pnand %p5681_p6, %p5678_p5 }
  0x13   :  { %5686 = shalt.err (!%p5683_p7)
}
  0x14   :  { %s5687_s14 = scalar_lea.vmem %s40_s30, 4096  ;;  %p5692_p9 = scmp.lt.s32.totalorder %s40_s30, %s40_s30 }
  0x15   :  { %p5688_p8 = scmp.ne.s32.totalorder %s40_s30, %s5687_s14  ;;  %p5693_p10 = scmp.lt.s32.totalorder %s5687_s14, %s5687_s14 }
  0x17   :  { %p5694_p11 = por %p5693_p10, %p5692_p9 }
  0x19   :  { %p5695_p12 = pnand %p5694_p11, %p5688_p8 }
  0x1b   :  { %5698 = shalt.err (!%p5695_p12)
}
  0x1c   :  { %s5777_s15 = smov 256   ;;  %s5778_s16 = smov 16  }
  0x1d   :  { %45 = dma.hbm_to_vmem [thread:$0]  %s7781_s5, 4096, %s40_s30, [#allocation3], %s5777_s15, %s5777_s15, %s5778_s16  }
  0x1e   :  { %s5779_s19 = smov [#allocation7]   ;;  %s5699_s23 = scalar_lea.hbm %s7782_s6, 4096 }
  0x1f   :  { %s51_s20 = sshll.u32 %s5779_s19, 4  ;;  %p5700_p13 = scmp.ne.s32.totalorder %s7782_s6, %s5699_s23  ;;  %s52_s20 = int_to_ptr.vmem [resolvable:$true] %s51_s20 }
  0x20   :  { %p5703_p0 = scmp.lt.u32.totalorder %s5699_s23, %s7782_s6 }
  0x22   :  { %p5705_p1 = pnand %p5703_p0, %p5700_p13 }
  0x24   :  { %5708 = shalt.err (!%p5705_p1)
}
  0x25   :  { %s5709_s28 = scalar_lea.vmem %s52_s20, 4096  ;;  %p5714_p3 = scmp.lt.s32.totalorder %s52_s20, %s52_s20 }
  0x26   :  { %p5710_p2 = scmp.ne.s32.totalorder %s52_s20, %s5709_s28  ;;  %p5715_p4 = scmp.lt.s32.totalorder %s5709_s28, %s5709_s28 }
  0x28   :  { %p5716_p5 = por %p5715_p4, %p5714_p3 }
  0x2a   :  { %p5717_p6 = pnand %p5716_p5, %p5710_p2 }
  0x2c   :  { %5720 = shalt.err (!%p5717_p6)
}
  0x2d   :  { %s5780_s5 = smov 64   ;;  %s5781_s29 = smov 4  }
  0x2e   :  { %57 = dma.hbm_to_vmem [thread:$0]  %s7782_s6, 4096, %s52_s20, [#allocation8], %s5780_s5, %s5780_s5, %s5781_s29  }
  0x2f   :  { %5755 = dma.done.wait [#allocation5], 16  }
  0x30   :  { %5756 = vsyncadd [#allocation5], 4294967280 }
  0x31   :  { %5757 = dma.done.wait [#allocation3], 4096  }
  0x32   :  { %5758 = vsyncadd [#allocation3], 4294963200 }
  0x33   :  { %5759 = dma.done.wait [#allocation8], 4096  }
  0x34   :  { %5760 = vsyncadd [#allocation8], 4294963200 }
  0x35   :  { %67 = sfence }
  0x36   :  { %v5149_v0 = vld [vmem:[%s7779_s3] sm:$0xff]   ;;  %v5782_v1 = vmov 0.0   ;;  %v5150_v2 = vld [vmem:[%s7779_s3 + $0x8] sm:$0xff]   ;;  %vm5783_vm0 = vmmov 0   ;;  %vm88_vm1 = vcmask 261120   ;;  %v5153_v7 = vld [vmem:[%s7780_s4 + $0x10] sm:$0xff]   ;;  %v7786_v45 = vlaneseq }
  0x37   :  { %5085 = vmatprep.subr.bf16.mxu0 %v5782_v1  ;;  %5093 = vmatprep.subr.bf16.mxu1 %v5782_v1  ;;  %v69_v3 = vld [vmem:[%s7777_s1] sm:$0x1]  ;;  %v5152_v5 = vld [vmem:[%s7780_s4 + $0x8] sm:$0xff]   ;;  %v5154_v8 = vld [vmem:[%s7780_s4 + $0x18] sm:$0xff]   ;;  %s5784_s29 = smov 96   ;;  %vm253_vm4 = vcmask 253952  }
  0x38   :  { %5086 = vmatpush3.bf16.msra.mxu0 %v5149_v0  ;;  %5089 = vmatprep.mubr.msk.bf16.mxu0 %vm5783_vm0, %v5782_v1  ;;  %v5151_v4 = vld [vmem:[%s7780_s4] sm:$0xff]   ;;  %v70_v6 = vpack.c.bf16 %v69_v3, %v69_v3  ;;  %v5156_v10 = vld [vmem:[%s7780_s4 + $0x28] sm:$0xff]   ;;  %v5157_v11 = vld [vmem:[%s7780_s4 + $0x30] sm:$0xff]   ;;  %v5924_v46 = vand.u32 127, %v7786_v45 }
  0x39   :  { %5087 = vmatprep.subr.bf16.mxu0 %v5782_v1  ;;  %5109 = vmatprep.mubr.msk.bf16.mxu1 %vm5783_vm0, %v5782_v1  ;;  %v5155_v9 = vld [vmem:[%s7780_s4 + $0x20] sm:$0xff]   ;;  %v5158_v12 = vld [vmem:[%s7780_s4 + $0x38] sm:$0xff]   ;;  %v5921_v42 = vld [vmem:[%s7778_s2 + $0xe] ss:$0 sm:$0xff] }
  0x3a   :  { %5094 = vmatpush3.bf16.msra.mxu1 %v5151_v4  ;;  %v71_v13 = vld [vmem:[%s7778_s2] ss:$0 sm:$0xff]  ;;  %v137_v24 = vld [vmem:[%s7778_s2 + $0x1] ss:$0 sm:$0xff]  ;;  %v5896_v37 = vld [vmem:[%s7778_s2 + $0x2] ss:$0 sm:$0xff] }
  0x3b   :  { %5095 = vmatprep.subr.bf16.mxu1 %v5782_v1  ;;  %v5901_v38 = vld [vmem:[%s7778_s2 + $0x3] ss:$0 sm:$0xff]  ;;  %v5906_v39 = vld [vmem:[%s7778_s2 + $0x5] ss:$0 sm:$0xff]  ;;  %v5916_v41 = vld [vmem:[%s7778_s2 + $0x6] ss:$0 sm:$0xff] }
  0x3c   :  { %5088 = vmatpush3.bf16.msra.mxu0 %v5150_v2  ;;  %v5911_v40 = vld [vmem:[%s7778_s2 + $0x4] ss:$8 sm:$0xf]  ;;  %8216 = vst [vmem:[#allocation15_spill] sm:$0xff] %v5924_v46  ;;  %vm271_vm5 = vcmp.eq.s32.totalorder %v5924_v46, 0  ;;  %s5931_s2 = smov 0  }
  0x3d   :  { %8215 = vst [vmem:[#allocation14_spill] sm:$0xff] %v5911_v40 }
  0x3e   :  { %5096 = vmatpush3.bf16.msra.mxu1 %v5152_v5 }
  0x3f   :  { %5090 = vmatmul.mubr.msk.bf16.vlgmr.msra.gmra.mrb[0].mxu0 %vm88_vm1, %v70_v6  ;;  %5097 = vmatprep.subr.bf16.mxu1 %v5782_v1 }
  0x42   :  { %5098 = vmatpush3.bf16.msra.mxu1 %v5153_v7 }
  0x43   :  { %5099 = vmatprep.subr.bf16.mxu1 %v5782_v1 }
  0x46   :  { %5100 = vmatpush3.bf16.msra.mxu1 %v5154_v8 }
  0x47   :  { %5101 = vmatprep.subr.bf16.mxu1 %v5782_v1 }
  0x4a   :  { %5102 = vmatpush3.bf16.msra.mxu1 %v5155_v9 }
  0x4b   :  { %5103 = vmatprep.subr.bf16.mxu1 %v5782_v1 }
  0x4e   :  { %5104 = vmatpush3.bf16.msra.mxu1 %v5156_v10 }
  0x4f   :  { %5105 = vmatprep.subr.bf16.mxu1 %v5782_v1 }
  0x52   :  { %5106 = vmatpush3.bf16.msra.mxu1 %v5157_v11 }
  0x53   :  { %5107 = vmatprep.subr.bf16.mxu1 %v5782_v1 }
  0x56   :  { %5108 = vmatpush3.bf16.msra.mxu1 %v5158_v12 }
 0x112   :  { %v126_v14 = vpop.f32.mrb[0].mxu0 }
 0x113   :  { %v127_v15 = vadd.f32 %v126_v14, %v71_v13  ;;  %v5091_v16 = vpop.f32.mrb[1].mxu0 }
 0x114   :  { %v129_v17 = vpop.f32.mrb[2].mxu0 }
 0x115   :  { %v133_v18 = vmul.f32 1.442695, %v127_v15  ;;  %v5092_v19 = vpop.f32.mrb[3].mxu0  ;;  %vm132_vm2 = vcmp.gt.f32.partialorder %v127_v15, 0.0 }
 0x117   :  { %5159 = vpow2.f32 %v133_v18 }
 0x121   :  { %v5160_v20 = vpop.eup %5159 }
 0x122   :  { %v4197_v21 = vadd.f32 -1.0, %v5160_v20 }
 0x124   :  { %v136_v22 = vsel %vm132_vm2, %v127_v15, %v4197_v21 }
 0x125   :  { %v138_v23 = vpack.c.bf16 %v136_v22, %v136_v22 }
 0x127   :  { %5110 = vmatmul.mubr.bf16.vlgmr.msra.gmra.mrb[0].mxu1 %v138_v23 }
 0x1fa   :  { %v237_v25 = vpop.f32.mrb[0].mxu1 }
 0x1fb   :  { %v238_v26 = vadd.f32 %v237_v25, %v137_v24  ;;  %v5111_v27 = vpop.f32.mrb[1].mxu1 }
 0x1fc   :  { %v240_v28 = vpop.f32.mrb[2].mxu1 }
 0x1fd   :  { %v244_v29 = vmul.f32 1.442695, %v238_v26  ;;  %v5112_v30 = vpop.f32.mrb[3].mxu1  ;;  %vm243_vm3 = vcmp.gt.f32.partialorder %v238_v26, 0.0 }
 0x1ff   :  { %5161 = vpow2.f32 %v244_v29 }
 0x209   :  { %v5162_v31 = vpop.eup %5161 }
 0x20a   :  { %v4206_v32 = vadd.f32 -1.0, %v5162_v31 }
 0x20c   :  { %v247_v33 = vsel %vm243_vm3, %v238_v26, %v4206_v32 }
 0x20d   :  { %249 = vrot.lane.b32.xlu0 %v247_v33, %s5784_s29 }
 0x27f   :  { %v250_v34 = vpop.permute.xlu0 %249 }
 0x280   :  { %v252_v35 = vmul.f32 %v250_v34, %v247_v33 }
 0x282   :  { %v254_v36 = vsel %vm253_vm4, %v252_v35, 0.0 }
 0x283   :  { %255 = vadd.xlane.f32.xlu0 %v254_v36 }
 0x310   :  { %v256_v43 = vpop.xlane.xlu0 %255 }
 0x311   :  { %v258_v44 = vmul.f32 1.442695, %v256_v43  ;;  %vm257_vm6 = vcmp.gt.f32.partialorder %v256_v43, 0.0 }
 0x313   :  { %5163 = vpow2.f32 %v258_v44 }
 0x31d   :  { %v5164_v47 = vpop.eup %5163 }
 0x31e   :  { %v4207_v48 = vadd.f32 -1.0, %v5164_v47 }
 0x320   :  { %v261_v49 = vsel %vm257_vm6, %v256_v43, %v4207_v48  }
 0x321   :  { %v272_v50 = vsel %vm271_vm5, %v261_v49, 0.0  }
 0x322 LB: > { %v8217_v40 = vld [vmem:[#allocation14_spill] sm:$0xff]  ;;  %8218 = vst [vmem:[#allocation16_spill] sm:$0xff] %v5765_v50  ;;  %v7784_v52 = vmov 0   ;;  %v5945_v53 = vld [vmem:[#allocation6 + $0xc] ss:$16 sps:$4 sm:$0xff]   ;;  %v6067_v36 = vld [vmem:[#allocation7 + $0x50] sm:$0xff]   ;;  %v5765_v50 = vphi %v272_v50, %v8780_v50   ;;  %s5773_s2 = sphi %s5931_s2, %s8781_s2   ;;  %v5769_v49 = vphi %v261_v49, %v4156_v49  }
 0x323   : > { %v5942_v51 = vld [vmem:[#allocation6 + $0x4] ss:$16 sps:$4 sm:$0xff]   ;;  %5165 = vset.pattern.permute.xlu0 %v7784_v52  ;;  %8220 = vst [vmem:[#allocation18_spill] sm:$0xff] %v5945_v53  ;;  %545 = vmatprep.mubr.bf16.mxu0 %v7784_v52  ;;  %v5950_v54 = vld [vmem:[#allocation6] ss:$16 sps:$4 sm:$0xff]   ;;  %v6055_v32 = vld [vmem:[#allocation7 + $0x48] sm:$0xff]  }
 0x324   : > { %8219 = vst [vmem:[#allocation17_spill] sm:$0xff] %v5942_v51  ;;  %289 = vperm.xlu0 %5165, %v5769_v49   ;;  %513 = vmatprep.subr.bf16.mxu0 %v5942_v51  ;;  %v5952_v55 = vld [vmem:[#allocation6 + $0x8] ss:$16 sps:$4 sm:$0xff]   ;;  %v5955_v56 = vld [vmem:[#allocation6 + $0x24] ss:$16 sps:$4 sm:$0xff]   ;;  %8224 = vst [vmem:[#allocation22_spill] sm:$0xff] %v6067_v36 }
 0x325   : > { %554 = vmatprep.subr.bf16.mxu1 %v5945_v53  ;;  %586 = vmatprep.mubr.bf16.mxu1 %v7784_v52  ;;  %v5960_v57 = vld [vmem:[#allocation6 + $0x2c] ss:$16 sps:$4 sm:$0xff]   ;;  %v5962_v58 = vld [vmem:[#allocation6 + $0x20] ss:$16 sps:$4 sm:$0xff]   ;;  %v5965_v59 = vld [vmem:[#allocation6 + $0x28] ss:$16 sps:$4 sm:$0xff]  }
 0x326   : > { %514 = vmatpush1.bf16.msra.mxu0 %v5950_v54  ;;  %555 = vmatpush1.bf16.msra.mxu1 %v5952_v55  ;;  %v5969_v60 = vld [vmem:[#allocation6 + $0x44] ss:$16 sps:$4 sm:$0xff]   ;;  %v5971_v61 = vld [vmem:[#allocation6 + $0x4c] ss:$16 sps:$4 sm:$0xff]   ;;  %v5973_v62 = vld [vmem:[#allocation6 + $0x40] ss:$16 sps:$4 sm:$0xff]  }
 0x327   : > { %515 = vmatprep.subr.bf16.mxu0 %v5955_v56  ;;  %5166 = vset.pattern.permute.xlu1 %v7784_v52  ;;  %v5975_v63 = vld [vmem:[#allocation6 + $0x48] ss:$16 sps:$4 sm:$0xff]   ;;  %v5979_v0 = vld [vmem:[#allocation6 + $0x64] ss:$16 sps:$4 sm:$0xff]   ;;  %v5983_v1 = vld [vmem:[#allocation6 + $0x6c] ss:$16 sps:$4 sm:$0xff]  }
 0x328   : > { %556 = vmatprep.subr.bf16.mxu1 %v5960_v57  ;;  %v5985_v2 = vld [vmem:[#allocation6 + $0x60] ss:$16 sps:$4 sm:$0xff]   ;;  %v5989_v3 = vld [vmem:[#allocation6 + $0x68] ss:$16 sps:$4 sm:$0xff]   ;;  %v5991_v4 = vld [vmem:[#allocation6 + $0x84] ss:$16 sps:$4 sm:$0xff]  }
 0x329   : > { %v5995_v5 = vld [vmem:[#allocation6 + $0x8c] ss:$16 sps:$4 sm:$0xff]   ;;  %v5997_v6 = vld [vmem:[#allocation6 + $0x80] ss:$16 sps:$4 sm:$0xff]   ;;  %v5999_v7 = vld [vmem:[#allocation6 + $0x88] ss:$16 sps:$4 sm:$0xff]  }
 0x32a   : > { %516 = vmatpush1.bf16.msra.mxu0 %v5962_v58  ;;  %557 = vmatpush1.bf16.msra.mxu1 %v5965_v59  ;;  %v6003_v8 = vld [vmem:[#allocation6 + $0xa4] ss:$16 sps:$4 sm:$0xff]   ;;  %v6007_v9 = vld [vmem:[#allocation6 + $0xac] ss:$16 sps:$4 sm:$0xff]   ;;  %v6009_v10 = vld [vmem:[#allocation6 + $0xa0] ss:$16 sps:$4 sm:$0xff]  }
 0x32b   : > { %517 = vmatprep.subr.bf16.mxu0 %v5969_v60  ;;  %558 = vmatprep.subr.bf16.mxu1 %v5971_v61  ;;  %v6013_v11 = vld [vmem:[#allocation6 + $0xa8] ss:$16 sps:$4 sm:$0xff]   ;;  %v6015_v12 = vld [vmem:[#allocation6 + $0xc4] ss:$16 sps:$4 sm:$0xff]   ;;  %v6019_v13 = vld [vmem:[#allocation6 + $0xcc] ss:$16 sps:$4 sm:$0xff]  }
 0x32c   : > { %v6023_v14 = vld [vmem:[#allocation6 + $0xc0] ss:$16 sps:$4 sm:$0xff]   ;;  %v6025_v15 = vld [vmem:[#allocation6 + $0xc8] ss:$16 sps:$4 sm:$0xff]   ;;  %v6027_v16 = vld [vmem:[#allocation6 + $0xe4] ss:$16 sps:$4 sm:$0xff]  }
 0x32d   : > { %v6031_v17 = vld [vmem:[#allocation6 + $0xec] ss:$16 sps:$4 sm:$0xff]   ;;  %v6033_v18 = vld [vmem:[#allocation6 + $0xe0] ss:$16 sps:$4 sm:$0xff]   ;;  %v6035_v19 = vld [vmem:[#allocation6 + $0xe8] ss:$16 sps:$4 sm:$0xff]  }
 0x32e   : > { %518 = vmatpush1.bf16.msra.mxu0 %v5973_v62  ;;  %559 = vmatpush1.bf16.msra.mxu1 %v5975_v63  ;;  %v6039_v20 = vld [vmem:[#allocation7 + $0x40] sm:$0xff]   ;;  %v6057_v33 = vld [vmem:[#allocation7 + $0xc8] sm:$0xff]   ;;  %v6069_v43 = vld [vmem:[#allocation7 + $0xd0] sm:$0xff]   ;;  %vm961_vm13 = vcmask 1040384   ;;  %s6198_s3 = sadd.s32 1, %s5773_s2   ;;  %s283_s1 = sld [smem:[#allocation2 + %s5773_s2]] }
 0x32f   : > { %519 = vmatprep.subr.bf16.mxu0 %v5979_v0  ;;  %560 = vmatprep.subr.bf16.mxu1 %v5983_v1  ;;  %v6043_v21 = vld [vmem:[#allocation7 + $0xc0] sm:$0xff]   ;;  %8221 = vst [vmem:[#allocation19_spill] sm:$0xff] %v6057_v33  ;;  %v6061_v34 = vld [vmem:[#allocation7 + $0x8] sm:$0xff]   ;;  %8225 = vst [vmem:[#allocation23_spill] sm:$0xff] %v6069_v43  ;;  %s282_s17 = sld [smem:[#allocation2 + %s6198_s3]]  ;;  %p275_p7 = scmp.ge.s32.totalorder %s6198_s3, 7  }
 0x330   : > { %v6051_v29 = vld [vmem:[#allocation7] sm:$0xff]   ;;  %8222 = vst [vmem:[#allocation20_spill] sm:$0xff] %v6061_v34  ;;  %v6063_v35 = vld [vmem:[#allocation7 + $0x88] sm:$0xff]   ;;  %v6075_v44 = vld [vmem:[#allocation7 + $0x10] sm:$0xff]   ;;  %s8781_s2 = smov %s6198_s3  ;;  %s5786_s22 = smov (%p275_p7), [#allocation9]  }
 0x331   : > { %v6053_v30 = vld [vmem:[#allocation7 + $0x80] sm:$0xff]   ;;  %8223 = vst [vmem:[#allocation21_spill] sm:$0xff] %v6063_v35  ;;  %8226 = vst [vmem:[#allocation24_spill] sm:$0xff] %v6075_v44  ;;  %v6077_v47 = vld [vmem:[#allocation7 + $0x90] sm:$0xff]   ;;  %s4172_s23 = sshll.u32 (%p275_p7), %s5786_s22, 4  ;;  %s4173_s23 = int_to_ptr.vmem [resolvable:$true] %s4172_s23 }
 0x332   : > { %520 = vmatpush1.bf16.msra.mxu0 %v5985_v2  ;;  %561 = vmatpush1.bf16.msra.mxu1 %v5989_v3  ;;  %8227 = vst [vmem:[#allocation25_spill] sm:$0xff] %v6077_v47  ;;  %v6081_v48 = vld [vmem:[#allocation7 + $0x58] sm:$0xff]   ;;  %v6107_v52 = vld [vmem:[#allocation7 + $0xe8] sm:$0xff]   ;;  %v6117_v46 = vld [vmem:[#allocation7 + $0x70] sm:$0xff]   ;;  %s5721_s24 = scalar_lea.vmem (%p275_p7), %s4173_s23, 16  ;;  %s5725_s25 = scalar_lea.vmem (%p275_p7), %s4173_s23, 32 }
 0x333   : > { %521 = vmatprep.subr.bf16.mxu0 %v5991_v4  ;;  %562 = vmatprep.subr.bf16.mxu1 %v5995_v5  ;;  %8228 = vst [vmem:[#allocation26_spill] sm:$0xff] %v6081_v48  ;;  %8237 = vst [vmem:[#allocation35_spill] sm:$0xff] %v6107_v52  ;;  %v6109_v45 = vld [vmem:[#allocation7 + $0x28] sm:$0xff]   ;;  %p5722_p8 = scmp.ne.s32.totalorder (%p275_p7), %s4173_s23, %s5721_s24  ;;  %p5726_p9 = scmp.lt.s32.totalorder (%p275_p7), %s4173_s23, %s4173_s23 }
 0x334   : > { %8238 = vst [vmem:[#allocation36_spill] sm:$0xff] %v6109_v45  ;;  %v6111_v50 = vld [vmem:[#allocation7 + $0xa8] sm:$0xff]   ;;  %8240 = vst [vmem:[#allocation38_spill] sm:$0xff] %v6117_v46  ;;  %p5727_p10 = scmp.lt.s32.totalorder (%p275_p7), %s5725_s25, %s5721_s24 }
 0x335   : > { %8239 = vst [vmem:[#allocation37_spill] sm:$0xff] %v6111_v50  ;;  %s284_s18 = ssub.f32 %s282_s17, %s283_s1 }
 0x336   : > { %522 = vmatpush1.bf16.msra.mxu0 %v5997_v6  ;;  %563 = vmatpush1.bf16.msra.mxu1 %v5999_v7  ;;  %p5728_p11 = por (%p275_p7), %p5727_p10, %p5726_p9 }
 0x337   : > { %523 = vmatprep.subr.bf16.mxu0 %v6003_v8  ;;  %564 = vmatprep.subr.bf16.mxu1 %v6007_v9  ;;  %s6202_s19 = smul.f32 0.25, %s284_s18 }
 0x338   :  { %p5729_p12 = pnand (%p275_p7), %p5728_p11, %p5722_p8 }
 0x339   : > { %s286_s20 = smul.f32 0.5, %s6202_s19 }
 0x33a   : > { %524 = vmatpush1.bf16.msra.mxu0 %v6009_v10  ;;  %565 = vmatpush1.bf16.msra.mxu1 %v6013_v11  ;;  %s1601_s21 = smul.f32 0.16666667, %s6202_s19 }
 0x33b   : > { %525 = vmatprep.subr.bf16.mxu0 %v6015_v12  ;;  %566 = vmatprep.subr.bf16.mxu1 %v6019_v13 }
 0x33e   : > { %526 = vmatpush1.bf16.msra.mxu0 %v6023_v14  ;;  %567 = vmatpush1.bf16.msra.mxu1 %v6025_v15 }
 0x33f   : > { %527 = vmatprep.subr.bf16.mxu0 %v6027_v16  ;;  %568 = vmatprep.subr.bf16.mxu1 %v6031_v17 }
 0x342   : > { %528 = vmatpush1.bf16.msra.mxu0 %v6033_v18  ;;  %569 = vmatpush1.bf16.msra.mxu1 %v6035_v19 }
 0x343   : > { %4381 = vmatprep.subr.bf16.mxu0 %v6039_v20  ;;  %4403 = vmatprep.subr.bf16.mxu1 %v6043_v21 }
 0x3a3   : > { %v290_v22 = vpop.permute.xlu0 %289 }
 0x3a4   : > { %v292_v23 = vmul.f32 %v290_v22, %v5896_v37  ;;  %v6083_v22 = vld [vmem:[#allocation7 + $0xd8] sm:$0xff]  }
 0x3a5   : > { %8229 = vst [vmem:[#allocation27_spill] sm:$0xff] %v6083_v22 }
 0x3a6   : > { %v293_v24 = vadd.f32 %v292_v23, %v5901_v38  ;;  %v6085_v23 = vld [vmem:[#allocation7 + $0x18] sm:$0xff]  }
 0x3a7   : > { %8230 = vst [vmem:[#allocation28_spill] sm:$0xff] %v6085_v23 }
 0x3a8   : > { %v295_v25 = vmul.f32 1.442695, %v293_v24  ;;  %vm294_vm7 = vcmp.gt.f32.partialorder %v293_v24, 0.0 }
 0x3aa   : > { %5247 = vpow2.f32 %v295_v25  ;;  %v6093_v25 = vld [vmem:[#allocation7 + $0x60] sm:$0xff]  }
 0x3ab   : > { %8232 = vst [vmem:[#allocation30_spill] sm:$0xff] %v6093_v25 }
 0x3b4   : > { %v5248_v26 = vpop.eup %5247 }
 0x3b5   : > { %v4209_v27 = vadd.f32 -1.0, %v5248_v26  ;;  %v6095_v26 = vld [vmem:[#allocation7 + $0xe0] sm:$0xff]  }
 0x3b6   : > { %8233 = vst [vmem:[#allocation31_spill] sm:$0xff] %v6095_v26 }
 0x3b7   : > { %v298_v28 = vsel %vm294_vm7, %v293_v24, %v4209_v27  ;;  %v6087_v24 = vld [vmem:[#allocation7 + $0x98] sm:$0xff]   ;;  %v6097_v27 = vld [vmem:[#allocation7 + $0x20] sm:$0xff]  }
 0x3b8   : > { %v299_v31 = vpack.c.bf16 %v298_v28, %v298_v28  ;;  %8231 = vst [vmem:[#allocation29_spill] sm:$0xff] %v6087_v24  ;;  %8234 = vst [vmem:[#allocation32_spill] sm:$0xff] %v6097_v27  ;;  %v6099_v28 = vld [vmem:[#allocation7 + $0xa0] sm:$0xff]  }
 0x3b9   : > { %8235 = vst [vmem:[#allocation33_spill] sm:$0xff] %v6099_v28 }
 0x3ba   : > { %546 = vmatmul.mubr.bf16.vlgmr.msra.gmra.mrb[0].mxu0 %v299_v31  ;;  %587 = vmatmul.mubr.bf16.vlgmr.msra.gmra.mrb[0].mxu1 %v299_v31  ;;  %v6105_v31 = vld [vmem:[#allocation7 + $0x68] sm:$0xff]  }
 0x3bb   : > { %4382 = vmatpush3.bf16.msra.mxu0 %v6051_v29  ;;  %4404 = vmatpush3.bf16.msra.mxu1 %v6053_v30  ;;  %8236 = vst [vmem:[#allocation34_spill] sm:$0xff] %v6105_v31 }
 0x3bc   : > { %4383 = vmatprep.subr.bf16.mxu0 %v6055_v32  ;;  %4405 = vmatprep.subr.bf16.mxu1 %v6057_v33 }
 0x3bf   : > { %4384 = vmatpush3.bf16.msra.mxu0 %v6061_v34  ;;  %4406 = vmatpush3.bf16.msra.mxu1 %v6063_v35 }
 0x3c0   : > { %4385 = vmatprep.subr.bf16.mxu0 %v6067_v36  ;;  %4407 = vmatprep.subr.bf16.mxu1 %v6069_v43 }
 0x3c3   : > { %4386 = vmatpush3.bf16.msra.mxu0 %v6075_v44  ;;  %4408 = vmatpush3.bf16.msra.mxu1 %v6077_v47 }
 0x3c4   : > { %4387 = vmatprep.subr.bf16.mxu0 %v6081_v48  ;;  %4409 = vmatprep.subr.bf16.mxu1 %v6083_v22 }
 0x3c7   : > { %4388 = vmatpush3.bf16.msra.mxu0 %v6085_v23  ;;  %4410 = vmatpush3.bf16.msra.mxu1 %v6087_v24 }
 0x3c8   : > { %4389 = vmatprep.subr.bf16.mxu0 %v6093_v25  ;;  %4411 = vmatprep.subr.bf16.mxu1 %v6095_v26  ;;  %v6123_v26 = vld [vmem:[#allocation7 + $0xb0] sm:$0xff]  }
 0x3c9   : > { %8243 = vst [vmem:[#allocation41_spill] sm:$0xff] %v6123_v26 }
 0x3cb   : > { %4390 = vmatpush3.bf16.msra.mxu0 %v6097_v27  ;;  %4412 = vmatpush3.bf16.msra.mxu1 %v6099_v28  ;;  %v6119_v27 = vld [vmem:[#allocation7 + $0xf0] sm:$0xff]  }
 0x3cc   : > { %4391 = vmatprep.subr.bf16.mxu0 %v6105_v31  ;;  %4413 = vmatprep.subr.bf16.mxu1 %v6107_v52  ;;  %8241 = vst [vmem:[#allocation39_spill] sm:$0xff] %v6119_v27  ;;  %v6121_v28 = vld [vmem:[#allocation7 + $0x30] sm:$0xff]   ;;  %v6129_v52 = vld [vmem:[#allocation7 + $0x78] sm:$0xff]  }
 0x3cd   : > { %8242 = vst [vmem:[#allocation40_spill] sm:$0xff] %v6121_v28  ;;  %8244 = vst [vmem:[#allocation42_spill] sm:$0xff] %v6129_v52  ;;  %v6135_v31 = vld [vmem:[#allocation7 + $0xb8] sm:$0xff]  }
 0x3ce   : > { %8247 = vst [vmem:[#allocation45_spill] sm:$0xff] %v6135_v31 }
 0x3cf   : > { %4392 = vmatpush3.bf16.msra.mxu0 %v6109_v45  ;;  %4414 = vmatpush3.bf16.msra.mxu1 %v6111_v50  ;;  %v6131_v45 = vld [vmem:[#allocation7 + $0xf8] sm:$0xff]  }
 0x3d0   : > { %4393 = vmatprep.subr.bf16.mxu0 %v6117_v46  ;;  %4415 = vmatprep.subr.bf16.mxu1 %v6119_v27  ;;  %8245 = vst [vmem:[#allocation43_spill] sm:$0xff] %v6131_v45  ;;  %v6133_v50 = vld [vmem:[#allocation7 + $0x38] sm:$0xff]  }
 0x3d1   : > { %8246 = vst [vmem:[#allocation44_spill] sm:$0xff] %v6133_v50 }
 0x3d3   : > { %4394 = vmatpush3.bf16.msra.mxu0 %v6121_v28  ;;  %4416 = vmatpush3.bf16.msra.mxu1 %v6123_v26  ;;  %v8248_v26 = vlaneseq }
 0x3d4   : > { %4395 = vmatprep.subr.bf16.mxu0 %v6129_v52  ;;  %4417 = vmatprep.subr.bf16.mxu1 %v6131_v45 }
 0x3d5   : > { %v494_v28 = vshrl.u32 %v8248_v26, 7 }
 0x3d7   : > { %4396 = vmatpush3.bf16.msra.mxu0 %v6133_v50  ;;  %4418 = vmatpush3.bf16.msra.mxu1 %v6135_v31  ;;  %v495_v27 = vsub.s32 0, %v494_v28  ;;  %v503_v46 = vsub.s32 2, %v494_v28  ;;  %v499_v25 = vsub.s32 1, %v494_v28  ;;  %v507_v24 = vsub.s32 3, %v494_v28 }
 0x3d8   : > { %982 = vmatprep.subr.bf16.mxu0 %v5942_v51  ;;  %1023 = vmatprep.subr.bf16.mxu1 %v5945_v53 }
 0x3d9   : > { %v6145_v23 = vrot.slane %v8217_v40, %v495_v27  ;;  %v6148_v52 = vrot.slane %v8217_v40, %v503_v46  ;;  %v6151_v50 = vrot.slane %v8217_v40, %v499_v25  ;;  %v6154_v31 = vrot.slane %v8217_v40, %v507_v24 }
 0x3db   : > { %8249 = vst [vmem:[#allocation46_spill] sm:$0xff] %v6145_v23  ;;  %8250 = vst [vmem:[#allocation47_spill] sm:$0xff] %v6148_v52 }
 0x3dc   : > { %8251 = vst [vmem:[#allocation48_spill] sm:$0xff] %v6154_v31 }
 0x48d   : > { %v547_v51 = vpop.f32.mrb[0].mxu0  ;;  %v588_v53 = vpop.f32.mrb[0].mxu1 }
 0x48e   : > { %v548_v26 = vadd.f32 %v547_v51, %v6145_v23  ;;  %v589_v45 = vadd.f32 %v588_v53, %v6148_v52  ;;  %v549_v22 = vpop.f32.mrb[1].mxu0  ;;  %v590_v28 = vpop.f32.mrb[1].mxu1 }
 0x48f   : > { %v550_v27 = vadd.f32 %v549_v22, %v6151_v50  ;;  %v591_v48 = vadd.f32 %v590_v28, %v6154_v31  ;;  %v551_v46 = vpop.f32.mrb[2].mxu0  ;;  %v592_v47 = vpop.f32.mrb[2].mxu1 }
 0x490   : > { %v599_v44 = vmul.f32 1.442695, %v548_v26  ;;  %v603_v25 = vmul.f32 1.442695, %v589_v45  ;;  %v552_v24 = vpop.f32.mrb[3].mxu0  ;;  %v593_v40 = vpop.f32.mrb[3].mxu1 }
 0x491   : > { %v601_v43 = vmul.f32 1.442695, %v550_v27  ;;  %v605_v36 = vmul.f32 1.442695, %v591_v48  ;;  %vm595_vm8 = vcmp.gt.f32.partialorder %v548_v26, 0.0  ;;  %vm597_vm9 = vcmp.gt.f32.partialorder %v589_v45, 0.0 }
 0x492   : > { %5249 = vpow2.f32 %v599_v44  ;;  %vm596_vm10 = vcmp.gt.f32.partialorder %v550_v27, 0.0  ;;  %vm598_vm11 = vcmp.gt.f32.partialorder %v591_v48, 0.0 }
 0x493   : > { %5251 = vpow2.f32 %v603_v25 }
 0x494   : > { %5253 = vpow2.f32 %v601_v43 }
 0x495   : > { %5255 = vpow2.f32 %v605_v36 }
 0x49c   : > { %v5250_v51 = vpop.eup %5249 }
 0x49d   : > { %v5252_v53 = vpop.eup %5251  ;;  %v4242_v52 = vadd.f32 -1.0, %v5250_v51 }
 0x49e   : > { %v5254_v23 = vpop.eup %5253  ;;  %v4244_v35 = vadd.f32 -1.0, %v5252_v53 }
 0x49f   : > { %v5256_v22 = vpop.eup %5255  ;;  %v4243_v28 = vadd.f32 -1.0, %v5254_v23  ;;  %v611_v46 = vsel %vm595_vm8, %v548_v26, %v4242_v52 }
 0x4a0   : > { %v4245_v47 = vadd.f32 -1.0, %v5256_v22  ;;  %v613_v31 = vsel %vm597_vm9, %v589_v45, %v4244_v35  ;;  %v615_v25 = vpack.c.bf16 %v611_v46, %v611_v46  ;;  %v8252_v45 = vmov 0  }
 0x4a1   : > { %v612_v44 = vsel %vm596_vm10, %v550_v27, %v4243_v28  ;;  %v617_v36 = vpack.c.bf16 %v613_v31, %v613_v31 }
 0x4a2   : > { %v616_v24 = vpack.c.bf16 %v612_v44, %v612_v44  ;;  %v614_v40 = vsel %vm598_vm11, %v591_v48, %v4245_v47 }
 0x4a3   : > { %v618_v43 = vpack.c.bf16 %v614_v40, %v614_v40 }
 0x4a4   : > { %907 = vmatprep.mubr.bf16.mxu0 %v616_v24 }
 0x4a5   : > { %947 = vmatprep.mubr.bf16.mxu1 %v618_v43  ;;  %908 = vmatmul.mubr.bf16.vlgmr.msra.gmra.mrb[4].mxu0 %v615_v25 }
 0x4a6   : > { %948 = vmatmul.mubr.bf16.vlgmr.msra.gmra.mrb[4].mxu1 %v617_v36  ;;  %983 = vmatpush1.bf16.msra.mxu0 %v5950_v54  ;;  %v6205_v36 = vstv %s286_s20 }
 0x4a7   : > { %1024 = vmatpush1.bf16.msra.mxu1 %v5952_v55  ;;  %984 = vmatprep.subr.bf16.mxu0 %v5955_v56  ;;  %8253 = vst [vmem:[#allocation49_spill] sm:$0xff] %v6205_v36 }
 0x4a8   : > { %1025 = vmatprep.subr.bf16.mxu1 %v5960_v57  ;;  %1014 = vmatprep.mubr.bf16.mxu0 %v8252_v45 }
 0x4a9   : > { %1055 = vmatprep.mubr.bf16.mxu1 %v8252_v45 }
 0x4aa   : > { %985 = vmatpush1.bf16.msra.mxu0 %v5962_v58 }
 0x4ab   : > { %1026 = vmatpush1.bf16.msra.mxu1 %v5965_v59  ;;  %986 = vmatprep.subr.bf16.mxu0 %v5969_v60 }
 0x4ac   : > { %1027 = vmatprep.subr.bf16.mxu1 %v5971_v61 }
 0x4ae   : > { %987 = vmatpush1.bf16.msra.mxu0 %v5973_v62 }
 0x4af   : > { %1028 = vmatpush1.bf16.msra.mxu1 %v5975_v63  ;;  %988 = vmatprep.subr.bf16.mxu0 %v5979_v0 }
 0x4b0   : > { %1029 = vmatprep.subr.bf16.mxu1 %v5983_v1 }
 0x4b2   : > { %989 = vmatpush1.bf16.msra.mxu0 %v5985_v2 }
 0x4b3   : > { %1030 = vmatpush1.bf16.msra.mxu1 %v5989_v3  ;;  %990 = vmatprep.subr.bf16.mxu0 %v5991_v4 }
 0x4b4   : > { %1031 = vmatprep.subr.bf16.mxu1 %v5995_v5 }
 0x4b6   : > { %991 = vmatpush1.bf16.msra.mxu0 %v5997_v6 }
 0x4b7   : > { %1032 = vmatpush1.bf16.msra.mxu1 %v5999_v7  ;;  %992 = vmatprep.subr.bf16.mxu0 %v6003_v8 }
 0x4b8   : > { %1033 = vmatprep.subr.bf16.mxu1 %v6007_v9 }
 0x4ba   : > { %993 = vmatpush1.bf16.msra.mxu0 %v6009_v10 }
 0x4bb   : > { %1034 = vmatpush1.bf16.msra.mxu1 %v6013_v11  ;;  %994 = vmatprep.subr.bf16.mxu0 %v6015_v12 }
 0x4bc   : > { %1035 = vmatprep.subr.bf16.mxu1 %v6019_v13 }
 0x4be   : > { %995 = vmatpush1.bf16.msra.mxu0 %v6023_v14 }
 0x4bf   : > { %1036 = vmatpush1.bf16.msra.mxu1 %v6025_v15  ;;  %996 = vmatprep.subr.bf16.mxu0 %v6027_v16 }
 0x4c0   : > { %1037 = vmatprep.subr.bf16.mxu1 %v6031_v17 }
 0x4c2   : > { %997 = vmatpush1.bf16.msra.mxu0 %v6033_v18 }
 0x4c3   : > { %1038 = vmatpush1.bf16.msra.mxu1 %v6035_v19  ;;  %4425 = vmatprep.subr.bf16.mxu0 %v6039_v20 }
 0x4c4   : > { %4447 = vmatprep.subr.bf16.mxu1 %v6043_v21 }
 0x578   : > { %v4397_v52 = vpop.f32.mrb[4].mxu0 }
 0x579   : > { %v4419_v35 = vpop.f32.mrb[4].mxu1  ;;  %v4398_v48 = vpop.f32.mrb[5].mxu0 }
 0x57a   : > { %v4399_v23 = vadd.f32 %v4398_v48, %v4397_v52  ;;  %v4420_v31 = vpop.f32.mrb[5].mxu1  ;;  %v4400_v26 = vpop.f32.mrb[6].mxu0 }
 0x57b   : > { %v4421_v27 = vadd.f32 %v4420_v31, %v4419_v35  ;;  %v4422_v51 = vpop.f32.mrb[6].mxu1  ;;  %v4401_v53 = vpop.f32.mrb[7].mxu0 }
 0x57c   : > { %v910_v22 = vadd.f32 %v4399_v23, %v5906_v39  ;;  %v4423_v28 = vpop.f32.mrb[7].mxu1 }
 0x57e   : > { %v950_v46 = vadd.f32 %v4421_v27, %v910_v22 }
 0x580   : > { %v956_v47 = vmul.f32 1.442695, %v950_v46  ;;  %vm955_vm12 = vcmp.gt.f32.partialorder %v950_v46, 0.0 }
 0x582   : > { %5257 = vpow2.f32 %v956_v47  ;;  %v8255_v47 = vld [vmem:[#allocation21_spill] sm:$0xff] }
 0x58c   : > { %v5258_v44 = vpop.eup %5257 }
 0x58d   : > { %v4278_v24 = vadd.f32 -1.0, %v5258_v44  ;;  %v8256_v44 = vld [vmem:[#allocation22_spill] sm:$0xff] }
 0x58f   : > { %v959_v40 = vsel %vm955_vm12, %v950_v46, %v4278_v24  ;;  %v8257_v24 = vld [vmem:[#allocation23_spill] sm:$0xff] }
 0x590   : > { %v960_v25 = vmul.f32 %v959_v40, %v5916_v41  ;;  %v8258_v40 = vld [vmem:[#allocation24_spill] sm:$0xff] }
 0x592   : > { %v962_v43 = vsel %vm961_vm13, %v960_v25, 0.0  ;;  %v8259_v25 = vld [vmem:[#allocation25_spill] sm:$0xff] }
 0x593   : > { %963 = vadd.xlane.f32.xlu0 %v962_v43  ;;  %v8260_v43 = vld [vmem:[#allocation26_spill] sm:$0xff] }
 0x620   : > { %v964_v52 = vpop.xlane.xlu0 %963 }
 0x621   : > { %v6208_v35 = vadd.f32 %v964_v52, %v5921_v42  ;;  %v8261_v52 = vld [vmem:[#allocation27_spill] sm:$0xff] }
 0x623   : > { %8254 = vst [vmem:[#allocation50_spill] sm:$0xff] %v6208_v35  ;;  %v967_v48 = vmul.f32 %v6205_v36, %v6208_v35  ;;  %v8272_v35 = vld [vmem:[#allocation38_spill] sm:$0xff] }
 0x625   : > { %v968_v23 = vadd.f32 %v5769_v49, %v967_v48  ;;  %v8262_v48 = vld [vmem:[#allocation28_spill] sm:$0xff] }
 0x627   : > { %971 = vperm.xlu1 %5166, %v968_v23   ;;  %v8263_v23 = vld [vmem:[#allocation29_spill] sm:$0xff] }
 0x6a6   : > { %v972_v31 = vpop.permute.xlu1 %971 }
 0x6a7   : > { %v974_v26 = vmul.f32 %v972_v31, %v5896_v37  ;;  %v8264_v31 = vld [vmem:[#allocation30_spill] sm:$0xff] }
 0x6a9   : > { %v975_v27 = vadd.f32 %v974_v26, %v5901_v38  ;;  %v8265_v26 = vld [vmem:[#allocation31_spill] sm:$0xff] }
 0x6ab   : > { %v977_v51 = vmul.f32 1.442695, %v975_v27  ;;  %vm976_vm14 = vcmp.gt.f32.partialorder %v975_v27, 0.0 }
 0x6ad   : > { %5259 = vpow2.f32 %v977_v51  ;;  %v8267_v51 = vld [vmem:[#allocation33_spill] sm:$0xff] }
 0x6b7   : > { %v5260_v53 = vpop.eup %5259 }
 0x6b8   : > { %v4279_v22 = vadd.f32 -1.0, %v5260_v53  ;;  %v8268_v53 = vld [vmem:[#allocation34_spill] sm:$0xff] }
 0x6ba   : > { %v980_v28 = vsel %vm976_vm14, %v975_v27, %v4279_v22  ;;  %v8266_v27 = vld [vmem:[#allocation32_spill] sm:$0xff]  ;;  %v8269_v22 = vld [vmem:[#allocation35_spill] sm:$0xff] }
 0x6bb   : > { %v981_v46 = vpack.c.bf16 %v980_v28, %v980_v28  ;;  %v8270_v28 = vld [vmem:[#allocation36_spill] sm:$0xff] }
 0x6bd   : > { %1015 = vmatmul.mubr.bf16.vlgmr.msra.gmra.mrb[8].mxu0 %v981_v46  ;;  %1056 = vmatmul.mubr.bf16.vlgmr.msra.gmra.mrb[8].mxu1 %v981_v46  ;;  %v8271_v46 = vld [vmem:[#allocation37_spill] sm:$0xff] }
 0x6be   : > { %4426 = vmatpush3.bf16.msra.mxu0 %v6051_v29  ;;  %4448 = vmatpush3.bf16.msra.mxu1 %v6053_v30 }
 0x6bf   : > { %4427 = vmatprep.subr.bf16.mxu0 %v6055_v32  ;;  %4449 = vmatprep.subr.bf16.mxu1 %v6057_v33 }
 0x6c2   : > { %4428 = vmatpush3.bf16.msra.mxu0 %v6061_v34  ;;  %4450 = vmatpush3.bf16.msra.mxu1 %v8255_v47 }
 0x6c3   : > { %4429 = vmatprep.subr.bf16.mxu0 %v8256_v44  ;;  %4451 = vmatprep.subr.bf16.mxu1 %v8257_v24 }
 0x6c6   : > { %4430 = vmatpush3.bf16.msra.mxu0 %v8258_v40  ;;  %4452 = vmatpush3.bf16.msra.mxu1 %v8259_v25  ;;  %v8284_v40 = vld [vmem:[#allocation48_spill] sm:$0xff] }
 0x6c7   : > { %4431 = vmatprep.subr.bf16.mxu0 %v8260_v43  ;;  %4453 = vmatprep.subr.bf16.mxu1 %v8261_v52  ;;  %v8282_v52 = vld [vmem:[#allocation46_spill] sm:$0xff]  ;;  %v8283_v43 = vld [vmem:[#allocation47_spill] sm:$0xff] }
 0x6ca   : > { %4432 = vmatpush3.bf16.msra.mxu0 %v8262_v48  ;;  %4454 = vmatpush3.bf16.msra.mxu1 %v8263_v23  ;;  %v8273_v48 = vld [vmem:[#allocation39_spill] sm:$0xff]  ;;  %v8274_v23 = vld [vmem:[#allocation40_spill] sm:$0xff] }
 0x6cb   : > { %4433 = vmatprep.subr.bf16.mxu0 %v8264_v31  ;;  %4455 = vmatprep.subr.bf16.mxu1 %v8265_v26  ;;  %v8275_v31 = vld [vmem:[#allocation41_spill] sm:$0xff]  ;;  %v8276_v26 = vld [vmem:[#allocation42_spill] sm:$0xff] }
 0x6ce   : > { %4434 = vmatpush3.bf16.msra.mxu0 %v8266_v27  ;;  %4456 = vmatpush3.bf16.msra.mxu1 %v8267_v51  ;;  %v8277_v27 = vld [vmem:[#allocation43_spill] sm:$0xff]  ;;  %v8278_v51 = vld [vmem:[#allocation44_spill] sm:$0xff] }
 0x6cf   : > { %4435 = vmatprep.subr.bf16.mxu0 %v8268_v53  ;;  %4457 = vmatprep.subr.bf16.mxu1 %v8269_v22  ;;  %v8279_v53 = vld [vmem:[#allocation45_spill] sm:$0xff] }
 0x6d0   : > { %v8280_v22 = vld [vmem:[#allocation17_spill] sm:$0xff] }
 0x6d2   : > { %4436 = vmatpush3.bf16.msra.mxu0 %v8270_v28  ;;  %4458 = vmatpush3.bf16.msra.mxu1 %v8271_v46  ;;  %v8281_v28 = vld [vmem:[#allocation18_spill] sm:$0xff] }
 0x6d3   : > { %4437 = vmatprep.subr.bf16.mxu0 %v8272_v35  ;;  %4459 = vmatprep.subr.bf16.mxu1 %v8273_v48 }
 0x6d6   : > { %4438 = vmatpush3.bf16.msra.mxu0 %v8274_v23  ;;  %4460 = vmatpush3.bf16.msra.mxu1 %v8275_v31 }
 0x6d7   : > { %4439 = vmatprep.subr.bf16.mxu0 %v8276_v26  ;;  %4461 = vmatprep.subr.bf16.mxu1 %v8277_v27 }
 0x6da   : > { %4440 = vmatpush3.bf16.msra.mxu0 %v8278_v51  ;;  %4462 = vmatpush3.bf16.msra.mxu1 %v8279_v53 }
 0x6db   : > { %1193 = vmatprep.subr.bf16.mxu0 %v8280_v22  ;;  %1234 = vmatprep.subr.bf16.mxu1 %v8281_v28 }
 0x790   : > { %v1016_v46 = vpop.f32.mrb[8].mxu0  ;;  %v1057_v35 = vpop.f32.mrb[8].mxu1 }
 0x791   : > { %v1017_v48 = vadd.f32 %v1016_v46, %v8282_v52  ;;  %v1058_v23 = vadd.f32 %v1057_v35, %v8283_v43  ;;  %v1018_v25 = vpop.f32.mrb[9].mxu0  ;;  %v1059_v31 = vpop.f32.mrb[9].mxu1 }
 0x792   : > { %v1019_v26 = vadd.f32 %v1018_v25, %v6151_v50  ;;  %v1060_v27 = vadd.f32 %v1059_v31, %v8284_v40  ;;  %v1020_v24 = vpop.f32.mrb[10].mxu0  ;;  %v1061_v51 = vpop.f32.mrb[10].mxu1 }
 0x793   : > { %v1068_v44 = vmul.f32 1.442695, %v1017_v48  ;;  %v1072_v53 = vmul.f32 1.442695, %v1058_v23  ;;  %v1021_v28 = vpop.f32.mrb[11].mxu0  ;;  %v1062_v34 = vpop.f32.mrb[11].mxu1 }
 0x794   : > { %v1070_v47 = vmul.f32 1.442695, %v1019_v26  ;;  %v1074_v22 = vmul.f32 1.442695, %v1060_v27  ;;  %vm1064_vm15 = vcmp.gt.f32.partialorder %v1017_v48, 0.0  ;;  %vm1066_vm0 = vcmp.gt.f32.partialorder %v1058_v23, 0.0 }
 0x795   : > { %5261 = vpow2.f32 %v1068_v44  ;;  %vm1065_vm1 = vcmp.gt.f32.partialorder %v1019_v26, 0.0  ;;  %vm1067_vm2 = vcmp.gt.f32.partialorder %v1060_v27, 0.0 }
 0x796   : > { %5263 = vpow2.f32 %v1072_v53 }
 0x797   : > { %5265 = vpow2.f32 %v1070_v47 }
 0x798   : > { %5267 = vpow2.f32 %v1074_v22 }
 0x79f   : > { %v5262_v46 = vpop.eup %5261 }
 0x7a0   : > { %v5264_v35 = vpop.eup %5263  ;;  %v4280_v43 = vadd.f32 -1.0, %v5262_v46  ;;  %v8295_v46 = vld [vmem:[#allocation29_spill] sm:$0xff] }
 0x7a1   : > { %v5266_v52 = vpop.eup %5265  ;;  %v4282_v33 = vadd.f32 -1.0, %v5264_v35  ;;  %v8296_v35 = vld [vmem:[#allocation30_spill] sm:$0xff] }
 0x7a2   : > { %v5268_v25 = vpop.eup %5267  ;;  %v4281_v31 = vadd.f32 -1.0, %v5266_v52  ;;  %v1080_v24 = vsel %vm1064_vm15, %v1017_v48, %v4280_v43  ;;  %v8289_v43 = vld [vmem:[#allocation23_spill] sm:$0xff]  ;;  %v8290_v52 = vld [vmem:[#allocation24_spill] sm:$0xff]  ;;  %v8291_v48 = vld [vmem:[#allocation25_spill] sm:$0xff] }
 0x7a3   : > { %v4283_v51 = vadd.f32 -1.0, %v5268_v25  ;;  %v1082_v40 = vsel %vm1066_vm0, %v1058_v23, %v4282_v33  ;;  %v1084_v53 = vpack.c.bf16 %v1080_v24, %v1080_v24  ;;  %v8287_v33 = vld [vmem:[#allocation21_spill] sm:$0xff]  ;;  %v8292_v23 = vld [vmem:[#allocation26_spill] sm:$0xff]  ;;  %v8297_v25 = vld [vmem:[#allocation31_spill] sm:$0xff] }
 0x7a4   : > { %v1081_v44 = vsel %vm1065_vm1, %v1019_v26, %v4281_v31  ;;  %v1086_v22 = vpack.c.bf16 %v1082_v40, %v1082_v40  ;;  %v8288_v40 = vld [vmem:[#allocation22_spill] sm:$0xff]  ;;  %v8293_v26 = vld [vmem:[#allocation27_spill] sm:$0xff]  ;;  %v8298_v31 = vld [vmem:[#allocation32_spill] sm:$0xff] }
 0x7a5   : > { %v1085_v28 = vpack.c.bf16 %v1081_v44, %v1081_v44  ;;  %v1083_v34 = vsel %vm1067_vm2, %v1060_v27, %v4283_v51  ;;  %v8294_v27 = vld [vmem:[#allocation28_spill] sm:$0xff]  ;;  %v8299_v24 = vld [vmem:[#allocation33_spill] sm:$0xff]  ;;  %v8300_v51 = vld [vmem:[#allocation34_spill] sm:$0xff] }
 0x7a6   : > { %v1087_v47 = vpack.c.bf16 %v1083_v34, %v1083_v34  ;;  %v8301_v44 = vld [vmem:[#allocation35_spill] sm:$0xff]  ;;  %v8303_v34 = vld [vmem:[#allocation37_spill] sm:$0xff] }
 0x7a7   : > { %1120 = vmatprep.mubr.bf16.mxu0 %v1085_v28  ;;  %v8302_v28 = vld [vmem:[#allocation36_spill] sm:$0xff] }
 0x7a8   : > { %1160 = vmatprep.mubr.bf16.mxu1 %v1087_v47  ;;  %1121 = vmatmul.mubr.bf16.vlgmr.msra.gmra.mrb[12].mxu0 %v1084_v53  ;;  %v8304_v53 = vld [vmem:[#allocation38_spill] sm:$0xff]  ;;  %v8305_v47 = vld [vmem:[#allocation39_spill] sm:$0xff] }
 0x7a9   : > { %1161 = vmatmul.mubr.bf16.vlgmr.msra.gmra.mrb[12].mxu1 %v1086_v22  ;;  %1194 = vmatpush1.bf16.msra.mxu0 %v5950_v54  ;;  %v8306_v22 = vld [vmem:[#allocation40_spill] sm:$0xff] }
 0x7aa   : > { %1235 = vmatpush1.bf16.msra.mxu1 %v5952_v55  ;;  %1195 = vmatprep.subr.bf16.mxu0 %v5955_v56 }
 0x7ab   : > { %1236 = vmatprep.subr.bf16.mxu1 %v5960_v57  ;;  %1225 = vmatprep.mubr.bf16.mxu0 %v8252_v45 }
 0x7ac   : > { %1266 = vmatprep.mubr.bf16.mxu1 %v8252_v45 }
 0x7ad   : > { %1196 = vmatpush1.bf16.msra.mxu0 %v5962_v58 }
 0x7ae   : > { %1237 = vmatpush1.bf16.msra.mxu1 %v5965_v59  ;;  %1197 = vmatprep.subr.bf16.mxu0 %v5969_v60 }
 0x7af   : > { %1238 = vmatprep.subr.bf16.mxu1 %v5971_v61 }
 0x7b1   : > { %1198 = vmatpush1.bf16.msra.mxu0 %v5973_v62 }
 0x7b2   : > { %1239 = vmatpush1.bf16.msra.mxu1 %v5975_v63  ;;  %1199 = vmatprep.subr.bf16.mxu0 %v5979_v0 }
 0x7b3   : > { %1240 = vmatprep.subr.bf16.mxu1 %v5983_v1 }
 0x7b5   : > { %1200 = vmatpush1.bf16.msra.mxu0 %v5985_v2 }
 0x7b6   : > { %1241 = vmatpush1.bf16.msra.mxu1 %v5989_v3  ;;  %1201 = vmatprep.subr.bf16.mxu0 %v5991_v4 }
 0x7b7   : > { %1242 = vmatprep.subr.bf16.mxu1 %v5995_v5 }
 0x7b9   : > { %1202 = vmatpush1.bf16.msra.mxu0 %v5997_v6 }
 0x7ba   : > { %1243 = vmatpush1.bf16.msra.mxu1 %v5999_v7  ;;  %1203 = vmatprep.subr.bf16.mxu0 %v6003_v8 }
 0x7bb   : > { %1244 = vmatprep.subr.bf16.mxu1 %v6007_v9 }
 0x7bd   : > { %1204 = vmatpush1.bf16.msra.mxu0 %v6009_v10 }
 0x7be   : > { %1245 = vmatpush1.bf16.msra.mxu1 %v6013_v11  ;;  %1205 = vmatprep.subr.bf16.mxu0 %v6015_v12 }
 0x7bf   : > { %1246 = vmatprep.subr.bf16.mxu1 %v6019_v13 }
 0x7c1   : > { %1206 = vmatpush1.bf16.msra.mxu0 %v6023_v14 }
 0x7c2   : > { %1247 = vmatpush1.bf16.msra.mxu1 %v6025_v15  ;;  %1207 = vmatprep.subr.bf16.mxu0 %v6027_v16 }
 0x7c3   : > { %1248 = vmatprep.subr.bf16.mxu1 %v6031_v17 }
 0x7c5   : > { %1208 = vmatpush1.bf16.msra.mxu0 %v6033_v18 }
 0x7c6   : > { %1249 = vmatpush1.bf16.msra.mxu1 %v6035_v19  ;;  %4469 = vmatprep.subr.bf16.mxu0 %v6039_v20  ;;  %v8285_v20 = vld [vmem:[#allocation19_spill] sm:$0xff] }
 0x7c7   : > { %4491 = vmatprep.subr.bf16.mxu1 %v6043_v21  ;;  %v8286_v21 = vld [vmem:[#allocation20_spill] sm:$0xff] }
 0x87b   : > { %v4441_v54 = vpop.f32.mrb[12].mxu0 }
 0x87c   : > { %v4463_v55 = vpop.f32.mrb[12].mxu1  ;;  %v4442_v56 = vpop.f32.mrb[13].mxu0 }
 0x87d   : > { %v4443_v57 = vadd.f32 %v4442_v56, %v4441_v54  ;;  %v4464_v58 = vpop.f32.mrb[13].mxu1  ;;  %v4444_v59 = vpop.f32.mrb[14].mxu0  ;;  %v8307_v54 = vld [vmem:[#allocation41_spill] sm:$0xff]  ;;  %v8309_v56 = vld [vmem:[#allocation43_spill] sm:$0xff] }
 0x87e   : > { %v4465_v60 = vadd.f32 %v4464_v58, %v4463_v55  ;;  %v4466_v61 = vpop.f32.mrb[14].mxu1  ;;  %v4445_v62 = vpop.f32.mrb[15].mxu0  ;;  %v8308_v55 = vld [vmem:[#allocation42_spill] sm:$0xff]  ;;  %v8311_v58 = vld [vmem:[#allocation45_spill] sm:$0xff] }
 0x87f   : > { %v1123_v63 = vadd.f32 %v4443_v57, %v5906_v39  ;;  %v4467_v0 = vpop.f32.mrb[15].mxu1  ;;  %v8310_v57 = vld [vmem:[#allocation44_spill] sm:$0xff] }
 0x880   : > { %v6326_v59 = vld [vmem:[#allocation6 + $0x4] ss:$16 sps:$4 sm:$0xff]  }
 0x881   : > { %v1163_v1 = vadd.f32 %v4465_v60, %v1123_v63  ;;  %8312 = vst [vmem:[#allocation17_spill] sm:$0xff] %v6326_v59  ;;  %v6329_v60 = vld [vmem:[#allocation6 + $0xc] ss:$16 sps:$4 sm:$0xff]   ;;  %v8314_v63 = vld [vmem:[#allocation46_spill] sm:$0xff] }
 0x882   : > { %8313 = vst [vmem:[#allocation18_spill] sm:$0xff] %v6329_v60 }
 0x883   : > { %v1169_v2 = vmul.f32 1.442695, %v1163_v1  ;;  %vm1168_vm3 = vcmp.gt.f32.partialorder %v1163_v1, 0.0 }
 0x885   : > { %5269 = vpow2.f32 %v1169_v2 }
 0x88f   : > { %v5270_v3 = vpop.eup %5269 }
 0x890   : > { %v4284_v4 = vadd.f32 -1.0, %v5270_v3 }
 0x892   : > { %v1172_v5 = vsel %vm1168_vm3, %v1163_v1, %v4284_v4  ;;  %v8315_v1 = vld [vmem:[#allocation47_spill] sm:$0xff] }
 0x893   : > { %v1173_v6 = vmul.f32 %v1172_v5, %v5916_v41 }
 0x895   : > { %v1174_v7 = vsel %vm961_vm13, %v1173_v6, 0.0  ;;  %v8316_v6 = vld [vmem:[#allocation48_spill] sm:$0xff] }
 0x896   : > { %1175 = vadd.xlane.f32.xlu1 %v1174_v7 }
 0x923   : > { %v1176_v8 = vpop.xlane.xlu1 %1175 }
 0x924   : > { %v6289_v9 = vadd.f32 %v1176_v8, %v5921_v42 }
 0x926   : > { %v1178_v10 = vmul.f32 %v6289_v9, %v6205_v36 }
 0x928   : > { %v1179_v11 = vadd.f32 %v5769_v49, %v1178_v10 }
 0x92a   : > { %1182 = vperm.xlu0 %5165, %v1179_v11  }
 0x9a9   : > { %v1183_v12 = vpop.permute.xlu0 %1182 }
 0x9aa   : > { %v1185_v13 = vmul.f32 %v1183_v12, %v5896_v37 }
 0x9ac   : > { %v1186_v14 = vadd.f32 %v1185_v13, %v5901_v38 }
 0x9ae   : > { %v1188_v15 = vmul.f32 1.442695, %v1186_v14  ;;  %vm1187_vm4 = vcmp.gt.f32.partialorder %v1186_v14, 0.0 }
 0x9b0   : > { %5271 = vpow2.f32 %v1188_v15 }
 0x9ba   : > { %v5272_v16 = vpop.eup %5271 }
 0x9bb   : > { %v4285_v17 = vadd.f32 -1.0, %v5272_v16 }
 0x9bd   : > { %v1191_v18 = vsel %vm1187_vm4, %v1186_v14, %v4285_v17 }
 0x9be   : > { %v1192_v19 = vpack.c.bf16 %v1191_v18, %v1191_v18 }
 0x9c0   : > { %1226 = vmatmul.mubr.bf16.vlgmr.msra.gmra.mrb[16].mxu0 %v1192_v19  ;;  %1267 = vmatmul.mubr.bf16.vlgmr.msra.gmra.mrb[16].mxu1 %v1192_v19 }
 0x9c1   : > { %4470 = vmatpush3.bf16.msra.mxu0 %v6051_v29  ;;  %4492 = vmatpush3.bf16.msra.mxu1 %v6053_v30 }
 0x9c2   : > { %4471 = vmatprep.subr.bf16.mxu0 %v6055_v32  ;;  %4493 = vmatprep.subr.bf16.mxu1 %v8285_v20 }
 0x9c5   : > { %4472 = vmatpush3.bf16.msra.mxu0 %v8286_v21  ;;  %4494 = vmatpush3.bf16.msra.mxu1 %v8287_v33 }
 0x9c6   : > { %4473 = vmatprep.subr.bf16.mxu0 %v8288_v40  ;;  %4495 = vmatprep.subr.bf16.mxu1 %v8289_v43 }
 0x9c9   : > { %4474 = vmatpush3.bf16.msra.mxu0 %v8290_v52  ;;  %4496 = vmatpush3.bf16.msra.mxu1 %v8291_v48 }
 0x9ca   : > { %4475 = vmatprep.subr.bf16.mxu0 %v8292_v23  ;;  %4497 = vmatprep.subr.bf16.mxu1 %v8293_v26 }
 0x9cd   : > { %4476 = vmatpush3.bf16.msra.mxu0 %v8294_v27  ;;  %4498 = vmatpush3.bf16.msra.mxu1 %v8295_v46 }
 0x9ce   : > { %4477 = vmatprep.subr.bf16.mxu0 %v8296_v35  ;;  %4499 = vmatprep.subr.bf16.mxu1 %v8297_v25 }
 0x9d1   : > { %4478 = vmatpush3.bf16.msra.mxu0 %v8298_v31  ;;  %4500 = vmatpush3.bf16.msra.mxu1 %v8299_v24 }
 0x9d2   : > { %4479 = vmatprep.subr.bf16.mxu0 %v8300_v51  ;;  %4501 = vmatprep.subr.bf16.mxu1 %v8301_v44 }
 0x9d5   : > { %4480 = vmatpush3.bf16.msra.mxu0 %v8302_v28  ;;  %4502 = vmatpush3.bf16.msra.mxu1 %v8303_v34 }
 0x9d6   : > { %4481 = vmatprep.subr.bf16.mxu0 %v8304_v53  ;;  %4503 = vmatprep.subr.bf16.mxu1 %v8305_v47 }
 0x9d9   : > { %4482 = vmatpush3.bf16.msra.mxu0 %v8306_v22  ;;  %4504 = vmatpush3.bf16.msra.mxu1 %v8307_v54 }
 0x9da   : > { %4483 = vmatprep.subr.bf16.mxu0 %v8308_v55  ;;  %4505 = vmatprep.subr.bf16.mxu1 %v8309_v56 }
 0x9dd   : > { %4484 = vmatpush3.bf16.msra.mxu0 %v8310_v57  ;;  %4506 = vmatpush3.bf16.msra.mxu1 %v8311_v58 }
 0x9de   : > { %1405 = vmatprep.subr.bf16.mxu0 %v6326_v59  ;;  %1446 = vmatprep.subr.bf16.mxu1 %v6329_v60 }
 0xa93   : > { %v1227_v61 = vpop.f32.mrb[16].mxu0  ;;  %v1268_v62 = vpop.f32.mrb[16].mxu1 }
 0xa94   : > { %v1228_v0 = vadd.f32 %v1227_v61, %v8314_v63  ;;  %v1269_v2 = vadd.f32 %v1268_v62, %v8315_v1  ;;  %v1229_v3 = vpop.f32.mrb[17].mxu0  ;;  %v1270_v4 = vpop.f32.mrb[17].mxu1 }
 0xa95   : > { %v1230_v5 = vadd.f32 %v1229_v3, %v6151_v50  ;;  %v1271_v7 = vadd.f32 %v1270_v4, %v8316_v6  ;;  %v1231_v8 = vpop.f32.mrb[18].mxu0  ;;  %v1272_v10 = vpop.f32.mrb[18].mxu1 }
 0xa96   : > { %v1279_v11 = vmul.f32 1.442695, %v1228_v0  ;;  %v1283_v12 = vmul.f32 1.442695, %v1269_v2  ;;  %v1232_v15 = vpop.f32.mrb[19].mxu0  ;;  %v1273_v16 = vpop.f32.mrb[19].mxu1 }
 0xa97   : > { %v1281_v13 = vmul.f32 1.442695, %v1230_v5  ;;  %v1285_v14 = vmul.f32 1.442695, %v1271_v7  ;;  %vm1275_vm5 = vcmp.gt.f32.partialorder %v1228_v0, 0.0  ;;  %vm1277_vm6 = vcmp.gt.f32.partialorder %v1269_v2, 0.0 }
 0xa98   : > { %5273 = vpow2.f32 %v1279_v11  ;;  %vm1276_vm7 = vcmp.gt.f32.partialorder %v1230_v5, 0.0  ;;  %vm1278_vm8 = vcmp.gt.f32.partialorder %v1271_v7, 0.0 }
 0xa99   : > { %5275 = vpow2.f32 %v1283_v12 }
 0xa9a   : > { %5277 = vpow2.f32 %v1281_v13 }
 0xa9b   : > { %5279 = vpow2.f32 %v1285_v14 }
 0xaa2   : > { %v5274_v17 = vpop.eup %5273 }
 0xaa3   : > { %v5276_v18 = vpop.eup %5275  ;;  %v4286_v19 = vadd.f32 -1.0, %v5274_v17  ;;  %v6336_v17 = vld [vmem:[#allocation6] ss:$16 sps:$4 sm:$0xff]  }
 0xaa4   : > { %v5278_v61 = vpop.eup %5277  ;;  %v4288_v62 = vadd.f32 -1.0, %v5276_v18  ;;  %v6356_v18 = vld [vmem:[#allocation6 + $0x44] ss:$16 sps:$4 sm:$0xff]  }
 0xaa5   : > { %v5280_v3 = vpop.eup %5279  ;;  %v4287_v4 = vadd.f32 -1.0, %v5278_v61  ;;  %v1291_v8 = vsel %vm1275_vm5, %v1228_v0, %v4286_v19  ;;  %v6339_v0 = vld [vmem:[#allocation6 + $0x8] ss:$16 sps:$4 sm:$0xff]   ;;  %8319 = vst [vmem:[#allocation21_spill] sm:$0xff] %v6356_v18  ;;  %v6359_v19 = vld [vmem:[#allocation6 + $0x4c] ss:$16 sps:$4 sm:$0xff]  }
 0xaa6   : > { %v4289_v10 = vadd.f32 -1.0, %v5280_v3  ;;  %v1293_v36 = vsel %vm1277_vm6, %v1269_v2, %v4288_v62  ;;  %v1295_v12 = vpack.c.bf16 %v1291_v8, %v1291_v8  ;;  %v6342_v2 = vld [vmem:[#allocation6 + $0x24] ss:$16 sps:$4 sm:$0xff]   ;;  %8320 = vst [vmem:[#allocation22_spill] sm:$0xff] %v6359_v19  ;;  %v6362_v61 = vld [vmem:[#allocation6 + $0x40] ss:$16 sps:$4 sm:$0xff]  }
 0xaa7   : > { %v1292_v11 = vsel %vm1276_vm7, %v1230_v5, %v4287_v4  ;;  %v1297_v14 = vpack.c.bf16 %v1293_v36, %v1293_v36  ;;  %v6345_v5 = vld [vmem:[#allocation6 + $0x2c] ss:$16 sps:$4 sm:$0xff]   ;;  %v6350_v36 = vld [vmem:[#allocation6 + $0x20] ss:$16 sps:$4 sm:$0xff]   ;;  %8321 = vst [vmem:[#allocation23_spill] sm:$0xff] %v6362_v61 }
 0xaa8   : > { %v1296_v15 = vpack.c.bf16 %v1292_v11, %v1292_v11  ;;  %v1294_v16 = vsel %vm1278_vm8, %v1271_v7, %v4289_v10  ;;  %8317 = vst [vmem:[#allocation19_spill] sm:$0xff] %v6350_v36  ;;  %v6353_v7 = vld [vmem:[#allocation6 + $0x28] ss:$16 sps:$4 sm:$0xff]   ;;  %v6368_v3 = vld [vmem:[#allocation6 + $0x64] ss:$16 sps:$4 sm:$0xff]  }
 0xaa9   : > { %v1298_v13 = vpack.c.bf16 %v1294_v16, %v1294_v16  ;;  %8318 = vst [vmem:[#allocation20_spill] sm:$0xff] %v6353_v7  ;;  %v6365_v62 = vld [vmem:[#allocation6 + $0x48] ss:$16 sps:$4 sm:$0xff]   ;;  %8323 = vst [vmem:[#allocation25_spill] sm:$0xff] %v6368_v3  ;;  %v6371_v4 = vld [vmem:[#allocation6 + $0x6c] ss:$16 sps:$4 sm:$0xff]  }
 0xaaa   : > { %1331 = vmatprep.mubr.bf16.mxu0 %v1296_v15  ;;  %8322 = vst [vmem:[#allocation24_spill] sm:$0xff] %v6365_v62  ;;  %8324 = vst [vmem:[#allocation26_spill] sm:$0xff] %v6371_v4  ;;  %v6374_v8 = vld [vmem:[#allocation6 + $0x60] ss:$16 sps:$4 sm:$0xff]   ;;  %v6377_v10 = vld [vmem:[#allocation6 + $0x68] ss:$16 sps:$4 sm:$0xff]  }
 0xaab   : > { %1371 = vmatprep.mubr.bf16.mxu1 %v1298_v13  ;;  %1332 = vmatmul.mubr.bf16.vlgmr.msra.gmra.mrb[20].mxu0 %v1295_v12  ;;  %8325 = vst [vmem:[#allocation27_spill] sm:$0xff] %v6374_v8  ;;  %8326 = vst [vmem:[#allocation28_spill] sm:$0xff] %v6377_v10  ;;  %v6380_v11 = vld [vmem:[#allocation6 + $0x84] ss:$16 sps:$4 sm:$0xff]   ;;  %v6383_v15 = vld [vmem:[#allocation6 + $0x8c] ss:$16 sps:$4 sm:$0xff]  }
 0xaac   : > { %1372 = vmatmul.mubr.bf16.vlgmr.msra.gmra.mrb[20].mxu1 %v1297_v14  ;;  %1406 = vmatpush1.bf16.msra.mxu0 %v6336_v17  ;;  %8327 = vst [vmem:[#allocation29_spill] sm:$0xff] %v6380_v11  ;;  %8328 = vst [vmem:[#allocation30_spill] sm:$0xff] %v6383_v15  ;;  %v6386_v16 = vld [vmem:[#allocation6 + $0x80] ss:$16 sps:$4 sm:$0xff]   ;;  %v6389_v12 = vld [vmem:[#allocation6 + $0x88] ss:$16 sps:$4 sm:$0xff]  }
 0xaad   : > { %1447 = vmatpush1.bf16.msra.mxu1 %v6339_v0  ;;  %1407 = vmatprep.subr.bf16.mxu0 %v6342_v2  ;;  %8329 = vst [vmem:[#allocation31_spill] sm:$0xff] %v6386_v16  ;;  %8330 = vst [vmem:[#allocation32_spill] sm:$0xff] %v6389_v12  ;;  %v6392_v13 = vld [vmem:[#allocation6 + $0xa4] ss:$16 sps:$4 sm:$0xff]   ;;  %v6395_v14 = vld [vmem:[#allocation6 + $0xac] ss:$16 sps:$4 sm:$0xff]  }
 0xaae   : > { %1448 = vmatprep.subr.bf16.mxu1 %v6345_v5  ;;  %1437 = vmatprep.mubr.bf16.mxu0 %v8252_v45  ;;  %8331 = vst [vmem:[#allocation33_spill] sm:$0xff] %v6392_v13  ;;  %8332 = vst [vmem:[#allocation34_spill] sm:$0xff] %v6395_v14 }
 0xaaf   : > { %1478 = vmatprep.mubr.bf16.mxu1 %v8252_v45 }
 0xab0   : > { %1408 = vmatpush1.bf16.msra.mxu0 %v6350_v36 }
 0xab1   : > { %1449 = vmatpush1.bf16.msra.mxu1 %v6353_v7  ;;  %1409 = vmatprep.subr.bf16.mxu0 %v6356_v18 }
 0xab2   : > { %1450 = vmatprep.subr.bf16.mxu1 %v6359_v19 }
 0xab4   : > { %1410 = vmatpush1.bf16.msra.mxu0 %v6362_v61 }
 0xab5   : > { %1451 = vmatpush1.bf16.msra.mxu1 %v6365_v62  ;;  %1411 = vmatprep.subr.bf16.mxu0 %v6368_v3 }
 0xab6   : > { %1452 = vmatprep.subr.bf16.mxu1 %v6371_v4 }
 0xab8   : > { %1412 = vmatpush1.bf16.msra.mxu0 %v6374_v8 }
 0xab9   : > { %1453 = vmatpush1.bf16.msra.mxu1 %v6377_v10  ;;  %1413 = vmatprep.subr.bf16.mxu0 %v6380_v11  ;;  %v6398_v11 = vld [vmem:[#allocation6 + $0xa0] ss:$16 sps:$4 sm:$0xff]  }
 0xaba   : > { %1454 = vmatprep.subr.bf16.mxu1 %v6383_v15  ;;  %8333 = vst [vmem:[#allocation35_spill] sm:$0xff] %v6398_v11  ;;  %v6401_v15 = vld [vmem:[#allocation6 + $0xa8] ss:$16 sps:$4 sm:$0xff]  }
 0xabb   : > { %8334 = vst [vmem:[#allocation36_spill] sm:$0xff] %v6401_v15 }
 0xabc   : > { %1414 = vmatpush1.bf16.msra.mxu0 %v6386_v16  ;;  %v6404_v16 = vld [vmem:[#allocation6 + $0xc4] ss:$16 sps:$4 sm:$0xff]  }
 0xabd   : > { %1455 = vmatpush1.bf16.msra.mxu1 %v6389_v12  ;;  %1415 = vmatprep.subr.bf16.mxu0 %v6392_v13  ;;  %8335 = vst [vmem:[#allocation37_spill] sm:$0xff] %v6404_v16  ;;  %v6407_v12 = vld [vmem:[#allocation6 + $0xcc] ss:$16 sps:$4 sm:$0xff]   ;;  %v6410_v13 = vld [vmem:[#allocation6 + $0xc0] ss:$16 sps:$4 sm:$0xff]  }
 0xabe   : > { %1456 = vmatprep.subr.bf16.mxu1 %v6395_v14  ;;  %8336 = vst [vmem:[#allocation38_spill] sm:$0xff] %v6407_v12  ;;  %8337 = vst [vmem:[#allocation39_spill] sm:$0xff] %v6410_v13  ;;  %v6413_v14 = vld [vmem:[#allocation6 + $0xc8] ss:$16 sps:$4 sm:$0xff]  }
 0xabf   : > { %8338 = vst [vmem:[#allocation40_spill] sm:$0xff] %v6413_v14 }
 0xac0   : > { %1416 = vmatpush1.bf16.msra.mxu0 %v6398_v11  ;;  %v6416_v11 = vld [vmem:[#allocation6 + $0xe4] ss:$16 sps:$4 sm:$0xff]  }
 0xac1   : > { %1457 = vmatpush1.bf16.msra.mxu1 %v6401_v15  ;;  %1417 = vmatprep.subr.bf16.mxu0 %v6404_v16  ;;  %8339 = vst [vmem:[#allocation41_spill] sm:$0xff] %v6416_v11  ;;  %v6419_v15 = vld [vmem:[#allocation6 + $0xec] ss:$16 sps:$4 sm:$0xff]   ;;  %v6422_v16 = vld [vmem:[#allocation6 + $0xe0] ss:$16 sps:$4 sm:$0xff]  }
 0xac2   : > { %1458 = vmatprep.subr.bf16.mxu1 %v6407_v12  ;;  %8340 = vst [vmem:[#allocation42_spill] sm:$0xff] %v6419_v15  ;;  %8341 = vst [vmem:[#allocation43_spill] sm:$0xff] %v6422_v16  ;;  %v6425_v12 = vld [vmem:[#allocation6 + $0xe8] ss:$16 sps:$4 sm:$0xff]  }
 0xac3   : > { %8342 = vst [vmem:[#allocation44_spill] sm:$0xff] %v6425_v12 }
 0xac4   : > { %1418 = vmatpush1.bf16.msra.mxu0 %v6410_v13  ;;  %v6428_v13 = vld [vmem:[#allocation7 + $0x40] sm:$0xff]  }
 0xac5   : > { %1459 = vmatpush1.bf16.msra.mxu1 %v6413_v14  ;;  %1419 = vmatprep.subr.bf16.mxu0 %v6416_v11  ;;  %8343 = vst [vmem:[#allocation45_spill] sm:$0xff] %v6428_v13  ;;  %v6431_v14 = vld [vmem:[#allocation7 + $0xc0] sm:$0xff]  }
 0xac6   : > { %1460 = vmatprep.subr.bf16.mxu1 %v6419_v15  ;;  %8344 = vst [vmem:[#allocation51_spill] sm:$0xff] %v6431_v14 }
 0xac8   : > { %1420 = vmatpush1.bf16.msra.mxu0 %v6422_v16 }
 0xac9   : > { %1461 = vmatpush1.bf16.msra.mxu1 %v6425_v12  ;;  %4513 = vmatprep.subr.bf16.mxu0 %v6428_v13 }
 0xaca   : > { %4535 = vmatprep.subr.bf16.mxu1 %v6431_v14 }
 0xb7e   : > { %v4485_v11 = vpop.f32.mrb[20].mxu0 }
 0xb7f   : > { %v4507_v10 = vpop.f32.mrb[20].mxu1  ;;  %v4486_v8 = vpop.f32.mrb[21].mxu0 }
 0xb80   : > { %v4487_v15 = vadd.f32 %v4486_v8, %v4485_v11  ;;  %v4508_v4 = vpop.f32.mrb[21].mxu1  ;;  %v4488_v3 = vpop.f32.mrb[22].mxu0 }
 0xb81   : > { %v4509_v62 = vadd.f32 %v4508_v4, %v4507_v10  ;;  %v4510_v16 = vpop.f32.mrb[22].mxu1  ;;  %v4489_v61 = vpop.f32.mrb[23].mxu0  ;;  %v1602_v3 = vmul.f32 2.0, %v6289_v9  ;;  %v6439_v4 = vstv %s6202_s19 }
 0xb82   : > { %v1334_v12 = vadd.f32 %v4487_v15, %v5906_v39  ;;  %v4511_v19 = vpop.f32.mrb[23].mxu1  ;;  %8345 = vst [vmem:[#allocation52_spill] sm:$0xff] %v6439_v4 }
 0xb83   : > { %v8346_v19 = vld [vmem:[#allocation50_spill] sm:$0xff] }
 0xb84   : > { %v1374_v18 = vadd.f32 %v4509_v62, %v1334_v12  ;;  %v1603_v62 = vadd.f32 %v1602_v3, %v8346_v19  ;;  %v8348_v19 = vld [vmem:[#allocation19_spill] sm:$0xff] }
 0xb86   : > { %v1380_v7 = vmul.f32 1.442695, %v1374_v18  ;;  %vm1379_vm9 = vcmp.gt.f32.partialorder %v1374_v18, 0.0 }
 0xb88   : > { %5281 = vpow2.f32 %v1380_v7 }
 0xb92   : > { %v5282_v13 = vpop.eup %5281 }
 0xb93   : > { %v4290_v36 = vadd.f32 -1.0, %v5282_v13 }
 0xb95   : > { %v1383_v14 = vsel %vm1379_vm9, %v1374_v18, %v4290_v36 }
 0xb96   : > { %v1384_v45 = vmul.f32 %v1383_v14, %v5916_v41 }
 0xb98   : > { %v1385_v8 = vsel %vm961_vm13, %v1384_v45, 0.0 }
 0xb99   : > { %1386 = vadd.xlane.f32.xlu1 %v1385_v8 }
 0xc26   : > { %v1387_v61 = vpop.xlane.xlu1 %1386 }
 0xc27   : > { %v1388_v10 = vadd.f32 %v1387_v61, %v5921_v42 }
 0xc29   : > { %v1390_v7 = vmul.f32 %v6439_v4, %v1388_v10  ;;  %v1604_v11 = vmul.f32 2.0, %v1388_v10  ;;  %v8347_v10 = vmov 0   ;;  %v6588_v4 = vld [vmem:[#allocation7 + $0x68] sm:$0xff]  }
 0xc2b   : > { %v1391_v15 = vadd.f32 %v5769_v49, %v1390_v7  ;;  %v6445_v36 = vadd.f32 %v1604_v11, %v1603_v62  ;;  %v8349_v62 = vld [vmem:[#allocation20_spill] sm:$0xff]  ;;  %v8350_v7 = vld [vmem:[#allocation21_spill] sm:$0xff]  ;;  %v8351_v11 = vld [vmem:[#allocation22_spill] sm:$0xff] }
 0xc2d   : > { %1394 = vperm.xlu1 %5166, %v1391_v15   ;;  %v8352_v15 = vld [vmem:[#allocation23_spill] sm:$0xff] }
 0xcac   : > { %v1395_v18 = vpop.permute.xlu1 %1394 }
 0xcad   : > { %v1397_v45 = vmul.f32 %v1395_v18, %v5896_v37  ;;  %v8353_v18 = vld [vmem:[#allocation24_spill] sm:$0xff] }
 0xcaf   : > { %v1398_v9 = vadd.f32 %v1397_v45, %v5901_v38  ;;  %v8354_v45 = vld [vmem:[#allocation25_spill] sm:$0xff] }
 0xcb1   : > { %v1400_v16 = vmul.f32 1.442695, %v1398_v9  ;;  %vm1399_vm10 = vcmp.gt.f32.partialorder %v1398_v9, 0.0 }
 0xcb3   : > { %5283 = vpow2.f32 %v1400_v16  ;;  %v8356_v16 = vld [vmem:[#allocation27_spill] sm:$0xff] }
 0xcbd   : > { %v5284_v12 = vpop.eup %5283 }
 0xcbe   : > { %v4291_v13 = vadd.f32 -1.0, %v5284_v12  ;;  %v8357_v12 = vld [vmem:[#allocation28_spill] sm:$0xff] }
 0xcc0   : > { %v1403_v14 = vsel %vm1399_vm10, %v1398_v9, %v4291_v13  ;;  %v8355_v9 = vld [vmem:[#allocation26_spill] sm:$0xff]  ;;  %v8358_v13 = vld [vmem:[#allocation29_spill] sm:$0xff] }
 0xcc1   : > { %v1404_v8 = vpack.c.bf16 %v1403_v14, %v1403_v14  ;;  %v8359_v14 = vld [vmem:[#allocation30_spill] sm:$0xff] }
 0xcc3   : > { %1438 = vmatmul.mubr.bf16.vlgmr.msra.gmra.mrb[24].mxu0 %v1404_v8  ;;  %1479 = vmatmul.mubr.bf16.vlgmr.msra.gmra.mrb[24].mxu1 %v1404_v8  ;;  %v8360_v8 = vld [vmem:[#allocation31_spill] sm:$0xff] }
 0xcc4   : > { %4514 = vmatpush3.bf16.msra.mxu0 %v6051_v29  ;;  %4536 = vmatpush3.bf16.msra.mxu1 %v6053_v30 }
 0xcc5   : > { %4515 = vmatprep.subr.bf16.mxu0 %v6055_v32  ;;  %4537 = vmatprep.subr.bf16.mxu1 %v8285_v20 }
 0xcc8   : > { %4516 = vmatpush3.bf16.msra.mxu0 %v8286_v21  ;;  %4538 = vmatpush3.bf16.msra.mxu1 %v8287_v33 }
 0xcc9   : > { %4517 = vmatprep.subr.bf16.mxu0 %v8288_v40  ;;  %4539 = vmatprep.subr.bf16.mxu1 %v8289_v43 }
 0xccc   : > { %4518 = vmatpush3.bf16.msra.mxu0 %v8290_v52  ;;  %4540 = vmatpush3.bf16.msra.mxu1 %v8291_v48 }
 0xccd   : > { %4519 = vmatprep.subr.bf16.mxu0 %v8292_v23  ;;  %4541 = vmatprep.subr.bf16.mxu1 %v8293_v26 }
 0xcd0   : > { %4520 = vmatpush3.bf16.msra.mxu0 %v8294_v27  ;;  %4542 = vmatpush3.bf16.msra.mxu1 %v8295_v46 }
 0xcd1   : > { %4521 = vmatprep.subr.bf16.mxu0 %v8296_v35  ;;  %4543 = vmatprep.subr.bf16.mxu1 %v8297_v25 }
 0xcd4   : > { %4522 = vmatpush3.bf16.msra.mxu0 %v8298_v31  ;;  %4544 = vmatpush3.bf16.msra.mxu1 %v8299_v24 }
 0xcd5   : > { %4523 = vmatprep.subr.bf16.mxu0 %v8300_v51  ;;  %4545 = vmatprep.subr.bf16.mxu1 %v8301_v44 }
 0xcd8   : > { %4524 = vmatpush3.bf16.msra.mxu0 %v8302_v28  ;;  %4546 = vmatpush3.bf16.msra.mxu1 %v8303_v34 }
 0xcd9   : > { %4525 = vmatprep.subr.bf16.mxu0 %v8304_v53  ;;  %4547 = vmatprep.subr.bf16.mxu1 %v8305_v47 }
 0xcdc   : > { %4526 = vmatpush3.bf16.msra.mxu0 %v8306_v22  ;;  %4548 = vmatpush3.bf16.msra.mxu1 %v8307_v54 }
 0xcdd   : > { %4527 = vmatprep.subr.bf16.mxu0 %v8308_v55  ;;  %4549 = vmatprep.subr.bf16.mxu1 %v8309_v56 }
 0xce0   : > { %4528 = vmatpush3.bf16.msra.mxu0 %v8310_v57  ;;  %4550 = vmatpush3.bf16.msra.mxu1 %v8311_v58 }
 0xce1   : > { %1623 = vmatprep.subr.bf16.mxu0 %v6326_v59  ;;  %1664 = vmatprep.subr.bf16.mxu1 %v6329_v60 }
 0xd96   : > { %v1439_v29 = vpop.f32.mrb[24].mxu0  ;;  %v1480_v30 = vpop.f32.mrb[24].mxu1 }
 0xd97   : > { %v1440_v32 = vadd.f32 %v1439_v29, %v8314_v63  ;;  %v1481_v20 = vadd.f32 %v1480_v30, %v8315_v1  ;;  %v1441_v21 = vpop.f32.mrb[25].mxu0  ;;  %v1482_v33 = vpop.f32.mrb[25].mxu1  ;;  %v8361_v29 = vld [vmem:[#allocation32_spill] sm:$0xff]  ;;  %v8362_v30 = vld [vmem:[#allocation33_spill] sm:$0xff] }
 0xd98   : > { %v1442_v40 = vadd.f32 %v1441_v21, %v6151_v50  ;;  %v1483_v43 = vadd.f32 %v1482_v33, %v8316_v6  ;;  %v1443_v52 = vpop.f32.mrb[26].mxu0  ;;  %v1484_v48 = vpop.f32.mrb[26].mxu1  ;;  %v8365_v21 = vld [vmem:[#allocation36_spill] sm:$0xff]  ;;  %v8366_v33 = vld [vmem:[#allocation37_spill] sm:$0xff] }
 0xd99   : > { %v1491_v23 = vmul.f32 1.442695, %v1440_v32  ;;  %v1495_v26 = vmul.f32 1.442695, %v1481_v20  ;;  %v1444_v35 = vpop.f32.mrb[27].mxu0  ;;  %v1485_v25 = vpop.f32.mrb[27].mxu1 }
 0xd9a   : > { %v1493_v27 = vmul.f32 1.442695, %v1442_v40  ;;  %v1497_v46 = vmul.f32 1.442695, %v1483_v43  ;;  %vm1487_vm11 = vcmp.gt.f32.partialorder %v1440_v32, 0.0  ;;  %vm1489_vm12 = vcmp.gt.f32.partialorder %v1481_v20, 0.0 }
 0xd9b   : > { %5285 = vpow2.f32 %v1491_v23  ;;  %vm1488_vm14 = vcmp.gt.f32.partialorder %v1442_v40, 0.0  ;;  %vm1490_vm15 = vcmp.gt.f32.partialorder %v1483_v43, 0.0  ;;  %v8369_v52 = vld [vmem:[#allocation40_spill] sm:$0xff]  ;;  %v8370_v48 = vld [vmem:[#allocation41_spill] sm:$0xff]  ;;  %v8371_v23 = vld [vmem:[#allocation42_spill] sm:$0xff] }
 0xd9c   : > { %5287 = vpow2.f32 %v1495_v26  ;;  %v8372_v26 = vld [vmem:[#allocation43_spill] sm:$0xff] }
 0xd9d   : > { %5289 = vpow2.f32 %v1493_v27  ;;  %v8373_v27 = vld [vmem:[#allocation44_spill] sm:$0xff]  ;;  %v8375_v35 = vld [vmem:[#allocation51_spill] sm:$0xff] }
 0xd9e   : > { %5291 = vpow2.f32 %v1497_v46  ;;  %v8374_v46 = vld [vmem:[#allocation45_spill] sm:$0xff] }
 0xda5   : > { %v5286_v31 = vpop.eup %5285 }
 0xda6   : > { %v5288_v24 = vpop.eup %5287  ;;  %v4292_v51 = vadd.f32 -1.0, %v5286_v31 }
 0xda7   : > { %v5290_v44 = vpop.eup %5289  ;;  %v4294_v28 = vadd.f32 -1.0, %v5288_v24 }
 0xda8   : > { %v5292_v34 = vpop.eup %5291  ;;  %v4293_v53 = vadd.f32 -1.0, %v5290_v44  ;;  %v1503_v47 = vsel %vm1487_vm11, %v1440_v32, %v4292_v51  ;;  %v8363_v32 = vld [vmem:[#allocation34_spill] sm:$0xff] }
 0xda9   : > { %v4295_v22 = vadd.f32 -1.0, %v5292_v34  ;;  %v1505_v54 = vsel %vm1489_vm12, %v1481_v20, %v4294_v28  ;;  %v1507_v58 = vpack.c.bf16 %v1503_v47, %v1503_v47  ;;  %v8364_v20 = vld [vmem:[#allocation35_spill] sm:$0xff]  ;;  %8392 = vst [vmem:[#allocation34_spill] sm:$0xff] %v6588_v4 }
 0xdaa   : > { %v1504_v55 = vsel %vm1488_vm14, %v1442_v40, %v4293_v53  ;;  %v1509_v61 = vpack.c.bf16 %v1505_v54, %v1505_v54  ;;  %v8367_v40 = vld [vmem:[#allocation38_spill] sm:$0xff] }
 0xdab   : > { %v1508_v56 = vpack.c.bf16 %v1504_v55, %v1504_v55  ;;  %v1506_v57 = vsel %vm1490_vm15, %v1483_v43, %v4295_v22  ;;  %v8368_v43 = vld [vmem:[#allocation39_spill] sm:$0xff] }
 0xdac   : > { %v1510_v3 = vpack.c.bf16 %v1506_v57, %v1506_v57 }
 0xdad   : > { %1543 = vmatprep.mubr.bf16.mxu0 %v1508_v56 }
 0xdae   : > { %1583 = vmatprep.mubr.bf16.mxu1 %v1510_v3  ;;  %1544 = vmatmul.mubr.bf16.vlgmr.msra.gmra.mrb[28].mxu0 %v1507_v58 }
 0xdaf   : > { %1584 = vmatmul.mubr.bf16.vlgmr.msra.gmra.mrb[28].mxu1 %v1509_v61  ;;  %1624 = vmatpush1.bf16.msra.mxu0 %v6336_v17 }
 0xdb0   : > { %1665 = vmatpush1.bf16.msra.mxu1 %v6339_v0  ;;  %1625 = vmatprep.subr.bf16.mxu0 %v6342_v2 }
 0xdb1   : > { %1666 = vmatprep.subr.bf16.mxu1 %v6345_v5  ;;  %1655 = vmatprep.mubr.bf16.mxu0 %v8347_v10 }
 0xdb2   : > { %1696 = vmatprep.mubr.bf16.mxu1 %v8347_v10 }
 0xdb3   : > { %1626 = vmatpush1.bf16.msra.mxu0 %v8348_v19 }
 0xdb4   : > { %1667 = vmatpush1.bf16.msra.mxu1 %v8349_v62  ;;  %1627 = vmatprep.subr.bf16.mxu0 %v8350_v7 }
 0xdb5   : > { %1668 = vmatprep.subr.bf16.mxu1 %v8351_v11 }
 0xdb7   : > { %1628 = vmatpush1.bf16.msra.mxu0 %v8352_v15 }
 0xdb8   : > { %1669 = vmatpush1.bf16.msra.mxu1 %v8353_v18  ;;  %1629 = vmatprep.subr.bf16.mxu0 %v8354_v45 }
 0xdb9   : > { %1670 = vmatprep.subr.bf16.mxu1 %v8355_v9 }
 0xdbb   : > { %1630 = vmatpush1.bf16.msra.mxu0 %v8356_v16 }
 0xdbc   : > { %1671 = vmatpush1.bf16.msra.mxu1 %v8357_v12  ;;  %1631 = vmatprep.subr.bf16.mxu0 %v8358_v13 }
 0xdbd   : > { %1672 = vmatprep.subr.bf16.mxu1 %v8359_v14 }
 0xdbf   : > { %1632 = vmatpush1.bf16.msra.mxu0 %v8360_v8 }
 0xdc0   : > { %1673 = vmatpush1.bf16.msra.mxu1 %v8361_v29  ;;  %1633 = vmatprep.subr.bf16.mxu0 %v8362_v30 }
 0xdc1   : > { %1674 = vmatprep.subr.bf16.mxu1 %v8363_v32 }
 0xdc3   : > { %1634 = vmatpush1.bf16.msra.mxu0 %v8364_v20 }
 0xdc4   : > { %1675 = vmatpush1.bf16.msra.mxu1 %v8365_v21  ;;  %1635 = vmatprep.subr.bf16.mxu0 %v8366_v33 }
 0xdc5   : > { %1676 = vmatprep.subr.bf16.mxu1 %v8367_v40 }
 0xdc7   : > { %1636 = vmatpush1.bf16.msra.mxu0 %v8368_v43 }
 0xdc8   : > { %1677 = vmatpush1.bf16.msra.mxu1 %v8369_v52  ;;  %1637 = vmatprep.subr.bf16.mxu0 %v8370_v48 }
 0xdc9   : > { %1678 = vmatprep.subr.bf16.mxu1 %v8371_v23 }
 0xdcb   : > { %1638 = vmatpush1.bf16.msra.mxu0 %v8372_v26 }
 0xdcc   : > { %1679 = vmatpush1.bf16.msra.mxu1 %v8373_v27  ;;  %4557 = vmatprep.subr.bf16.mxu0 %v8374_v46 }
 0xdcd   : > { %4579 = vmatprep.subr.bf16.mxu1 %v8375_v35 }
 0xe81   : > { %v4529_v25 = vpop.f32.mrb[28].mxu0 }
 0xe82   : > { %v4551_v31 = vpop.f32.mrb[28].mxu1  ;;  %v4530_v24 = vpop.f32.mrb[29].mxu0 }
 0xe83   : > { %v4531_v51 = vadd.f32 %v4530_v24, %v4529_v25  ;;  %v4552_v44 = vpop.f32.mrb[29].mxu1  ;;  %v4532_v28 = vpop.f32.mrb[30].mxu0 }
 0xe84   : > { %v4553_v34 = vadd.f32 %v4552_v44, %v4551_v31  ;;  %v4554_v53 = vpop.f32.mrb[30].mxu1  ;;  %v4533_v47 = vpop.f32.mrb[31].mxu0  ;;  %v6524_v44 = vstv %s1601_s21 }
 0xe85   : > { %v1546_v22 = vadd.f32 %v4531_v51, %v5906_v39  ;;  %v4555_v54 = vpop.f32.mrb[31].mxu1  ;;  %8376 = vst [vmem:[#allocation50_spill] sm:$0xff] %v6524_v44 }
 0xe87   : > { %v1586_v55 = vadd.f32 %v4553_v34, %v1546_v22 }
 0xe89   : > { %v1592_v56 = vmul.f32 1.442695, %v1586_v55  ;;  %vm1591_vm0 = vcmp.gt.f32.partialorder %v1586_v55, 0.0 }
 0xe8b   : > { %5293 = vpow2.f32 %v1592_v56 }
 0xe95   : > { %v5294_v57 = vpop.eup %5293 }
 0xe96   : > { %v4296_v58 = vadd.f32 -1.0, %v5294_v57 }
 0xe98   : > { %v1595_v3 = vsel %vm1591_vm0, %v1586_v55, %v4296_v58 }
 0xe99   : > { %v1596_v61 = vmul.f32 %v1595_v3, %v5916_v41  ;;  %v6540_v3 = vld [vmem:[#allocation7 + $0x48] sm:$0xff]  }
 0xe9b   : > { %v1597_v25 = vsel %vm961_vm13, %v1596_v61, 0.0  ;;  %v6543_v61 = vld [vmem:[#allocation7 + $0xc8] sm:$0xff]  }
 0xe9c   : > { %1598 = vadd.xlane.f32.xlu0 %v1597_v25  ;;  %8377 = vst [vmem:[#allocation19_spill] sm:$0xff] %v6543_v61  ;;  %v6546_v25 = vld [vmem:[#allocation7 + $0x8] sm:$0xff]  }
 0xe9d   : > { %8378 = vst [vmem:[#allocation20_spill] sm:$0xff] %v6546_v25 }
 0xf29   : > { %v1599_v24 = vpop.xlane.xlu0 %1598 }
 0xf2a   : > { %v1600_v31 = vadd.f32 %v1599_v24, %v5921_v42  ;;  %v6549_v24 = vld [vmem:[#allocation7 + $0x88] sm:$0xff]  }
 0xf2b   : > { %8379 = vst [vmem:[#allocation21_spill] sm:$0xff] %v6549_v24 }
 0xf2c   : > { %v1606_v51 = vadd.f32 %v6445_v36, %v1600_v31  ;;  %v6534_v36 = vld [vmem:[#allocation7] sm:$0xff]   ;;  %v6552_v31 = vld [vmem:[#allocation7 + $0x50] sm:$0xff]  }
 0xf2d   : > { %8380 = vst [vmem:[#allocation22_spill] sm:$0xff] %v6552_v31 }
 0xf2e   : > { %v1608_v28 = vmul.f32 %v6524_v44, %v1606_v51  ;;  %v6555_v51 = vld [vmem:[#allocation7 + $0xd0] sm:$0xff]   ;;  %v6585_v44 = vld [vmem:[#allocation7 + $0xa0] sm:$0xff]  }
 0xf2f   : > { %8381 = vst [vmem:[#allocation23_spill] sm:$0xff] %v6555_v51  ;;  %8391 = vst [vmem:[#allocation33_spill] sm:$0xff] %v6585_v44 }
 0xf30   : > { %v6529_v34 = vadd.f32 %v5769_v49, %v1608_v28  ;;  %v6537_v49 = vld [vmem:[#allocation7 + $0x80] sm:$0xff]   ;;  %v6558_v28 = vld [vmem:[#allocation7 + $0x10] sm:$0xff]  }
 0xf31   : > { %8382 = vst [vmem:[#allocation24_spill] sm:$0xff] %v6558_v28 }
 0xf32   : > { %1612 = vperm.xlu1 %5166, %v6529_v34  }
 0xfb1   : > { %v1613_v53 = vpop.permute.xlu1 %1612 }
 0xfb2   : > { %v1615_v47 = vmul.f32 %v1613_v53, %v5896_v37  ;;  %v6561_v53 = vld [vmem:[#allocation7 + $0x90] sm:$0xff]  }
 0xfb3   : > { %8383 = vst [vmem:[#allocation25_spill] sm:$0xff] %v6561_v53 }
 0xfb4   : > { %v1616_v22 = vadd.f32 %v1615_v47, %v5901_v38  ;;  %v6564_v47 = vld [vmem:[#allocation7 + $0x58] sm:$0xff]  }
 0xfb5   : > { %8384 = vst [vmem:[#allocation26_spill] sm:$0xff] %v6564_v47 }
 0xfb6   : > { %v1618_v54 = vmul.f32 1.442695, %v1616_v22  ;;  %vm1617_vm1 = vcmp.gt.f32.partialorder %v1616_v22, 0.0 }
 0xfb8   : > { %5295 = vpow2.f32 %v1618_v54  ;;  %v6570_v54 = vld [vmem:[#allocation7 + $0x18] sm:$0xff]  }
 0xfb9   : > { %8386 = vst [vmem:[#allocation28_spill] sm:$0xff] %v6570_v54 }
 0xfc2   : > { %v5296_v55 = vpop.eup %5295 }
 0xfc3   : > { %v4297_v56 = vadd.f32 -1.0, %v5296_v55  ;;  %v6573_v55 = vld [vmem:[#allocation7 + $0x98] sm:$0xff]  }
 0xfc4   : > { %8387 = vst [vmem:[#allocation29_spill] sm:$0xff] %v6573_v55 }
 0xfc5   : > { %v1621_v57 = vsel %vm1617_vm1, %v1616_v22, %v4297_v56  ;;  %v6567_v22 = vld [vmem:[#allocation7 + $0xd8] sm:$0xff]   ;;  %v6576_v56 = vld [vmem:[#allocation7 + $0x60] sm:$0xff]  }
 0xfc6   : > { %v1622_v58 = vpack.c.bf16 %v1621_v57, %v1621_v57  ;;  %8385 = vst [vmem:[#allocation27_spill] sm:$0xff] %v6567_v22  ;;  %8388 = vst [vmem:[#allocation30_spill] sm:$0xff] %v6576_v56  ;;  %v6579_v57 = vld [vmem:[#allocation7 + $0xe0] sm:$0xff]  }
 0xfc7   : > { %8389 = vst [vmem:[#allocation31_spill] sm:$0xff] %v6579_v57 }
 0xfc8   : > { %1656 = vmatmul.mubr.bf16.vlgmr.msra.gmra.mrb[32].mxu0 %v1622_v58  ;;  %1697 = vmatmul.mubr.bf16.vlgmr.msra.gmra.mrb[32].mxu1 %v1622_v58  ;;  %v6582_v58 = vld [vmem:[#allocation7 + $0x20] sm:$0xff]  }
 0xfc9   : > { %4558 = vmatpush3.bf16.msra.mxu0 %v6534_v36  ;;  %4580 = vmatpush3.bf16.msra.mxu1 %v6537_v49  ;;  %8390 = vst [vmem:[#allocation32_spill] sm:$0xff] %v6582_v58 }
 0xfca   : > { %4559 = vmatprep.subr.bf16.mxu0 %v6540_v3  ;;  %4581 = vmatprep.subr.bf16.mxu1 %v6543_v61 }
 0xfcd   : > { %4560 = vmatpush3.bf16.msra.mxu0 %v6546_v25  ;;  %4582 = vmatpush3.bf16.msra.mxu1 %v6549_v24 }
 0xfce   : > { %4561 = vmatprep.subr.bf16.mxu0 %v6552_v31  ;;  %4583 = vmatprep.subr.bf16.mxu1 %v6555_v51 }
 0xfd1   : > { %4562 = vmatpush3.bf16.msra.mxu0 %v6558_v28  ;;  %4584 = vmatpush3.bf16.msra.mxu1 %v6561_v53 }
 0xfd2   : > { %4563 = vmatprep.subr.bf16.mxu0 %v6564_v47  ;;  %4585 = vmatprep.subr.bf16.mxu1 %v6567_v22 }
 0xfd5   : > { %4564 = vmatpush3.bf16.msra.mxu0 %v6570_v54  ;;  %4586 = vmatpush3.bf16.msra.mxu1 %v6573_v55  ;;  %v6591_v55 = vld [vmem:[#allocation7 + $0xe8] sm:$0xff]  }
 0xfd6   : > { %4565 = vmatprep.subr.bf16.mxu0 %v6576_v56  ;;  %4587 = vmatprep.subr.bf16.mxu1 %v6579_v57  ;;  %8393 = vst [vmem:[#allocation35_spill] sm:$0xff] %v6591_v55  ;;  %v6594_v56 = vld [vmem:[#allocation7 + $0x28] sm:$0xff]  }
 0xfd7   : > { %8394 = vst [vmem:[#allocation36_spill] sm:$0xff] %v6594_v56  ;;  %v6597_v57 = vld [vmem:[#allocation7 + $0xa8] sm:$0xff]  }
 0xfd8   : > { %8395 = vst [vmem:[#allocation37_spill] sm:$0xff] %v6597_v57 }
 0xfd9   : > { %4566 = vmatpush3.bf16.msra.mxu0 %v6582_v58  ;;  %4588 = vmatpush3.bf16.msra.mxu1 %v6585_v44  ;;  %v6600_v58 = vld [vmem:[#allocation7 + $0x70] sm:$0xff]  }
 0xfda   : > { %4567 = vmatprep.subr.bf16.mxu0 %v6588_v4  ;;  %4589 = vmatprep.subr.bf16.mxu1 %v6591_v55  ;;  %8396 = vst [vmem:[#allocation38_spill] sm:$0xff] %v6600_v58  ;;  %v6603_v44 = vld [vmem:[#allocation7 + $0xf0] sm:$0xff]  }
 0xfdb   : > { %8397 = vst [vmem:[#allocation39_spill] sm:$0xff] %v6603_v44  ;;  %v6606_v4 = vld [vmem:[#allocation7 + $0x30] sm:$0xff]  }
 0xfdc   : > { %8398 = vst [vmem:[#allocation40_spill] sm:$0xff] %v6606_v4  ;;  %v6609_v55 = vld [vmem:[#allocation7 + $0xb0] sm:$0xff]  }
 0xfdd   : > { %4568 = vmatpush3.bf16.msra.mxu0 %v6594_v56  ;;  %4590 = vmatpush3.bf16.msra.mxu1 %v6597_v57  ;;  %8399 = vst [vmem:[#allocation41_spill] sm:$0xff] %v6609_v55  ;;  %v6612_v56 = vld [vmem:[#allocation7 + $0x78] sm:$0xff]  }
 0xfde   : > { %4569 = vmatprep.subr.bf16.mxu0 %v6600_v58  ;;  %4591 = vmatprep.subr.bf16.mxu1 %v6603_v44  ;;  %8400 = vst [vmem:[#allocation42_spill] sm:$0xff] %v6612_v56  ;;  %v6615_v57 = vld [vmem:[#allocation7 + $0xf8] sm:$0xff]  }
 0xfdf   : > { %8401 = vst [vmem:[#allocation43_spill] sm:$0xff] %v6615_v57  ;;  %v6618_v58 = vld [vmem:[#allocation7 + $0x38] sm:$0xff]  }
 0xfe0   : > { %8402 = vst [vmem:[#allocation44_spill] sm:$0xff] %v6618_v58  ;;  %v6621_v44 = vld [vmem:[#allocation7 + $0xb8] sm:$0xff]  }
 0xfe1   : > { %4570 = vmatpush3.bf16.msra.mxu0 %v6606_v4  ;;  %4592 = vmatpush3.bf16.msra.mxu1 %v6609_v55  ;;  %8403 = vst [vmem:[#allocation45_spill] sm:$0xff] %v6621_v44 }
 0xfe2   : > { %4571 = vmatprep.subr.bf16.mxu0 %v6612_v56  ;;  %4593 = vmatprep.subr.bf16.mxu1 %v6615_v57 }
 0xfe5   : > { %4572 = vmatpush3.bf16.msra.mxu0 %v6618_v58  ;;  %4594 = vmatpush3.bf16.msra.mxu1 %v6621_v44 }
 0xfe6   : > { %1834 = vmatprep.subr.bf16.mxu0 %v6326_v59  ;;  %1875 = vmatprep.subr.bf16.mxu1 %v6329_v60 }
0x109b   : > { %v1657_v55 = vpop.f32.mrb[32].mxu0  ;;  %v1698_v4 = vpop.f32.mrb[32].mxu1 }
0x109c   : > { %v1658_v56 = vadd.f32 %v1657_v55, %v8314_v63  ;;  %v1699_v54 = vadd.f32 %v1698_v4, %v8315_v1  ;;  %v1659_v22 = vpop.f32.mrb[33].mxu0  ;;  %v1700_v57 = vpop.f32.mrb[33].mxu1 }
0x109d   : > { %v1660_v47 = vadd.f32 %v1659_v22, %v6151_v50  ;;  %v1701_v58 = vadd.f32 %v1700_v57, %v8316_v6  ;;  %v1661_v53 = vpop.f32.mrb[34].mxu0  ;;  %v1702_v28 = vpop.f32.mrb[34].mxu1 }
0x109e   : > { %v1709_v51 = vmul.f32 1.442695, %v1658_v56  ;;  %v1713_v44 = vmul.f32 1.442695, %v1699_v54  ;;  %v1662_v60 = vpop.f32.mrb[35].mxu0  ;;  %v1703_v24 = vpop.f32.mrb[35].mxu1 }
0x109f   : > { %v1711_v31 = vmul.f32 1.442695, %v1660_v47  ;;  %v1715_v59 = vmul.f32 1.442695, %v1701_v58  ;;  %vm1705_vm2 = vcmp.gt.f32.partialorder %v1658_v56, 0.0  ;;  %vm1707_vm3 = vcmp.gt.f32.partialorder %v1699_v54, 0.0 }
0x10a0   : > { %5297 = vpow2.f32 %v1709_v51  ;;  %vm1706_vm4 = vcmp.gt.f32.partialorder %v1660_v47, 0.0  ;;  %vm1708_vm5 = vcmp.gt.f32.partialorder %v1701_v58, 0.0 }
0x10a1   : > { %5299 = vpow2.f32 %v1713_v44 }
0x10a2   : > { %5301 = vpow2.f32 %v1711_v31 }
0x10a3   : > { %5303 = vpow2.f32 %v1715_v59 }
0x10aa   : > { %v5298_v55 = vpop.eup %5297 }
0x10ab   : > { %v5300_v4 = vpop.eup %5299  ;;  %v4298_v1 = vadd.f32 -1.0, %v5298_v55 }
0x10ac   : > { %v5302_v63 = vpop.eup %5301  ;;  %v4300_v25 = vadd.f32 -1.0, %v5300_v4 }
0x10ad   : > { %v5304_v22 = vpop.eup %5303  ;;  %v4299_v57 = vadd.f32 -1.0, %v5302_v63  ;;  %v1721_v53 = vsel %vm1705_vm2, %v1658_v56, %v4298_v1 }
0x10ae   : > { %v4301_v28 = vadd.f32 -1.0, %v5304_v22  ;;  %v1723_v6 = vsel %vm1707_vm3, %v1699_v54, %v4300_v25  ;;  %v1725_v44 = vpack.c.bf16 %v1721_v53, %v1721_v53 }
0x10af   : > { %v1722_v51 = vsel %vm1706_vm4, %v1660_v47, %v4299_v57  ;;  %v1727_v59 = vpack.c.bf16 %v1723_v6, %v1723_v6 }
0x10b0   : > { %v1726_v60 = vpack.c.bf16 %v1722_v51, %v1722_v51  ;;  %v1724_v24 = vsel %vm1708_vm5, %v1701_v58, %v4301_v28 }
0x10b1   : > { %v1728_v31 = vpack.c.bf16 %v1724_v24, %v1724_v24 }
0x10b2   : > { %1761 = vmatprep.mubr.bf16.mxu0 %v1726_v60 }
0x10b3   : > { %1801 = vmatprep.mubr.bf16.mxu1 %v1728_v31  ;;  %1762 = vmatmul.mubr.bf16.vlgmr.msra.gmra.mrb[36].mxu0 %v1725_v44 }
0x10b4   : > { %1802 = vmatmul.mubr.bf16.vlgmr.msra.gmra.mrb[36].mxu1 %v1727_v59  ;;  %1835 = vmatpush1.bf16.msra.mxu0 %v6336_v17 }
0x10b5   : > { %1876 = vmatpush1.bf16.msra.mxu1 %v6339_v0  ;;  %1836 = vmatprep.subr.bf16.mxu0 %v6342_v2 }
0x10b6   : > { %1877 = vmatprep.subr.bf16.mxu1 %v6345_v5  ;;  %1866 = vmatprep.mubr.bf16.mxu0 %v8347_v10 }
0x10b7   : > { %1907 = vmatprep.mubr.bf16.mxu1 %v8347_v10 }
0x10b8   : > { %1837 = vmatpush1.bf16.msra.mxu0 %v8348_v19 }
0x10b9   : > { %1878 = vmatpush1.bf16.msra.mxu1 %v8349_v62  ;;  %1838 = vmatprep.subr.bf16.mxu0 %v8350_v7 }
0x10ba   : > { %1879 = vmatprep.subr.bf16.mxu1 %v8351_v11 }
0x10bc   : > { %1839 = vmatpush1.bf16.msra.mxu0 %v8352_v15 }
0x10bd   : > { %1880 = vmatpush1.bf16.msra.mxu1 %v8353_v18  ;;  %1840 = vmatprep.subr.bf16.mxu0 %v8354_v45 }
0x10be   : > { %1881 = vmatprep.subr.bf16.mxu1 %v8355_v9 }
0x10c0   : > { %1841 = vmatpush1.bf16.msra.mxu0 %v8356_v16 }
0x10c1   : > { %1882 = vmatpush1.bf16.msra.mxu1 %v8357_v12  ;;  %1842 = vmatprep.subr.bf16.mxu0 %v8358_v13 }
0x10c2   : > { %1883 = vmatprep.subr.bf16.mxu1 %v8359_v14 }
0x10c4   : > { %1843 = vmatpush1.bf16.msra.mxu0 %v8360_v8 }
0x10c5   : > { %1884 = vmatpush1.bf16.msra.mxu1 %v8361_v29  ;;  %1844 = vmatprep.subr.bf16.mxu0 %v8362_v30 }
0x10c6   : > { %1885 = vmatprep.subr.bf16.mxu1 %v8363_v32 }
0x10c8   : > { %1845 = vmatpush1.bf16.msra.mxu0 %v8364_v20 }
0x10c9   : > { %1886 = vmatpush1.bf16.msra.mxu1 %v8365_v21  ;;  %1846 = vmatprep.subr.bf16.mxu0 %v8366_v33 }
0x10ca   : > { %1887 = vmatprep.subr.bf16.mxu1 %v8367_v40 }
0x10cc   : > { %1847 = vmatpush1.bf16.msra.mxu0 %v8368_v43 }
0x10cd   : > { %1888 = vmatpush1.bf16.msra.mxu1 %v8369_v52  ;;  %1848 = vmatprep.subr.bf16.mxu0 %v8370_v48 }
0x10ce   : > { %1889 = vmatprep.subr.bf16.mxu1 %v8371_v23 }
0x10d0   : > { %1849 = vmatpush1.bf16.msra.mxu0 %v8372_v26 }
0x10d1   : > { %1890 = vmatpush1.bf16.msra.mxu1 %v8373_v27  ;;  %4601 = vmatprep.subr.bf16.mxu0 %v8374_v46 }
0x10d2   : > { %4623 = vmatprep.subr.bf16.mxu1 %v8375_v35 }
0x1186   : > { %v4573_v63 = vpop.f32.mrb[36].mxu0 }
0x1187   : > { %v4595_v1 = vpop.f32.mrb[36].mxu1  ;;  %v4574_v6 = vpop.f32.mrb[37].mxu0 }
0x1188   : > { %v4575_v25 = vadd.f32 %v4574_v6, %v4573_v63  ;;  %v4596_v47 = vpop.f32.mrb[37].mxu1  ;;  %v4576_v54 = vpop.f32.mrb[38].mxu0  ;;  %v8405_v63 = vld [vmem:[#allocation49_spill] sm:$0xff] }
0x1189   : > { %v4597_v56 = vadd.f32 %v4596_v47, %v4595_v1  ;;  %v4598_v58 = vpop.f32.mrb[38].mxu1  ;;  %v4577_v55 = vpop.f32.mrb[39].mxu0 }
0x118a   : > { %v1764_v4 = vadd.f32 %v4575_v25, %v5906_v39  ;;  %v4599_v22 = vpop.f32.mrb[39].mxu1 }
0x118c   : > { %v1804_v57 = vadd.f32 %v4597_v56, %v1764_v4 }
0x118e   : > { %v1810_v53 = vmul.f32 1.442695, %v1804_v57  ;;  %vm1809_vm6 = vcmp.gt.f32.partialorder %v1804_v57, 0.0 }
0x1190   : > { %5305 = vpow2.f32 %v1810_v53  ;;  %v8407_v53 = vld [vmem:[#allocation21_spill] sm:$0xff] }
0x119a   : > { %v5306_v28 = vpop.eup %5305 }
0x119b   : > { %v4302_v51 = vadd.f32 -1.0, %v5306_v28  ;;  %v8408_v28 = vld [vmem:[#allocation22_spill] sm:$0xff] }
0x119d   : > { %v1813_v60 = vsel %vm1809_vm6, %v1804_v57, %v4302_v51  ;;  %v8406_v57 = vld [vmem:[#allocation20_spill] sm:$0xff]  ;;  %v8409_v51 = vld [vmem:[#allocation23_spill] sm:$0xff] }
0x119e   : > { %v1814_v24 = vmul.f32 %v1813_v60, %v5916_v41  ;;  %v8410_v60 = vld [vmem:[#allocation24_spill] sm:$0xff] }
0x11a0   : > { %v1815_v44 = vsel %vm961_vm13, %v1814_v24, 0.0  ;;  %v8411_v24 = vld [vmem:[#allocation25_spill] sm:$0xff] }
0x11a1   : > { %1816 = vadd.xlane.f32.xlu1 %v1815_v44  ;;  %v8412_v44 = vld [vmem:[#allocation26_spill] sm:$0xff] }
0x122e   : > { %v1817_v31 = vpop.xlane.xlu1 %1816 }
0x122f   : > { %v6668_v59 = vadd.f32 %v1817_v31, %v5921_v42  ;;  %v8413_v31 = vld [vmem:[#allocation27_spill] sm:$0xff] }
0x1231   : > { %8404 = vst [vmem:[#allocation51_spill] sm:$0xff] %v6668_v59  ;;  %v1819_v1 = vmul.f32 %v6668_v59, %v8405_v63  ;;  %v8424_v59 = vld [vmem:[#allocation38_spill] sm:$0xff] }
0x1233   : > { %v1820_v6 = vadd.f32 %v1819_v1, %v6529_v34  ;;  %v8414_v1 = vld [vmem:[#allocation28_spill] sm:$0xff] }
0x1235   : > { %1823 = vperm.xlu0 %5165, %v1820_v6   ;;  %v8415_v6 = vld [vmem:[#allocation29_spill] sm:$0xff] }
0x12b4   : > { %v1824_v25 = vpop.permute.xlu0 %1823 }
0x12b5   : > { %v1826_v47 = vmul.f32 %v1824_v25, %v5896_v37  ;;  %v8416_v25 = vld [vmem:[#allocation30_spill] sm:$0xff] }
0x12b7   : > { %v1827_v54 = vadd.f32 %v1826_v47, %v5901_v38  ;;  %v8417_v47 = vld [vmem:[#allocation31_spill] sm:$0xff] }
0x12b9   : > { %v1829_v56 = vmul.f32 1.442695, %v1827_v54  ;;  %vm1828_vm7 = vcmp.gt.f32.partialorder %v1827_v54, 0.0 }
0x12bb   : > { %5307 = vpow2.f32 %v1829_v56  ;;  %v8419_v56 = vld [vmem:[#allocation33_spill] sm:$0xff] }
0x12c5   : > { %v5308_v58 = vpop.eup %5307 }
0x12c6   : > { %v4303_v55 = vadd.f32 -1.0, %v5308_v58  ;;  %v8420_v58 = vld [vmem:[#allocation34_spill] sm:$0xff] }
0x12c8   : > { %v1832_v4 = vsel %vm1828_vm7, %v1827_v54, %v4303_v55  ;;  %v8418_v54 = vld [vmem:[#allocation32_spill] sm:$0xff]  ;;  %v8421_v55 = vld [vmem:[#allocation35_spill] sm:$0xff] }
0x12c9   : > { %v1833_v22 = vpack.c.bf16 %v1832_v4, %v1832_v4  ;;  %v8422_v4 = vld [vmem:[#allocation36_spill] sm:$0xff] }
0x12cb   : > { %1867 = vmatmul.mubr.bf16.vlgmr.msra.gmra.mrb[40].mxu0 %v1833_v22  ;;  %1908 = vmatmul.mubr.bf16.vlgmr.msra.gmra.mrb[40].mxu1 %v1833_v22  ;;  %v8423_v22 = vld [vmem:[#allocation37_spill] sm:$0xff] }
0x12cc   : > { %4602 = vmatpush3.bf16.msra.mxu0 %v6534_v36  ;;  %4624 = vmatpush3.bf16.msra.mxu1 %v6537_v49 }
0x12cd   : > { %4603 = vmatprep.subr.bf16.mxu0 %v6540_v3  ;;  %4625 = vmatprep.subr.bf16.mxu1 %v6543_v61 }
0x12d0   : > { %4604 = vmatpush3.bf16.msra.mxu0 %v8406_v57  ;;  %4626 = vmatpush3.bf16.msra.mxu1 %v8407_v53 }
0x12d1   : > { %4605 = vmatprep.subr.bf16.mxu0 %v8408_v28  ;;  %4627 = vmatprep.subr.bf16.mxu1 %v8409_v51 }
0x12d4   : > { %4606 = vmatpush3.bf16.msra.mxu0 %v8410_v60  ;;  %4628 = vmatpush3.bf16.msra.mxu1 %v8411_v24  ;;  %v8436_v60 = vld [vmem:[#allocation48_spill] sm:$0xff] }
0x12d5   : > { %4607 = vmatprep.subr.bf16.mxu0 %v8412_v44  ;;  %4629 = vmatprep.subr.bf16.mxu1 %v8413_v31  ;;  %v8434_v31 = vld [vmem:[#allocation46_spill] sm:$0xff]  ;;  %v8435_v44 = vld [vmem:[#allocation47_spill] sm:$0xff] }
0x12d8   : > { %4608 = vmatpush3.bf16.msra.mxu0 %v8414_v1  ;;  %4630 = vmatpush3.bf16.msra.mxu1 %v8415_v6  ;;  %v8425_v1 = vld [vmem:[#allocation39_spill] sm:$0xff]  ;;  %v8426_v6 = vld [vmem:[#allocation40_spill] sm:$0xff] }
0x12d9   : > { %4609 = vmatprep.subr.bf16.mxu0 %v8416_v25  ;;  %4631 = vmatprep.subr.bf16.mxu1 %v8417_v47  ;;  %v8427_v25 = vld [vmem:[#allocation41_spill] sm:$0xff]  ;;  %v8428_v47 = vld [vmem:[#allocation42_spill] sm:$0xff] }
0x12dc   : > { %4610 = vmatpush3.bf16.msra.mxu0 %v8418_v54  ;;  %4632 = vmatpush3.bf16.msra.mxu1 %v8419_v56  ;;  %v8429_v54 = vld [vmem:[#allocation43_spill] sm:$0xff]  ;;  %v8430_v56 = vld [vmem:[#allocation44_spill] sm:$0xff] }
0x12dd   : > { %4611 = vmatprep.subr.bf16.mxu0 %v8420_v58  ;;  %4633 = vmatprep.subr.bf16.mxu1 %v8421_v55  ;;  %v8431_v58 = vld [vmem:[#allocation45_spill] sm:$0xff] }
0x12de   : > { %v8432_v55 = vld [vmem:[#allocation17_spill] sm:$0xff] }
0x12e0   : > { %4612 = vmatpush3.bf16.msra.mxu0 %v8422_v4  ;;  %4634 = vmatpush3.bf16.msra.mxu1 %v8423_v22  ;;  %v8433_v4 = vld [vmem:[#allocation18_spill] sm:$0xff] }
0x12e1   : > { %4613 = vmatprep.subr.bf16.mxu0 %v8424_v59  ;;  %4635 = vmatprep.subr.bf16.mxu1 %v8425_v1 }
0x12e4   : > { %4614 = vmatpush3.bf16.msra.mxu0 %v8426_v6  ;;  %4636 = vmatpush3.bf16.msra.mxu1 %v8427_v25 }
0x12e5   : > { %4615 = vmatprep.subr.bf16.mxu0 %v8428_v47  ;;  %4637 = vmatprep.subr.bf16.mxu1 %v8429_v54 }
0x12e8   : > { %4616 = vmatpush3.bf16.msra.mxu0 %v8430_v56  ;;  %4638 = vmatpush3.bf16.msra.mxu1 %v8431_v58 }
0x12e9   : > { %2045 = vmatprep.subr.bf16.mxu0 %v8432_v55  ;;  %2086 = vmatprep.subr.bf16.mxu1 %v8433_v4 }
0x139e   : > { %v1868_v22 = vpop.f32.mrb[40].mxu0  ;;  %v1909_v59 = vpop.f32.mrb[40].mxu1 }
0x139f   : > { %v1869_v1 = vadd.f32 %v1868_v22, %v8434_v31  ;;  %v1910_v6 = vadd.f32 %v1909_v59, %v8435_v44  ;;  %v1870_v24 = vpop.f32.mrb[41].mxu0  ;;  %v1911_v25 = vpop.f32.mrb[41].mxu1 }
0x13a0   : > { %v1871_v47 = vadd.f32 %v1870_v24, %v6151_v50  ;;  %v1912_v54 = vadd.f32 %v1911_v25, %v8436_v60  ;;  %v1872_v51 = vpop.f32.mrb[42].mxu0  ;;  %v1913_v56 = vpop.f32.mrb[42].mxu1 }
0x13a1   : > { %v1920_v28 = vmul.f32 1.442695, %v1869_v1  ;;  %v1924_v58 = vmul.f32 1.442695, %v1910_v6  ;;  %v1873_v4 = vpop.f32.mrb[43].mxu0  ;;  %v1914_v57 = vpop.f32.mrb[43].mxu1 }
0x13a2   : > { %v1922_v53 = vmul.f32 1.442695, %v1871_v47  ;;  %v1926_v55 = vmul.f32 1.442695, %v1912_v54  ;;  %vm1916_vm8 = vcmp.gt.f32.partialorder %v1869_v1, 0.0  ;;  %vm1918_vm9 = vcmp.gt.f32.partialorder %v1910_v6, 0.0 }
0x13a3   : > { %5309 = vpow2.f32 %v1920_v28  ;;  %vm1917_vm10 = vcmp.gt.f32.partialorder %v1871_v47, 0.0  ;;  %vm1919_vm11 = vcmp.gt.f32.partialorder %v1912_v54, 0.0 }
0x13a4   : > { %5311 = vpow2.f32 %v1924_v58 }
0x13a5   : > { %5313 = vpow2.f32 %v1922_v53 }
0x13a6   : > { %5315 = vpow2.f32 %v1926_v55 }
0x13ad   : > { %v5310_v22 = vpop.eup %5309 }
0x13ae   : > { %v5312_v59 = vpop.eup %5311  ;;  %v4304_v44 = vadd.f32 -1.0, %v5310_v22  ;;  %v8447_v22 = vld [vmem:[#allocation29_spill] sm:$0xff] }
0x13af   : > { %v5314_v31 = vpop.eup %5313  ;;  %v4306_v61 = vadd.f32 -1.0, %v5312_v59  ;;  %v8448_v59 = vld [vmem:[#allocation30_spill] sm:$0xff] }
0x13b0   : > { %v5316_v24 = vpop.eup %5315  ;;  %v4305_v25 = vadd.f32 -1.0, %v5314_v31  ;;  %v1932_v51 = vsel %vm1916_vm8, %v1869_v1, %v4304_v44  ;;  %v8441_v44 = vld [vmem:[#allocation23_spill] sm:$0xff]  ;;  %v8442_v31 = vld [vmem:[#allocation24_spill] sm:$0xff]  ;;  %v8443_v1 = vld [vmem:[#allocation25_spill] sm:$0xff] }
0x13b1   : > { %v4307_v56 = vadd.f32 -1.0, %v5316_v24  ;;  %v1934_v60 = vsel %vm1918_vm9, %v1910_v6, %v4306_v61  ;;  %v1936_v58 = vpack.c.bf16 %v1932_v51, %v1932_v51  ;;  %v8439_v61 = vld [vmem:[#allocation21_spill] sm:$0xff]  ;;  %v8444_v6 = vld [vmem:[#allocation26_spill] sm:$0xff]  ;;  %v8449_v24 = vld [vmem:[#allocation31_spill] sm:$0xff] }
0x13b2   : > { %v1933_v28 = vsel %vm1917_vm10, %v1871_v47, %v4305_v25  ;;  %v1938_v55 = vpack.c.bf16 %v1934_v60, %v1934_v60  ;;  %v8440_v60 = vld [vmem:[#allocation22_spill] sm:$0xff]  ;;  %v8445_v47 = vld [vmem:[#allocation27_spill] sm:$0xff]  ;;  %v8450_v25 = vld [vmem:[#allocation32_spill] sm:$0xff] }
0x13b3   : > { %v1937_v4 = vpack.c.bf16 %v1933_v28, %v1933_v28  ;;  %v1935_v57 = vsel %vm1919_vm11, %v1912_v54, %v4307_v56  ;;  %v8446_v54 = vld [vmem:[#allocation28_spill] sm:$0xff]  ;;  %v8451_v51 = vld [vmem:[#allocation33_spill] sm:$0xff]  ;;  %v8452_v56 = vld [vmem:[#allocation34_spill] sm:$0xff] }
0x13b4   : > { %v1939_v53 = vpack.c.bf16 %v1935_v57, %v1935_v57  ;;  %v8453_v28 = vld [vmem:[#allocation35_spill] sm:$0xff]  ;;  %v8455_v57 = vld [vmem:[#allocation37_spill] sm:$0xff] }
0x13b5   : > { %1972 = vmatprep.mubr.bf16.mxu0 %v1937_v4  ;;  %v8454_v4 = vld [vmem:[#allocation36_spill] sm:$0xff] }
0x13b6   : > { %2012 = vmatprep.mubr.bf16.mxu1 %v1939_v53  ;;  %1973 = vmatmul.mubr.bf16.vlgmr.msra.gmra.mrb[44].mxu0 %v1936_v58  ;;  %v8456_v58 = vld [vmem:[#allocation38_spill] sm:$0xff]  ;;  %v8457_v53 = vld [vmem:[#allocation39_spill] sm:$0xff] }
0x13b7   : > { %2013 = vmatmul.mubr.bf16.vlgmr.msra.gmra.mrb[44].mxu1 %v1938_v55  ;;  %2046 = vmatpush1.bf16.msra.mxu0 %v6336_v17  ;;  %v8458_v55 = vld [vmem:[#allocation40_spill] sm:$0xff] }
0x13b8   : > { %2087 = vmatpush1.bf16.msra.mxu1 %v6339_v0  ;;  %2047 = vmatprep.subr.bf16.mxu0 %v6342_v2 }
0x13b9   : > { %2088 = vmatprep.subr.bf16.mxu1 %v6345_v5  ;;  %2077 = vmatprep.mubr.bf16.mxu0 %v8347_v10 }
0x13ba   : > { %2118 = vmatprep.mubr.bf16.mxu1 %v8347_v10 }
0x13bb   : > { %2048 = vmatpush1.bf16.msra.mxu0 %v8348_v19 }
0x13bc   : > { %2089 = vmatpush1.bf16.msra.mxu1 %v8349_v62  ;;  %2049 = vmatprep.subr.bf16.mxu0 %v8350_v7 }
0x13bd   : > { %2090 = vmatprep.subr.bf16.mxu1 %v8351_v11 }
0x13bf   : > { %2050 = vmatpush1.bf16.msra.mxu0 %v8352_v15 }
0x13c0   : > { %2091 = vmatpush1.bf16.msra.mxu1 %v8353_v18  ;;  %2051 = vmatprep.subr.bf16.mxu0 %v8354_v45 }
0x13c1   : > { %2092 = vmatprep.subr.bf16.mxu1 %v8355_v9 }
0x13c3   : > { %2052 = vmatpush1.bf16.msra.mxu0 %v8356_v16 }
0x13c4   : > { %2093 = vmatpush1.bf16.msra.mxu1 %v8357_v12  ;;  %2053 = vmatprep.subr.bf16.mxu0 %v8358_v13 }
0x13c5   : > { %2094 = vmatprep.subr.bf16.mxu1 %v8359_v14 }
0x13c7   : > { %2054 = vmatpush1.bf16.msra.mxu0 %v8360_v8 }
0x13c8   : > { %2095 = vmatpush1.bf16.msra.mxu1 %v8361_v29  ;;  %2055 = vmatprep.subr.bf16.mxu0 %v8362_v30 }
0x13c9   : > { %2096 = vmatprep.subr.bf16.mxu1 %v8363_v32 }
0x13cb   : > { %2056 = vmatpush1.bf16.msra.mxu0 %v8364_v20 }
0x13cc   : > { %2097 = vmatpush1.bf16.msra.mxu1 %v8365_v21  ;;  %2057 = vmatprep.subr.bf16.mxu0 %v8366_v33 }
0x13cd   : > { %2098 = vmatprep.subr.bf16.mxu1 %v8367_v40 }
0x13cf   : > { %2058 = vmatpush1.bf16.msra.mxu0 %v8368_v43 }
0x13d0   : > { %2099 = vmatpush1.bf16.msra.mxu1 %v8369_v52  ;;  %2059 = vmatprep.subr.bf16.mxu0 %v8370_v48 }
0x13d1   : > { %2100 = vmatprep.subr.bf16.mxu1 %v8371_v23 }
0x13d3   : > { %2060 = vmatpush1.bf16.msra.mxu0 %v8372_v26 }
0x13d4   : > { %2101 = vmatpush1.bf16.msra.mxu1 %v8373_v27  ;;  %4645 = vmatprep.subr.bf16.mxu0 %v8374_v46  ;;  %v8437_v46 = vld [vmem:[#allocation19_spill] sm:$0xff] }
0x13d5   : > { %4667 = vmatprep.subr.bf16.mxu1 %v8375_v35  ;;  %v8438_v35 = vld [vmem:[#allocation20_spill] sm:$0xff] }
0x1489   : > { %v4617_v17 = vpop.f32.mrb[44].mxu0 }
0x148a   : > { %v4639_v0 = vpop.f32.mrb[44].mxu1  ;;  %v4618_v2 = vpop.f32.mrb[45].mxu0 }
0x148b   : > { %v4619_v5 = vadd.f32 %v4618_v2, %v4617_v17  ;;  %v4640_v19 = vpop.f32.mrb[45].mxu1  ;;  %v4620_v62 = vpop.f32.mrb[46].mxu0  ;;  %v8459_v17 = vld [vmem:[#allocation41_spill] sm:$0xff]  ;;  %v8461_v2 = vld [vmem:[#allocation43_spill] sm:$0xff] }
0x148c   : > { %v4641_v7 = vadd.f32 %v4640_v19, %v4639_v0  ;;  %v4642_v11 = vpop.f32.mrb[46].mxu1  ;;  %v4621_v15 = vpop.f32.mrb[47].mxu0  ;;  %v8460_v0 = vld [vmem:[#allocation42_spill] sm:$0xff]  ;;  %v8463_v19 = vld [vmem:[#allocation45_spill] sm:$0xff] }
0x148d   : > { %v1975_v18 = vadd.f32 %v4619_v5, %v5906_v39  ;;  %v4643_v45 = vpop.f32.mrb[47].mxu1  ;;  %v8462_v5 = vld [vmem:[#allocation44_spill] sm:$0xff] }
0x148e   : > { %v6786_v62 = vld [vmem:[#allocation6 + $0x4] ss:$16 sps:$4 sm:$0xff]  }
0x148f   : > { %v2015_v9 = vadd.f32 %v4641_v7, %v1975_v18  ;;  %8464 = vst [vmem:[#allocation17_spill] sm:$0xff] %v6786_v62  ;;  %v6789_v7 = vld [vmem:[#allocation6 + $0xc] ss:$16 sps:$4 sm:$0xff]   ;;  %v8466_v18 = vld [vmem:[#allocation46_spill] sm:$0xff] }
0x1490   : > { %8465 = vst [vmem:[#allocation18_spill] sm:$0xff] %v6789_v7 }
0x1491   : > { %v2021_v16 = vmul.f32 1.442695, %v2015_v9  ;;  %vm2020_vm12 = vcmp.gt.f32.partialorder %v2015_v9, 0.0 }
0x1493   : > { %5317 = vpow2.f32 %v2021_v16 }
0x149d   : > { %v5318_v12 = vpop.eup %5317 }
0x149e   : > { %v4308_v13 = vadd.f32 -1.0, %v5318_v12 }
0x14a0   : > { %v2024_v14 = vsel %vm2020_vm12, %v2015_v9, %v4308_v13  ;;  %v8467_v9 = vld [vmem:[#allocation47_spill] sm:$0xff] }
0x14a1   : > { %v2025_v8 = vmul.f32 %v2024_v14, %v5916_v41 }
0x14a3   : > { %v2026_v29 = vsel %vm961_vm13, %v2025_v8, 0.0  ;;  %v8468_v8 = vld [vmem:[#allocation48_spill] sm:$0xff] }
0x14a4   : > { %2027 = vadd.xlane.f32.xlu1 %v2026_v29 }
0x1531   : > { %v2028_v30 = vpop.xlane.xlu1 %2027 }
0x1532   : > { %v6749_v32 = vadd.f32 %v2028_v30, %v5921_v42 }
0x1534   : > { %v2030_v20 = vmul.f32 %v6749_v32, %v8405_v63 }
0x1536   : > { %v2031_v21 = vadd.f32 %v2030_v20, %v6529_v34 }
0x1538   : > { %2034 = vperm.xlu1 %5166, %v2031_v21  }
0x15b7   : > { %v2035_v33 = vpop.permute.xlu1 %2034 }
0x15b8   : > { %v2037_v40 = vmul.f32 %v2035_v33, %v5896_v37 }
0x15ba   : > { %v2038_v43 = vadd.f32 %v2037_v40, %v5901_v38 }
0x15bc   : > { %v2040_v52 = vmul.f32 1.442695, %v2038_v43  ;;  %vm2039_vm14 = vcmp.gt.f32.partialorder %v2038_v43, 0.0 }
0x15be   : > { %5319 = vpow2.f32 %v2040_v52 }
0x15c8   : > { %v5320_v48 = vpop.eup %5319 }
0x15c9   : > { %v4309_v23 = vadd.f32 -1.0, %v5320_v48 }
0x15cb   : > { %v2043_v26 = vsel %vm2039_vm14, %v2038_v43, %v4309_v23 }
0x15cc   : > { %v2044_v27 = vpack.c.bf16 %v2043_v26, %v2043_v26 }
0x15ce   : > { %2078 = vmatmul.mubr.bf16.vlgmr.msra.gmra.mrb[48].mxu0 %v2044_v27  ;;  %2119 = vmatmul.mubr.bf16.vlgmr.msra.gmra.mrb[48].mxu1 %v2044_v27 }
0x15cf   : > { %4646 = vmatpush3.bf16.msra.mxu0 %v6534_v36  ;;  %4668 = vmatpush3.bf16.msra.mxu1 %v6537_v49 }
0x15d0   : > { %4647 = vmatprep.subr.bf16.mxu0 %v6540_v3  ;;  %4669 = vmatprep.subr.bf16.mxu1 %v8437_v46 }
0x15d3   : > { %4648 = vmatpush3.bf16.msra.mxu0 %v8438_v35  ;;  %4670 = vmatpush3.bf16.msra.mxu1 %v8439_v61 }
0x15d4   : > { %4649 = vmatprep.subr.bf16.mxu0 %v8440_v60  ;;  %4671 = vmatprep.subr.bf16.mxu1 %v8441_v44 }
0x15d7   : > { %4650 = vmatpush3.bf16.msra.mxu0 %v8442_v31  ;;  %4672 = vmatpush3.bf16.msra.mxu1 %v8443_v1 }
0x15d8   : > { %4651 = vmatprep.subr.bf16.mxu0 %v8444_v6  ;;  %4673 = vmatprep.subr.bf16.mxu1 %v8445_v47 }
0x15db   : > { %4652 = vmatpush3.bf16.msra.mxu0 %v8446_v54  ;;  %4674 = vmatpush3.bf16.msra.mxu1 %v8447_v22 }
0x15dc   : > { %4653 = vmatprep.subr.bf16.mxu0 %v8448_v59  ;;  %4675 = vmatprep.subr.bf16.mxu1 %v8449_v24 }
0x15df   : > { %4654 = vmatpush3.bf16.msra.mxu0 %v8450_v25  ;;  %4676 = vmatpush3.bf16.msra.mxu1 %v8451_v51 }
0x15e0   : > { %4655 = vmatprep.subr.bf16.mxu0 %v8452_v56  ;;  %4677 = vmatprep.subr.bf16.mxu1 %v8453_v28 }
0x15e3   : > { %4656 = vmatpush3.bf16.msra.mxu0 %v8454_v4  ;;  %4678 = vmatpush3.bf16.msra.mxu1 %v8455_v57 }
0x15e4   : > { %4657 = vmatprep.subr.bf16.mxu0 %v8456_v58  ;;  %4679 = vmatprep.subr.bf16.mxu1 %v8457_v53 }
0x15e7   : > { %4658 = vmatpush3.bf16.msra.mxu0 %v8458_v55  ;;  %4680 = vmatpush3.bf16.msra.mxu1 %v8459_v17 }
0x15e8   : > { %4659 = vmatprep.subr.bf16.mxu0 %v8460_v0  ;;  %4681 = vmatprep.subr.bf16.mxu1 %v8461_v2 }
0x15eb   : > { %4660 = vmatpush3.bf16.msra.mxu0 %v8462_v5  ;;  %4682 = vmatpush3.bf16.msra.mxu1 %v8463_v19 }
0x15ec   : > { %2256 = vmatprep.subr.bf16.mxu0 %v6786_v62  ;;  %2297 = vmatprep.subr.bf16.mxu1 %v6789_v7 }
0x16a1   : > { %v2079_v11 = vpop.f32.mrb[48].mxu0  ;;  %v2120_v15 = vpop.f32.mrb[48].mxu1 }
0x16a2   : > { %v2080_v45 = vadd.f32 %v2079_v11, %v8466_v18  ;;  %v2121_v16 = vadd.f32 %v2120_v15, %v8467_v9  ;;  %v2081_v12 = vpop.f32.mrb[49].mxu0  ;;  %v2122_v13 = vpop.f32.mrb[49].mxu1 }
0x16a3   : > { %v2082_v14 = vadd.f32 %v2081_v12, %v6151_v50  ;;  %v2123_v29 = vadd.f32 %v2122_v13, %v8468_v8  ;;  %v2083_v30 = vpop.f32.mrb[50].mxu0  ;;  %v2124_v20 = vpop.f32.mrb[50].mxu1 }
0x16a4   : > { %v2131_v21 = vmul.f32 1.442695, %v2080_v45  ;;  %v2135_v33 = vmul.f32 1.442695, %v2121_v16  ;;  %v2084_v52 = vpop.f32.mrb[51].mxu0  ;;  %v2125_v48 = vpop.f32.mrb[51].mxu1 }
0x16a5   : > { %v2133_v40 = vmul.f32 1.442695, %v2082_v14  ;;  %v2137_v43 = vmul.f32 1.442695, %v2123_v29  ;;  %vm2127_vm15 = vcmp.gt.f32.partialorder %v2080_v45, 0.0  ;;  %vm2129_vm0 = vcmp.gt.f32.partialorder %v2121_v16, 0.0 }
0x16a6   : > { %5321 = vpow2.f32 %v2131_v21  ;;  %vm2128_vm1 = vcmp.gt.f32.partialorder %v2082_v14, 0.0  ;;  %vm2130_vm2 = vcmp.gt.f32.partialorder %v2123_v29, 0.0 }
0x16a7   : > { %5323 = vpow2.f32 %v2135_v33 }
0x16a8   : > { %5325 = vpow2.f32 %v2133_v40 }
0x16a9   : > { %5327 = vpow2.f32 %v2137_v43 }
0x16b0   : > { %v5322_v23 = vpop.eup %5321 }
0x16b1   : > { %v5324_v26 = vpop.eup %5323  ;;  %v4310_v27 = vadd.f32 -1.0, %v5322_v23  ;;  %v6796_v23 = vld [vmem:[#allocation6] ss:$16 sps:$4 sm:$0xff]  }
0x16b2   : > { %v5326_v11 = vpop.eup %5325  ;;  %v4312_v15 = vadd.f32 -1.0, %v5324_v26  ;;  %v6816_v26 = vld [vmem:[#allocation6 + $0x44] ss:$16 sps:$4 sm:$0xff]  }
0x16b3   : > { %v5328_v12 = vpop.eup %5327  ;;  %v4311_v13 = vadd.f32 -1.0, %v5326_v11  ;;  %v2143_v30 = vsel %vm2127_vm15, %v2080_v45, %v4310_v27  ;;  %v6799_v45 = vld [vmem:[#allocation6 + $0x8] ss:$16 sps:$4 sm:$0xff]   ;;  %8472 = vst [vmem:[#allocation22_spill] sm:$0xff] %v6816_v26  ;;  %v6819_v27 = vld [vmem:[#allocation6 + $0x4c] ss:$16 sps:$4 sm:$0xff]  }
0x16b4   : > { %v4313_v20 = vadd.f32 -1.0, %v5328_v12  ;;  %v2145_v63 = vsel %vm2129_vm0, %v2121_v16, %v4312_v15  ;;  %v2147_v33 = vpack.c.bf16 %v2143_v30, %v2143_v30  ;;  %v6802_v16 = vld [vmem:[#allocation6 + $0x24] ss:$16 sps:$4 sm:$0xff]   ;;  %8473 = vst [vmem:[#allocation23_spill] sm:$0xff] %v6819_v27  ;;  %v6822_v11 = vld [vmem:[#allocation6 + $0x40] ss:$16 sps:$4 sm:$0xff]  }
0x16b5   : > { %v2144_v21 = vsel %vm2128_vm1, %v2082_v14, %v4311_v13  ;;  %v2149_v43 = vpack.c.bf16 %v2145_v63, %v2145_v63  ;;  %v6805_v14 = vld [vmem:[#allocation6 + $0x2c] ss:$16 sps:$4 sm:$0xff]   ;;  %v6810_v63 = vld [vmem:[#allocation6 + $0x20] ss:$16 sps:$4 sm:$0xff]   ;;  %8474 = vst [vmem:[#allocation24_spill] sm:$0xff] %v6822_v11 }
0x16b6   : > { %v2148_v52 = vpack.c.bf16 %v2144_v21, %v2144_v21  ;;  %v2146_v48 = vsel %vm2130_vm2, %v2123_v29, %v4313_v20  ;;  %8469 = vst [vmem:[#allocation19_spill] sm:$0xff] %v6805_v14  ;;  %8470 = vst [vmem:[#allocation20_spill] sm:$0xff] %v6810_v63  ;;  %v6813_v29 = vld [vmem:[#allocation6 + $0x28] ss:$16 sps:$4 sm:$0xff]   ;;  %v6828_v12 = vld [vmem:[#allocation6 + $0x64] ss:$16 sps:$4 sm:$0xff]  }
0x16b7   : > { %v2150_v40 = vpack.c.bf16 %v2146_v48, %v2146_v48  ;;  %8471 = vst [vmem:[#allocation21_spill] sm:$0xff] %v6813_v29  ;;  %v6825_v15 = vld [vmem:[#allocation6 + $0x48] ss:$16 sps:$4 sm:$0xff]   ;;  %8476 = vst [vmem:[#allocation26_spill] sm:$0xff] %v6828_v12  ;;  %v6831_v13 = vld [vmem:[#allocation6 + $0x6c] ss:$16 sps:$4 sm:$0xff]  }
0x16b8   : > { %2183 = vmatprep.mubr.bf16.mxu0 %v2148_v52  ;;  %8475 = vst [vmem:[#allocation25_spill] sm:$0xff] %v6825_v15  ;;  %8477 = vst [vmem:[#allocation27_spill] sm:$0xff] %v6831_v13  ;;  %v6834_v30 = vld [vmem:[#allocation6 + $0x60] ss:$16 sps:$4 sm:$0xff]   ;;  %v6837_v20 = vld [vmem:[#allocation6 + $0x68] ss:$16 sps:$4 sm:$0xff]  }
0x16b9   : > { %2223 = vmatprep.mubr.bf16.mxu1 %v2150_v40  ;;  %2184 = vmatmul.mubr.bf16.vlgmr.msra.gmra.mrb[52].mxu0 %v2147_v33  ;;  %8478 = vst [vmem:[#allocation28_spill] sm:$0xff] %v6834_v30  ;;  %8479 = vst [vmem:[#allocation29_spill] sm:$0xff] %v6837_v20  ;;  %v6840_v21 = vld [vmem:[#allocation6 + $0x84] ss:$16 sps:$4 sm:$0xff]   ;;  %v6843_v52 = vld [vmem:[#allocation6 + $0x8c] ss:$16 sps:$4 sm:$0xff]  }
0x16ba   : > { %2224 = vmatmul.mubr.bf16.vlgmr.msra.gmra.mrb[52].mxu1 %v2149_v43  ;;  %2257 = vmatpush1.bf16.msra.mxu0 %v6796_v23  ;;  %8480 = vst [vmem:[#allocation30_spill] sm:$0xff] %v6840_v21  ;;  %8481 = vst [vmem:[#allocation31_spill] sm:$0xff] %v6843_v52  ;;  %v6846_v48 = vld [vmem:[#allocation6 + $0x80] ss:$16 sps:$4 sm:$0xff]   ;;  %v6849_v33 = vld [vmem:[#allocation6 + $0x88] ss:$16 sps:$4 sm:$0xff]  }
0x16bb   : > { %2298 = vmatpush1.bf16.msra.mxu1 %v6799_v45  ;;  %2258 = vmatprep.subr.bf16.mxu0 %v6802_v16  ;;  %8482 = vst [vmem:[#allocation32_spill] sm:$0xff] %v6846_v48  ;;  %8483 = vst [vmem:[#allocation33_spill] sm:$0xff] %v6849_v33  ;;  %v6852_v40 = vld [vmem:[#allocation6 + $0xa4] ss:$16 sps:$4 sm:$0xff]   ;;  %v6855_v43 = vld [vmem:[#allocation6 + $0xac] ss:$16 sps:$4 sm:$0xff]  }
0x16bc   : > { %2299 = vmatprep.subr.bf16.mxu1 %v6805_v14  ;;  %2288 = vmatprep.mubr.bf16.mxu0 %v8347_v10  ;;  %8484 = vst [vmem:[#allocation34_spill] sm:$0xff] %v6852_v40  ;;  %8485 = vst [vmem:[#allocation35_spill] sm:$0xff] %v6855_v43 }
0x16bd   : > { %2329 = vmatprep.mubr.bf16.mxu1 %v8347_v10 }
0x16be   : > { %2259 = vmatpush1.bf16.msra.mxu0 %v6810_v63 }
0x16bf   : > { %2300 = vmatpush1.bf16.msra.mxu1 %v6813_v29  ;;  %2260 = vmatprep.subr.bf16.mxu0 %v6816_v26 }
0x16c0   : > { %2301 = vmatprep.subr.bf16.mxu1 %v6819_v27 }
0x16c2   : > { %2261 = vmatpush1.bf16.msra.mxu0 %v6822_v11 }
0x16c3   : > { %2302 = vmatpush1.bf16.msra.mxu1 %v6825_v15  ;;  %2262 = vmatprep.subr.bf16.mxu0 %v6828_v12 }
0x16c4   : > { %2303 = vmatprep.subr.bf16.mxu1 %v6831_v13 }
0x16c6   : > { %2263 = vmatpush1.bf16.msra.mxu0 %v6834_v30 }
0x16c7   : > { %2304 = vmatpush1.bf16.msra.mxu1 %v6837_v20  ;;  %2264 = vmatprep.subr.bf16.mxu0 %v6840_v21  ;;  %v6858_v21 = vld [vmem:[#allocation6 + $0xa0] ss:$16 sps:$4 sm:$0xff]  }
0x16c8   : > { %2305 = vmatprep.subr.bf16.mxu1 %v6843_v52  ;;  %8486 = vst [vmem:[#allocation36_spill] sm:$0xff] %v6858_v21  ;;  %v6861_v52 = vld [vmem:[#allocation6 + $0xa8] ss:$16 sps:$4 sm:$0xff]  }
0x16c9   : > { %8487 = vst [vmem:[#allocation37_spill] sm:$0xff] %v6861_v52 }
0x16ca   : > { %2265 = vmatpush1.bf16.msra.mxu0 %v6846_v48  ;;  %v6864_v48 = vld [vmem:[#allocation6 + $0xc4] ss:$16 sps:$4 sm:$0xff]  }
0x16cb   : > { %2306 = vmatpush1.bf16.msra.mxu1 %v6849_v33  ;;  %2266 = vmatprep.subr.bf16.mxu0 %v6852_v40  ;;  %8488 = vst [vmem:[#allocation38_spill] sm:$0xff] %v6864_v48  ;;  %v6867_v33 = vld [vmem:[#allocation6 + $0xcc] ss:$16 sps:$4 sm:$0xff]   ;;  %v6870_v40 = vld [vmem:[#allocation6 + $0xc0] ss:$16 sps:$4 sm:$0xff]  }
0x16cc   : > { %2307 = vmatprep.subr.bf16.mxu1 %v6855_v43  ;;  %8489 = vst [vmem:[#allocation39_spill] sm:$0xff] %v6867_v33  ;;  %8490 = vst [vmem:[#allocation40_spill] sm:$0xff] %v6870_v40  ;;  %v6873_v43 = vld [vmem:[#allocation6 + $0xc8] ss:$16 sps:$4 sm:$0xff]  }
0x16cd   : > { %8491 = vst [vmem:[#allocation41_spill] sm:$0xff] %v6873_v43 }
0x16ce   : > { %2267 = vmatpush1.bf16.msra.mxu0 %v6858_v21  ;;  %v6876_v21 = vld [vmem:[#allocation6 + $0xe4] ss:$16 sps:$4 sm:$0xff]  }
0x16cf   : > { %2308 = vmatpush1.bf16.msra.mxu1 %v6861_v52  ;;  %2268 = vmatprep.subr.bf16.mxu0 %v6864_v48  ;;  %8492 = vst [vmem:[#allocation42_spill] sm:$0xff] %v6876_v21  ;;  %v6879_v52 = vld [vmem:[#allocation6 + $0xec] ss:$16 sps:$4 sm:$0xff]   ;;  %v6882_v48 = vld [vmem:[#allocation6 + $0xe0] ss:$16 sps:$4 sm:$0xff]  }
0x16d0   : > { %2309 = vmatprep.subr.bf16.mxu1 %v6867_v33  ;;  %8493 = vst [vmem:[#allocation43_spill] sm:$0xff] %v6879_v52  ;;  %8494 = vst [vmem:[#allocation44_spill] sm:$0xff] %v6882_v48  ;;  %v6885_v33 = vld [vmem:[#allocation6 + $0xe8] ss:$16 sps:$4 sm:$0xff]  }
0x16d1   : > { %8495 = vst [vmem:[#allocation45_spill] sm:$0xff] %v6885_v33 }
0x16d2   : > { %2269 = vmatpush1.bf16.msra.mxu0 %v6870_v40  ;;  %v6888_v40 = vld [vmem:[#allocation7 + $0x40] sm:$0xff]  }
0x16d3   : > { %2310 = vmatpush1.bf16.msra.mxu1 %v6873_v43  ;;  %2270 = vmatprep.subr.bf16.mxu0 %v6876_v21  ;;  %8496 = vst [vmem:[#allocation53_spill] sm:$0xff] %v6888_v40  ;;  %v6891_v43 = vld [vmem:[#allocation7 + $0xc0] sm:$0xff]  }
0x16d4   : > { %2311 = vmatprep.subr.bf16.mxu1 %v6879_v52  ;;  %8497 = vst [vmem:[#allocation54_spill] sm:$0xff] %v6891_v43 }
0x16d6   : > { %2271 = vmatpush1.bf16.msra.mxu0 %v6882_v48 }
0x16d7   : > { %2312 = vmatpush1.bf16.msra.mxu1 %v6885_v33  ;;  %4689 = vmatprep.subr.bf16.mxu0 %v6888_v40 }
0x16d8   : > { %4711 = vmatprep.subr.bf16.mxu1 %v6891_v43 }
0x178c   : > { %v4661_v21 = vpop.f32.mrb[52].mxu0 }
0x178d   : > { %v4683_v20 = vpop.f32.mrb[52].mxu1  ;;  %v4662_v30 = vpop.f32.mrb[53].mxu0 }
0x178e   : > { %v4663_v52 = vadd.f32 %v4662_v30, %v4661_v21  ;;  %v4684_v13 = vpop.f32.mrb[53].mxu1  ;;  %v4664_v12 = vpop.f32.mrb[54].mxu0  ;;  %v8498_v30 = vld [vmem:[#allocation51_spill] sm:$0xff]  ;;  %v8499_v21 = vld [vmem:[#allocation52_spill] sm:$0xff] }
0x178f   : > { %v4685_v15 = vadd.f32 %v4684_v13, %v4683_v20  ;;  %v4686_v48 = vpop.f32.mrb[54].mxu1  ;;  %v4665_v11 = vpop.f32.mrb[55].mxu0  ;;  %v2452_v12 = vmul.f32 2.0, %v6749_v32 }
0x1790   : > { %v2186_v27 = vadd.f32 %v4663_v52, %v5906_v39  ;;  %v4687_v33 = vpop.f32.mrb[55].mxu1 }
0x1791   : > { %v2453_v20 = vadd.f32 %v2452_v12, %v8498_v30  ;;  %v8502_v30 = vld [vmem:[#allocation20_spill] sm:$0xff] }
0x1792   : > { %v2226_v26 = vadd.f32 %v4685_v15, %v2186_v27 }
0x1794   : > { %v2232_v29 = vmul.f32 1.442695, %v2226_v26  ;;  %vm2231_vm3 = vcmp.gt.f32.partialorder %v2226_v26, 0.0 }
0x1796   : > { %5329 = vpow2.f32 %v2232_v29 }
0x17a0   : > { %v5330_v40 = vpop.eup %5329 }
0x17a1   : > { %v4314_v63 = vadd.f32 -1.0, %v5330_v40 }
0x17a3   : > { %v2235_v10 = vsel %vm2231_vm3, %v2226_v26, %v4314_v63 }
0x17a4   : > { %v2236_v43 = vmul.f32 %v2235_v10, %v5916_v41 }
0x17a6   : > { %v2237_v14 = vsel %vm961_vm13, %v2236_v43, 0.0 }
0x17a7   : > { %2238 = vadd.xlane.f32.xlu0 %v2237_v14 }
0x1834   : > { %v2239_v13 = vpop.xlane.xlu0 %2238 }
0x1835   : > { %v2240_v11 = vadd.f32 %v2239_v13, %v5921_v42  ;;  %v8500_v13 = vld [vmem:[#allocation19_spill] sm:$0xff] }
0x1837   : > { %v2241_v27 = vmul.f32 %v2240_v11, %v8499_v21  ;;  %v2454_v15 = vmul.f32 2.0, %v2240_v11  ;;  %v8501_v11 = vmov 0  }
0x1839   : > { %v2242_v29 = vadd.f32 %v2241_v27, %v6529_v34  ;;  %v6902_v52 = vadd.f32 %v2454_v15, %v2453_v20  ;;  %v8503_v20 = vld [vmem:[#allocation21_spill] sm:$0xff]  ;;  %v8504_v27 = vld [vmem:[#allocation22_spill] sm:$0xff]  ;;  %v8505_v15 = vld [vmem:[#allocation23_spill] sm:$0xff] }
0x183b   : > { %2245 = vperm.xlu1 %5166, %v2242_v29   ;;  %v8506_v29 = vld [vmem:[#allocation24_spill] sm:$0xff] }
0x18ba   : > { %v2246_v63 = vpop.permute.xlu1 %2245 }
0x18bb   : > { %v2248_v10 = vmul.f32 %v2246_v63, %v5896_v37  ;;  %v8507_v63 = vld [vmem:[#allocation25_spill] sm:$0xff] }
0x18bd   : > { %v2249_v14 = vadd.f32 %v2248_v10, %v5901_v38  ;;  %v8508_v10 = vld [vmem:[#allocation26_spill] sm:$0xff] }
0x18bf   : > { %v2251_v26 = vmul.f32 1.442695, %v2249_v14  ;;  %vm2250_vm4 = vcmp.gt.f32.partialorder %v2249_v14, 0.0 }
0x18c1   : > { %5331 = vpow2.f32 %v2251_v26  ;;  %v8510_v26 = vld [vmem:[#allocation28_spill] sm:$0xff] }
0x18cb   : > { %v5332_v32 = vpop.eup %5331 }
0x18cc   : > { %v4315_v48 = vadd.f32 -1.0, %v5332_v32  ;;  %v8511_v32 = vld [vmem:[#allocation29_spill] sm:$0xff] }
0x18ce   : > { %v2254_v33 = vsel %vm2250_vm4, %v2249_v14, %v4315_v48  ;;  %v8509_v14 = vld [vmem:[#allocation27_spill] sm:$0xff]  ;;  %v8512_v48 = vld [vmem:[#allocation30_spill] sm:$0xff] }
0x18cf   : > { %v2255_v40 = vpack.c.bf16 %v2254_v33, %v2254_v33  ;;  %v8513_v33 = vld [vmem:[#allocation31_spill] sm:$0xff] }
0x18d1   : > { %2289 = vmatmul.mubr.bf16.vlgmr.msra.gmra.mrb[56].mxu0 %v2255_v40  ;;  %2330 = vmatmul.mubr.bf16.vlgmr.msra.gmra.mrb[56].mxu1 %v2255_v40  ;;  %v8514_v40 = vld [vmem:[#allocation32_spill] sm:$0xff] }
0x18d2   : > { %4690 = vmatpush3.bf16.msra.mxu0 %v6534_v36  ;;  %4712 = vmatpush3.bf16.msra.mxu1 %v6537_v49 }
0x18d3   : > { %4691 = vmatprep.subr.bf16.mxu0 %v6540_v3  ;;  %4713 = vmatprep.subr.bf16.mxu1 %v8437_v46 }
0x18d6   : > { %4692 = vmatpush3.bf16.msra.mxu0 %v8438_v35  ;;  %4714 = vmatpush3.bf16.msra.mxu1 %v8439_v61 }
0x18d7   : > { %4693 = vmatprep.subr.bf16.mxu0 %v8440_v60  ;;  %4715 = vmatprep.subr.bf16.mxu1 %v8441_v44 }
0x18da   : > { %4694 = vmatpush3.bf16.msra.mxu0 %v8442_v31  ;;  %4716 = vmatpush3.bf16.msra.mxu1 %v8443_v1 }
0x18db   : > { %4695 = vmatprep.subr.bf16.mxu0 %v8444_v6  ;;  %4717 = vmatprep.subr.bf16.mxu1 %v8445_v47 }
0x18de   : > { %4696 = vmatpush3.bf16.msra.mxu0 %v8446_v54  ;;  %4718 = vmatpush3.bf16.msra.mxu1 %v8447_v22 }
0x18df   : > { %4697 = vmatprep.subr.bf16.mxu0 %v8448_v59  ;;  %4719 = vmatprep.subr.bf16.mxu1 %v8449_v24 }
0x18e2   : > { %4698 = vmatpush3.bf16.msra.mxu0 %v8450_v25  ;;  %4720 = vmatpush3.bf16.msra.mxu1 %v8451_v51 }
0x18e3   : > { %4699 = vmatprep.subr.bf16.mxu0 %v8452_v56  ;;  %4721 = vmatprep.subr.bf16.mxu1 %v8453_v28 }
0x18e6   : > { %4700 = vmatpush3.bf16.msra.mxu0 %v8454_v4  ;;  %4722 = vmatpush3.bf16.msra.mxu1 %v8455_v57 }
0x18e7   : > { %4701 = vmatprep.subr.bf16.mxu0 %v8456_v58  ;;  %4723 = vmatprep.subr.bf16.mxu1 %v8457_v53 }
0x18ea   : > { %4702 = vmatpush3.bf16.msra.mxu0 %v8458_v55  ;;  %4724 = vmatpush3.bf16.msra.mxu1 %v8459_v17 }
0x18eb   : > { %4703 = vmatprep.subr.bf16.mxu0 %v8460_v0  ;;  %4725 = vmatprep.subr.bf16.mxu1 %v8461_v2 }
0x18ee   : > { %4704 = vmatpush3.bf16.msra.mxu0 %v8462_v5  ;;  %4726 = vmatpush3.bf16.msra.mxu1 %v8463_v19 }
0x18ef   : > { %2472 = vmatprep.subr.bf16.mxu0 %v6786_v62  ;;  %2513 = vmatprep.subr.bf16.mxu1 %v6789_v7 }
0x19a4   : > { %v2290_v36 = vpop.f32.mrb[56].mxu0  ;;  %v2331_v49 = vpop.f32.mrb[56].mxu1 }
0x19a5   : > { %v2291_v3 = vadd.f32 %v2290_v36, %v8466_v18  ;;  %v2332_v46 = vadd.f32 %v2331_v49, %v8467_v9  ;;  %v2292_v35 = vpop.f32.mrb[57].mxu0  ;;  %v2333_v61 = vpop.f32.mrb[57].mxu1  ;;  %v8515_v36 = vld [vmem:[#allocation33_spill] sm:$0xff]  ;;  %v8516_v49 = vld [vmem:[#allocation34_spill] sm:$0xff] }
0x19a6   : > { %v2293_v60 = vadd.f32 %v2292_v35, %v6151_v50  ;;  %v2334_v44 = vadd.f32 %v2333_v61, %v8468_v8  ;;  %v2294_v31 = vpop.f32.mrb[58].mxu0  ;;  %v2335_v1 = vpop.f32.mrb[58].mxu1  ;;  %v8519_v35 = vld [vmem:[#allocation37_spill] sm:$0xff]  ;;  %v8520_v61 = vld [vmem:[#allocation38_spill] sm:$0xff] }
0x19a7   : > { %v2342_v6 = vmul.f32 1.442695, %v2291_v3  ;;  %v2346_v47 = vmul.f32 1.442695, %v2332_v46  ;;  %v2295_v59 = vpop.f32.mrb[59].mxu0  ;;  %v2336_v24 = vpop.f32.mrb[59].mxu1 }
0x19a8   : > { %v2344_v54 = vmul.f32 1.442695, %v2293_v60  ;;  %v2348_v22 = vmul.f32 1.442695, %v2334_v44  ;;  %vm2338_vm5 = vcmp.gt.f32.partialorder %v2291_v3, 0.0  ;;  %vm2340_vm6 = vcmp.gt.f32.partialorder %v2332_v46, 0.0 }
0x19a9   : > { %5333 = vpow2.f32 %v2342_v6  ;;  %vm2339_vm7 = vcmp.gt.f32.partialorder %v2293_v60, 0.0  ;;  %vm2341_vm8 = vcmp.gt.f32.partialorder %v2334_v44, 0.0  ;;  %v8523_v31 = vld [vmem:[#allocation41_spill] sm:$0xff]  ;;  %v8524_v1 = vld [vmem:[#allocation42_spill] sm:$0xff]  ;;  %v8525_v6 = vld [vmem:[#allocation43_spill] sm:$0xff] }
0x19aa   : > { %5335 = vpow2.f32 %v2346_v47  ;;  %v8526_v47 = vld [vmem:[#allocation44_spill] sm:$0xff]  ;;  %v8529_v59 = vld [vmem:[#allocation54_spill] sm:$0xff] }
0x19ab   : > { %5337 = vpow2.f32 %v2344_v54  ;;  %v8527_v54 = vld [vmem:[#allocation45_spill] sm:$0xff] }
0x19ac   : > { %5339 = vpow2.f32 %v2348_v22  ;;  %v8528_v22 = vld [vmem:[#allocation53_spill] sm:$0xff] }
0x19b3   : > { %v5334_v25 = vpop.eup %5333 }
0x19b4   : > { %v5336_v51 = vpop.eup %5335  ;;  %v4316_v56 = vadd.f32 -1.0, %v5334_v25 }
0x19b5   : > { %v5338_v28 = vpop.eup %5337  ;;  %v4318_v4 = vadd.f32 -1.0, %v5336_v51 }
0x19b6   : > { %v5340_v57 = vpop.eup %5339  ;;  %v4317_v58 = vadd.f32 -1.0, %v5338_v28  ;;  %v2354_v53 = vsel %vm2338_vm5, %v2291_v3, %v4316_v56  ;;  %v8517_v3 = vld [vmem:[#allocation35_spill] sm:$0xff] }
0x19b7   : > { %v4319_v55 = vadd.f32 -1.0, %v5340_v57  ;;  %v2356_v17 = vsel %vm2340_vm6, %v2332_v46, %v4318_v4  ;;  %v2358_v19 = vpack.c.bf16 %v2354_v53, %v2354_v53  ;;  %v8518_v46 = vld [vmem:[#allocation36_spill] sm:$0xff] }
0x19b8   : > { %v2355_v0 = vsel %vm2339_vm7, %v2293_v60, %v4317_v58  ;;  %v2360_v12 = vpack.c.bf16 %v2356_v17, %v2356_v17  ;;  %v8521_v60 = vld [vmem:[#allocation39_spill] sm:$0xff] }
0x19b9   : > { %v2359_v2 = vpack.c.bf16 %v2355_v0, %v2355_v0  ;;  %v2357_v5 = vsel %vm2341_vm8, %v2334_v44, %v4319_v55  ;;  %v8522_v44 = vld [vmem:[#allocation40_spill] sm:$0xff] }
0x19ba   : > { %v2361_v43 = vpack.c.bf16 %v2357_v5, %v2357_v5 }
0x19bb   : > { %2394 = vmatprep.mubr.bf16.mxu0 %v2359_v2 }
0x19bc   : > { %2434 = vmatprep.mubr.bf16.mxu1 %v2361_v43  ;;  %2395 = vmatmul.mubr.bf16.vlgmr.msra.gmra.mrb[60].mxu0 %v2358_v19 }
0x19bd   : > { %2435 = vmatmul.mubr.bf16.vlgmr.msra.gmra.mrb[60].mxu1 %v2360_v12  ;;  %2473 = vmatpush1.bf16.msra.mxu0 %v6796_v23 }
0x19be   : > { %2514 = vmatpush1.bf16.msra.mxu1 %v6799_v45  ;;  %2474 = vmatprep.subr.bf16.mxu0 %v6802_v16 }
0x19bf   : > { %2515 = vmatprep.subr.bf16.mxu1 %v8500_v13  ;;  %2504 = vmatprep.mubr.bf16.mxu0 %v8501_v11 }
0x19c0   : > { %2545 = vmatprep.mubr.bf16.mxu1 %v8501_v11 }
0x19c1   : > { %2475 = vmatpush1.bf16.msra.mxu0 %v8502_v30 }
0x19c2   : > { %2516 = vmatpush1.bf16.msra.mxu1 %v8503_v20  ;;  %2476 = vmatprep.subr.bf16.mxu0 %v8504_v27 }
0x19c3   : > { %2517 = vmatprep.subr.bf16.mxu1 %v8505_v15 }
0x19c5   : > { %2477 = vmatpush1.bf16.msra.mxu0 %v8506_v29 }
0x19c6   : > { %2518 = vmatpush1.bf16.msra.mxu1 %v8507_v63  ;;  %2478 = vmatprep.subr.bf16.mxu0 %v8508_v10 }
0x19c7   : > { %2519 = vmatprep.subr.bf16.mxu1 %v8509_v14 }
0x19c9   : > { %2479 = vmatpush1.bf16.msra.mxu0 %v8510_v26 }
0x19ca   : > { %2520 = vmatpush1.bf16.msra.mxu1 %v8511_v32  ;;  %2480 = vmatprep.subr.bf16.mxu0 %v8512_v48 }
0x19cb   : > { %2521 = vmatprep.subr.bf16.mxu1 %v8513_v33 }
0x19cd   : > { %2481 = vmatpush1.bf16.msra.mxu0 %v8514_v40 }
0x19ce   : > { %2522 = vmatpush1.bf16.msra.mxu1 %v8515_v36  ;;  %2482 = vmatprep.subr.bf16.mxu0 %v8516_v49 }
0x19cf   : > { %2523 = vmatprep.subr.bf16.mxu1 %v8517_v3 }
0x19d1   : > { %2483 = vmatpush1.bf16.msra.mxu0 %v8518_v46 }
0x19d2   : > { %2524 = vmatpush1.bf16.msra.mxu1 %v8519_v35  ;;  %2484 = vmatprep.subr.bf16.mxu0 %v8520_v61 }
0x19d3   : > { %2525 = vmatprep.subr.bf16.mxu1 %v8521_v60 }
0x19d5   : > { %2485 = vmatpush1.bf16.msra.mxu0 %v8522_v44 }
0x19d6   : > { %2526 = vmatpush1.bf16.msra.mxu1 %v8523_v31  ;;  %2486 = vmatprep.subr.bf16.mxu0 %v8524_v1 }
0x19d7   : > { %2527 = vmatprep.subr.bf16.mxu1 %v8525_v6 }
0x19d9   : > { %2487 = vmatpush1.bf16.msra.mxu0 %v8526_v47 }
0x19da   : > { %2528 = vmatpush1.bf16.msra.mxu1 %v8527_v54  ;;  %4733 = vmatprep.subr.bf16.mxu0 %v8528_v22 }
0x19db   : > { %4755 = vmatprep.subr.bf16.mxu1 %v8529_v59 }
0x1a8f   : > { %v4705_v24 = vpop.f32.mrb[60].mxu0 }
0x1a90   : > { %v4727_v25 = vpop.f32.mrb[60].mxu1  ;;  %v4706_v51 = vpop.f32.mrb[61].mxu0 }
0x1a91   : > { %v4707_v56 = vadd.f32 %v4706_v51, %v4705_v24  ;;  %v4728_v28 = vpop.f32.mrb[61].mxu1  ;;  %v4708_v4 = vpop.f32.mrb[62].mxu0 }
0x1a92   : > { %v4729_v57 = vadd.f32 %v4728_v28, %v4727_v25  ;;  %v4730_v58 = vpop.f32.mrb[62].mxu1  ;;  %v4709_v53 = vpop.f32.mrb[63].mxu0  ;;  %v8530_v28 = vld [vmem:[#allocation50_spill] sm:$0xff] }
0x1a93   : > { %v2397_v55 = vadd.f32 %v4707_v56, %v5906_v39  ;;  %v4731_v17 = vpop.f32.mrb[63].mxu1 }
0x1a95   : > { %v2437_v0 = vadd.f32 %v4729_v57, %v2397_v55 }
0x1a97   : > { %v2443_v2 = vmul.f32 1.442695, %v2437_v0  ;;  %vm2442_vm9 = vcmp.gt.f32.partialorder %v2437_v0, 0.0 }
0x1a99   : > { %5341 = vpow2.f32 %v2443_v2 }
0x1aa3   : > { %v5342_v5 = vpop.eup %5341 }
0x1aa4   : > { %v4320_v19 = vadd.f32 -1.0, %v5342_v5  ;;  %v6994_v5 = vld [vmem:[#allocation7 + $0x48] sm:$0xff]  }
0x1aa6   : > { %v2446_v43 = vsel %vm2442_vm9, %v2437_v0, %v4320_v19  ;;  %v6997_v19 = vld [vmem:[#allocation7 + $0xc8] sm:$0xff]  }
0x1aa7   : > { %v2447_v12 = vmul.f32 %v2446_v43, %v5916_v41  ;;  %8531 = vst [vmem:[#allocation51_spill] sm:$0xff] %v6997_v19  ;;  %v7000_v43 = vld [vmem:[#allocation7 + $0x8] sm:$0xff]  }
0x1aa8   : > { %8532 = vst [vmem:[#allocation19_spill] sm:$0xff] %v7000_v43 }
0x1aa9   : > { %v2448_v21 = vsel %vm961_vm13, %v2447_v12, 0.0  ;;  %v7003_v12 = vld [vmem:[#allocation7 + $0x88] sm:$0xff]  }
0x1aaa   : > { %2449 = vadd.xlane.f32.xlu1 %v2448_v21  ;;  %8533 = vst [vmem:[#allocation20_spill] sm:$0xff] %v7003_v12 }
0x1b37   : > { %v2450_v24 = vpop.xlane.xlu1 %2449 }
0x1b38   : > { %v2451_v25 = vadd.f32 %v2450_v24, %v5921_v42  ;;  %v7006_v24 = vld [vmem:[#allocation7 + $0x50] sm:$0xff]  }
0x1b39   : > { %8534 = vst [vmem:[#allocation21_spill] sm:$0xff] %v7006_v24 }
0x1b3a   : > { %v2456_v51 = vadd.f32 %v6902_v52, %v2451_v25  ;;  %v6988_v52 = vld [vmem:[#allocation7] sm:$0xff]   ;;  %v7009_v25 = vld [vmem:[#allocation7 + $0xd0] sm:$0xff]  }
0x1b3b   : > { %8535 = vst [vmem:[#allocation22_spill] sm:$0xff] %v7009_v25 }
0x1b3c   : > { %v2457_v56 = vmul.f32 %v2456_v51, %v8530_v28  ;;  %v7012_v51 = vld [vmem:[#allocation7 + $0x10] sm:$0xff]   ;;  %v7042_v28 = vld [vmem:[#allocation7 + $0x68] sm:$0xff]  }
0x1b3d   : > { %8536 = vst [vmem:[#allocation23_spill] sm:$0xff] %v7012_v51  ;;  %8546 = vst [vmem:[#allocation33_spill] sm:$0xff] %v7042_v28 }
0x1b3e   : > { %v6983_v4 = vadd.f32 %v2457_v56, %v6529_v34  ;;  %v6991_v34 = vld [vmem:[#allocation7 + $0x80] sm:$0xff]   ;;  %v7015_v56 = vld [vmem:[#allocation7 + $0x90] sm:$0xff]  }
0x1b3f   : > { %8537 = vst [vmem:[#allocation24_spill] sm:$0xff] %v7015_v56 }
0x1b40   : > { %2461 = vperm.xlu0 %5165, %v6983_v4  }
0x1bbf   : > { %v2462_v57 = vpop.permute.xlu0 %2461 }
0x1bc0   : > { %v2464_v58 = vmul.f32 %v2462_v57, %v5896_v37  ;;  %v7018_v57 = vld [vmem:[#allocation7 + $0x58] sm:$0xff]  }
0x1bc1   : > { %8538 = vst [vmem:[#allocation25_spill] sm:$0xff] %v7018_v57 }
0x1bc2   : > { %v2465_v53 = vadd.f32 %v2464_v58, %v5901_v38  ;;  %v7021_v58 = vld [vmem:[#allocation7 + $0xd8] sm:$0xff]  }
0x1bc3   : > { %8539 = vst [vmem:[#allocation26_spill] sm:$0xff] %v7021_v58 }
0x1bc4   : > { %v2467_v55 = vmul.f32 1.442695, %v2465_v53  ;;  %vm2466_vm10 = vcmp.gt.f32.partialorder %v2465_v53, 0.0 }
0x1bc6   : > { %5343 = vpow2.f32 %v2467_v55  ;;  %v7027_v55 = vld [vmem:[#allocation7 + $0x98] sm:$0xff]  }
0x1bc7   : > { %8541 = vst [vmem:[#allocation28_spill] sm:$0xff] %v7027_v55 }
0x1bd0   : > { %v5344_v21 = vpop.eup %5343 }
0x1bd1   : > { %v4321_v17 = vadd.f32 -1.0, %v5344_v21  ;;  %v7030_v21 = vld [vmem:[#allocation7 + $0x60] sm:$0xff]  }
0x1bd2   : > { %8542 = vst [vmem:[#allocation29_spill] sm:$0xff] %v7030_v21 }
0x1bd3   : > { %v2470_v0 = vsel %vm2466_vm10, %v2465_v53, %v4321_v17  ;;  %v7024_v53 = vld [vmem:[#allocation7 + $0x18] sm:$0xff]   ;;  %v7033_v17 = vld [vmem:[#allocation7 + $0xe0] sm:$0xff]  }
0x1bd4   : > { %v2471_v2 = vpack.c.bf16 %v2470_v0, %v2470_v0  ;;  %8540 = vst [vmem:[#allocation27_spill] sm:$0xff] %v7024_v53  ;;  %8543 = vst [vmem:[#allocation30_spill] sm:$0xff] %v7033_v17  ;;  %v7036_v0 = vld [vmem:[#allocation7 + $0x20] sm:$0xff]  }
0x1bd5   : > { %8544 = vst [vmem:[#allocation31_spill] sm:$0xff] %v7036_v0 }
0x1bd6   : > { %2505 = vmatmul.mubr.bf16.vlgmr.msra.gmra.mrb[64].mxu0 %v2471_v2  ;;  %2546 = vmatmul.mubr.bf16.vlgmr.msra.gmra.mrb[64].mxu1 %v2471_v2  ;;  %v7039_v2 = vld [vmem:[#allocation7 + $0xa0] sm:$0xff]  }
0x1bd7   : > { %4734 = vmatpush3.bf16.msra.mxu0 %v6988_v52  ;;  %4756 = vmatpush3.bf16.msra.mxu1 %v6991_v34  ;;  %8545 = vst [vmem:[#allocation32_spill] sm:$0xff] %v7039_v2 }
0x1bd8   : > { %4735 = vmatprep.subr.bf16.mxu0 %v6994_v5  ;;  %4757 = vmatprep.subr.bf16.mxu1 %v6997_v19 }
0x1bdb   : > { %4736 = vmatpush3.bf16.msra.mxu0 %v7000_v43  ;;  %4758 = vmatpush3.bf16.msra.mxu1 %v7003_v12 }
0x1bdc   : > { %4737 = vmatprep.subr.bf16.mxu0 %v7006_v24  ;;  %4759 = vmatprep.subr.bf16.mxu1 %v7009_v25 }
0x1bdf   : > { %4738 = vmatpush3.bf16.msra.mxu0 %v7012_v51  ;;  %4760 = vmatpush3.bf16.msra.mxu1 %v7015_v56 }
0x1be0   : > { %4739 = vmatprep.subr.bf16.mxu0 %v7018_v57  ;;  %4761 = vmatprep.subr.bf16.mxu1 %v7021_v58 }
0x1be3   : > { %4740 = vmatpush3.bf16.msra.mxu0 %v7024_v53  ;;  %4762 = vmatpush3.bf16.msra.mxu1 %v7027_v55  ;;  %v7045_v55 = vld [vmem:[#allocation7 + $0xe8] sm:$0xff]  }
0x1be4   : > { %4741 = vmatprep.subr.bf16.mxu0 %v7030_v21  ;;  %4763 = vmatprep.subr.bf16.mxu1 %v7033_v17  ;;  %8547 = vst [vmem:[#allocation34_spill] sm:$0xff] %v7045_v55  ;;  %v7048_v21 = vld [vmem:[#allocation7 + $0x28] sm:$0xff]  }
0x1be5   : > { %8548 = vst [vmem:[#allocation35_spill] sm:$0xff] %v7048_v21  ;;  %v7051_v17 = vld [vmem:[#allocation7 + $0xa8] sm:$0xff]  }
0x1be6   : > { %8549 = vst [vmem:[#allocation36_spill] sm:$0xff] %v7051_v17 }
0x1be7   : > { %4742 = vmatpush3.bf16.msra.mxu0 %v7036_v0  ;;  %4764 = vmatpush3.bf16.msra.mxu1 %v7039_v2  ;;  %v7054_v0 = vld [vmem:[#allocation7 + $0x70] sm:$0xff]  }
0x1be8   : > { %4743 = vmatprep.subr.bf16.mxu0 %v7042_v28  ;;  %4765 = vmatprep.subr.bf16.mxu1 %v7045_v55  ;;  %8550 = vst [vmem:[#allocation37_spill] sm:$0xff] %v7054_v0  ;;  %v7057_v2 = vld [vmem:[#allocation7 + $0xf0] sm:$0xff]  }
0x1be9   : > { %8551 = vst [vmem:[#allocation38_spill] sm:$0xff] %v7057_v2  ;;  %v7060_v28 = vld [vmem:[#allocation7 + $0x30] sm:$0xff]  }
0x1bea   : > { %8552 = vst [vmem:[#allocation39_spill] sm:$0xff] %v7060_v28  ;;  %v7063_v55 = vld [vmem:[#allocation7 + $0xb0] sm:$0xff]  }
0x1beb   : > { %4744 = vmatpush3.bf16.msra.mxu0 %v7048_v21  ;;  %4766 = vmatpush3.bf16.msra.mxu1 %v7051_v17  ;;  %8553 = vst [vmem:[#allocation40_spill] sm:$0xff] %v7063_v55  ;;  %v7066_v21 = vld [vmem:[#allocation7 + $0x78] sm:$0xff]  }
0x1bec   : > { %4745 = vmatprep.subr.bf16.mxu0 %v7054_v0  ;;  %4767 = vmatprep.subr.bf16.mxu1 %v7057_v2  ;;  %8554 = vst [vmem:[#allocation41_spill] sm:$0xff] %v7066_v21  ;;  %v7069_v17 = vld [vmem:[#allocation7 + $0xf8] sm:$0xff]  }
0x1bed   : > { %8555 = vst [vmem:[#allocation42_spill] sm:$0xff] %v7069_v17  ;;  %v7072_v0 = vld [vmem:[#allocation7 + $0x38] sm:$0xff]  }
0x1bee   : > { %8556 = vst [vmem:[#allocation43_spill] sm:$0xff] %v7072_v0  ;;  %v7075_v2 = vld [vmem:[#allocation7 + $0xb8] sm:$0xff]  }
0x1bef   : > { %4746 = vmatpush3.bf16.msra.mxu0 %v7060_v28  ;;  %4768 = vmatpush3.bf16.msra.mxu1 %v7063_v55  ;;  %8557 = vst [vmem:[#allocation44_spill] sm:$0xff] %v7075_v2 }
0x1bf0   : > { %4747 = vmatprep.subr.bf16.mxu0 %v7066_v21  ;;  %4769 = vmatprep.subr.bf16.mxu1 %v7069_v17 }
0x1bf3   : > { %4748 = vmatpush3.bf16.msra.mxu0 %v7072_v0  ;;  %4770 = vmatpush3.bf16.msra.mxu1 %v7075_v2 }
0x1bf4   : > { %2683 = vmatprep.subr.bf16.mxu0 %v6786_v62  ;;  %2724 = vmatprep.subr.bf16.mxu1 %v6789_v7 }
0x1ca9   : > { %v2506_v55 = vpop.f32.mrb[64].mxu0  ;;  %v2547_v28 = vpop.f32.mrb[64].mxu1 }
0x1caa   : > { %v2507_v21 = vadd.f32 %v2506_v55, %v8466_v18  ;;  %v2548_v53 = vadd.f32 %v2547_v28, %v8467_v9  ;;  %v2508_v58 = vpop.f32.mrb[65].mxu0  ;;  %v2549_v17 = vpop.f32.mrb[65].mxu1 }
0x1cab   : > { %v2509_v57 = vadd.f32 %v2508_v58, %v6151_v50  ;;  %v2550_v0 = vadd.f32 %v2549_v17, %v8468_v8  ;;  %v2510_v56 = vpop.f32.mrb[66].mxu0  ;;  %v2551_v51 = vpop.f32.mrb[66].mxu1 }
0x1cac   : > { %v2558_v25 = vmul.f32 1.442695, %v2507_v21  ;;  %v2562_v2 = vmul.f32 1.442695, %v2548_v53  ;;  %v2511_v7 = vpop.f32.mrb[67].mxu0  ;;  %v2552_v12 = vpop.f32.mrb[67].mxu1 }
0x1cad   : > { %v2560_v24 = vmul.f32 1.442695, %v2509_v57  ;;  %v2564_v62 = vmul.f32 1.442695, %v2550_v0  ;;  %vm2554_vm11 = vcmp.gt.f32.partialorder %v2507_v21, 0.0  ;;  %vm2556_vm12 = vcmp.gt.f32.partialorder %v2548_v53, 0.0 }
0x1cae   : > { %5345 = vpow2.f32 %v2558_v25  ;;  %vm2555_vm14 = vcmp.gt.f32.partialorder %v2509_v57, 0.0  ;;  %vm2557_vm15 = vcmp.gt.f32.partialorder %v2550_v0, 0.0 }
0x1caf   : > { %5347 = vpow2.f32 %v2562_v2 }
0x1cb0   : > { %5349 = vpow2.f32 %v2560_v24 }
0x1cb1   : > { %5351 = vpow2.f32 %v2564_v62 }
0x1cb8   : > { %v5346_v55 = vpop.eup %5345 }
0x1cb9   : > { %v5348_v28 = vpop.eup %5347  ;;  %v4322_v9 = vadd.f32 -1.0, %v5346_v55 }
0x1cba   : > { %v5350_v18 = vpop.eup %5349  ;;  %v4324_v43 = vadd.f32 -1.0, %v5348_v28 }
0x1cbb   : > { %v5352_v58 = vpop.eup %5351  ;;  %v4323_v17 = vadd.f32 -1.0, %v5350_v18  ;;  %v2570_v56 = vsel %vm2554_vm11, %v2507_v21, %v4322_v9 }
0x1cbc   : > { %v4325_v51 = vadd.f32 -1.0, %v5352_v58  ;;  %v2572_v8 = vsel %vm2556_vm12, %v2548_v53, %v4324_v43  ;;  %v2574_v2 = vpack.c.bf16 %v2570_v56, %v2570_v56 }
0x1cbd   : > { %v2571_v25 = vsel %vm2555_vm14, %v2509_v57, %v4323_v17  ;;  %v2576_v62 = vpack.c.bf16 %v2572_v8, %v2572_v8 }
0x1cbe   : > { %v2575_v7 = vpack.c.bf16 %v2571_v25, %v2571_v25  ;;  %v2573_v12 = vsel %vm2557_vm15, %v2550_v0, %v4325_v51 }
0x1cbf   : > { %v2577_v24 = vpack.c.bf16 %v2573_v12, %v2573_v12 }
0x1cc0   : > { %2610 = vmatprep.mubr.bf16.mxu0 %v2575_v7 }
0x1cc1   : > { %2650 = vmatprep.mubr.bf16.mxu1 %v2577_v24  ;;  %2611 = vmatmul.mubr.bf16.vlgmr.msra.gmra.mrb[68].mxu0 %v2574_v2 }
0x1cc2   : > { %2651 = vmatmul.mubr.bf16.vlgmr.msra.gmra.mrb[68].mxu1 %v2576_v62  ;;  %2684 = vmatpush1.bf16.msra.mxu0 %v6796_v23 }
0x1cc3   : > { %2725 = vmatpush1.bf16.msra.mxu1 %v6799_v45  ;;  %2685 = vmatprep.subr.bf16.mxu0 %v6802_v16 }
0x1cc4   : > { %2726 = vmatprep.subr.bf16.mxu1 %v8500_v13  ;;  %2715 = vmatprep.mubr.bf16.mxu0 %v8501_v11 }
0x1cc5   : > { %2756 = vmatprep.mubr.bf16.mxu1 %v8501_v11 }
0x1cc6   : > { %2686 = vmatpush1.bf16.msra.mxu0 %v8502_v30 }
0x1cc7   : > { %2727 = vmatpush1.bf16.msra.mxu1 %v8503_v20  ;;  %2687 = vmatprep.subr.bf16.mxu0 %v8504_v27 }
0x1cc8   : > { %2728 = vmatprep.subr.bf16.mxu1 %v8505_v15 }
0x1cca   : > { %2688 = vmatpush1.bf16.msra.mxu0 %v8506_v29 }
0x1ccb   : > { %2729 = vmatpush1.bf16.msra.mxu1 %v8507_v63  ;;  %2689 = vmatprep.subr.bf16.mxu0 %v8508_v10 }
0x1ccc   : > { %2730 = vmatprep.subr.bf16.mxu1 %v8509_v14 }
0x1cce   : > { %2690 = vmatpush1.bf16.msra.mxu0 %v8510_v26 }
0x1ccf   : > { %2731 = vmatpush1.bf16.msra.mxu1 %v8511_v32  ;;  %2691 = vmatprep.subr.bf16.mxu0 %v8512_v48 }
0x1cd0   : > { %2732 = vmatprep.subr.bf16.mxu1 %v8513_v33 }
0x1cd2   : > { %2692 = vmatpush1.bf16.msra.mxu0 %v8514_v40 }
0x1cd3   : > { %2733 = vmatpush1.bf16.msra.mxu1 %v8515_v36  ;;  %2693 = vmatprep.subr.bf16.mxu0 %v8516_v49 }
0x1cd4   : > { %2734 = vmatprep.subr.bf16.mxu1 %v8517_v3 }
0x1cd6   : > { %2694 = vmatpush1.bf16.msra.mxu0 %v8518_v46 }
0x1cd7   : > { %2735 = vmatpush1.bf16.msra.mxu1 %v8519_v35  ;;  %2695 = vmatprep.subr.bf16.mxu0 %v8520_v61 }
0x1cd8   : > { %2736 = vmatprep.subr.bf16.mxu1 %v8521_v60 }
0x1cda   : > { %2696 = vmatpush1.bf16.msra.mxu0 %v8522_v44 }
0x1cdb   : > { %2737 = vmatpush1.bf16.msra.mxu1 %v8523_v31  ;;  %2697 = vmatprep.subr.bf16.mxu0 %v8524_v1 }
0x1cdc   : > { %2738 = vmatprep.subr.bf16.mxu1 %v8525_v6 }
0x1cde   : > { %2698 = vmatpush1.bf16.msra.mxu0 %v8526_v47 }
0x1cdf   : > { %2739 = vmatpush1.bf16.msra.mxu1 %v8527_v54  ;;  %4777 = vmatprep.subr.bf16.mxu0 %v8528_v22 }
0x1ce0   : > { %4799 = vmatprep.subr.bf16.mxu1 %v8529_v59 }
0x1d94   : > { %v4749_v18 = vpop.f32.mrb[68].mxu0 }
0x1d95   : > { %v4771_v9 = vpop.f32.mrb[68].mxu1  ;;  %v4750_v8 = vpop.f32.mrb[69].mxu0 }
0x1d96   : > { %v4751_v43 = vadd.f32 %v4750_v8, %v4749_v18  ;;  %v4772_v57 = vpop.f32.mrb[69].mxu1  ;;  %v4752_v53 = vpop.f32.mrb[70].mxu0  ;;  %v8559_v18 = vld [vmem:[#allocation49_spill] sm:$0xff] }
0x1d97   : > { %v4773_v21 = vadd.f32 %v4772_v57, %v4771_v9  ;;  %v4774_v0 = vpop.f32.mrb[70].mxu1  ;;  %v4753_v55 = vpop.f32.mrb[71].mxu0 }
0x1d98   : > { %v2613_v28 = vadd.f32 %v4751_v43, %v5906_v39  ;;  %v4775_v58 = vpop.f32.mrb[71].mxu1 }
0x1d9a   : > { %v2653_v17 = vadd.f32 %v4773_v21, %v2613_v28 }
0x1d9c   : > { %v2659_v56 = vmul.f32 1.442695, %v2653_v17  ;;  %vm2658_vm0 = vcmp.gt.f32.partialorder %v2653_v17, 0.0 }
0x1d9e   : > { %5353 = vpow2.f32 %v2659_v56  ;;  %v8561_v56 = vld [vmem:[#allocation20_spill] sm:$0xff] }
0x1da8   : > { %v5354_v51 = vpop.eup %5353 }
0x1da9   : > { %v4326_v25 = vadd.f32 -1.0, %v5354_v51  ;;  %v8562_v51 = vld [vmem:[#allocation21_spill] sm:$0xff] }
0x1dab   : > { %v2662_v7 = vsel %vm2658_vm0, %v2653_v17, %v4326_v25  ;;  %v8560_v17 = vld [vmem:[#allocation19_spill] sm:$0xff]  ;;  %v8563_v25 = vld [vmem:[#allocation22_spill] sm:$0xff] }
0x1dac   : > { %v2663_v12 = vmul.f32 %v2662_v7, %v5916_v41  ;;  %v8564_v7 = vld [vmem:[#allocation23_spill] sm:$0xff] }
0x1dae   : > { %v2664_v2 = vsel %vm961_vm13, %v2663_v12, 0.0  ;;  %v8565_v12 = vld [vmem:[#allocation24_spill] sm:$0xff] }
0x1daf   : > { %2665 = vadd.xlane.f32.xlu1 %v2664_v2  ;;  %v8566_v2 = vld [vmem:[#allocation25_spill] sm:$0xff] }
0x1e3c   : > { %v2666_v24 = vpop.xlane.xlu1 %2665 }
0x1e3d   : > { %v7122_v62 = vadd.f32 %v2666_v24, %v5921_v42  ;;  %v8567_v24 = vld [vmem:[#allocation26_spill] sm:$0xff] }
0x1e3f   : > { %8558 = vst [vmem:[#allocation45_spill] sm:$0xff] %v7122_v62  ;;  %v2668_v9 = vmul.f32 %v7122_v62, %v8559_v18  ;;  %v8578_v62 = vld [vmem:[#allocation37_spill] sm:$0xff] }
0x1e41   : > { %v2669_v8 = vadd.f32 %v2668_v9, %v6983_v4  ;;  %v8568_v9 = vld [vmem:[#allocation27_spill] sm:$0xff] }
0x1e43   : > { %2672 = vperm.xlu0 %5165, %v2669_v8   ;;  %v8569_v8 = vld [vmem:[#allocation28_spill] sm:$0xff] }
0x1ec2   : > { %v2673_v43 = vpop.permute.xlu0 %2672 }
0x1ec3   : > { %v2675_v57 = vmul.f32 %v2673_v43, %v5896_v37  ;;  %v8570_v43 = vld [vmem:[#allocation29_spill] sm:$0xff] }
0x1ec5   : > { %v2676_v53 = vadd.f32 %v2675_v57, %v5901_v38  ;;  %v8571_v57 = vld [vmem:[#allocation30_spill] sm:$0xff] }
0x1ec7   : > { %v2678_v21 = vmul.f32 1.442695, %v2676_v53  ;;  %vm2677_vm1 = vcmp.gt.f32.partialorder %v2676_v53, 0.0 }
0x1ec9   : > { %5355 = vpow2.f32 %v2678_v21  ;;  %v8573_v21 = vld [vmem:[#allocation32_spill] sm:$0xff] }
0x1ed3   : > { %v5356_v0 = vpop.eup %5355 }
0x1ed4   : > { %v4327_v55 = vadd.f32 -1.0, %v5356_v0  ;;  %v8574_v0 = vld [vmem:[#allocation33_spill] sm:$0xff] }
0x1ed6   : > { %v2681_v28 = vsel %vm2677_vm1, %v2676_v53, %v4327_v55  ;;  %v8572_v53 = vld [vmem:[#allocation31_spill] sm:$0xff]  ;;  %v8575_v55 = vld [vmem:[#allocation34_spill] sm:$0xff] }
0x1ed7   : > { %v2682_v58 = vpack.c.bf16 %v2681_v28, %v2681_v28  ;;  %v8576_v28 = vld [vmem:[#allocation35_spill] sm:$0xff] }
0x1ed9   : > { %2716 = vmatmul.mubr.bf16.vlgmr.msra.gmra.mrb[72].mxu0 %v2682_v58  ;;  %2757 = vmatmul.mubr.bf16.vlgmr.msra.gmra.mrb[72].mxu1 %v2682_v58  ;;  %v8577_v58 = vld [vmem:[#allocation36_spill] sm:$0xff] }
0x1eda   : > { %4778 = vmatpush3.bf16.msra.mxu0 %v6988_v52  ;;  %4800 = vmatpush3.bf16.msra.mxu1 %v6991_v34 }
0x1edb   : > { %4779 = vmatprep.subr.bf16.mxu0 %v6994_v5  ;;  %4801 = vmatprep.subr.bf16.mxu1 %v6997_v19 }
0x1ede   : > { %4780 = vmatpush3.bf16.msra.mxu0 %v8560_v17  ;;  %4802 = vmatpush3.bf16.msra.mxu1 %v8561_v56 }
0x1edf   : > { %4781 = vmatprep.subr.bf16.mxu0 %v8562_v51  ;;  %4803 = vmatprep.subr.bf16.mxu1 %v8563_v25 }
0x1ee2   : > { %4782 = vmatpush3.bf16.msra.mxu0 %v8564_v7  ;;  %4804 = vmatpush3.bf16.msra.mxu1 %v8565_v12  ;;  %v8590_v7 = vld [vmem:[#allocation48_spill] sm:$0xff] }
0x1ee3   : > { %4783 = vmatprep.subr.bf16.mxu0 %v8566_v2  ;;  %4805 = vmatprep.subr.bf16.mxu1 %v8567_v24  ;;  %v8588_v24 = vld [vmem:[#allocation46_spill] sm:$0xff]  ;;  %v8589_v2 = vld [vmem:[#allocation47_spill] sm:$0xff] }
0x1ee6   : > { %4784 = vmatpush3.bf16.msra.mxu0 %v8568_v9  ;;  %4806 = vmatpush3.bf16.msra.mxu1 %v8569_v8  ;;  %v8579_v9 = vld [vmem:[#allocation38_spill] sm:$0xff]  ;;  %v8580_v8 = vld [vmem:[#allocation39_spill] sm:$0xff] }
0x1ee7   : > { %4785 = vmatprep.subr.bf16.mxu0 %v8570_v43  ;;  %4807 = vmatprep.subr.bf16.mxu1 %v8571_v57  ;;  %v8581_v43 = vld [vmem:[#allocation40_spill] sm:$0xff]  ;;  %v8582_v57 = vld [vmem:[#allocation41_spill] sm:$0xff] }
0x1eea   : > { %4786 = vmatpush3.bf16.msra.mxu0 %v8572_v53  ;;  %4808 = vmatpush3.bf16.msra.mxu1 %v8573_v21  ;;  %v8583_v53 = vld [vmem:[#allocation42_spill] sm:$0xff]  ;;  %v8584_v21 = vld [vmem:[#allocation43_spill] sm:$0xff] }
0x1eeb   : > { %4787 = vmatprep.subr.bf16.mxu0 %v8574_v0  ;;  %4809 = vmatprep.subr.bf16.mxu1 %v8575_v55  ;;  %v8585_v0 = vld [vmem:[#allocation44_spill] sm:$0xff]  ;;  %v8586_v55 = vld [vmem:[#allocation17_spill] sm:$0xff] }
0x1eee   : > { %4788 = vmatpush3.bf16.msra.mxu0 %v8576_v28  ;;  %4810 = vmatpush3.bf16.msra.mxu1 %v8577_v58  ;;  %v8587_v28 = vld [vmem:[#allocation18_spill] sm:$0xff] }
0x1eef   : > { %4789 = vmatprep.subr.bf16.mxu0 %v8578_v62  ;;  %4811 = vmatprep.subr.bf16.mxu1 %v8579_v9 }
0x1ef2   : > { %4790 = vmatpush3.bf16.msra.mxu0 %v8580_v8  ;;  %4812 = vmatpush3.bf16.msra.mxu1 %v8581_v43 }
0x1ef3   : > { %4791 = vmatprep.subr.bf16.mxu0 %v8582_v57  ;;  %4813 = vmatprep.subr.bf16.mxu1 %v8583_v53 }
0x1ef6   : > { %4792 = vmatpush3.bf16.msra.mxu0 %v8584_v21  ;;  %4814 = vmatpush3.bf16.msra.mxu1 %v8585_v0 }
0x1ef7   : > { %2894 = vmatprep.subr.bf16.mxu0 %v8586_v55  ;;  %2935 = vmatprep.subr.bf16.mxu1 %v8587_v28 }
0x1fac   : > { %v2717_v58 = vpop.f32.mrb[72].mxu0  ;;  %v2758_v62 = vpop.f32.mrb[72].mxu1 }
0x1fad   : > { %v2718_v9 = vadd.f32 %v2717_v58, %v8588_v24  ;;  %v2759_v8 = vadd.f32 %v2758_v62, %v8589_v2  ;;  %v2719_v12 = vpop.f32.mrb[73].mxu0  ;;  %v2760_v43 = vpop.f32.mrb[73].mxu1 }
0x1fae   : > { %v2720_v57 = vadd.f32 %v2719_v12, %v6151_v50  ;;  %v2761_v53 = vadd.f32 %v2760_v43, %v8590_v7  ;;  %v2721_v25 = vpop.f32.mrb[74].mxu0  ;;  %v2762_v21 = vpop.f32.mrb[74].mxu1 }
0x1faf   : > { %v2769_v51 = vmul.f32 1.442695, %v2718_v9  ;;  %v2773_v0 = vmul.f32 1.442695, %v2759_v8  ;;  %v2722_v28 = vpop.f32.mrb[75].mxu0  ;;  %v2763_v17 = vpop.f32.mrb[75].mxu1 }
0x1fb0   : > { %v2771_v56 = vmul.f32 1.442695, %v2720_v57  ;;  %v2775_v55 = vmul.f32 1.442695, %v2761_v53  ;;  %vm2765_vm2 = vcmp.gt.f32.partialorder %v2718_v9, 0.0  ;;  %vm2767_vm3 = vcmp.gt.f32.partialorder %v2759_v8, 0.0 }
0x1fb1   : > { %5357 = vpow2.f32 %v2769_v51  ;;  %vm2766_vm4 = vcmp.gt.f32.partialorder %v2720_v57, 0.0  ;;  %vm2768_vm5 = vcmp.gt.f32.partialorder %v2761_v53, 0.0 }
0x1fb2   : > { %5359 = vpow2.f32 %v2773_v0 }
0x1fb3   : > { %5361 = vpow2.f32 %v2771_v56 }
0x1fb4   : > { %5363 = vpow2.f32 %v2775_v55 }
0x1fbb   : > { %v5358_v58 = vpop.eup %5357 }
0x1fbc   : > { %v5360_v62 = vpop.eup %5359  ;;  %v4328_v2 = vadd.f32 -1.0, %v5358_v58  ;;  %v8601_v58 = vld [vmem:[#allocation28_spill] sm:$0xff] }
0x1fbd   : > { %v5362_v24 = vpop.eup %5361  ;;  %v4330_v19 = vadd.f32 -1.0, %v5360_v62  ;;  %v8602_v62 = vld [vmem:[#allocation29_spill] sm:$0xff] }
0x1fbe   : > { %v5364_v12 = vpop.eup %5363  ;;  %v4329_v43 = vadd.f32 -1.0, %v5362_v24  ;;  %v2781_v25 = vsel %vm2765_vm2, %v2718_v9, %v4328_v2  ;;  %v8595_v2 = vld [vmem:[#allocation22_spill] sm:$0xff]  ;;  %v8596_v24 = vld [vmem:[#allocation23_spill] sm:$0xff]  ;;  %v8597_v9 = vld [vmem:[#allocation24_spill] sm:$0xff] }
0x1fbf   : > { %v4331_v21 = vadd.f32 -1.0, %v5364_v12  ;;  %v2783_v7 = vsel %vm2767_vm3, %v2759_v8, %v4330_v19  ;;  %v2785_v0 = vpack.c.bf16 %v2781_v25, %v2781_v25  ;;  %v8593_v19 = vld [vmem:[#allocation20_spill] sm:$0xff]  ;;  %v8598_v8 = vld [vmem:[#allocation25_spill] sm:$0xff]  ;;  %v8603_v12 = vld [vmem:[#allocation30_spill] sm:$0xff] }
0x1fc0   : > { %v2782_v51 = vsel %vm2766_vm4, %v2720_v57, %v4329_v43  ;;  %v2787_v55 = vpack.c.bf16 %v2783_v7, %v2783_v7  ;;  %v8594_v7 = vld [vmem:[#allocation21_spill] sm:$0xff]  ;;  %v8599_v57 = vld [vmem:[#allocation26_spill] sm:$0xff]  ;;  %v8604_v43 = vld [vmem:[#allocation31_spill] sm:$0xff] }
0x1fc1   : > { %v2786_v28 = vpack.c.bf16 %v2782_v51, %v2782_v51  ;;  %v2784_v17 = vsel %vm2768_vm5, %v2761_v53, %v4331_v21  ;;  %v8600_v53 = vld [vmem:[#allocation27_spill] sm:$0xff]  ;;  %v8605_v25 = vld [vmem:[#allocation32_spill] sm:$0xff]  ;;  %v8606_v21 = vld [vmem:[#allocation33_spill] sm:$0xff] }
0x1fc2   : > { %v2788_v56 = vpack.c.bf16 %v2784_v17, %v2784_v17  ;;  %v8607_v51 = vld [vmem:[#allocation34_spill] sm:$0xff]  ;;  %v8609_v17 = vld [vmem:[#allocation36_spill] sm:$0xff] }
0x1fc3   : > { %2821 = vmatprep.mubr.bf16.mxu0 %v2786_v28  ;;  %v8608_v28 = vld [vmem:[#allocation35_spill] sm:$0xff] }
0x1fc4   : > { %2861 = vmatprep.mubr.bf16.mxu1 %v2788_v56  ;;  %2822 = vmatmul.mubr.bf16.vlgmr.msra.gmra.mrb[76].mxu0 %v2785_v0  ;;  %v8610_v0 = vld [vmem:[#allocation37_spill] sm:$0xff]  ;;  %v8611_v56 = vld [vmem:[#allocation38_spill] sm:$0xff] }
0x1fc5   : > { %2862 = vmatmul.mubr.bf16.vlgmr.msra.gmra.mrb[76].mxu1 %v2787_v55  ;;  %2895 = vmatpush1.bf16.msra.mxu0 %v6796_v23  ;;  %v8612_v55 = vld [vmem:[#allocation39_spill] sm:$0xff] }
0x1fc6   : > { %2936 = vmatpush1.bf16.msra.mxu1 %v6799_v45  ;;  %2896 = vmatprep.subr.bf16.mxu0 %v6802_v16 }
0x1fc7   : > { %2937 = vmatprep.subr.bf16.mxu1 %v8500_v13  ;;  %2926 = vmatprep.mubr.bf16.mxu0 %v8501_v11 }
0x1fc8   : > { %2967 = vmatprep.mubr.bf16.mxu1 %v8501_v11 }
0x1fc9   : > { %2897 = vmatpush1.bf16.msra.mxu0 %v8502_v30 }
0x1fca   : > { %2938 = vmatpush1.bf16.msra.mxu1 %v8503_v20  ;;  %2898 = vmatprep.subr.bf16.mxu0 %v8504_v27 }
0x1fcb   : > { %2939 = vmatprep.subr.bf16.mxu1 %v8505_v15 }
0x1fcd   : > { %2899 = vmatpush1.bf16.msra.mxu0 %v8506_v29 }
0x1fce   : > { %2940 = vmatpush1.bf16.msra.mxu1 %v8507_v63  ;;  %2900 = vmatprep.subr.bf16.mxu0 %v8508_v10 }
0x1fcf   : > { %2941 = vmatprep.subr.bf16.mxu1 %v8509_v14 }
0x1fd1   : > { %2901 = vmatpush1.bf16.msra.mxu0 %v8510_v26 }
0x1fd2   : > { %2942 = vmatpush1.bf16.msra.mxu1 %v8511_v32  ;;  %2902 = vmatprep.subr.bf16.mxu0 %v8512_v48 }
0x1fd3   : > { %2943 = vmatprep.subr.bf16.mxu1 %v8513_v33 }
0x1fd5   : > { %2903 = vmatpush1.bf16.msra.mxu0 %v8514_v40 }
0x1fd6   : > { %2944 = vmatpush1.bf16.msra.mxu1 %v8515_v36  ;;  %2904 = vmatprep.subr.bf16.mxu0 %v8516_v49 }
0x1fd7   : > { %2945 = vmatprep.subr.bf16.mxu1 %v8517_v3 }
0x1fd9   : > { %2905 = vmatpush1.bf16.msra.mxu0 %v8518_v46 }
0x1fda   : > { %2946 = vmatpush1.bf16.msra.mxu1 %v8519_v35  ;;  %2906 = vmatprep.subr.bf16.mxu0 %v8520_v61 }
0x1fdb   : > { %2947 = vmatprep.subr.bf16.mxu1 %v8521_v60 }
0x1fdd   : > { %2907 = vmatpush1.bf16.msra.mxu0 %v8522_v44 }
0x1fde   : > { %2948 = vmatpush1.bf16.msra.mxu1 %v8523_v31  ;;  %2908 = vmatprep.subr.bf16.mxu0 %v8524_v1 }
0x1fdf   : > { %2949 = vmatprep.subr.bf16.mxu1 %v8525_v6 }
0x1fe1   : > { %2909 = vmatpush1.bf16.msra.mxu0 %v8526_v47 }
0x1fe2   : > { %2950 = vmatpush1.bf16.msra.mxu1 %v8527_v54  ;;  %4821 = vmatprep.subr.bf16.mxu0 %v8528_v22  ;;  %v8591_v22 = vld [vmem:[#allocation51_spill] sm:$0xff] }
0x1fe3   : > { %4843 = vmatprep.subr.bf16.mxu1 %v8529_v59  ;;  %v8592_v59 = vld [vmem:[#allocation19_spill] sm:$0xff] }
0x2097   : > { %v4793_v23 = vpop.f32.mrb[76].mxu0 }
0x2098   : > { %v4815_v45 = vpop.f32.mrb[76].mxu1  ;;  %v4794_v16 = vpop.f32.mrb[77].mxu0 }
0x2099   : > { %v4795_v13 = vadd.f32 %v4794_v16, %v4793_v23  ;;  %v4816_v30 = vpop.f32.mrb[77].mxu1  ;;  %v4796_v20 = vpop.f32.mrb[78].mxu0  ;;  %v8613_v23 = vld [vmem:[#allocation40_spill] sm:$0xff]  ;;  %v8615_v16 = vld [vmem:[#allocation42_spill] sm:$0xff] }
0x209a   : > { %v4817_v27 = vadd.f32 %v4816_v30, %v4815_v45  ;;  %v4818_v15 = vpop.f32.mrb[78].mxu1  ;;  %v4797_v29 = vpop.f32.mrb[79].mxu0  ;;  %v8614_v45 = vld [vmem:[#allocation41_spill] sm:$0xff]  ;;  %v8617_v30 = vld [vmem:[#allocation44_spill] sm:$0xff] }
0x209b   : > { %v2824_v63 = vadd.f32 %v4795_v13, %v5906_v39  ;;  %v4819_v10 = vpop.f32.mrb[79].mxu1  ;;  %v8616_v13 = vld [vmem:[#allocation43_spill] sm:$0xff]  ;;  %v7240_v20 = vld [vmem:[#allocation6 + $0x4] ss:$16 sps:$4 sm:$0xff]  }
0x209c   : > { %8618 = vst [vmem:[#allocation53_spill] sm:$0xff] %v7240_v20 }
0x209d   : > { %v2864_v14 = vadd.f32 %v4817_v27, %v2824_v63  ;;  %v7243_v27 = vld [vmem:[#allocation6 + $0xc] ss:$16 sps:$4 sm:$0xff]   ;;  %v8620_v63 = vld [vmem:[#allocation46_spill] sm:$0xff] }
0x209e   : > { %8619 = vst [vmem:[#allocation54_spill] sm:$0xff] %v7243_v27 }
0x209f   : > { %v2870_v26 = vmul.f32 1.442695, %v2864_v14  ;;  %vm2869_vm6 = vcmp.gt.f32.partialorder %v2864_v14, 0.0 }
0x20a1   : > { %5365 = vpow2.f32 %v2870_v26 }
0x20ab   : > { %v5366_v32 = vpop.eup %5365 }
0x20ac   : > { %v4332_v48 = vadd.f32 -1.0, %v5366_v32 }
0x20ae   : > { %v2873_v33 = vsel %vm2869_vm6, %v2864_v14, %v4332_v48  ;;  %v8621_v14 = vld [vmem:[#allocation47_spill] sm:$0xff] }
0x20af   : > { %v2874_v40 = vmul.f32 %v2873_v33, %v5916_v41 }
0x20b1   : > { %v2875_v36 = vsel %vm961_vm13, %v2874_v40, 0.0  ;;  %v8622_v40 = vld [vmem:[#allocation48_spill] sm:$0xff] }
0x20b2   : > { %2876 = vadd.xlane.f32.xlu1 %v2875_v36 }
0x213f   : > { %v2877_v49 = vpop.xlane.xlu1 %2876 }
0x2140   : > { %v7203_v3 = vadd.f32 %v2877_v49, %v5921_v42 }
0x2142   : > { %v2879_v46 = vmul.f32 %v7203_v3, %v8559_v18 }
0x2144   : > { %v2880_v35 = vadd.f32 %v2879_v46, %v6983_v4 }
0x2146   : > { %2883 = vperm.xlu0 %5165, %v2880_v35  }
0x21c5   : > { %v2884_v61 = vpop.permute.xlu0 %2883 }
0x21c6   : > { %v2886_v60 = vmul.f32 %v2884_v61, %v5896_v37 }
0x21c8   : > { %v2887_v44 = vadd.f32 %v2886_v60, %v5901_v38 }
0x21ca   : > { %v2889_v31 = vmul.f32 1.442695, %v2887_v44  ;;  %vm2888_vm7 = vcmp.gt.f32.partialorder %v2887_v44, 0.0 }
0x21cc   : > { %5367 = vpow2.f32 %v2889_v31 }
0x21d6   : > { %v5368_v1 = vpop.eup %5367 }
0x21d7   : > { %v4333_v6 = vadd.f32 -1.0, %v5368_v1 }
0x21d9   : > { %v2892_v47 = vsel %vm2888_vm7, %v2887_v44, %v4333_v6 }
0x21da   : > { %v2893_v54 = vpack.c.bf16 %v2892_v47, %v2892_v47 }
0x21dc   : > { %2927 = vmatmul.mubr.bf16.vlgmr.msra.gmra.mrb[80].mxu0 %v2893_v54  ;;  %2968 = vmatmul.mubr.bf16.vlgmr.msra.gmra.mrb[80].mxu1 %v2893_v54 }
0x21dd   : > { %4822 = vmatpush3.bf16.msra.mxu0 %v6988_v52  ;;  %4844 = vmatpush3.bf16.msra.mxu1 %v6991_v34 }
0x21de   : > { %4823 = vmatprep.subr.bf16.mxu0 %v6994_v5  ;;  %4845 = vmatprep.subr.bf16.mxu1 %v8591_v22 }
0x21e1   : > { %4824 = vmatpush3.bf16.msra.mxu0 %v8592_v59  ;;  %4846 = vmatpush3.bf16.msra.mxu1 %v8593_v19 }
0x21e2   : > { %4825 = vmatprep.subr.bf16.mxu0 %v8594_v7  ;;  %4847 = vmatprep.subr.bf16.mxu1 %v8595_v2 }
0x21e5   : > { %4826 = vmatpush3.bf16.msra.mxu0 %v8596_v24  ;;  %4848 = vmatpush3.bf16.msra.mxu1 %v8597_v9 }
0x21e6   : > { %4827 = vmatprep.subr.bf16.mxu0 %v8598_v8  ;;  %4849 = vmatprep.subr.bf16.mxu1 %v8599_v57 }
0x21e9   : > { %4828 = vmatpush3.bf16.msra.mxu0 %v8600_v53  ;;  %4850 = vmatpush3.bf16.msra.mxu1 %v8601_v58 }
0x21ea   : > { %4829 = vmatprep.subr.bf16.mxu0 %v8602_v62  ;;  %4851 = vmatprep.subr.bf16.mxu1 %v8603_v12 }
0x21ed   : > { %4830 = vmatpush3.bf16.msra.mxu0 %v8604_v43  ;;  %4852 = vmatpush3.bf16.msra.mxu1 %v8605_v25 }
0x21ee   : > { %4831 = vmatprep.subr.bf16.mxu0 %v8606_v21  ;;  %4853 = vmatprep.subr.bf16.mxu1 %v8607_v51 }
0x21f1   : > { %4832 = vmatpush3.bf16.msra.mxu0 %v8608_v28  ;;  %4854 = vmatpush3.bf16.msra.mxu1 %v8609_v17 }
0x21f2   : > { %4833 = vmatprep.subr.bf16.mxu0 %v8610_v0  ;;  %4855 = vmatprep.subr.bf16.mxu1 %v8611_v56 }
0x21f5   : > { %4834 = vmatpush3.bf16.msra.mxu0 %v8612_v55  ;;  %4856 = vmatpush3.bf16.msra.mxu1 %v8613_v23 }
0x21f6   : > { %4835 = vmatprep.subr.bf16.mxu0 %v8614_v45  ;;  %4857 = vmatprep.subr.bf16.mxu1 %v8615_v16 }
0x21f9   : > { %4836 = vmatpush3.bf16.msra.mxu0 %v8616_v13  ;;  %4858 = vmatpush3.bf16.msra.mxu1 %v8617_v30 }
0x21fa   : > { %3105 = vmatprep.subr.bf16.mxu0 %v7240_v20  ;;  %3146 = vmatprep.subr.bf16.mxu1 %v7243_v27 }
0x22af   : > { %v2928_v15 = vpop.f32.mrb[80].mxu0  ;;  %v2969_v29 = vpop.f32.mrb[80].mxu1 }
0x22b0   : > { %v2929_v10 = vadd.f32 %v2928_v15, %v8620_v63  ;;  %v2970_v26 = vadd.f32 %v2969_v29, %v8621_v14  ;;  %v2930_v32 = vpop.f32.mrb[81].mxu0  ;;  %v2971_v48 = vpop.f32.mrb[81].mxu1 }
0x22b1   : > { %v2931_v33 = vadd.f32 %v2930_v32, %v6151_v50  ;;  %v2972_v36 = vadd.f32 %v2971_v48, %v8622_v40  ;;  %v2932_v49 = vpop.f32.mrb[82].mxu0  ;;  %v2973_v46 = vpop.f32.mrb[82].mxu1 }
0x22b2   : > { %v2980_v35 = vmul.f32 1.442695, %v2929_v10  ;;  %v2984_v61 = vmul.f32 1.442695, %v2970_v26  ;;  %v2933_v31 = vpop.f32.mrb[83].mxu0  ;;  %v2974_v1 = vpop.f32.mrb[83].mxu1 }
0x22b3   : > { %v2982_v60 = vmul.f32 1.442695, %v2931_v33  ;;  %v2986_v44 = vmul.f32 1.442695, %v2972_v36  ;;  %vm2976_vm8 = vcmp.gt.f32.partialorder %v2929_v10, 0.0  ;;  %vm2978_vm9 = vcmp.gt.f32.partialorder %v2970_v26, 0.0 }
0x22b4   : > { %5369 = vpow2.f32 %v2980_v35  ;;  %vm2977_vm10 = vcmp.gt.f32.partialorder %v2931_v33, 0.0  ;;  %vm2979_vm11 = vcmp.gt.f32.partialorder %v2972_v36, 0.0 }
0x22b5   : > { %5371 = vpow2.f32 %v2984_v61 }
0x22b6   : > { %5373 = vpow2.f32 %v2982_v60 }
0x22b7   : > { %5375 = vpow2.f32 %v2986_v44 }
0x22be   : > { %v5370_v6 = vpop.eup %5369 }
0x22bf   : > { %v5372_v47 = vpop.eup %5371  ;;  %v4334_v54 = vadd.f32 -1.0, %v5370_v6  ;;  %v7250_v6 = vld [vmem:[#allocation6] ss:$16 sps:$4 sm:$0xff]  }
0x22c0   : > { %v5374_v15 = vpop.eup %5373  ;;  %v4336_v29 = vadd.f32 -1.0, %v5372_v47  ;;  %v7270_v47 = vld [vmem:[#allocation6 + $0x44] ss:$16 sps:$4 sm:$0xff]  }
0x22c1   : > { %v5376_v32 = vpop.eup %5375  ;;  %v4335_v48 = vadd.f32 -1.0, %v5374_v15  ;;  %v2992_v49 = vsel %vm2976_vm8, %v2929_v10, %v4334_v54  ;;  %v7253_v10 = vld [vmem:[#allocation6 + $0x8] ss:$16 sps:$4 sm:$0xff]   ;;  %8626 = vst [vmem:[#allocation19_spill] sm:$0xff] %v7270_v47  ;;  %v7273_v54 = vld [vmem:[#allocation6 + $0x4c] ss:$16 sps:$4 sm:$0xff]  }
0x22c2   : > { %v4337_v46 = vadd.f32 -1.0, %v5376_v32  ;;  %v2994_v18 = vsel %vm2978_vm9, %v2970_v26, %v4336_v29  ;;  %v2996_v61 = vpack.c.bf16 %v2992_v49, %v2992_v49  ;;  %v7256_v26 = vld [vmem:[#allocation6 + $0x24] ss:$16 sps:$4 sm:$0xff]   ;;  %8627 = vst [vmem:[#allocation20_spill] sm:$0xff] %v7273_v54  ;;  %v7276_v15 = vld [vmem:[#allocation6 + $0x40] ss:$16 sps:$4 sm:$0xff]  }
0x22c3   : > { %v2993_v35 = vsel %vm2977_vm10, %v2931_v33, %v4335_v48  ;;  %v2998_v44 = vpack.c.bf16 %v2994_v18, %v2994_v18  ;;  %v7259_v33 = vld [vmem:[#allocation6 + $0x2c] ss:$16 sps:$4 sm:$0xff]   ;;  %v7264_v18 = vld [vmem:[#allocation6 + $0x20] ss:$16 sps:$4 sm:$0xff]   ;;  %8628 = vst [vmem:[#allocation21_spill] sm:$0xff] %v7276_v15 }
0x22c4   : > { %v2997_v31 = vpack.c.bf16 %v2993_v35, %v2993_v35  ;;  %v2995_v1 = vsel %vm2979_vm11, %v2972_v36, %v4337_v46  ;;  %8623 = vst [vmem:[#allocation17_spill] sm:$0xff] %v7259_v33  ;;  %8624 = vst [vmem:[#allocation18_spill] sm:$0xff] %v7264_v18  ;;  %v7267_v36 = vld [vmem:[#allocation6 + $0x28] ss:$16 sps:$4 sm:$0xff]   ;;  %v7282_v32 = vld [vmem:[#allocation6 + $0x64] ss:$16 sps:$4 sm:$0xff]  }
0x22c5   : > { %v2999_v60 = vpack.c.bf16 %v2995_v1, %v2995_v1  ;;  %8625 = vst [vmem:[#allocation51_spill] sm:$0xff] %v7267_v36  ;;  %v7279_v29 = vld [vmem:[#allocation6 + $0x48] ss:$16 sps:$4 sm:$0xff]   ;;  %8630 = vst [vmem:[#allocation23_spill] sm:$0xff] %v7282_v32  ;;  %v7285_v48 = vld [vmem:[#allocation6 + $0x6c] ss:$16 sps:$4 sm:$0xff]  }
0x22c6   : > { %3032 = vmatprep.mubr.bf16.mxu0 %v2997_v31  ;;  %8629 = vst [vmem:[#allocation22_spill] sm:$0xff] %v7279_v29  ;;  %8631 = vst [vmem:[#allocation24_spill] sm:$0xff] %v7285_v48  ;;  %v7288_v49 = vld [vmem:[#allocation6 + $0x60] ss:$16 sps:$4 sm:$0xff]   ;;  %v7291_v46 = vld [vmem:[#allocation6 + $0x68] ss:$16 sps:$4 sm:$0xff]  }
0x22c7   : > { %3072 = vmatprep.mubr.bf16.mxu1 %v2999_v60  ;;  %3033 = vmatmul.mubr.bf16.vlgmr.msra.gmra.mrb[84].mxu0 %v2996_v61  ;;  %8632 = vst [vmem:[#allocation25_spill] sm:$0xff] %v7288_v49  ;;  %8633 = vst [vmem:[#allocation26_spill] sm:$0xff] %v7291_v46  ;;  %v7294_v35 = vld [vmem:[#allocation6 + $0x84] ss:$16 sps:$4 sm:$0xff]   ;;  %v7297_v31 = vld [vmem:[#allocation6 + $0x8c] ss:$16 sps:$4 sm:$0xff]  }
0x22c8   : > { %3073 = vmatmul.mubr.bf16.vlgmr.msra.gmra.mrb[84].mxu1 %v2998_v44  ;;  %3106 = vmatpush1.bf16.msra.mxu0 %v7250_v6  ;;  %8634 = vst [vmem:[#allocation27_spill] sm:$0xff] %v7294_v35  ;;  %8635 = vst [vmem:[#allocation28_spill] sm:$0xff] %v7297_v31  ;;  %v7300_v1 = vld [vmem:[#allocation6 + $0x80] ss:$16 sps:$4 sm:$0xff]   ;;  %v7303_v61 = vld [vmem:[#allocation6 + $0x88] ss:$16 sps:$4 sm:$0xff]  }
0x22c9   : > { %3147 = vmatpush1.bf16.msra.mxu1 %v7253_v10  ;;  %3107 = vmatprep.subr.bf16.mxu0 %v7256_v26  ;;  %8636 = vst [vmem:[#allocation29_spill] sm:$0xff] %v7300_v1  ;;  %8637 = vst [vmem:[#allocation30_spill] sm:$0xff] %v7303_v61  ;;  %v7306_v60 = vld [vmem:[#allocation6 + $0xa4] ss:$16 sps:$4 sm:$0xff]   ;;  %v7309_v44 = vld [vmem:[#allocation6 + $0xac] ss:$16 sps:$4 sm:$0xff]  }
0x22ca   : > { %3148 = vmatprep.subr.bf16.mxu1 %v7259_v33  ;;  %3137 = vmatprep.mubr.bf16.mxu0 %v8501_v11  ;;  %8638 = vst [vmem:[#allocation31_spill] sm:$0xff] %v7306_v60  ;;  %8639 = vst [vmem:[#allocation32_spill] sm:$0xff] %v7309_v44 }
0x22cb   : > { %3178 = vmatprep.mubr.bf16.mxu1 %v8501_v11 }
0x22cc   : > { %3108 = vmatpush1.bf16.msra.mxu0 %v7264_v18 }
0x22cd   : > { %3149 = vmatpush1.bf16.msra.mxu1 %v7267_v36  ;;  %3109 = vmatprep.subr.bf16.mxu0 %v7270_v47 }
0x22ce   : > { %3150 = vmatprep.subr.bf16.mxu1 %v7273_v54 }
0x22d0   : > { %3110 = vmatpush1.bf16.msra.mxu0 %v7276_v15 }
0x22d1   : > { %3151 = vmatpush1.bf16.msra.mxu1 %v7279_v29  ;;  %3111 = vmatprep.subr.bf16.mxu0 %v7282_v32 }
0x22d2   : > { %3152 = vmatprep.subr.bf16.mxu1 %v7285_v48 }
0x22d4   : > { %3112 = vmatpush1.bf16.msra.mxu0 %v7288_v49 }
0x22d5   : > { %3153 = vmatpush1.bf16.msra.mxu1 %v7291_v46  ;;  %3113 = vmatprep.subr.bf16.mxu0 %v7294_v35  ;;  %v7312_v35 = vld [vmem:[#allocation6 + $0xa0] ss:$16 sps:$4 sm:$0xff]  }
0x22d6   : > { %3154 = vmatprep.subr.bf16.mxu1 %v7297_v31  ;;  %8640 = vst [vmem:[#allocation33_spill] sm:$0xff] %v7312_v35  ;;  %v7315_v31 = vld [vmem:[#allocation6 + $0xa8] ss:$16 sps:$4 sm:$0xff]  }
0x22d7   : > { %8641 = vst [vmem:[#allocation34_spill] sm:$0xff] %v7315_v31 }
0x22d8   : > { %3114 = vmatpush1.bf16.msra.mxu0 %v7300_v1  ;;  %v7318_v1 = vld [vmem:[#allocation6 + $0xc4] ss:$16 sps:$4 sm:$0xff]  }
0x22d9   : > { %3155 = vmatpush1.bf16.msra.mxu1 %v7303_v61  ;;  %3115 = vmatprep.subr.bf16.mxu0 %v7306_v60  ;;  %8642 = vst [vmem:[#allocation35_spill] sm:$0xff] %v7318_v1  ;;  %v7321_v61 = vld [vmem:[#allocation6 + $0xcc] ss:$16 sps:$4 sm:$0xff]   ;;  %v7324_v60 = vld [vmem:[#allocation6 + $0xc0] ss:$16 sps:$4 sm:$0xff]  }
0x22da   : > { %3156 = vmatprep.subr.bf16.mxu1 %v7309_v44  ;;  %8643 = vst [vmem:[#allocation36_spill] sm:$0xff] %v7321_v61  ;;  %8644 = vst [vmem:[#allocation37_spill] sm:$0xff] %v7324_v60  ;;  %v7327_v44 = vld [vmem:[#allocation6 + $0xc8] ss:$16 sps:$4 sm:$0xff]  }
0x22db   : > { %8645 = vst [vmem:[#allocation38_spill] sm:$0xff] %v7327_v44 }
0x22dc   : > { %3116 = vmatpush1.bf16.msra.mxu0 %v7312_v35  ;;  %v7330_v35 = vld [vmem:[#allocation6 + $0xe4] ss:$16 sps:$4 sm:$0xff]  }
0x22dd   : > { %3157 = vmatpush1.bf16.msra.mxu1 %v7315_v31  ;;  %3117 = vmatprep.subr.bf16.mxu0 %v7318_v1  ;;  %8646 = vst [vmem:[#allocation39_spill] sm:$0xff] %v7330_v35  ;;  %v7333_v31 = vld [vmem:[#allocation6 + $0xec] ss:$16 sps:$4 sm:$0xff]   ;;  %v7336_v1 = vld [vmem:[#allocation6 + $0xe0] ss:$16 sps:$4 sm:$0xff]  }
0x22de   : > { %3158 = vmatprep.subr.bf16.mxu1 %v7321_v61  ;;  %8647 = vst [vmem:[#allocation40_spill] sm:$0xff] %v7333_v31  ;;  %8648 = vst [vmem:[#allocation41_spill] sm:$0xff] %v7336_v1  ;;  %v7339_v61 = vld [vmem:[#allocation6 + $0xe8] ss:$16 sps:$4 sm:$0xff]  }
0x22df   : > { %8649 = vst [vmem:[#allocation42_spill] sm:$0xff] %v7339_v61 }
0x22e0   : > { %3118 = vmatpush1.bf16.msra.mxu0 %v7324_v60  ;;  %v7342_v60 = vld [vmem:[#allocation7 + $0x40] sm:$0xff]  }
0x22e1   : > { %3159 = vmatpush1.bf16.msra.mxu1 %v7327_v44  ;;  %3119 = vmatprep.subr.bf16.mxu0 %v7330_v35  ;;  %8650 = vst [vmem:[#allocation43_spill] sm:$0xff] %v7342_v60  ;;  %v7345_v44 = vld [vmem:[#allocation7 + $0xc0] sm:$0xff]  }
0x22e2   : > { %3160 = vmatprep.subr.bf16.mxu1 %v7333_v31  ;;  %8651 = vst [vmem:[#allocation44_spill] sm:$0xff] %v7345_v44 }
0x22e4   : > { %3120 = vmatpush1.bf16.msra.mxu0 %v7336_v1 }
0x22e5   : > { %3161 = vmatpush1.bf16.msra.mxu1 %v7339_v61  ;;  %4865 = vmatprep.subr.bf16.mxu0 %v7342_v60 }
0x22e6   : > { %4887 = vmatprep.subr.bf16.mxu1 %v7345_v44 }
0x239a   : > { %v4837_v35 = vpop.f32.mrb[84].mxu0 }
0x239b   : > { %v4859_v46 = vpop.f32.mrb[84].mxu1  ;;  %v4838_v49 = vpop.f32.mrb[85].mxu0 }
0x239c   : > { %v4839_v31 = vadd.f32 %v4838_v49, %v4837_v35  ;;  %v4860_v48 = vpop.f32.mrb[85].mxu1  ;;  %v4840_v32 = vpop.f32.mrb[86].mxu0  ;;  %v8652_v49 = vld [vmem:[#allocation45_spill] sm:$0xff]  ;;  %v8653_v35 = vld [vmem:[#allocation52_spill] sm:$0xff] }
0x239d   : > { %v4861_v29 = vadd.f32 %v4860_v48, %v4859_v46  ;;  %v4862_v1 = vpop.f32.mrb[86].mxu1  ;;  %v4841_v15 = vpop.f32.mrb[87].mxu0  ;;  %v3301_v32 = vmul.f32 2.0, %v7203_v3 }
0x239e   : > { %v3035_v54 = vadd.f32 %v4839_v31, %v5906_v39  ;;  %v4863_v61 = vpop.f32.mrb[87].mxu1 }
0x239f   : > { %v3302_v46 = vadd.f32 %v3301_v32, %v8652_v49  ;;  %v8656_v49 = vld [vmem:[#allocation18_spill] sm:$0xff] }
0x23a0   : > { %v3075_v47 = vadd.f32 %v4861_v29, %v3035_v54 }
0x23a2   : > { %v3081_v36 = vmul.f32 1.442695, %v3075_v47  ;;  %vm3080_vm12 = vcmp.gt.f32.partialorder %v3075_v47, 0.0 }
0x23a4   : > { %5377 = vpow2.f32 %v3081_v36 }
0x23ae   : > { %v5378_v60 = vpop.eup %5377 }
0x23af   : > { %v4338_v18 = vadd.f32 -1.0, %v5378_v60 }
0x23b1   : > { %v3084_v11 = vsel %vm3080_vm12, %v3075_v47, %v4338_v18 }
0x23b2   : > { %v3085_v44 = vmul.f32 %v3084_v11, %v5916_v41 }
0x23b4   : > { %v3086_v33 = vsel %vm961_vm13, %v3085_v44, 0.0 }
0x23b5   : > { %3087 = vadd.xlane.f32.xlu1 %v3086_v33 }
0x2442   : > { %v3088_v48 = vpop.xlane.xlu1 %3087 }
0x2443   : > { %v3089_v15 = vadd.f32 %v3088_v48, %v5921_v42  ;;  %v8654_v48 = vld [vmem:[#allocation17_spill] sm:$0xff] }
0x2445   : > { %v3090_v54 = vmul.f32 %v3089_v15, %v8653_v35  ;;  %v3303_v29 = vmul.f32 2.0, %v3089_v15  ;;  %v8655_v15 = vmov 0  }
0x2447   : > { %v3091_v36 = vadd.f32 %v3090_v54, %v6983_v4  ;;  %v7356_v31 = vadd.f32 %v3303_v29, %v3302_v46  ;;  %v8657_v46 = vld [vmem:[#allocation51_spill] sm:$0xff]  ;;  %v8659_v29 = vld [vmem:[#allocation20_spill] sm:$0xff] }
0x2448   : > { %v8658_v54 = vld [vmem:[#allocation19_spill] sm:$0xff] }
0x2449   : > { %3094 = vperm.xlu0 %5165, %v3091_v36   ;;  %v8660_v36 = vld [vmem:[#allocation21_spill] sm:$0xff] }
0x24c8   : > { %v3095_v18 = vpop.permute.xlu0 %3094 }
0x24c9   : > { %v3097_v11 = vmul.f32 %v3095_v18, %v5896_v37  ;;  %v8661_v18 = vld [vmem:[#allocation22_spill] sm:$0xff] }
0x24cb   : > { %v3098_v33 = vadd.f32 %v3097_v11, %v5901_v38  ;;  %v8662_v11 = vld [vmem:[#allocation23_spill] sm:$0xff] }
0x24cd   : > { %v3100_v47 = vmul.f32 1.442695, %v3098_v33  ;;  %vm3099_vm14 = vcmp.gt.f32.partialorder %v3098_v33, 0.0 }
0x24cf   : > { %5379 = vpow2.f32 %v3100_v47  ;;  %v8664_v47 = vld [vmem:[#allocation25_spill] sm:$0xff] }
0x24d9   : > { %v5380_v3 = vpop.eup %5379 }
0x24da   : > { %v4339_v1 = vadd.f32 -1.0, %v5380_v3  ;;  %v8665_v3 = vld [vmem:[#allocation26_spill] sm:$0xff] }
0x24dc   : > { %v3103_v61 = vsel %vm3099_vm14, %v3098_v33, %v4339_v1  ;;  %v8663_v33 = vld [vmem:[#allocation24_spill] sm:$0xff]  ;;  %v8666_v1 = vld [vmem:[#allocation27_spill] sm:$0xff] }
0x24dd   : > { %v3104_v60 = vpack.c.bf16 %v3103_v61, %v3103_v61  ;;  %v8667_v61 = vld [vmem:[#allocation28_spill] sm:$0xff] }
0x24df   : > { %3138 = vmatmul.mubr.bf16.vlgmr.msra.gmra.mrb[88].mxu0 %v3104_v60  ;;  %3179 = vmatmul.mubr.bf16.vlgmr.msra.gmra.mrb[88].mxu1 %v3104_v60  ;;  %v8668_v60 = vld [vmem:[#allocation29_spill] sm:$0xff] }
0x24e0   : > { %4866 = vmatpush3.bf16.msra.mxu0 %v6988_v52  ;;  %4888 = vmatpush3.bf16.msra.mxu1 %v6991_v34 }
0x24e1   : > { %4867 = vmatprep.subr.bf16.mxu0 %v6994_v5  ;;  %4889 = vmatprep.subr.bf16.mxu1 %v8591_v22 }
0x24e4   : > { %4868 = vmatpush3.bf16.msra.mxu0 %v8592_v59  ;;  %4890 = vmatpush3.bf16.msra.mxu1 %v8593_v19 }
0x24e5   : > { %4869 = vmatprep.subr.bf16.mxu0 %v8594_v7  ;;  %4891 = vmatprep.subr.bf16.mxu1 %v8595_v2 }
0x24e8   : > { %4870 = vmatpush3.bf16.msra.mxu0 %v8596_v24  ;;  %4892 = vmatpush3.bf16.msra.mxu1 %v8597_v9 }
0x24e9   : > { %4871 = vmatprep.subr.bf16.mxu0 %v8598_v8  ;;  %4893 = vmatprep.subr.bf16.mxu1 %v8599_v57 }
0x24ec   : > { %4872 = vmatpush3.bf16.msra.mxu0 %v8600_v53  ;;  %4894 = vmatpush3.bf16.msra.mxu1 %v8601_v58 }
0x24ed   : > { %4873 = vmatprep.subr.bf16.mxu0 %v8602_v62  ;;  %4895 = vmatprep.subr.bf16.mxu1 %v8603_v12 }
0x24f0   : > { %4874 = vmatpush3.bf16.msra.mxu0 %v8604_v43  ;;  %4896 = vmatpush3.bf16.msra.mxu1 %v8605_v25 }
0x24f1   : > { %4875 = vmatprep.subr.bf16.mxu0 %v8606_v21  ;;  %4897 = vmatprep.subr.bf16.mxu1 %v8607_v51 }
0x24f4   : > { %4876 = vmatpush3.bf16.msra.mxu0 %v8608_v28  ;;  %4898 = vmatpush3.bf16.msra.mxu1 %v8609_v17 }
0x24f5   : > { %4877 = vmatprep.subr.bf16.mxu0 %v8610_v0  ;;  %4899 = vmatprep.subr.bf16.mxu1 %v8611_v56 }
0x24f8   : > { %4878 = vmatpush3.bf16.msra.mxu0 %v8612_v55  ;;  %4900 = vmatpush3.bf16.msra.mxu1 %v8613_v23 }
0x24f9   : > { %4879 = vmatprep.subr.bf16.mxu0 %v8614_v45  ;;  %4901 = vmatprep.subr.bf16.mxu1 %v8615_v16 }
0x24fc   : > { %4880 = vmatpush3.bf16.msra.mxu0 %v8616_v13  ;;  %4902 = vmatpush3.bf16.msra.mxu1 %v8617_v30 }
0x24fd   : > { %3321 = vmatprep.subr.bf16.mxu0 %v7240_v20  ;;  %3362 = vmatprep.subr.bf16.mxu1 %v7243_v27 }
0x25b2   : > { %v3139_v52 = vpop.f32.mrb[88].mxu0  ;;  %v3180_v34 = vpop.f32.mrb[88].mxu1 }
0x25b3   : > { %v3140_v5 = vadd.f32 %v3139_v52, %v8620_v63  ;;  %v3181_v22 = vadd.f32 %v3180_v34, %v8621_v14  ;;  %v3141_v59 = vpop.f32.mrb[89].mxu0  ;;  %v3182_v19 = vpop.f32.mrb[89].mxu1  ;;  %v8669_v52 = vld [vmem:[#allocation30_spill] sm:$0xff]  ;;  %v8670_v34 = vld [vmem:[#allocation31_spill] sm:$0xff] }
0x25b4   : > { %v3142_v7 = vadd.f32 %v3141_v59, %v6151_v50  ;;  %v3183_v2 = vadd.f32 %v3182_v19, %v8622_v40  ;;  %v3143_v24 = vpop.f32.mrb[90].mxu0  ;;  %v3184_v9 = vpop.f32.mrb[90].mxu1  ;;  %v8673_v59 = vld [vmem:[#allocation34_spill] sm:$0xff]  ;;  %v8674_v19 = vld [vmem:[#allocation35_spill] sm:$0xff] }
0x25b5   : > { %v3191_v8 = vmul.f32 1.442695, %v3140_v5  ;;  %v3195_v57 = vmul.f32 1.442695, %v3181_v22  ;;  %v3144_v62 = vpop.f32.mrb[91].mxu0  ;;  %v3185_v12 = vpop.f32.mrb[91].mxu1 }
0x25b6   : > { %v3193_v53 = vmul.f32 1.442695, %v3142_v7  ;;  %v3197_v58 = vmul.f32 1.442695, %v3183_v2  ;;  %vm3187_vm15 = vcmp.gt.f32.partialorder %v3140_v5, 0.0  ;;  %vm3189_vm0 = vcmp.gt.f32.partialorder %v3181_v22, 0.0 }
0x25b7   : > { %5381 = vpow2.f32 %v3191_v8  ;;  %vm3188_vm1 = vcmp.gt.f32.partialorder %v3142_v7, 0.0  ;;  %vm3190_vm2 = vcmp.gt.f32.partialorder %v3183_v2, 0.0  ;;  %v8677_v24 = vld [vmem:[#allocation38_spill] sm:$0xff]  ;;  %v8678_v9 = vld [vmem:[#allocation39_spill] sm:$0xff]  ;;  %v8679_v8 = vld [vmem:[#allocation40_spill] sm:$0xff] }
0x25b8   : > { %5383 = vpow2.f32 %v3195_v57  ;;  %v8680_v57 = vld [vmem:[#allocation41_spill] sm:$0xff]  ;;  %v8683_v62 = vld [vmem:[#allocation44_spill] sm:$0xff] }
0x25b9   : > { %5385 = vpow2.f32 %v3193_v53  ;;  %v8681_v53 = vld [vmem:[#allocation42_spill] sm:$0xff] }
0x25ba   : > { %5387 = vpow2.f32 %v3197_v58  ;;  %v8682_v58 = vld [vmem:[#allocation43_spill] sm:$0xff] }
0x25c1   : > { %v5382_v43 = vpop.eup %5381 }
0x25c2   : > { %v5384_v25 = vpop.eup %5383  ;;  %v4340_v21 = vadd.f32 -1.0, %v5382_v43 }
0x25c3   : > { %v5386_v51 = vpop.eup %5385  ;;  %v4342_v28 = vadd.f32 -1.0, %v5384_v25 }
0x25c4   : > { %v5388_v17 = vpop.eup %5387  ;;  %v4341_v0 = vadd.f32 -1.0, %v5386_v51  ;;  %v3203_v56 = vsel %vm3187_vm15, %v3140_v5, %v4340_v21  ;;  %v8671_v5 = vld [vmem:[#allocation32_spill] sm:$0xff] }
0x25c5   : > { %v4343_v55 = vadd.f32 -1.0, %v5388_v17  ;;  %v3205_v23 = vsel %vm3189_vm0, %v3181_v22, %v4342_v28  ;;  %v3207_v30 = vpack.c.bf16 %v3203_v56, %v3203_v56  ;;  %v8672_v22 = vld [vmem:[#allocation33_spill] sm:$0xff] }
0x25c6   : > { %v3204_v45 = vsel %vm3188_vm1, %v3142_v7, %v4341_v0  ;;  %v3209_v32 = vpack.c.bf16 %v3205_v23, %v3205_v23  ;;  %v8675_v7 = vld [vmem:[#allocation36_spill] sm:$0xff] }
0x25c7   : > { %v3208_v16 = vpack.c.bf16 %v3204_v45, %v3204_v45  ;;  %v3206_v13 = vsel %vm3190_vm2, %v3183_v2, %v4343_v55  ;;  %v8676_v2 = vld [vmem:[#allocation37_spill] sm:$0xff] }
0x25c8   : > { %v3210_v44 = vpack.c.bf16 %v3206_v13, %v3206_v13 }
0x25c9   : > { %3243 = vmatprep.mubr.bf16.mxu0 %v3208_v16 }
0x25ca   : > { %3283 = vmatprep.mubr.bf16.mxu1 %v3210_v44  ;;  %3244 = vmatmul.mubr.bf16.vlgmr.msra.gmra.mrb[92].mxu0 %v3207_v30 }
0x25cb   : > { %3284 = vmatmul.mubr.bf16.vlgmr.msra.gmra.mrb[92].mxu1 %v3209_v32  ;;  %3322 = vmatpush1.bf16.msra.mxu0 %v7250_v6 }
0x25cc   : > { %3363 = vmatpush1.bf16.msra.mxu1 %v7253_v10  ;;  %3323 = vmatprep.subr.bf16.mxu0 %v7256_v26 }
0x25cd   : > { %3364 = vmatprep.subr.bf16.mxu1 %v8654_v48  ;;  %3353 = vmatprep.mubr.bf16.mxu0 %v8655_v15 }
0x25ce   : > { %3394 = vmatprep.mubr.bf16.mxu1 %v8655_v15 }
0x25cf   : > { %3324 = vmatpush1.bf16.msra.mxu0 %v8656_v49 }
0x25d0   : > { %3365 = vmatpush1.bf16.msra.mxu1 %v8657_v46  ;;  %3325 = vmatprep.subr.bf16.mxu0 %v8658_v54 }
0x25d1   : > { %3366 = vmatprep.subr.bf16.mxu1 %v8659_v29 }
0x25d3   : > { %3326 = vmatpush1.bf16.msra.mxu0 %v8660_v36 }
0x25d4   : > { %3367 = vmatpush1.bf16.msra.mxu1 %v8661_v18  ;;  %3327 = vmatprep.subr.bf16.mxu0 %v8662_v11 }
0x25d5   : > { %3368 = vmatprep.subr.bf16.mxu1 %v8663_v33 }
0x25d7   : > { %3328 = vmatpush1.bf16.msra.mxu0 %v8664_v47 }
0x25d8   : > { %3369 = vmatpush1.bf16.msra.mxu1 %v8665_v3  ;;  %3329 = vmatprep.subr.bf16.mxu0 %v8666_v1 }
0x25d9   : > { %3370 = vmatprep.subr.bf16.mxu1 %v8667_v61 }
0x25db   : > { %3330 = vmatpush1.bf16.msra.mxu0 %v8668_v60 }
0x25dc   : > { %3371 = vmatpush1.bf16.msra.mxu1 %v8669_v52  ;;  %3331 = vmatprep.subr.bf16.mxu0 %v8670_v34 }
0x25dd   : > { %3372 = vmatprep.subr.bf16.mxu1 %v8671_v5 }
0x25df   : > { %3332 = vmatpush1.bf16.msra.mxu0 %v8672_v22 }
0x25e0   : > { %3373 = vmatpush1.bf16.msra.mxu1 %v8673_v59  ;;  %3333 = vmatprep.subr.bf16.mxu0 %v8674_v19 }
0x25e1   : > { %3374 = vmatprep.subr.bf16.mxu1 %v8675_v7 }
0x25e3   : > { %3334 = vmatpush1.bf16.msra.mxu0 %v8676_v2 }
0x25e4   : > { %3375 = vmatpush1.bf16.msra.mxu1 %v8677_v24  ;;  %3335 = vmatprep.subr.bf16.mxu0 %v8678_v9 }
0x25e5   : > { %3376 = vmatprep.subr.bf16.mxu1 %v8679_v8 }
0x25e7   : > { %3336 = vmatpush1.bf16.msra.mxu0 %v8680_v57 }
0x25e8   : > { %3377 = vmatpush1.bf16.msra.mxu1 %v8681_v53  ;;  %4909 = vmatprep.subr.bf16.mxu0 %v8682_v58 }
0x25e9   : > { %4931 = vmatprep.subr.bf16.mxu1 %v8683_v62 }
0x269d   : > { %v4881_v12 = vpop.f32.mrb[92].mxu0 }
0x269e   : > { %v4903_v43 = vpop.f32.mrb[92].mxu1  ;;  %v4882_v25 = vpop.f32.mrb[93].mxu0 }
0x269f   : > { %v4883_v21 = vadd.f32 %v4882_v25, %v4881_v12  ;;  %v4904_v51 = vpop.f32.mrb[93].mxu1  ;;  %v4884_v28 = vpop.f32.mrb[94].mxu0 }
0x26a0   : > { %v4905_v17 = vadd.f32 %v4904_v51, %v4903_v43  ;;  %v4906_v0 = vpop.f32.mrb[94].mxu1  ;;  %v4885_v56 = vpop.f32.mrb[95].mxu0  ;;  %v8684_v51 = vld [vmem:[#allocation50_spill] sm:$0xff] }
0x26a1   : > { %v3246_v55 = vadd.f32 %v4883_v21, %v5906_v39  ;;  %v4907_v23 = vpop.f32.mrb[95].mxu1 }
0x26a3   : > { %v3286_v45 = vadd.f32 %v4905_v17, %v3246_v55 }
0x26a5   : > { %v3292_v16 = vmul.f32 1.442695, %v3286_v45  ;;  %vm3291_vm3 = vcmp.gt.f32.partialorder %v3286_v45, 0.0 }
0x26a7   : > { %5389 = vpow2.f32 %v3292_v16 }
0x26b1   : > { %v5390_v13 = vpop.eup %5389 }
0x26b2   : > { %v4344_v30 = vadd.f32 -1.0, %v5390_v13  ;;  %v7448_v13 = vld [vmem:[#allocation7 + $0x48] sm:$0xff]  }
0x26b4   : > { %v3295_v44 = vsel %vm3291_vm3, %v3286_v45, %v4344_v30  ;;  %v7451_v30 = vld [vmem:[#allocation7 + $0xc8] sm:$0xff]  }
0x26b5   : > { %v3296_v32 = vmul.f32 %v3295_v44, %v5916_v41  ;;  %8685 = vst [vmem:[#allocation45_spill] sm:$0xff] %v7451_v30  ;;  %v7454_v44 = vld [vmem:[#allocation7 + $0x8] sm:$0xff]  }
0x26b6   : > { %8686 = vst [vmem:[#allocation17_spill] sm:$0xff] %v7454_v44 }
0x26b7   : > { %v3297_v35 = vsel %vm961_vm13, %v3296_v32, 0.0  ;;  %v7457_v32 = vld [vmem:[#allocation7 + $0x88] sm:$0xff]  }
0x26b8   : > { %3298 = vadd.xlane.f32.xlu1 %v3297_v35  ;;  %8687 = vst [vmem:[#allocation18_spill] sm:$0xff] %v7457_v32 }
0x2745   : > { %v3299_v12 = vpop.xlane.xlu1 %3298 }
0x2746   : > { %v3300_v43 = vadd.f32 %v3299_v12, %v5921_v42  ;;  %v7460_v12 = vld [vmem:[#allocation7 + $0x50] sm:$0xff]  }
0x2747   : > { %8688 = vst [vmem:[#allocation51_spill] sm:$0xff] %v7460_v12 }
0x2748   : > { %v3305_v25 = vadd.f32 %v7356_v31, %v3300_v43  ;;  %v7442_v31 = vld [vmem:[#allocation7] sm:$0xff]   ;;  %v7463_v43 = vld [vmem:[#allocation7 + $0xd0] sm:$0xff]  }
0x2749   : > { %8689 = vst [vmem:[#allocation19_spill] sm:$0xff] %v7463_v43 }
0x274a   : > { %v3306_v21 = vmul.f32 %v3305_v25, %v8684_v51  ;;  %v7466_v25 = vld [vmem:[#allocation7 + $0x10] sm:$0xff]   ;;  %v7496_v51 = vld [vmem:[#allocation7 + $0x68] sm:$0xff]  }
0x274b   : > { %8690 = vst [vmem:[#allocation20_spill] sm:$0xff] %v7466_v25  ;;  %8700 = vst [vmem:[#allocation30_spill] sm:$0xff] %v7496_v51 }
0x274c   : > { %v7437_v28 = vadd.f32 %v3306_v21, %v6983_v4  ;;  %v7445_v4 = vld [vmem:[#allocation7 + $0x80] sm:$0xff]   ;;  %v7469_v21 = vld [vmem:[#allocation7 + $0x90] sm:$0xff]  }
0x274d   : > { %8691 = vst [vmem:[#allocation21_spill] sm:$0xff] %v7469_v21 }
0x274e   : > { %3310 = vperm.xlu0 %5165, %v7437_v28  }
0x27cd   : > { %v3311_v17 = vpop.permute.xlu0 %3310 }
0x27ce   : > { %v3313_v0 = vmul.f32 %v3311_v17, %v5896_v37  ;;  %v7472_v17 = vld [vmem:[#allocation7 + $0x58] sm:$0xff]  }
0x27cf   : > { %8692 = vst [vmem:[#allocation22_spill] sm:$0xff] %v7472_v17 }
0x27d0   : > { %v3314_v56 = vadd.f32 %v3313_v0, %v5901_v38  ;;  %v7475_v0 = vld [vmem:[#allocation7 + $0xd8] sm:$0xff]  }
0x27d1   : > { %8693 = vst [vmem:[#allocation23_spill] sm:$0xff] %v7475_v0 }
0x27d2   : > { %v3316_v55 = vmul.f32 1.442695, %v3314_v56  ;;  %vm3315_vm4 = vcmp.gt.f32.partialorder %v3314_v56, 0.0 }
0x27d4   : > { %5391 = vpow2.f32 %v3316_v55  ;;  %v7481_v55 = vld [vmem:[#allocation7 + $0x98] sm:$0xff]  }
0x27d5   : > { %8695 = vst [vmem:[#allocation25_spill] sm:$0xff] %v7481_v55 }
0x27de   : > { %v5392_v35 = vpop.eup %5391 }
0x27df   : > { %v4345_v23 = vadd.f32 -1.0, %v5392_v35  ;;  %v7484_v35 = vld [vmem:[#allocation7 + $0x60] sm:$0xff]  }
0x27e0   : > { %8696 = vst [vmem:[#allocation26_spill] sm:$0xff] %v7484_v35 }
0x27e1   : > { %v3319_v45 = vsel %vm3315_vm4, %v3314_v56, %v4345_v23  ;;  %v7478_v56 = vld [vmem:[#allocation7 + $0x18] sm:$0xff]   ;;  %v7487_v23 = vld [vmem:[#allocation7 + $0xe0] sm:$0xff]  }
0x27e2   : > { %v3320_v16 = vpack.c.bf16 %v3319_v45, %v3319_v45  ;;  %8694 = vst [vmem:[#allocation24_spill] sm:$0xff] %v7478_v56  ;;  %8697 = vst [vmem:[#allocation27_spill] sm:$0xff] %v7487_v23  ;;  %v7490_v45 = vld [vmem:[#allocation7 + $0x20] sm:$0xff]  }
0x27e3   : > { %8698 = vst [vmem:[#allocation28_spill] sm:$0xff] %v7490_v45 }
0x27e4   : > { %3354 = vmatmul.mubr.bf16.vlgmr.msra.gmra.mrb[96].mxu0 %v3320_v16  ;;  %3395 = vmatmul.mubr.bf16.vlgmr.msra.gmra.mrb[96].mxu1 %v3320_v16  ;;  %v7493_v16 = vld [vmem:[#allocation7 + $0xa0] sm:$0xff]  }
0x27e5   : > { %4910 = vmatpush3.bf16.msra.mxu0 %v7442_v31  ;;  %4932 = vmatpush3.bf16.msra.mxu1 %v7445_v4  ;;  %8699 = vst [vmem:[#allocation29_spill] sm:$0xff] %v7493_v16 }
0x27e6   : > { %4911 = vmatprep.subr.bf16.mxu0 %v7448_v13  ;;  %4933 = vmatprep.subr.bf16.mxu1 %v7451_v30 }
0x27e9   : > { %4912 = vmatpush3.bf16.msra.mxu0 %v7454_v44  ;;  %4934 = vmatpush3.bf16.msra.mxu1 %v7457_v32 }
0x27ea   : > { %4913 = vmatprep.subr.bf16.mxu0 %v7460_v12  ;;  %4935 = vmatprep.subr.bf16.mxu1 %v7463_v43 }
0x27ed   : > { %4914 = vmatpush3.bf16.msra.mxu0 %v7466_v25  ;;  %4936 = vmatpush3.bf16.msra.mxu1 %v7469_v21 }
0x27ee   : > { %4915 = vmatprep.subr.bf16.mxu0 %v7472_v17  ;;  %4937 = vmatprep.subr.bf16.mxu1 %v7475_v0 }
0x27f1   : > { %4916 = vmatpush3.bf16.msra.mxu0 %v7478_v56  ;;  %4938 = vmatpush3.bf16.msra.mxu1 %v7481_v55  ;;  %v7499_v55 = vld [vmem:[#allocation7 + $0xe8] sm:$0xff]  }
0x27f2   : > { %4917 = vmatprep.subr.bf16.mxu0 %v7484_v35  ;;  %4939 = vmatprep.subr.bf16.mxu1 %v7487_v23  ;;  %8701 = vst [vmem:[#allocation31_spill] sm:$0xff] %v7499_v55  ;;  %v7502_v35 = vld [vmem:[#allocation7 + $0x28] sm:$0xff]  }
0x27f3   : > { %8702 = vst [vmem:[#allocation32_spill] sm:$0xff] %v7502_v35  ;;  %v7505_v23 = vld [vmem:[#allocation7 + $0xa8] sm:$0xff]  }
0x27f4   : > { %8703 = vst [vmem:[#allocation33_spill] sm:$0xff] %v7505_v23 }
0x27f5   : > { %4918 = vmatpush3.bf16.msra.mxu0 %v7490_v45  ;;  %4940 = vmatpush3.bf16.msra.mxu1 %v7493_v16  ;;  %v7508_v45 = vld [vmem:[#allocation7 + $0x70] sm:$0xff]  }
0x27f6   : > { %4919 = vmatprep.subr.bf16.mxu0 %v7496_v51  ;;  %4941 = vmatprep.subr.bf16.mxu1 %v7499_v55  ;;  %8704 = vst [vmem:[#allocation34_spill] sm:$0xff] %v7508_v45  ;;  %v7511_v16 = vld [vmem:[#allocation7 + $0xf0] sm:$0xff]  }
0x27f7   : > { %8705 = vst [vmem:[#allocation35_spill] sm:$0xff] %v7511_v16  ;;  %v7514_v51 = vld [vmem:[#allocation7 + $0x30] sm:$0xff]  }
0x27f8   : > { %8706 = vst [vmem:[#allocation36_spill] sm:$0xff] %v7514_v51  ;;  %v7517_v55 = vld [vmem:[#allocation7 + $0xb0] sm:$0xff]  }
0x27f9   : > { %4920 = vmatpush3.bf16.msra.mxu0 %v7502_v35  ;;  %4942 = vmatpush3.bf16.msra.mxu1 %v7505_v23  ;;  %8707 = vst [vmem:[#allocation37_spill] sm:$0xff] %v7517_v55  ;;  %v7520_v35 = vld [vmem:[#allocation7 + $0x78] sm:$0xff]  }
0x27fa   : > { %4921 = vmatprep.subr.bf16.mxu0 %v7508_v45  ;;  %4943 = vmatprep.subr.bf16.mxu1 %v7511_v16  ;;  %8708 = vst [vmem:[#allocation38_spill] sm:$0xff] %v7520_v35  ;;  %v7523_v23 = vld [vmem:[#allocation7 + $0xf8] sm:$0xff]  }
0x27fb   : > { %8709 = vst [vmem:[#allocation39_spill] sm:$0xff] %v7523_v23  ;;  %v7526_v45 = vld [vmem:[#allocation7 + $0x38] sm:$0xff]  }
0x27fc   : > { %8710 = vst [vmem:[#allocation40_spill] sm:$0xff] %v7526_v45  ;;  %v7529_v16 = vld [vmem:[#allocation7 + $0xb8] sm:$0xff]  }
0x27fd   : > { %4922 = vmatpush3.bf16.msra.mxu0 %v7514_v51  ;;  %4944 = vmatpush3.bf16.msra.mxu1 %v7517_v55  ;;  %8711 = vst [vmem:[#allocation41_spill] sm:$0xff] %v7529_v16 }
0x27fe   : > { %4923 = vmatprep.subr.bf16.mxu0 %v7520_v35  ;;  %4945 = vmatprep.subr.bf16.mxu1 %v7523_v23 }
0x2801   : > { %4924 = vmatpush3.bf16.msra.mxu0 %v7526_v45  ;;  %4946 = vmatpush3.bf16.msra.mxu1 %v7529_v16 }
0x2802   : > { %3532 = vmatprep.subr.bf16.mxu0 %v7240_v20  ;;  %3573 = vmatprep.subr.bf16.mxu1 %v7243_v27 }
0x28b7   : > { %v3355_v55 = vpop.f32.mrb[96].mxu0  ;;  %v3396_v51 = vpop.f32.mrb[96].mxu1 }
0x28b8   : > { %v3356_v35 = vadd.f32 %v3355_v55, %v8620_v63  ;;  %v3397_v56 = vadd.f32 %v3396_v51, %v8621_v14  ;;  %v3357_v0 = vpop.f32.mrb[97].mxu0  ;;  %v3398_v23 = vpop.f32.mrb[97].mxu1 }
0x28b9   : > { %v3358_v17 = vadd.f32 %v3357_v0, %v6151_v50  ;;  %v3399_v45 = vadd.f32 %v3398_v23, %v8622_v40  ;;  %v3359_v21 = vpop.f32.mrb[98].mxu0  ;;  %v3400_v25 = vpop.f32.mrb[98].mxu1 }
0x28ba   : > { %v3407_v43 = vmul.f32 1.442695, %v3356_v35  ;;  %v3411_v16 = vmul.f32 1.442695, %v3397_v56  ;;  %v3360_v27 = vpop.f32.mrb[99].mxu0  ;;  %v3401_v32 = vpop.f32.mrb[99].mxu1 }
0x28bb   : > { %v3409_v12 = vmul.f32 1.442695, %v3358_v17  ;;  %v3413_v20 = vmul.f32 1.442695, %v3399_v45  ;;  %vm3403_vm5 = vcmp.gt.f32.partialorder %v3356_v35, 0.0  ;;  %vm3405_vm6 = vcmp.gt.f32.partialorder %v3397_v56, 0.0 }
0x28bc   : > { %5393 = vpow2.f32 %v3407_v43  ;;  %vm3404_vm7 = vcmp.gt.f32.partialorder %v3358_v17, 0.0  ;;  %vm3406_vm8 = vcmp.gt.f32.partialorder %v3399_v45, 0.0 }
0x28bd   : > { %5395 = vpow2.f32 %v3411_v16 }
0x28be   : > { %5397 = vpow2.f32 %v3409_v12 }
0x28bf   : > { %5399 = vpow2.f32 %v3413_v20 }
0x28c6   : > { %v5394_v55 = vpop.eup %5393 }
0x28c7   : > { %v5396_v51 = vpop.eup %5395  ;;  %v4346_v14 = vadd.f32 -1.0, %v5394_v55 }
0x28c8   : > { %v5398_v63 = vpop.eup %5397  ;;  %v4348_v44 = vadd.f32 -1.0, %v5396_v51 }
0x28c9   : > { %v5400_v0 = vpop.eup %5399  ;;  %v4347_v23 = vadd.f32 -1.0, %v5398_v63  ;;  %v3419_v21 = vsel %vm3403_vm5, %v3356_v35, %v4346_v14 }
0x28ca   : > { %v4349_v25 = vadd.f32 -1.0, %v5400_v0  ;;  %v3421_v40 = vsel %vm3405_vm6, %v3397_v56, %v4348_v44  ;;  %v3423_v16 = vpack.c.bf16 %v3419_v21, %v3419_v21 }
0x28cb   : > { %v3420_v43 = vsel %vm3404_vm7, %v3358_v17, %v4347_v23  ;;  %v3425_v20 = vpack.c.bf16 %v3421_v40, %v3421_v40 }
0x28cc   : > { %v3424_v27 = vpack.c.bf16 %v3420_v43, %v3420_v43  ;;  %v3422_v32 = vsel %vm3406_vm8, %v3399_v45, %v4349_v25 }
0x28cd   : > { %v3426_v12 = vpack.c.bf16 %v3422_v32, %v3422_v32 }
0x28ce   : > { %3459 = vmatprep.mubr.bf16.mxu0 %v3424_v27 }
0x28cf   : > { %3499 = vmatprep.mubr.bf16.mxu1 %v3426_v12  ;;  %3460 = vmatmul.mubr.bf16.vlgmr.msra.gmra.mrb[100].mxu0 %v3423_v16 }
0x28d0   : > { %3500 = vmatmul.mubr.bf16.vlgmr.msra.gmra.mrb[100].mxu1 %v3425_v20  ;;  %3533 = vmatpush1.bf16.msra.mxu0 %v7250_v6 }
0x28d1   : > { %3574 = vmatpush1.bf16.msra.mxu1 %v7253_v10  ;;  %3534 = vmatprep.subr.bf16.mxu0 %v7256_v26 }
0x28d2   : > { %3575 = vmatprep.subr.bf16.mxu1 %v8654_v48  ;;  %3564 = vmatprep.mubr.bf16.mxu0 %v8655_v15 }
0x28d3   : > { %3605 = vmatprep.mubr.bf16.mxu1 %v8655_v15 }
0x28d4   : > { %3535 = vmatpush1.bf16.msra.mxu0 %v8656_v49 }
0x28d5   : > { %3576 = vmatpush1.bf16.msra.mxu1 %v8657_v46  ;;  %3536 = vmatprep.subr.bf16.mxu0 %v8658_v54 }
0x28d6   : > { %3577 = vmatprep.subr.bf16.mxu1 %v8659_v29 }
0x28d8   : > { %3537 = vmatpush1.bf16.msra.mxu0 %v8660_v36 }
0x28d9   : > { %3578 = vmatpush1.bf16.msra.mxu1 %v8661_v18  ;;  %3538 = vmatprep.subr.bf16.mxu0 %v8662_v11 }
0x28da   : > { %3579 = vmatprep.subr.bf16.mxu1 %v8663_v33 }
0x28dc   : > { %3539 = vmatpush1.bf16.msra.mxu0 %v8664_v47 }
0x28dd   : > { %3580 = vmatpush1.bf16.msra.mxu1 %v8665_v3  ;;  %3540 = vmatprep.subr.bf16.mxu0 %v8666_v1 }
0x28de   : > { %3581 = vmatprep.subr.bf16.mxu1 %v8667_v61 }
0x28e0   : > { %3541 = vmatpush1.bf16.msra.mxu0 %v8668_v60 }
0x28e1   : > { %3582 = vmatpush1.bf16.msra.mxu1 %v8669_v52  ;;  %3542 = vmatprep.subr.bf16.mxu0 %v8670_v34 }
0x28e2   : > { %3583 = vmatprep.subr.bf16.mxu1 %v8671_v5 }
0x28e4   : > { %3543 = vmatpush1.bf16.msra.mxu0 %v8672_v22 }
0x28e5   : > { %3584 = vmatpush1.bf16.msra.mxu1 %v8673_v59  ;;  %3544 = vmatprep.subr.bf16.mxu0 %v8674_v19 }
0x28e6   : > { %3585 = vmatprep.subr.bf16.mxu1 %v8675_v7 }
0x28e8   : > { %3545 = vmatpush1.bf16.msra.mxu0 %v8676_v2 }
0x28e9   : > { %3586 = vmatpush1.bf16.msra.mxu1 %v8677_v24  ;;  %3546 = vmatprep.subr.bf16.mxu0 %v8678_v9 }
0x28ea   : > { %3587 = vmatprep.subr.bf16.mxu1 %v8679_v8 }
0x28ec   : > { %3547 = vmatpush1.bf16.msra.mxu0 %v8680_v57 }
0x28ed   : > { %3588 = vmatpush1.bf16.msra.mxu1 %v8681_v53  ;;  %4953 = vmatprep.subr.bf16.mxu0 %v8682_v58 }
0x28ee   : > { %4975 = vmatprep.subr.bf16.mxu1 %v8683_v62 }
0x29a2   : > { %v4925_v63 = vpop.f32.mrb[100].mxu0 }
0x29a3   : > { %v4947_v14 = vpop.f32.mrb[100].mxu1  ;;  %v4926_v40 = vpop.f32.mrb[101].mxu0 }
0x29a4   : > { %v4927_v44 = vadd.f32 %v4926_v40, %v4925_v63  ;;  %v4948_v17 = vpop.f32.mrb[101].mxu1  ;;  %v4928_v56 = vpop.f32.mrb[102].mxu0  ;;  %v8713_v63 = vld [vmem:[#allocation49_spill] sm:$0xff] }
0x29a5   : > { %v4949_v35 = vadd.f32 %v4948_v17, %v4947_v14  ;;  %v4950_v45 = vpop.f32.mrb[102].mxu1  ;;  %v4929_v55 = vpop.f32.mrb[103].mxu0 }
0x29a6   : > { %v3462_v51 = vadd.f32 %v4927_v44, %v5906_v39  ;;  %v4951_v0 = vpop.f32.mrb[103].mxu1 }
0x29a8   : > { %v3502_v23 = vadd.f32 %v4949_v35, %v3462_v51 }
0x29aa   : > { %v3508_v21 = vmul.f32 1.442695, %v3502_v23  ;;  %vm3507_vm9 = vcmp.gt.f32.partialorder %v3502_v23, 0.0 }
0x29ac   : > { %5401 = vpow2.f32 %v3508_v21  ;;  %v8715_v21 = vld [vmem:[#allocation18_spill] sm:$0xff] }
0x29b6   : > { %v5402_v25 = vpop.eup %5401 }
0x29b7   : > { %v4350_v43 = vadd.f32 -1.0, %v5402_v25  ;;  %v8716_v25 = vld [vmem:[#allocation51_spill] sm:$0xff] }
0x29b9   : > { %v3511_v27 = vsel %vm3507_vm9, %v3502_v23, %v4350_v43  ;;  %v8714_v23 = vld [vmem:[#allocation17_spill] sm:$0xff]  ;;  %v8717_v43 = vld [vmem:[#allocation19_spill] sm:$0xff] }
0x29ba   : > { %v3512_v32 = vmul.f32 %v3511_v27, %v5916_v41  ;;  %v8718_v27 = vld [vmem:[#allocation20_spill] sm:$0xff] }
0x29bc   : > { %v3513_v16 = vsel %vm961_vm13, %v3512_v32, 0.0  ;;  %v8719_v32 = vld [vmem:[#allocation21_spill] sm:$0xff] }
0x29bd   : > { %3514 = vadd.xlane.f32.xlu1 %v3513_v16  ;;  %v8720_v16 = vld [vmem:[#allocation22_spill] sm:$0xff] }
0x2a4a   : > { %v3515_v12 = vpop.xlane.xlu1 %3514 }
0x2a4b   : > { %v7576_v20 = vadd.f32 %v3515_v12, %v5921_v42  ;;  %v8721_v12 = vld [vmem:[#allocation23_spill] sm:$0xff] }
0x2a4d   : > { %8712 = vst [vmem:[#allocation42_spill] sm:$0xff] %v7576_v20  ;;  %v3517_v14 = vmul.f32 %v7576_v20, %v8713_v63  ;;  %v8732_v20 = vld [vmem:[#allocation34_spill] sm:$0xff] }
0x2a4f   : > { %v3518_v40 = vadd.f32 %v3517_v14, %v7437_v28  ;;  %v8722_v14 = vld [vmem:[#allocation24_spill] sm:$0xff] }
0x2a51   : > { %3521 = vperm.xlu0 %5165, %v3518_v40   ;;  %v8723_v40 = vld [vmem:[#allocation25_spill] sm:$0xff] }
0x2ad0   : > { %v3522_v44 = vpop.permute.xlu0 %3521 }
0x2ad1   : > { %v3524_v17 = vmul.f32 %v3522_v44, %v5896_v37  ;;  %v8724_v44 = vld [vmem:[#allocation26_spill] sm:$0xff] }
0x2ad3   : > { %v3525_v56 = vadd.f32 %v3524_v17, %v5901_v38  ;;  %v8725_v17 = vld [vmem:[#allocation27_spill] sm:$0xff] }
0x2ad5   : > { %v3527_v35 = vmul.f32 1.442695, %v3525_v56  ;;  %vm3526_vm10 = vcmp.gt.f32.partialorder %v3525_v56, 0.0 }
0x2ad7   : > { %5403 = vpow2.f32 %v3527_v35  ;;  %v8727_v35 = vld [vmem:[#allocation29_spill] sm:$0xff] }
0x2ae1   : > { %v5404_v45 = vpop.eup %5403 }
0x2ae2   : > { %v4351_v55 = vadd.f32 -1.0, %v5404_v45  ;;  %v8728_v45 = vld [vmem:[#allocation30_spill] sm:$0xff] }
0x2ae4   : > { %v3530_v51 = vsel %vm3526_vm10, %v3525_v56, %v4351_v55  ;;  %v8726_v56 = vld [vmem:[#allocation28_spill] sm:$0xff]  ;;  %v8729_v55 = vld [vmem:[#allocation31_spill] sm:$0xff] }
0x2ae5   : > { %v3531_v0 = vpack.c.bf16 %v3530_v51, %v3530_v51  ;;  %v8730_v51 = vld [vmem:[#allocation32_spill] sm:$0xff] }
0x2ae7   : > { %3565 = vmatmul.mubr.bf16.vlgmr.msra.gmra.mrb[104].mxu0 %v3531_v0  ;;  %3606 = vmatmul.mubr.bf16.vlgmr.msra.gmra.mrb[104].mxu1 %v3531_v0  ;;  %v8731_v0 = vld [vmem:[#allocation33_spill] sm:$0xff] }
0x2ae8   : > { %4954 = vmatpush3.bf16.msra.mxu0 %v7442_v31  ;;  %4976 = vmatpush3.bf16.msra.mxu1 %v7445_v4 }
0x2ae9   : > { %4955 = vmatprep.subr.bf16.mxu0 %v7448_v13  ;;  %4977 = vmatprep.subr.bf16.mxu1 %v7451_v30 }
0x2aec   : > { %4956 = vmatpush3.bf16.msra.mxu0 %v8714_v23  ;;  %4978 = vmatpush3.bf16.msra.mxu1 %v8715_v21 }
0x2aed   : > { %4957 = vmatprep.subr.bf16.mxu0 %v8716_v25  ;;  %4979 = vmatprep.subr.bf16.mxu1 %v8717_v43 }
0x2af0   : > { %4958 = vmatpush3.bf16.msra.mxu0 %v8718_v27  ;;  %4980 = vmatpush3.bf16.msra.mxu1 %v8719_v32  ;;  %v8744_v27 = vld [vmem:[#allocation48_spill] sm:$0xff] }
0x2af1   : > { %4959 = vmatprep.subr.bf16.mxu0 %v8720_v16  ;;  %4981 = vmatprep.subr.bf16.mxu1 %v8721_v12  ;;  %v8742_v12 = vld [vmem:[#allocation46_spill] sm:$0xff]  ;;  %v8743_v16 = vld [vmem:[#allocation47_spill] sm:$0xff] }
0x2af4   : > { %4960 = vmatpush3.bf16.msra.mxu0 %v8722_v14  ;;  %4982 = vmatpush3.bf16.msra.mxu1 %v8723_v40  ;;  %v8733_v14 = vld [vmem:[#allocation35_spill] sm:$0xff]  ;;  %v8734_v40 = vld [vmem:[#allocation36_spill] sm:$0xff] }
0x2af5   : > { %4961 = vmatprep.subr.bf16.mxu0 %v8724_v44  ;;  %4983 = vmatprep.subr.bf16.mxu1 %v8725_v17  ;;  %v8735_v44 = vld [vmem:[#allocation37_spill] sm:$0xff]  ;;  %v8736_v17 = vld [vmem:[#allocation38_spill] sm:$0xff] }
0x2af8   : > { %4962 = vmatpush3.bf16.msra.mxu0 %v8726_v56  ;;  %4984 = vmatpush3.bf16.msra.mxu1 %v8727_v35  ;;  %v8737_v56 = vld [vmem:[#allocation39_spill] sm:$0xff]  ;;  %v8738_v35 = vld [vmem:[#allocation40_spill] sm:$0xff] }
0x2af9   : > { %4963 = vmatprep.subr.bf16.mxu0 %v8728_v45  ;;  %4985 = vmatprep.subr.bf16.mxu1 %v8729_v55  ;;  %v8739_v45 = vld [vmem:[#allocation41_spill] sm:$0xff] }
0x2afa   : > { %v8740_v55 = vld [vmem:[#allocation53_spill] sm:$0xff] }
0x2afc   : > { %4964 = vmatpush3.bf16.msra.mxu0 %v8730_v51  ;;  %4986 = vmatpush3.bf16.msra.mxu1 %v8731_v0  ;;  %v8741_v51 = vld [vmem:[#allocation54_spill] sm:$0xff] }
0x2afd   : > { %4965 = vmatprep.subr.bf16.mxu0 %v8732_v20  ;;  %4987 = vmatprep.subr.bf16.mxu1 %v8733_v14 }
0x2b00   : > { %4966 = vmatpush3.bf16.msra.mxu0 %v8734_v40  ;;  %4988 = vmatpush3.bf16.msra.mxu1 %v8735_v44 }
0x2b01   : > { %4967 = vmatprep.subr.bf16.mxu0 %v8736_v17  ;;  %4989 = vmatprep.subr.bf16.mxu1 %v8737_v56 }
0x2b04   : > { %4968 = vmatpush3.bf16.msra.mxu0 %v8738_v35  ;;  %4990 = vmatpush3.bf16.msra.mxu1 %v8739_v45 }
0x2b05   : > { %3743 = vmatprep.subr.bf16.mxu0 %v8740_v55  ;;  %3784 = vmatprep.subr.bf16.mxu1 %v8741_v51 }
0x2bba   : > { %v3566_v0 = vpop.f32.mrb[104].mxu0  ;;  %v3607_v20 = vpop.f32.mrb[104].mxu1 }
0x2bbb   : > { %v3567_v14 = vadd.f32 %v3566_v0, %v8742_v12  ;;  %v3608_v40 = vadd.f32 %v3607_v20, %v8743_v16  ;;  %v3568_v32 = vpop.f32.mrb[105].mxu0  ;;  %v3609_v44 = vpop.f32.mrb[105].mxu1 }
0x2bbc   : > { %v3569_v17 = vadd.f32 %v3568_v32, %v6151_v50  ;;  %v3610_v56 = vadd.f32 %v3609_v44, %v8744_v27  ;;  %v3570_v43 = vpop.f32.mrb[106].mxu0  ;;  %v3611_v35 = vpop.f32.mrb[106].mxu1 }
0x2bbd   : > { %v3618_v25 = vmul.f32 1.442695, %v3567_v14  ;;  %v3622_v45 = vmul.f32 1.442695, %v3608_v40  ;;  %v3571_v51 = vpop.f32.mrb[107].mxu0  ;;  %v3612_v23 = vpop.f32.mrb[107].mxu1 }
0x2bbe   : > { %v3620_v21 = vmul.f32 1.442695, %v3569_v17  ;;  %v3624_v55 = vmul.f32 1.442695, %v3610_v56  ;;  %vm3614_vm11 = vcmp.gt.f32.partialorder %v3567_v14, 0.0  ;;  %vm3616_vm12 = vcmp.gt.f32.partialorder %v3608_v40, 0.0 }
0x2bbf   : > { %5405 = vpow2.f32 %v3618_v25  ;;  %vm3615_vm14 = vcmp.gt.f32.partialorder %v3569_v17, 0.0  ;;  %vm3617_vm15 = vcmp.gt.f32.partialorder %v3610_v56, 0.0 }
0x2bc0   : > { %5407 = vpow2.f32 %v3622_v45 }
0x2bc1   : > { %5409 = vpow2.f32 %v3620_v21 }
0x2bc2   : > { %5411 = vpow2.f32 %v3624_v55 }
0x2bc9   : > { %v5406_v0 = vpop.eup %5405 }
0x2bca   : > { %v5408_v20 = vpop.eup %5407  ;;  %v4352_v16 = vadd.f32 -1.0, %v5406_v0  ;;  %v8756_v0 = vld [vmem:[#allocation26_spill] sm:$0xff] }
0x2bcb   : > { %v5410_v12 = vpop.eup %5409  ;;  %v4354_v30 = vadd.f32 -1.0, %v5408_v20  ;;  %v8757_v20 = vld [vmem:[#allocation27_spill] sm:$0xff] }
0x2bcc   : > { %v5412_v32 = vpop.eup %5411  ;;  %v4353_v44 = vadd.f32 -1.0, %v5410_v12  ;;  %v3630_v43 = vsel %vm3614_vm11, %v3567_v14, %v4352_v16  ;;  %v8750_v16 = vld [vmem:[#allocation20_spill] sm:$0xff]  ;;  %v8751_v12 = vld [vmem:[#allocation21_spill] sm:$0xff]  ;;  %v8752_v14 = vld [vmem:[#allocation22_spill] sm:$0xff] }
0x2bcd   : > { %v4355_v35 = vadd.f32 -1.0, %v5412_v32  ;;  %v3632_v27 = vsel %vm3616_vm12, %v3608_v40, %v4354_v30  ;;  %v3634_v45 = vpack.c.bf16 %v3630_v43, %v3630_v43  ;;  %v8747_v30 = vld [vmem:[#allocation18_spill] sm:$0xff]  ;;  %v8753_v40 = vld [vmem:[#allocation23_spill] sm:$0xff]  ;;  %v8758_v32 = vld [vmem:[#allocation28_spill] sm:$0xff] }
0x2bce   : > { %v3631_v25 = vsel %vm3615_vm14, %v3569_v17, %v4353_v44  ;;  %v3636_v55 = vpack.c.bf16 %v3632_v27, %v3632_v27  ;;  %v8749_v27 = vld [vmem:[#allocation19_spill] sm:$0xff]  ;;  %v8754_v17 = vld [vmem:[#allocation24_spill] sm:$0xff]  ;;  %v8759_v44 = vld [vmem:[#allocation29_spill] sm:$0xff] }
0x2bcf   : > { %v3635_v51 = vpack.c.bf16 %v3631_v25, %v3631_v25  ;;  %v3633_v23 = vsel %vm3617_vm15, %v3610_v56, %v4355_v35  ;;  %v8755_v56 = vld [vmem:[#allocation25_spill] sm:$0xff]  ;;  %v8760_v43 = vld [vmem:[#allocation30_spill] sm:$0xff]  ;;  %v8761_v35 = vld [vmem:[#allocation31_spill] sm:$0xff] }
0x2bd0   : > { %v3637_v21 = vpack.c.bf16 %v3633_v23, %v3633_v23  ;;  %v8762_v25 = vld [vmem:[#allocation32_spill] sm:$0xff]  ;;  %v8764_v23 = vld [vmem:[#allocation34_spill] sm:$0xff] }
0x2bd1   : > { %3670 = vmatprep.mubr.bf16.mxu0 %v3635_v51  ;;  %v8763_v51 = vld [vmem:[#allocation33_spill] sm:$0xff] }
0x2bd2   : > { %3710 = vmatprep.mubr.bf16.mxu1 %v3637_v21  ;;  %3671 = vmatmul.mubr.bf16.vlgmr.msra.gmra.mrb[108].mxu0 %v3634_v45  ;;  %v8765_v45 = vld [vmem:[#allocation35_spill] sm:$0xff]  ;;  %v8766_v21 = vld [vmem:[#allocation36_spill] sm:$0xff] }
0x2bd3   : > { %3711 = vmatmul.mubr.bf16.vlgmr.msra.gmra.mrb[108].mxu1 %v3636_v55  ;;  %3744 = vmatpush1.bf16.msra.mxu0 %v7250_v6  ;;  %v8767_v55 = vld [vmem:[#allocation37_spill] sm:$0xff] }
0x2bd4   : > { %3785 = vmatpush1.bf16.msra.mxu1 %v7253_v10  ;;  %3745 = vmatprep.subr.bf16.mxu0 %v7256_v26 }
0x2bd5   : > { %3786 = vmatprep.subr.bf16.mxu1 %v8654_v48  ;;  %3775 = vmatprep.mubr.bf16.mxu0 %v8655_v15 }
0x2bd6   : > { %3816 = vmatprep.mubr.bf16.mxu1 %v8655_v15 }
0x2bd7   : > { %3746 = vmatpush1.bf16.msra.mxu0 %v8656_v49 }
0x2bd8   : > { %3787 = vmatpush1.bf16.msra.mxu1 %v8657_v46  ;;  %3747 = vmatprep.subr.bf16.mxu0 %v8658_v54 }
0x2bd9   : > { %3788 = vmatprep.subr.bf16.mxu1 %v8659_v29 }
0x2bdb   : > { %3748 = vmatpush1.bf16.msra.mxu0 %v8660_v36 }
0x2bdc   : > { %3789 = vmatpush1.bf16.msra.mxu1 %v8661_v18  ;;  %3749 = vmatprep.subr.bf16.mxu0 %v8662_v11 }
0x2bdd   : > { %3790 = vmatprep.subr.bf16.mxu1 %v8663_v33 }
0x2bdf   : > { %3750 = vmatpush1.bf16.msra.mxu0 %v8664_v47 }
0x2be0   : > { %3791 = vmatpush1.bf16.msra.mxu1 %v8665_v3  ;;  %3751 = vmatprep.subr.bf16.mxu0 %v8666_v1 }
0x2be1   : > { %3792 = vmatprep.subr.bf16.mxu1 %v8667_v61 }
0x2be3   : > { %3752 = vmatpush1.bf16.msra.mxu0 %v8668_v60 }
0x2be4   : > { %3793 = vmatpush1.bf16.msra.mxu1 %v8669_v52  ;;  %3753 = vmatprep.subr.bf16.mxu0 %v8670_v34 }
0x2be5   : > { %3794 = vmatprep.subr.bf16.mxu1 %v8671_v5 }
0x2be7   : > { %3754 = vmatpush1.bf16.msra.mxu0 %v8672_v22 }
0x2be8   : > { %3795 = vmatpush1.bf16.msra.mxu1 %v8673_v59  ;;  %3755 = vmatprep.subr.bf16.mxu0 %v8674_v19 }
0x2be9   : > { %3796 = vmatprep.subr.bf16.mxu1 %v8675_v7 }
0x2beb   : > { %3756 = vmatpush1.bf16.msra.mxu0 %v8676_v2 }
0x2bec   : > { %3797 = vmatpush1.bf16.msra.mxu1 %v8677_v24  ;;  %3757 = vmatprep.subr.bf16.mxu0 %v8678_v9 }
0x2bed   : > { %3798 = vmatprep.subr.bf16.mxu1 %v8679_v8 }
0x2bef   : > { %3758 = vmatpush1.bf16.msra.mxu0 %v8680_v57 }
0x2bf0   : > { %3799 = vmatpush1.bf16.msra.mxu1 %v8681_v53  ;;  %4997 = vmatprep.subr.bf16.mxu0 %v8682_v58  ;;  %v8745_v58 = vld [vmem:[#allocation45_spill] sm:$0xff] }
0x2bf1   : > { %5019 = vmatprep.subr.bf16.mxu1 %v8683_v62  ;;  %v8746_v62 = vld [vmem:[#allocation17_spill] sm:$0xff] }
0x2ca5   : > { %v4969_v6 = vpop.f32.mrb[108].mxu0 }
0x2ca6   : > { %v4991_v10 = vpop.f32.mrb[108].mxu1  ;;  %v4970_v26 = vpop.f32.mrb[109].mxu0 }
0x2ca7   : > { %v4971_v48 = vadd.f32 %v4970_v26, %v4969_v6  ;;  %v4992_v49 = vpop.f32.mrb[109].mxu1  ;;  %v4972_v46 = vpop.f32.mrb[110].mxu0  ;;  %v8768_v6 = vld [vmem:[#allocation38_spill] sm:$0xff]  ;;  %v8770_v26 = vld [vmem:[#allocation40_spill] sm:$0xff] }
0x2ca8   : > { %v4993_v54 = vadd.f32 %v4992_v49, %v4991_v10  ;;  %v4994_v29 = vpop.f32.mrb[110].mxu1  ;;  %v4973_v36 = vpop.f32.mrb[111].mxu0  ;;  %v8769_v10 = vld [vmem:[#allocation39_spill] sm:$0xff]  ;;  %v5631_v49 = vld [vmem:[#allocation6 + $0x4] ss:$16 sps:$4 sm:$0xff]  }
0x2ca9   : > { %v3673_v18 = vadd.f32 %v4971_v48, %v5906_v39  ;;  %v4995_v11 = vpop.f32.mrb[111].mxu1  ;;  %v8771_v48 = vld [vmem:[#allocation41_spill] sm:$0xff]  ;;  %v8772_v36 = vld [vmem:[#allocation46_spill] sm:$0xff] }
0x2caa   : > { %v5632_v46 = vld [vmem:[#allocation6 + $0xc] ss:$16 sps:$4 sm:$0xff]  }
0x2cab   : > { %v3713_v33 = vadd.f32 %v4993_v54, %v3673_v18  ;;  %v8773_v11 = vld [vmem:[#allocation47_spill] sm:$0xff] }
0x2cad   : > { %v3719_v47 = vmul.f32 1.442695, %v3713_v33  ;;  %vm3718_vm0 = vcmp.gt.f32.partialorder %v3713_v33, 0.0 }
0x2caf   : > { %5413 = vpow2.f32 %v3719_v47 }
0x2cb9   : > { %v5414_v3 = vpop.eup %5413 }
0x2cba   : > { %v4356_v1 = vadd.f32 -1.0, %v5414_v3 }
0x2cbc   : > { %v3722_v61 = vsel %vm3718_vm0, %v3713_v33, %v4356_v1 }
0x2cbd   : > { %v3723_v60 = vmul.f32 %v3722_v61, %v5916_v41  ;;  %v8774_v61 = vld [vmem:[#allocation48_spill] sm:$0xff] }
0x2cbf   : > { %v3724_v52 = vsel %vm961_vm13, %v3723_v60, 0.0 }
0x2cc0   : > { %3725 = vadd.xlane.f32.xlu1 %v3724_v52 }
0x2d4d   : > { %v3726_v34 = vpop.xlane.xlu1 %3725 }
0x2d4e   : > { %v7657_v5 = vadd.f32 %v3726_v34, %v5921_v42 }
0x2d50   : > { %v3728_v22 = vmul.f32 %v7657_v5, %v8713_v63  ;;  %v8748_v63 = vld [vmem:[#allocation51_spill] sm:$0xff] }
0x2d52   : > { %v3729_v59 = vadd.f32 %v3728_v22, %v7437_v28 }
0x2d54   : > { %3732 = vperm.xlu0 %5165, %v3729_v59  }
0x2dd3   : > { %v3733_v19 = vpop.permute.xlu0 %3732 }
0x2dd4   : > { %v3735_v7 = vmul.f32 %v3733_v19, %v5896_v37 }
0x2dd6   : > { %v3736_v2 = vadd.f32 %v3735_v7, %v5901_v38 }
0x2dd8   : > { %v3738_v24 = vmul.f32 1.442695, %v3736_v2  ;;  %vm3737_vm1 = vcmp.gt.f32.partialorder %v3736_v2, 0.0 }
0x2dda   : > { %5415 = vpow2.f32 %v3738_v24 }
0x2de4   : > { %v5416_v9 = vpop.eup %5415 }
0x2de5   : > { %v4357_v8 = vadd.f32 -1.0, %v5416_v9 }
0x2de7   : > { %v3741_v57 = vsel %vm3737_vm1, %v3736_v2, %v4357_v8 }
0x2de8   : > { %v3742_v53 = vpack.c.bf16 %v3741_v57, %v3741_v57 }
0x2dea   : > { %3776 = vmatmul.mubr.bf16.vlgmr.msra.gmra.mrb[112].mxu0 %v3742_v53  ;;  %3817 = vmatmul.mubr.bf16.vlgmr.msra.gmra.mrb[112].mxu1 %v3742_v53 }
0x2deb   : > { %4998 = vmatpush3.bf16.msra.mxu0 %v7442_v31  ;;  %5020 = vmatpush3.bf16.msra.mxu1 %v7445_v4 }
0x2dec   : > { %4999 = vmatprep.subr.bf16.mxu0 %v7448_v13  ;;  %5021 = vmatprep.subr.bf16.mxu1 %v8745_v58 }
0x2def   : > { %5000 = vmatpush3.bf16.msra.mxu0 %v8746_v62  ;;  %5022 = vmatpush3.bf16.msra.mxu1 %v8747_v30 }
0x2df0   : > { %5001 = vmatprep.subr.bf16.mxu0 %v8748_v63  ;;  %5023 = vmatprep.subr.bf16.mxu1 %v8749_v27 }
0x2df3   : > { %5002 = vmatpush3.bf16.msra.mxu0 %v8750_v16  ;;  %5024 = vmatpush3.bf16.msra.mxu1 %v8751_v12 }
0x2df4   : > { %5003 = vmatprep.subr.bf16.mxu0 %v8752_v14  ;;  %5025 = vmatprep.subr.bf16.mxu1 %v8753_v40 }
0x2df7   : > { %5004 = vmatpush3.bf16.msra.mxu0 %v8754_v17  ;;  %5026 = vmatpush3.bf16.msra.mxu1 %v8755_v56 }
0x2df8   : > { %5005 = vmatprep.subr.bf16.mxu0 %v8756_v0  ;;  %5027 = vmatprep.subr.bf16.mxu1 %v8757_v20 }
0x2dfb   : > { %5006 = vmatpush3.bf16.msra.mxu0 %v8758_v32  ;;  %5028 = vmatpush3.bf16.msra.mxu1 %v8759_v44 }
0x2dfc   : > { %5007 = vmatprep.subr.bf16.mxu0 %v8760_v43  ;;  %5029 = vmatprep.subr.bf16.mxu1 %v8761_v35 }
0x2dff   : > { %5008 = vmatpush3.bf16.msra.mxu0 %v8762_v25  ;;  %5030 = vmatpush3.bf16.msra.mxu1 %v8763_v51 }
0x2e00   : > { %5009 = vmatprep.subr.bf16.mxu0 %v8764_v23  ;;  %5031 = vmatprep.subr.bf16.mxu1 %v8765_v45 }
0x2e03   : > { %5010 = vmatpush3.bf16.msra.mxu0 %v8766_v21  ;;  %5032 = vmatpush3.bf16.msra.mxu1 %v8767_v55 }
0x2e04   : > { %5011 = vmatprep.subr.bf16.mxu0 %v8768_v6  ;;  %5033 = vmatprep.subr.bf16.mxu1 %v8769_v10 }
0x2e07   : > { %5012 = vmatpush3.bf16.msra.mxu0 %v8770_v26  ;;  %5034 = vmatpush3.bf16.msra.mxu1 %v8771_v48 }
0x2e08   : > { %3954 = vmatprep.subr.bf16.mxu0 %v5631_v49  ;;  %3995 = vmatprep.subr.bf16.mxu1 %v5632_v46 }
0x2ebd   : > { %v3777_v54 = vpop.f32.mrb[112].mxu0  ;;  %v3818_v29 = vpop.f32.mrb[112].mxu1 }
0x2ebe   : > { %v3778_v18 = vadd.f32 %v3777_v54, %v8772_v36  ;;  %v3819_v33 = vadd.f32 %v3818_v29, %v8773_v11  ;;  %v3779_v47 = vpop.f32.mrb[113].mxu0  ;;  %v3820_v3 = vpop.f32.mrb[113].mxu1 }
0x2ebf   : > { %v3780_v1 = vadd.f32 %v3779_v47, %v6151_v50  ;;  %v3821_v60 = vadd.f32 %v3820_v3, %v8774_v61  ;;  %v3781_v52 = vpop.f32.mrb[114].mxu0  ;;  %v3822_v34 = vpop.f32.mrb[114].mxu1 }
0x2ec0   : > { %v3829_v22 = vmul.f32 1.442695, %v3778_v18  ;;  %v3833_v59 = vmul.f32 1.442695, %v3819_v33  ;;  %v3782_v2 = vpop.f32.mrb[115].mxu0  ;;  %v3823_v24 = vpop.f32.mrb[115].mxu1 }
0x2ec1   : > { %v3831_v19 = vmul.f32 1.442695, %v3780_v1  ;;  %v3835_v7 = vmul.f32 1.442695, %v3821_v60  ;;  %vm3825_vm2 = vcmp.gt.f32.partialorder %v3778_v18, 0.0  ;;  %vm3827_vm3 = vcmp.gt.f32.partialorder %v3819_v33, 0.0 }
0x2ec2   : > { %5417 = vpow2.f32 %v3829_v22  ;;  %vm3826_vm4 = vcmp.gt.f32.partialorder %v3780_v1, 0.0  ;;  %vm3828_vm5 = vcmp.gt.f32.partialorder %v3821_v60, 0.0  ;;  %v5633_v2 = vld [vmem:[#allocation6] ss:$16 sps:$4 sm:$0xff]   ;;  %v5634_v24 = vld [vmem:[#allocation6 + $0x8] ss:$16 sps:$4 sm:$0xff]  }
0x2ec3   : > { %5419 = vpow2.f32 %v3833_v59 }
0x2ec4   : > { %5421 = vpow2.f32 %v3831_v19 }
0x2ec5   : > { %5423 = vpow2.f32 %v3835_v7 }
0x2ecc   : > { %v5418_v9 = vpop.eup %5417 }
0x2ecd   : > { %v5420_v8 = vpop.eup %5419  ;;  %v4358_v57 = vadd.f32 -1.0, %v5418_v9  ;;  %v5636_v9 = vld [vmem:[#allocation6 + $0x2c] ss:$16 sps:$4 sm:$0xff]  }
0x2ece   : > { %v5422_v53 = vpop.eup %5421  ;;  %v4360_v49 = vadd.f32 -1.0, %v5420_v8  ;;  %v5640_v8 = vld [vmem:[#allocation6 + $0x4c] ss:$16 sps:$4 sm:$0xff]  }
0x2ecf   : > { %v5424_v46 = vpop.eup %5423  ;;  %v4359_v54 = vadd.f32 -1.0, %v5422_v53  ;;  %v3841_v29 = vsel %vm3825_vm2, %v3778_v18, %v4358_v57  ;;  %v5635_v18 = vld [vmem:[#allocation6 + $0x24] ss:$16 sps:$4 sm:$0xff]   ;;  %v5641_v57 = vld [vmem:[#allocation6 + $0x40] ss:$16 sps:$4 sm:$0xff]  }
0x2ed0   : > { %v4361_v47 = vadd.f32 -1.0, %v5424_v46  ;;  %v3843_v3 = vsel %vm3827_vm3, %v3819_v33, %v4360_v49  ;;  %v3845_v59 = vpack.c.bf16 %v3841_v29, %v3841_v29  ;;  %v5637_v33 = vld [vmem:[#allocation6 + $0x20] ss:$16 sps:$4 sm:$0xff]   ;;  %v5642_v53 = vld [vmem:[#allocation6 + $0x48] ss:$16 sps:$4 sm:$0xff]  }
0x2ed1   : > { %v3842_v52 = vsel %vm3826_vm4, %v3780_v1, %v4359_v54  ;;  %v3847_v7 = vpack.c.bf16 %v3843_v3, %v3843_v3  ;;  %v5638_v1 = vld [vmem:[#allocation6 + $0x28] ss:$16 sps:$4 sm:$0xff]   ;;  %v5643_v49 = vld [vmem:[#allocation6 + $0x64] ss:$16 sps:$4 sm:$0xff]   ;;  %v5644_v46 = vld [vmem:[#allocation6 + $0x6c] ss:$16 sps:$4 sm:$0xff]  }
0x2ed2   : > { %v3846_v34 = vpack.c.bf16 %v3842_v52, %v3842_v52  ;;  %v3844_v22 = vsel %vm3828_vm5, %v3821_v60, %v4361_v47  ;;  %v5639_v60 = vld [vmem:[#allocation6 + $0x44] ss:$16 sps:$4 sm:$0xff]   ;;  %v5645_v54 = vld [vmem:[#allocation6 + $0x60] ss:$16 sps:$4 sm:$0xff]   ;;  %v5646_v29 = vld [vmem:[#allocation6 + $0x68] ss:$16 sps:$4 sm:$0xff]  }
0x2ed3   : > { %v3848_v19 = vpack.c.bf16 %v3844_v22, %v3844_v22  ;;  %v5648_v47 = vld [vmem:[#allocation6 + $0x8c] ss:$16 sps:$4 sm:$0xff]   ;;  %v5649_v3 = vld [vmem:[#allocation6 + $0x80] ss:$16 sps:$4 sm:$0xff]   ;;  %v5650_v52 = vld [vmem:[#allocation6 + $0x88] ss:$16 sps:$4 sm:$0xff]  }
0x2ed4   : > { %3881 = vmatprep.mubr.bf16.mxu0 %v3846_v34  ;;  %v5651_v34 = vld [vmem:[#allocation6 + $0xa4] ss:$16 sps:$4 sm:$0xff]   ;;  %v5652_v22 = vld [vmem:[#allocation6 + $0xac] ss:$16 sps:$4 sm:$0xff]  }
0x2ed5   : > { %3921 = vmatprep.mubr.bf16.mxu1 %v3848_v19  ;;  %3882 = vmatmul.mubr.bf16.vlgmr.msra.gmra.mrb[116].mxu0 %v3845_v59  ;;  %v5653_v59 = vld [vmem:[#allocation6 + $0xa0] ss:$16 sps:$4 sm:$0xff]   ;;  %v5654_v19 = vld [vmem:[#allocation6 + $0xa8] ss:$16 sps:$4 sm:$0xff]  }
0x2ed6   : > { %3922 = vmatmul.mubr.bf16.vlgmr.msra.gmra.mrb[116].mxu1 %v3847_v7  ;;  %3955 = vmatpush1.bf16.msra.mxu0 %v5633_v2  ;;  %v5655_v7 = vld [vmem:[#allocation6 + $0xc4] ss:$16 sps:$4 sm:$0xff]   ;;  %v5656_v2 = vld [vmem:[#allocation6 + $0xcc] ss:$16 sps:$4 sm:$0xff]  }
0x2ed7   : > { %3996 = vmatpush1.bf16.msra.mxu1 %v5634_v24  ;;  %3956 = vmatprep.subr.bf16.mxu0 %v5635_v18  ;;  %v5657_v24 = vld [vmem:[#allocation6 + $0xc0] ss:$16 sps:$4 sm:$0xff]   ;;  %v5658_v18 = vld [vmem:[#allocation6 + $0xc8] ss:$16 sps:$4 sm:$0xff]  }
0x2ed8   : > { %3997 = vmatprep.subr.bf16.mxu1 %v5636_v9  ;;  %3986 = vmatprep.mubr.bf16.mxu0 %v8655_v15  ;;  %v5659_v9 = vld [vmem:[#allocation6 + $0xe4] ss:$16 sps:$4 sm:$0xff]  }
0x2ed9   : > { %4027 = vmatprep.mubr.bf16.mxu1 %v8655_v15  ;;  %v5647_v15 = vld [vmem:[#allocation6 + $0x84] ss:$16 sps:$4 sm:$0xff]  }
0x2eda   : > { %3957 = vmatpush1.bf16.msra.mxu0 %v5637_v33  ;;  %v5660_v33 = vld [vmem:[#allocation6 + $0xec] ss:$16 sps:$4 sm:$0xff]  }
0x2edb   : > { %3998 = vmatpush1.bf16.msra.mxu1 %v5638_v1  ;;  %3958 = vmatprep.subr.bf16.mxu0 %v5639_v60  ;;  %v5661_v1 = vld [vmem:[#allocation6 + $0xe0] ss:$16 sps:$4 sm:$0xff]   ;;  %v5662_v60 = vld [vmem:[#allocation6 + $0xe8] ss:$16 sps:$4 sm:$0xff]  }
0x2edc   : > { %3999 = vmatprep.subr.bf16.mxu1 %v5640_v8  ;;  %v5663_v8 = vld [vmem:[#allocation7 + $0x40] sm:$0xff]  }
0x2ede   : > { %3959 = vmatpush1.bf16.msra.mxu0 %v5641_v57  ;;  %v5664_v57 = vld [vmem:[#allocation7 + $0xc0] sm:$0xff]  }
0x2edf   : > { %4000 = vmatpush1.bf16.msra.mxu1 %v5642_v53  ;;  %3960 = vmatprep.subr.bf16.mxu0 %v5643_v49 }
0x2ee0   : > { %4001 = vmatprep.subr.bf16.mxu1 %v5644_v46 }
0x2ee2   : > { %3961 = vmatpush1.bf16.msra.mxu0 %v5645_v54 }
0x2ee3   : > { %4002 = vmatpush1.bf16.msra.mxu1 %v5646_v29  ;;  %3962 = vmatprep.subr.bf16.mxu0 %v5647_v15 }
0x2ee4   : > { %4003 = vmatprep.subr.bf16.mxu1 %v5648_v47 }
0x2ee6   : > { %3963 = vmatpush1.bf16.msra.mxu0 %v5649_v3 }
0x2ee7   : > { %4004 = vmatpush1.bf16.msra.mxu1 %v5650_v52  ;;  %3964 = vmatprep.subr.bf16.mxu0 %v5651_v34 }
0x2ee8   : > { %4005 = vmatprep.subr.bf16.mxu1 %v5652_v22 }
0x2eea   : > { %3965 = vmatpush1.bf16.msra.mxu0 %v5653_v59 }
0x2eeb   : > { %4006 = vmatpush1.bf16.msra.mxu1 %v5654_v19  ;;  %3966 = vmatprep.subr.bf16.mxu0 %v5655_v7 }
0x2eec   : > { %4007 = vmatprep.subr.bf16.mxu1 %v5656_v2 }
0x2eee   : > { %3967 = vmatpush1.bf16.msra.mxu0 %v5657_v24 }
0x2eef   : > { %4008 = vmatpush1.bf16.msra.mxu1 %v5658_v18  ;;  %3968 = vmatprep.subr.bf16.mxu0 %v5659_v9 }
0x2ef0   : > { %4009 = vmatprep.subr.bf16.mxu1 %v5660_v33  ;;  %v4150_v33 = vmul.f32 2.0, %v7657_v5 }
0x2ef2   : > { %3969 = vmatpush1.bf16.msra.mxu0 %v5661_v1 }
0x2ef3   : > { %4010 = vmatpush1.bf16.msra.mxu1 %v5662_v60  ;;  %5041 = vmatprep.subr.bf16.mxu0 %v5663_v8  ;;  %v8775_v8 = vld [vmem:[#allocation42_spill] sm:$0xff] }
0x2ef4   : > { %5063 = vmatprep.subr.bf16.mxu1 %v5664_v57  ;;  %v4151_v57 = vadd.f32 %v4150_v33, %v8775_v8 }
0x2fa8   : > { %v5013_v53 = vpop.f32.mrb[116].mxu0 }
0x2fa9   : > { %v5035_v49 = vpop.f32.mrb[116].mxu1  ;;  %v5014_v46 = vpop.f32.mrb[117].mxu0 }
0x2faa   : > { %v5015_v54 = vadd.f32 %v5014_v46, %v5013_v53  ;;  %v5036_v29 = vpop.f32.mrb[117].mxu1  ;;  %v5016_v15 = vpop.f32.mrb[118].mxu0  ;;  %v8776_v53 = vld [vmem:[#allocation52_spill] sm:$0xff] }
0x2fab   : > { %v5037_v47 = vadd.f32 %v5036_v29, %v5035_v49  ;;  %v5038_v3 = vpop.f32.mrb[118].mxu1  ;;  %v5017_v52 = vpop.f32.mrb[119].mxu0 }
0x2fac   : > { %v3884_v34 = vadd.f32 %v5015_v54, %v5906_v39  ;;  %v5039_v22 = vpop.f32.mrb[119].mxu1 }
0x2fae   : > { %v3924_v59 = vadd.f32 %v5037_v47, %v3884_v34 }
0x2fb0   : > { %v3930_v19 = vmul.f32 1.442695, %v3924_v59  ;;  %vm3929_vm6 = vcmp.gt.f32.partialorder %v3924_v59, 0.0 }
0x2fb2   : > { %5425 = vpow2.f32 %v3930_v19 }
0x2fbc   : > { %v5426_v7 = vpop.eup %5425 }
0x2fbd   : > { %v4362_v2 = vadd.f32 -1.0, %v5426_v7 }
0x2fbf   : > { %v3933_v24 = vsel %vm3929_vm6, %v3924_v59, %v4362_v2 }
0x2fc0   : > { %v3934_v18 = vmul.f32 %v3933_v24, %v5916_v41 }
0x2fc2   : > { %v3935_v9 = vsel %vm961_vm13, %v3934_v18, 0.0 }
0x2fc3   : > { %3936 = vadd.xlane.f32.xlu1 %v3935_v9 }
0x3050   : > { %v3937_v1 = vpop.xlane.xlu1 %3936 }
0x3051   : > { %v3938_v60 = vadd.f32 %v3937_v1, %v5921_v42 }
0x3053   : > { %v3939_v49 = vmul.f32 %v3938_v60, %v8776_v53  ;;  %v4152_v46 = vmul.f32 2.0, %v3938_v60 }
0x3055   : > { %v3940_v54 = vadd.f32 %v3939_v49, %v7437_v28  ;;  %v7708_v29 = vadd.f32 %v4152_v46, %v4151_v57 }
0x3057   : > { %3943 = vperm.xlu0 %5165, %v3940_v54  }
0x30d6   : > { %v3944_v15 = vpop.permute.xlu0 %3943 }
0x30d7   : > { %v3946_v47 = vmul.f32 %v3944_v15, %v5896_v37 }
0x30d9   : > { %v3947_v3 = vadd.f32 %v3946_v47, %v5901_v38 }
0x30db   : > { %v3949_v52 = vmul.f32 1.442695, %v3947_v3  ;;  %vm3948_vm7 = vcmp.gt.f32.partialorder %v3947_v3, 0.0 }
0x30dd   : > { %5427 = vpow2.f32 %v3949_v52 }
0x30e7   : > { %v5428_v5 = vpop.eup %5427 }
0x30e8   : > { %v4363_v34 = vadd.f32 -1.0, %v5428_v5  ;;  %v8777_v5 = vld [vmem:[#allocation50_spill] sm:$0xff] }
0x30ea   : > { %v3952_v22 = vsel %vm3948_vm7, %v3947_v3, %v4363_v34 }
0x30eb   : > { %v3953_v59 = vpack.c.bf16 %v3952_v22, %v3952_v22  ;;  %v4157_v22 = vstv %s6198_s3 }
0x30ed   : > { %3987 = vmatmul.mubr.bf16.vlgmr.msra.gmra.mrb[120].mxu0 %v3953_v59  ;;  %4028 = vmatmul.mubr.bf16.vlgmr.msra.gmra.mrb[120].mxu1 %v3953_v59  ;;  %v8778_v59 = vld [vmem:[#allocation15_spill] sm:$0xff] }
0x30ee   : > { %5042 = vmatpush3.bf16.msra.mxu0 %v7442_v31  ;;  %5064 = vmatpush3.bf16.msra.mxu1 %v7445_v4  ;;  %vm4158_vm14 = vcmp.eq.s32.totalorder %v8778_v59, %v4157_v22 }
0x30ef   : > { %5043 = vmatprep.subr.bf16.mxu0 %v7448_v13  ;;  %5065 = vmatprep.subr.bf16.mxu1 %v8745_v58 }
0x30f2   : > { %5044 = vmatpush3.bf16.msra.mxu0 %v8746_v62  ;;  %5066 = vmatpush3.bf16.msra.mxu1 %v8747_v30 }
0x30f3   : > { %5045 = vmatprep.subr.bf16.mxu0 %v8748_v63  ;;  %5067 = vmatprep.subr.bf16.mxu1 %v8749_v27 }
0x30f6   : > { %5046 = vmatpush3.bf16.msra.mxu0 %v8750_v16  ;;  %5068 = vmatpush3.bf16.msra.mxu1 %v8751_v12 }
0x30f7   : > { %5047 = vmatprep.subr.bf16.mxu0 %v8752_v14  ;;  %5069 = vmatprep.subr.bf16.mxu1 %v8753_v40 }
0x30fa   : > { %5048 = vmatpush3.bf16.msra.mxu0 %v8754_v17  ;;  %5070 = vmatpush3.bf16.msra.mxu1 %v8755_v56 }
0x30fb   : > { %5049 = vmatprep.subr.bf16.mxu0 %v8756_v0  ;;  %5071 = vmatprep.subr.bf16.mxu1 %v8757_v20 }
0x30fe   : > { %5050 = vmatpush3.bf16.msra.mxu0 %v8758_v32  ;;  %5072 = vmatpush3.bf16.msra.mxu1 %v8759_v44 }
0x30ff   : > { %5051 = vmatprep.subr.bf16.mxu0 %v8760_v43  ;;  %5073 = vmatprep.subr.bf16.mxu1 %v8761_v35 }
0x3102   : > { %5052 = vmatpush3.bf16.msra.mxu0 %v8762_v25  ;;  %5074 = vmatpush3.bf16.msra.mxu1 %v8763_v51 }
0x3103   : > { %5053 = vmatprep.subr.bf16.mxu0 %v8764_v23  ;;  %5075 = vmatprep.subr.bf16.mxu1 %v8765_v45 }
0x3106   : > { %5054 = vmatpush3.bf16.msra.mxu0 %v8766_v21  ;;  %5076 = vmatpush3.bf16.msra.mxu1 %v8767_v55 }
0x3107   : > { %5055 = vmatprep.subr.bf16.mxu0 %v8768_v6  ;;  %5077 = vmatprep.subr.bf16.mxu1 %v8769_v10 }
0x310a   : > { %5056 = vmatpush3.bf16.msra.mxu0 %v8770_v26  ;;  %5078 = vmatpush3.bf16.msra.mxu1 %v8771_v48 }
0x31c0   : > { %v3988_v31 = vpop.f32.mrb[120].mxu0  ;;  %v4029_v4 = vpop.f32.mrb[120].mxu1 }
0x31c1   : > { %v3989_v13 = vadd.f32 %v3988_v31, %v8772_v36  ;;  %v4030_v58 = vadd.f32 %v4029_v4, %v8773_v11  ;;  %v3990_v62 = vpop.f32.mrb[121].mxu0  ;;  %v4031_v30 = vpop.f32.mrb[121].mxu1  ;;  %v8779_v4 = vld [vmem:[#allocation16_spill] sm:$0xff] }
0x31c2   : > { %v3991_v63 = vadd.f32 %v3990_v62, %v6151_v50  ;;  %v4032_v27 = vadd.f32 %v4031_v30, %v8774_v61  ;;  %v3992_v16 = vpop.f32.mrb[122].mxu0  ;;  %v4033_v12 = vpop.f32.mrb[122].mxu1 }
0x31c3   : > { %v4040_v14 = vmul.f32 1.442695, %v3989_v13  ;;  %v4044_v40 = vmul.f32 1.442695, %v4030_v58  ;;  %v3993_v0 = vpop.f32.mrb[123].mxu0  ;;  %v4034_v20 = vpop.f32.mrb[123].mxu1 }
0x31c4   : > { %v4042_v17 = vmul.f32 1.442695, %v3991_v63  ;;  %v4046_v56 = vmul.f32 1.442695, %v4032_v27  ;;  %vm4036_vm8 = vcmp.gt.f32.partialorder %v3989_v13, 0.0  ;;  %vm4038_vm9 = vcmp.gt.f32.partialorder %v4030_v58, 0.0 }
0x31c5   : > { %5429 = vpow2.f32 %v4040_v14  ;;  %vm4037_vm10 = vcmp.gt.f32.partialorder %v3991_v63, 0.0  ;;  %vm4039_vm11 = vcmp.gt.f32.partialorder %v4032_v27, 0.0 }
0x31c6   : > { %5431 = vpow2.f32 %v4044_v40 }
0x31c7   : > { %5433 = vpow2.f32 %v4042_v17 }
0x31c8   : > { %5435 = vpow2.f32 %v4046_v56 }
0x31cf   : > { %v5430_v32 = vpop.eup %5429 }
0x31d0   : > { %v5432_v44 = vpop.eup %5431  ;;  %v4364_v43 = vadd.f32 -1.0, %v5430_v32 }
0x31d1   : > { %v5434_v35 = vpop.eup %5433  ;;  %v4366_v25 = vadd.f32 -1.0, %v5432_v44 }
0x31d2   : > { %v5436_v50 = vpop.eup %5435  ;;  %v4365_v51 = vadd.f32 -1.0, %v5434_v35  ;;  %v4052_v23 = vsel %vm4036_vm8, %v3989_v13, %v4364_v43 }
0x31d3   : > { %v4367_v45 = vadd.f32 -1.0, %v5436_v50  ;;  %v4054_v21 = vsel %vm4038_vm9, %v4030_v58, %v4366_v25  ;;  %v4056_v26 = vpack.c.bf16 %v4052_v23, %v4052_v23 }
0x31d4   : > { %v4053_v55 = vsel %vm4037_vm10, %v3991_v63, %v4365_v51  ;;  %v4058_v36 = vpack.c.bf16 %v4054_v21, %v4054_v21 }
0x31d5   : > { %v4057_v6 = vpack.c.bf16 %v4053_v55, %v4053_v55  ;;  %v4055_v10 = vsel %vm4039_vm11, %v4032_v27, %v4367_v45 }
0x31d6   : > { %v4059_v48 = vpack.c.bf16 %v4055_v10, %v4055_v10 }
0x31d7   : > { %4092 = vmatprep.mubr.bf16.mxu0 %v4057_v6 }
0x31d8   : > { %4132 = vmatprep.mubr.bf16.mxu1 %v4059_v48  ;;  %4093 = vmatmul.mubr.bf16.vlgmr.msra.gmra.mrb[124].mxu0 %v4056_v26 }
0x31d9   : > { %4133 = vmatmul.mubr.bf16.vlgmr.msra.gmra.mrb[124].mxu1 %v4058_v36 }
0x32ab   : > { %v5057_v11 = vpop.f32.mrb[124].mxu0 }
0x32ac   : > { %v5079_v61 = vpop.f32.mrb[124].mxu1  ;;  %v5058_v19 = vpop.f32.mrb[125].mxu0 }
0x32ad   : > { %v5059_v7 = vadd.f32 %v5058_v19, %v5057_v11  ;;  %v5080_v2 = vpop.f32.mrb[125].mxu1  ;;  %v5060_v24 = vpop.f32.mrb[126].mxu0 }
0x32ae   : > { %v5081_v18 = vadd.f32 %v5080_v2, %v5079_v61  ;;  %v5082_v9 = vpop.f32.mrb[126].mxu1  ;;  %v5061_v33 = vpop.f32.mrb[127].mxu0 }
0x32af   : > { %v4095_v1 = vadd.f32 %v5059_v7, %v5906_v39  ;;  %v5083_v60 = vpop.f32.mrb[127].mxu1 }
0x32b1   : > { %v4135_v8 = vadd.f32 %v5081_v18, %v4095_v1 }
0x32b3   : > { %v4141_v57 = vmul.f32 1.442695, %v4135_v8  ;;  %vm4140_vm12 = vcmp.gt.f32.partialorder %v4135_v8, 0.0 }
0x32b5   : > { %5437 = vpow2.f32 %v4141_v57 }
0x32bf   : > { %v5438_v53 = vpop.eup %5437 }
0x32c0   : > { %v4368_v49 = vadd.f32 -1.0, %v5438_v53 }
0x32c2   : > { %v4144_v46 = vsel %vm4140_vm12, %v4135_v8, %v4368_v49 }
0x32c3   : > { %v4145_v54 = vmul.f32 %v4144_v46, %v5916_v41 }
0x32c5   : > { %v4146_v15 = vsel %vm961_vm13, %v4145_v54, 0.0 }
0x32c6   : > { %4147 = vadd.xlane.f32.xlu1 %v4146_v15 }
0x3353   : > { %v4148_v47 = vpop.xlane.xlu1 %4147 }
0x3354   : > { %v4149_v3 = vadd.f32 %v4148_v47, %v5921_v42 }
0x3356   : > { %v4154_v52 = vadd.f32 %v7708_v29, %v4149_v3 }
0x3358   : > { %v4155_v34 = vmul.f32 %v4154_v52, %v8777_v5 }
0x335a   : > { %v4156_v49 = vadd.f32 %v4155_v34, %v7437_v28  }
0x335c   : > { %4161 = vperm.xlu0 %5165, %v4156_v49  }
0x33d7   :  { %277 = sbr.rel (!%p275_p7) target bundleno = 802 (0x322), region = 68 }
0x33db   : > { %v4162_v31 = vpop.permute.xlu0 %4161 }
0x33dc   : > { %v4164_v13 = vsel %vm4158_vm14, %v4162_v31, %v8779_v4  }
0x33dd   : > { %v8780_v50 = vmov %v4164_v13  ;;  %4165 = vst [vmem:[#allocation9] sm:$0x1] (%p275_p7), %v4164_v13 }
0x33de   :  { %5732 = shalt.err (!%p5729_p12)
}
0x33df   :  { %s5733_s28 = scalar_lea.hbm %s7783_s7, 16 }
0x33e0   :  { %p5734_p13 = scmp.ne.s32.totalorder %s7783_s7, %s5733_s28  ;;  %p5737_p0 = scmp.lt.u32.totalorder %s5733_s28, %s7783_s7 }
0x33e2   :  { %p5739_p1 = pnand %p5737_p0, %p5734_p13 }
0x33e4   :  { %5742 = shalt.err (!%p5739_p1)
}
0x33e5   :  { %4175 = dma.vmem_to_hbm [thread:$0]  %s4173_s23, 16, %s7783_s7, [#allocation4]  }
0x33e6   :  { %5761 = dma.done.wait [#allocation4], 16  }
0x33e7   :  { %5762 = vsyncadd [#allocation4], 4294967280 }
0x33e8   :  { %4179 = vsyncpa [#allocation3], 1 }
0x33e9   :  { %4180 = vsyncpa [#allocation8], 1 }
0x33ea   :  { %4181 = vsyncpa [#allocation4], 1 }
0x33eb   :  { %4182 = vsyncpa [#allocation5], 1 }

</bundles_post_ra>
